<compile_context>
chip_gen: v6e
topology: v6e:2x2x1
jax: 0.10.0
libtpu: 0.0.40
codegen_flags: <defaults>
</compile_context>

<pallas_src>
import jax
import jax.numpy as jnp
from jax.experimental import pallas as pl
from jax.experimental.pallas import tpu as pltpu

_CIN_PAD_FIRST = 8   # pad the RGB input's contraction dim (3 -> 8); padded rows are zero
_BN_EPS = 1e-5


# ------------------------- fused Conv-4 feature kernel -----------------------------

def _make_conv4_kernel(dims):
    """Build the fused kernel for a static per-block dim list [(H, W, Cin, Cout), ...].

    Ref layout (positional):
      refs[0]                  : x_ref   ((H+2)*(W+2)+2, Cin0) f32  haloed, row-flattened image
      refs[1+2b], refs[2+2b]   : w_b (9, Cin, Cout) bf16 (BN scale folded), shift_b (1, Cout) f32
      refs[1+2*nb]             : o_ref (Ho_f, Wo_f, Cout) f32  final pooled activation
      trailing scratch         : y_0, m_0, then for b>=1: xpad_b, y_b, m_b
        xpad_b ((H+2)*(W+2)+2, Cin) f32 : haloed, row-flattened input of block b
        y_b    (H*(W+2), Cout)     f32 : conv accumulator / post-ReLU rows (incl. halo cols)
        m_b    (H*(W+2)//2, Cout)  f32 : horizontal 2-max stage of the pool
    """
    nb = len(dims)

    def kernel(*refs):
        x_ref = refs[0]
        w_refs = [refs[1 + 2 * b] for b in range(nb)]
        s_refs = [refs[2 + 2 * b] for b in range(nb)]
        o_ref = refs[1 + 2 * nb]
        scr = refs[2 + 2 * nb:]

        # Parse scratch: block 0 reads its haloed input straight from x_ref (pre-padded
        # on the host), blocks >= 1 get a haloed VMEM scratch filled by the previous
        # block's pooling epilogue.
        srcs, ys, ms = [x_ref], [], []
        si = 0
        for b in range(nb):
            if b > 0:
                srcs.append(scr[si]); si += 1
            ys.append(scr[si]); si += 1
            ms.append(scr[si]); si += 1

        # Zero the haloed scratches every step: with a "parallel" grid the scratch is
        # per-core, so a one-time init under pl.when(program_id == 0) would miss cores
        # that never run step 0. Only the interiors get overwritten below.
        for b in range(1, nb):
            srcs[b][...] = jnp.zeros_like(srcs[b])

        for b in range(nb):
            H, W, Cin, Cout = dims[b]
            Wp = W + 2                 # padded row width
            Wph = Wp // 2              # = Wo + 1 (W is even)
            Ho, Wo = H // 2, W // 2
            HWp = H * Wp               # conv output rows, incl. halo-junk columns
            src, y, m = srcs[b], ys[b], ms[b]
            w_ref, s_ref = w_refs[b], s_refs[b]

            # --- 3x3 'SAME' conv as 9 shifted MXU matmuls, f32 accumulation in VMEM ---
            # Output flat row o = h*Wp + w reads padded flat row o + dy*Wp + dx; rows
            # with w in {W, W+1} are halo junk and are dropped by the pooling below.
            for t in range(9):
                dy, dx = divmod(t, 3)
                patch = src[pl.ds(dy * Wp + dx, HWp), :].astype(jnp.bfloat16)
                contrib = jnp.dot(patch, w_ref[t],
                                  preferred_element_type=jnp.float32)
                if t == 0:
                    y[...] = contrib
                else:
                    y[...] += contrib

            # --- folded BatchNorm shift + ReLU (scale already folded into weights) ----
            y[...] = jnp.maximum(y[...] + s_ref[...], 0.0)

            # --- fused 2x2 max-pool ---------------------------------------------------
            # Horizontal pairs: Wp is even, so even/odd flat rows <=> even/odd w.
            m[...] = jnp.maximum(y[pl.ds(0, H * Wph, stride=2), :],
                                 y[pl.ds(1, H * Wph, stride=2), :])
            # Vertical pairs: m row h*Wph + wo holds max over w in {2wo, 2wo+1}.
            if b + 1 < nb:
                nxt = srcs[b + 1]          # next block's haloed scratch (interior write)
                Wp_n = Wo + 2
                for ho in range(Ho):       # static unroll, small Ho
                    row = jnp.maximum(
                        m[(2 * ho) * Wph:(2 * ho) * Wph + Wo, :],
                        m[(2 * ho + 1) * Wph:(2 * ho + 1) * Wph + Wo, :])
                    base = (ho + 1) * Wp_n + 1
                    nxt[base:base + Wo, :] = row
            else:
                for ho in range(Ho):
                    row = jnp.maximum(
                        m[(2 * ho) * Wph:(2 * ho) * Wph + Wo, :],
                        m[(2 * ho + 1) * Wph:(2 * ho + 1) * Wph + Wo, :])
                    o_ref[ho] = row.astype(o_ref.dtype)

    return kernel


def conv4_features(x_nchw, kblocks):
    """Fused Conv-4 feature extractor. Returns the final pooled activation (NHWC, f32)."""
    N, C, H, W = x_nchw.shape
    nb = len(kblocks)
    cin0 = kblocks[0]["w"].shape[1]        # first block's (padded) contraction dim

    # Static per-block dims (H, W, Cin, Cout); spatial halves each block.
    dims = []
    h, w, cin = H, W, cin0
    for blk in kblocks:
        # TODO(synk): odd H/W would need PyTorch MaxPool2d floor handling; Conv-4 sizes are even.
        assert h % 2 == 0 and w % 2 == 0, "even spatial dims expected (MaxPool2d(2))"
        assert blk["w"].shape[1] == cin
        cout = blk["w"].shape[-1]
        dims.append((h, w, cin, cout))
        h, w, cin = h // 2, w // 2, cout
    Cf = dims[-1][3]

    # Host-side prep of the FIRST block's haloed, row-flattened input:
    #   NCHW -> NHWC, zero spatial halo (3x3 SAME), zero-pad channels 3 -> 8 for an
    #   aligned MXU K dim, flatten padded rows (flat = i*(W+2)+j), +2 tail rows so the
    #   (dy=2, dx=2) shifted reads stay in range.
    xp = jnp.transpose(x_nchw, (0, 2, 3, 1)).astype(jnp.float32)
    xp = jnp.pad(xp, ((0, 0), (1, 1), (1, 1), (0, cin0 - C)))
    xp = xp.reshape(N, (H + 2) * (W + 2), cin0)
    xp = jnp.pad(xp, ((0, 0), (0, 2), (0, 0)))
    rows0 = (H + 2) * (W + 2) + 2

    in_specs = [pl.BlockSpec((None, rows0, cin0), lambda n: (n, 0, 0))]   # one image/step
    args = [xp]
    for blk, (bh, bw, bc, bo) in zip(kblocks, dims):
        in_specs.append(pl.BlockSpec((9, bc, bo), lambda n: (0, 0, 0)))   # weights resident
        in_specs.append(pl.BlockSpec((1, bo), lambda n: (0, 0)))          # shift resident
        args += [blk["w"], blk["shift"]]

    scratch = []
    for b, (bh, bw, bc, bo) in enumerate(dims):
        wp = bw + 2
        if b > 0:
            scratch.append(pltpu.VMEM(((bh + 2) * wp + 2, bc), jnp.float32))  # haloed input
        scratch.append(pltpu.VMEM((bh * wp, bo), jnp.float32))                # conv acc / ReLU
        scratch.append(pltpu.VMEM((bh * (wp // 2), bo), jnp.float32))         # horiz pool stage

    return pl.pallas_call(
        _make_conv4_kernel(tuple(dims)),
        out_shape=jax.ShapeDtypeStruct((N, h, w, Cf), jnp.float32),
        grid=(N,),
        in_specs=in_specs,
        out_specs=pl.BlockSpec((None, h, w, Cf), lambda n: (n, 0, 0, 0)),
        scratch_shapes=scratch,
        compiler_params=pltpu.CompilerParams(
            dimension_semantics=("parallel",),   # shard the batch across TCs (v7x megacore)
        ),
    )(*args)


# ------------------------------- parameters ----------------------------------------

def init_params(key, in_ch=3, hidden=32, num_blocks=4, num_class=5):
    """Synthetic module parameters with the same structure as the PyTorch model."""
    blocks = []
    cin = in_ch
    for _ in range(num_blocks):
        key, kw, kb = jax.random.split(key, 3)
        blocks.append(dict(
            w=jax.random.normal(kw, (3, 3, cin, hidden), jnp.float32) * 0.05,  # HWIO
            b=jax.random.normal(kb, (hidden,), jnp.float32) * 0.01,            # conv bias
            gamma=jnp.ones((hidden,), jnp.float32),
            beta=jnp.zeros((hidden,), jnp.float32),
            mean=jnp.zeros((hidden,), jnp.float32),   # BN running stats at init
            var=jnp.ones((hidden,), jnp.float32),
        ))
        cin = hidden
    key, kc = jax.random.split(key)
    cls_w = jax.random.normal(kc, (hidden, num_class), jnp.float32) * 0.05
    cls_b = jnp.zeros((num_class,), jnp.float32)      # classifier.bias.data.fill_(0)
    return dict(blocks=blocks, cls_w=cls_w, cls_b=cls_b)


def prepare_kernel_params(params):
    """Fold BN into the conv weights and cast to the kernel dtypes.

    For real PyTorch checkpoints ([Cout, Cin, kh, kw]) map to the (9, Cin, Cout) tap
    layout via w.permute(2, 3, 1, 0) (HWIO) before the reshape, or results are silently
    permuted.
    TODO(synk): training-mode BatchNorm (batch statistics) is not folded here; this
                matches eval/init running stats only.
    """
    kblocks = []
    for bi, blk in enumerate(params["blocks"]):
        scale = blk["gamma"] / jnp.sqrt(blk["var"] + _BN_EPS)          # (Cout,)
        shift = blk["beta"] + scale * (blk["b"] - blk["mean"])         # (Cout,)
        w_folded = blk["w"] * scale[None, None, None, :]               # fold BN scale into W
        cin = w_folded.shape[2]
        if bi == 0 and cin < _CIN_PAD_FIRST:                           # pad K: 3 -> 8
            w_folded = jnp.pad(
                w_folded, ((0, 0), (0, 0), (0, _CIN_PAD_FIRST - cin), (0, 0)))
        cout = w_folded.shape[-1]
        w_taps = w_folded.reshape(9, -1, cout)                          # tap = dy*3 + dx
        kblocks.append(dict(w=w_taps.astype(jnp.bfloat16),
                            shift=shift[None, :].astype(jnp.float32)))
    return dict(blocks=kblocks, cls_w=params["cls_w"], cls_b=params["cls_b"])


# ------------------------------- forward passes -------------------------------------

def baseline_train_forward(x_nchw, kparams):
    """BaselineTrain.forward (loss_type='softmax'): returns class scores."""
    feats = conv4_features(x_nchw, kparams["blocks"])      # (N, Ho_f, Wo_f, C) f32
    # Final spatial is 1x1 here, so the flatten order is moot.
    # TODO(synk): for spatial > 1x1, PyTorch flattens channel-major (C, H, W).
    feat = feats.reshape(feats.shape[0], -1)
    # Classifier (batch x 32 @ 32 x num_class): too tiny for a dedicated pallas_call
    # (pure launch/DMA overhead) — left to XLA.
    return feat @ kparams["cls_w"] + kparams["cls_b"]

# TODO(synk): forward_loss / train_loop (CrossEntropyLoss, optimizer, SummaryWriter)
#             and the loss_type='dist' (distLinear) branch are host-side training
#             utilities, not kernel work.


def reference_forward(x_nchw, params):
    """Pure-JAX f32 reference of the PyTorch module (eval-mode BN with init stats)."""
    x = jnp.transpose(x_nchw, (0, 2, 3, 1)).astype(jnp.float32)
    for blk in params["blocks"]:
        z = jax.lax.conv_general_dilated(
            x, blk["w"], (1, 1), "SAME",
            dimension_numbers=("NHWC", "HWIO", "NHWC"),
            precision=jax.lax.Precision.HIGHEST) + blk["b"]
        z = (z - blk["mean"]) / jnp.sqrt(blk["var"] + _BN_EPS) * blk["gamma"] + blk["beta"]
        z = jnp.maximum(z, 0.0)
        x = jax.lax.reduce_window(z, -jnp.inf, jax.lax.max,
                                  (1, 2, 2, 1), (1, 2, 2, 1), "VALID")
    feat = x.reshape(x.shape[0], -1)
    return feat @ params["cls_w"] + params["cls_b"]


# --------------------------------------- main ----------------------------------------

if __name__ == "__main__":
    key = jax.random.PRNGKey(0)
    kx, kp = jax.random.split(key)
    x = jax.random.normal(kx, (2, 3, 16, 16), jnp.float32)   # NCHW, like the PyTorch input
    params = init_params(kp, in_ch=3, hidden=32, num_blocks=4, num_class=5)
    kparams = prepare_kernel_params(params)

    scores = jax.jit(baseline_train_forward)(x, kparams)
    scores = jax.block_until_ready(scores)
    assert scores.shape == (2, 5) and scores.dtype == jnp.float32

    ref = jax.jit(reference_forward)(x, params)
    ref = jax.block_until_ready(ref)
    assert bool(jnp.allclose(scores, ref, rtol=1e-1, atol=5e-2)), (
        "kernel/reference mismatch: max abs err "
        f"{float(jnp.max(jnp.abs(scores - ref)))}")

    print("KERNEL_OK")
</pallas_src>

<mosaic_0001>
module attributes {stable_mosaic.version = 11 : i64} {
  func.func @kernel(%arg0: i32, %arg1: memref<1x326x8xf32, #tpu.memory_space<vmem>>, %arg2: memref<9x8x32xbf16, #tpu.memory_space<vmem>>, %arg3: memref<1x32xf32, #tpu.memory_space<vmem>>, %arg4: memref<9x32x32xbf16, #tpu.memory_space<vmem>>, %arg5: memref<1x32xf32, #tpu.memory_space<vmem>>, %arg6: memref<9x32x32xbf16, #tpu.memory_space<vmem>>, %arg7: memref<1x32xf32, #tpu.memory_space<vmem>>, %arg8: memref<9x32x32xbf16, #tpu.memory_space<vmem>>, %arg9: memref<1x32xf32, #tpu.memory_space<vmem>>, %arg10: memref<1x1x1x32xf32, #tpu.memory_space<vmem>>, %arg11: memref<288x32xf32, #tpu.memory_space<vmem>>, %arg12: memref<144x32xf32, #tpu.memory_space<vmem>>, %arg13: memref<102x32xf32, #tpu.memory_space<vmem>>, %arg14: memref<80x32xf32, #tpu.memory_space<vmem>>, %arg15: memref<40x32xf32, #tpu.memory_space<vmem>>, %arg16: memref<38x32xf32, #tpu.memory_space<vmem>>, %arg17: memref<24x32xf32, #tpu.memory_space<vmem>>, %arg18: memref<12x32xf32, #tpu.memory_space<vmem>>, %arg19: memref<18x32xf32, #tpu.memory_space<vmem>>, %arg20: memref<8x32xf32, #tpu.memory_space<vmem>>, %arg21: memref<4x32xf32, #tpu.memory_space<vmem>>) attributes {dimension_semantics = [#tpu.dimension_semantics<parallel>], iteration_bounds = array<i64: 2>, scalar_prefetch = 0 : i64, scratch_operands = 11 : i64, tpu.core_type = #tpu.core_type<tc>, window_params = [{transform_indices = @transform_0, window_bounds = array<i64: 1, 326, 8>}, {pipeline_mode = #tpu.pipeline_mode<synchronous>, transform_indices = @transform_1, window_bounds = array<i64: 9, 8, 32>}, {pipeline_mode = #tpu.pipeline_mode<synchronous>, transform_indices = @transform_2, window_bounds = array<i64: 1, 32>}, {pipeline_mode = #tpu.pipeline_mode<synchronous>, transform_indices = @transform_3, window_bounds = array<i64: 9, 32, 32>}, {pipeline_mode = #tpu.pipeline_mode<synchronous>, transform_indices = @transform_4, window_bounds = array<i64: 1, 32>}, {pipeline_mode = #tpu.pipeline_mode<synchronous>, transform_indices = @transform_5, window_bounds = array<i64: 9, 32, 32>}, {pipeline_mode = #tpu.pipeline_mode<synchronous>, transform_indices = @transform_6, window_bounds = array<i64: 1, 32>}, {pipeline_mode = #tpu.pipeline_mode<synchronous>, transform_indices = @transform_7, window_bounds = array<i64: 9, 32, 32>}, {pipeline_mode = #tpu.pipeline_mode<synchronous>, transform_indices = @transform_8, window_bounds = array<i64: 1, 32>}, {transform_indices = @transform_9, window_bounds = array<i64: 1, 1, 1, 32>}]} {
    %cst = arith.constant 0.000000e+00 : f32
    %0 = vector.broadcast %cst : f32 to vector<102x32xf32>
    %c0 = arith.constant 0 : index
    %c0_0 = arith.constant 0 : index
    %1 = vector.load %arg13[%c0, %c0_0] : memref<102x32xf32, #tpu.memory_space<vmem>>, vector<102x32xf32>
    tpu.vector_store %arg13[%c0, %c0_0], %0 {strides = array<i32>} : memref<102x32xf32, #tpu.memory_space<vmem>>, vector<102x32xf32>,
    %cst_1 = arith.constant 0.000000e+00 : f32
    %2 = vector.broadcast %cst_1 : f32 to vector<38x32xf32>
    %c0_2 = arith.constant 0 : index
    %c0_3 = arith.constant 0 : index
    %3 = vector.load %arg16[%c0_2, %c0_3] : memref<38x32xf32, #tpu.memory_space<vmem>>, vector<38x32xf32>
    tpu.vector_store %arg16[%c0_2, %c0_3], %2 {strides = array<i32>} : memref<38x32xf32, #tpu.memory_space<vmem>>, vector<38x32xf32>,
    %cst_4 = arith.constant 0.000000e+00 : f32
    %4 = vector.broadcast %cst_4 : f32 to vector<18x32xf32>
    %c0_5 = arith.constant 0 : index
    %c0_6 = arith.constant 0 : index
    %5 = vector.load %arg19[%c0_5, %c0_6] : memref<18x32xf32, #tpu.memory_space<vmem>>, vector<18x32xf32>
    tpu.vector_store %arg19[%c0_5, %c0_6], %4 {strides = array<i32>} : memref<18x32xf32, #tpu.memory_space<vmem>>, vector<18x32xf32>,
    %c0_7 = arith.constant 0 : index
    %c0_8 = arith.constant 0 : index
    %c0_9 = arith.constant 0 : index
    %6 = vector.load %arg1[%c0_7, %c0_8, %c0_9] : memref<1x326x8xf32, #tpu.memory_space<vmem>>, vector<1x288x8xf32>
    %7 = vector.shape_cast %6 : vector<1x288x8xf32> to vector<288x8xf32>
    %8 = arith.truncf %7 : vector<288x8xf32> to vector<288x8xbf16>
    %c0_10 = arith.constant 0 : index
    %c0_11 = arith.constant 0 : index
    %c0_12 = arith.constant 0 : index
    %9 = vector.load %arg2[%c0_10, %c0_11, %c0_12] : memref<9x8x32xbf16, #tpu.memory_space<vmem>>, vector<1x8x32xbf16>
    %10 = vector.shape_cast %9 : vector<1x8x32xbf16> to vector<8x32xbf16>
    %cst_13 = arith.constant dense<0.000000e+00> : vector<288x32xf32>
    %11 = tpu.matmul %8, %10, %cst_13 {dimension_numbers = #tpu.dot_dimension_numbers<[1], [0], [0], [1], [0, 0, 1, 1], [], []>} : vector<288x8xbf16>, vector<8x32xbf16>, vector<288x32xf32> -> vector<288x32xf32>
    %c0_14 = arith.constant 0 : index
    %c0_15 = arith.constant 0 : index
    %12 = vector.load %arg11[%c0_14, %c0_15] : memref<288x32xf32, #tpu.memory_space<vmem>>, vector<288x32xf32>
    tpu.vector_store %arg11[%c0_14, %c0_15], %11 {strides = array<i32>} : memref<288x32xf32, #tpu.memory_space<vmem>>, vector<288x32xf32>,
    %c0_16 = arith.constant 0 : index
    %c1 = arith.constant 1 : index
    %c0_17 = arith.constant 0 : index
    %13 = vector.load %arg1[%c0_16, %c1, %c0_17] : memref<1x326x8xf32, #tpu.memory_space<vmem>>, vector<1x288x8xf32>
    %14 = vector.shape_cast %13 : vector<1x288x8xf32> to vector<288x8xf32>
    %15 = arith.truncf %14 : vector<288x8xf32> to vector<288x8xbf16>
    %c1_18 = arith.constant 1 : index
    %c0_19 = arith.constant 0 : index
    %c0_20 = arith.constant 0 : index
    %16 = vector.load %arg2[%c1_18, %c0_19, %c0_20] : memref<9x8x32xbf16, #tpu.memory_space<vmem>>, vector<1x8x32xbf16>
    %17 = vector.shape_cast %16 : vector<1x8x32xbf16> to vector<8x32xbf16>
    %cst_21 = arith.constant dense<0.000000e+00> : vector<288x32xf32>
    %18 = tpu.matmul %15, %17, %cst_21 {dimension_numbers = #tpu.dot_dimension_numbers<[1], [0], [0], [1], [0, 0, 1, 1], [], []>} : vector<288x8xbf16>, vector<8x32xbf16>, vector<288x32xf32> -> vector<288x32xf32>
    %c0_22 = arith.constant 0 : index
    %c0_23 = arith.constant 0 : index
    %19 = vector.load %arg11[%c0_22, %c0_23] : memref<288x32xf32, #tpu.memory_space<vmem>>, vector<288x32xf32>
    %20 = arith.addf %19, %18 : vector<288x32xf32>
    %c0_24 = arith.constant 0 : index
    %c0_25 = arith.constant 0 : index
    %21 = vector.load %arg11[%c0_24, %c0_25] : memref<288x32xf32, #tpu.memory_space<vmem>>, vector<288x32xf32>
    tpu.vector_store %arg11[%c0_24, %c0_25], %20 {strides = array<i32>} : memref<288x32xf32, #tpu.memory_space<vmem>>, vector<288x32xf32>,
    %c0_26 = arith.constant 0 : index
    %c2 = arith.constant 2 : index
    %c0_27 = arith.constant 0 : index
    %22 = vector.load %arg1[%c0_26, %c2, %c0_27] : memref<1x326x8xf32, #tpu.memory_space<vmem>>, vector<1x288x8xf32>
    %23 = vector.shape_cast %22 : vector<1x288x8xf32> to vector<288x8xf32>
    %24 = arith.truncf %23 : vector<288x8xf32> to vector<288x8xbf16>
    %c2_28 = arith.constant 2 : index
    %c0_29 = arith.constant 0 : index
    %c0_30 = arith.constant 0 : index
    %25 = vector.load %arg2[%c2_28, %c0_29, %c0_30] : memref<9x8x32xbf16, #tpu.memory_space<vmem>>, vector<1x8x32xbf16>
    %26 = vector.shape_cast %25 : vector<1x8x32xbf16> to vector<8x32xbf16>
    %cst_31 = arith.constant dense<0.000000e+00> : vector<288x32xf32>
    %27 = tpu.matmul %24, %26, %cst_31 {dimension_numbers = #tpu.dot_dimension_numbers<[1], [0], [0], [1], [0, 0, 1, 1], [], []>} : vector<288x8xbf16>, vector<8x32xbf16>, vector<288x32xf32> -> vector<288x32xf32>
    %c0_32 = arith.constant 0 : index
    %c0_33 = arith.constant 0 : index
    %28 = vector.load %arg11[%c0_32, %c0_33] : memref<288x32xf32, #tpu.memory_space<vmem>>, vector<288x32xf32>
    %29 = arith.addf %28, %27 : vector<288x32xf32>
    %c0_34 = arith.constant 0 : index
    %c0_35 = arith.constant 0 : index
    %30 = vector.load %arg11[%c0_34, %c0_35] : memref<288x32xf32, #tpu.memory_space<vmem>>, vector<288x32xf32>
    tpu.vector_store %arg11[%c0_34, %c0_35], %29 {strides = array<i32>} : memref<288x32xf32, #tpu.memory_space<vmem>>, vector<288x32xf32>,
    %c0_36 = arith.constant 0 : index
    %c18 = arith.constant 18 : index
    %c0_37 = arith.constant 0 : index
    %31 = vector.load %arg1[%c0_36, %c18, %c0_37] : memref<1x326x8xf32, #tpu.memory_space<vmem>>, vector<1x288x8xf32>
    %32 = vector.shape_cast %31 : vector<1x288x8xf32> to vector<288x8xf32>
    %33 = arith.truncf %32 : vector<288x8xf32> to vector<288x8xbf16>
    %c3 = arith.constant 3 : index
    %c0_38 = arith.constant 0 : index
    %c0_39 = arith.constant 0 : index
    %34 = vector.load %arg2[%c3, %c0_38, %c0_39] : memref<9x8x32xbf16, #tpu.memory_space<vmem>>, vector<1x8x32xbf16>
    %35 = vector.shape_cast %34 : vector<1x8x32xbf16> to vector<8x32xbf16>
    %cst_40 = arith.constant dense<0.000000e+00> : vector<288x32xf32>
    %36 = tpu.matmul %33, %35, %cst_40 {dimension_numbers = #tpu.dot_dimension_numbers<[1], [0], [0], [1], [0, 0, 1, 1], [], []>} : vector<288x8xbf16>, vector<8x32xbf16>, vector<288x32xf32> -> vector<288x32xf32>
    %c0_41 = arith.constant 0 : index
    %c0_42 = arith.constant 0 : index
    %37 = vector.load %arg11[%c0_41, %c0_42] : memref<288x32xf32, #tpu.memory_space<vmem>>, vector<288x32xf32>
    %38 = arith.addf %37, %36 : vector<288x32xf32>
    %c0_43 = arith.constant 0 : index
    %c0_44 = arith.constant 0 : index
    %39 = vector.load %arg11[%c0_43, %c0_44] : memref<288x32xf32, #tpu.memory_space<vmem>>, vector<288x32xf32>
    tpu.vector_store %arg11[%c0_43, %c0_44], %38 {strides = array<i32>} : memref<288x32xf32, #tpu.memory_space<vmem>>, vector<288x32xf32>,
    %c0_45 = arith.constant 0 : index
    %c19 = arith.constant 19 : index
    %c0_46 = arith.constant 0 : index
    %40 = vector.load %arg1[%c0_45, %c19, %c0_46] : memref<1x326x8xf32, #tpu.memory_space<vmem>>, vector<1x288x8xf32>
    %41 = vector.shape_cast %40 : vector<1x288x8xf32> to vector<288x8xf32>
    %42 = arith.truncf %41 : vector<288x8xf32> to vector<288x8xbf16>
    %c4 = arith.constant 4 : index
    %c0_47 = arith.constant 0 : index
    %c0_48 = arith.constant 0 : index
    %43 = vector.load %arg2[%c4, %c0_47, %c0_48] : memref<9x8x32xbf16, #tpu.memory_space<vmem>>, vector<1x8x32xbf16>
    %44 = vector.shape_cast %43 : vector<1x8x32xbf16> to vector<8x32xbf16>
    %cst_49 = arith.constant dense<0.000000e+00> : vector<288x32xf32>
    %45 = tpu.matmul %42, %44, %cst_49 {dimension_numbers = #tpu.dot_dimension_numbers<[1], [0], [0], [1], [0, 0, 1, 1], [], []>} : vector<288x8xbf16>, vector<8x32xbf16>, vector<288x32xf32> -> vector<288x32xf32>
    %c0_50 = arith.constant 0 : index
    %c0_51 = arith.constant 0 : index
    %46 = vector.load %arg11[%c0_50, %c0_51] : memref<288x32xf32, #tpu.memory_space<vmem>>, vector<288x32xf32>
    %47 = arith.addf %46, %45 : vector<288x32xf32>
    %c0_52 = arith.constant 0 : index
    %c0_53 = arith.constant 0 : index
    %48 = vector.load %arg11[%c0_52, %c0_53] : memref<288x32xf32, #tpu.memory_space<vmem>>, vector<288x32xf32>
    tpu.vector_store %arg11[%c0_52, %c0_53], %47 {strides = array<i32>} : memref<288x32xf32, #tpu.memory_space<vmem>>, vector<288x32xf32>,
    %c0_54 = arith.constant 0 : index
    %c20 = arith.constant 20 : index
    %c0_55 = arith.constant 0 : index
    %49 = vector.load %arg1[%c0_54, %c20, %c0_55] : memref<1x326x8xf32, #tpu.memory_space<vmem>>, vector<1x288x8xf32>
    %50 = vector.shape_cast %49 : vector<1x288x8xf32> to vector<288x8xf32>
    %51 = arith.truncf %50 : vector<288x8xf32> to vector<288x8xbf16>
    %c5 = arith.constant 5 : index
    %c0_56 = arith.constant 0 : index
    %c0_57 = arith.constant 0 : index
    %52 = vector.load %arg2[%c5, %c0_56, %c0_57] : memref<9x8x32xbf16, #tpu.memory_space<vmem>>, vector<1x8x32xbf16>
    %53 = vector.shape_cast %52 : vector<1x8x32xbf16> to vector<8x32xbf16>
    %cst_58 = arith.constant dense<0.000000e+00> : vector<288x32xf32>
    %54 = tpu.matmul %51, %53, %cst_58 {dimension_numbers = #tpu.dot_dimension_numbers<[1], [0], [0], [1], [0, 0, 1, 1], [], []>} : vector<288x8xbf16>, vector<8x32xbf16>, vector<288x32xf32> -> vector<288x32xf32>
    %c0_59 = arith.constant 0 : index
    %c0_60 = arith.constant 0 : index
    %55 = vector.load %arg11[%c0_59, %c0_60] : memref<288x32xf32, #tpu.memory_space<vmem>>, vector<288x32xf32>
    %56 = arith.addf %55, %54 : vector<288x32xf32>
    %c0_61 = arith.constant 0 : index
    %c0_62 = arith.constant 0 : index
    %57 = vector.load %arg11[%c0_61, %c0_62] : memref<288x32xf32, #tpu.memory_space<vmem>>, vector<288x32xf32>
    tpu.vector_store %arg11[%c0_61, %c0_62], %56 {strides = array<i32>} : memref<288x32xf32, #tpu.memory_space<vmem>>, vector<288x32xf32>,
    %c0_63 = arith.constant 0 : index
    %c36 = arith.constant 36 : index
    %c0_64 = arith.constant 0 : index
    %58 = vector.load %arg1[%c0_63, %c36, %c0_64] : memref<1x326x8xf32, #tpu.memory_space<vmem>>, vector<1x288x8xf32>
    %59 = vector.shape_cast %58 : vector<1x288x8xf32> to vector<288x8xf32>
    %60 = arith.truncf %59 : vector<288x8xf32> to vector<288x8xbf16>
    %c6 = arith.constant 6 : index
    %c0_65 = arith.constant 0 : index
    %c0_66 = arith.constant 0 : index
    %61 = vector.load %arg2[%c6, %c0_65, %c0_66] : memref<9x8x32xbf16, #tpu.memory_space<vmem>>, vector<1x8x32xbf16>
    %62 = vector.shape_cast %61 : vector<1x8x32xbf16> to vector<8x32xbf16>
    %cst_67 = arith.constant dense<0.000000e+00> : vector<288x32xf32>
    %63 = tpu.matmul %60, %62, %cst_67 {dimension_numbers = #tpu.dot_dimension_numbers<[1], [0], [0], [1], [0, 0, 1, 1], [], []>} : vector<288x8xbf16>, vector<8x32xbf16>, vector<288x32xf32> -> vector<288x32xf32>
    %c0_68 = arith.constant 0 : index
    %c0_69 = arith.constant 0 : index
    %64 = vector.load %arg11[%c0_68, %c0_69] : memref<288x32xf32, #tpu.memory_space<vmem>>, vector<288x32xf32>
    %65 = arith.addf %64, %63 : vector<288x32xf32>
    %c0_70 = arith.constant 0 : index
    %c0_71 = arith.constant 0 : index
    %66 = vector.load %arg11[%c0_70, %c0_71] : memref<288x32xf32, #tpu.memory_space<vmem>>, vector<288x32xf32>
    tpu.vector_store %arg11[%c0_70, %c0_71], %65 {strides = array<i32>} : memref<288x32xf32, #tpu.memory_space<vmem>>, vector<288x32xf32>,
    %c0_72 = arith.constant 0 : index
    %c37 = arith.constant 37 : index
    %c0_73 = arith.constant 0 : index
    %67 = vector.load %arg1[%c0_72, %c37, %c0_73] : memref<1x326x8xf32, #tpu.memory_space<vmem>>, vector<1x288x8xf32>
    %68 = vector.shape_cast %67 : vector<1x288x8xf32> to vector<288x8xf32>
    %69 = arith.truncf %68 : vector<288x8xf32> to vector<288x8xbf16>
    %c7 = arith.constant 7 : index
    %c0_74 = arith.constant 0 : index
    %c0_75 = arith.constant 0 : index
    %70 = vector.load %arg2[%c7, %c0_74, %c0_75] : memref<9x8x32xbf16, #tpu.memory_space<vmem>>, vector<1x8x32xbf16>
    %71 = vector.shape_cast %70 : vector<1x8x32xbf16> to vector<8x32xbf16>
    %cst_76 = arith.constant dense<0.000000e+00> : vector<288x32xf32>
    %72 = tpu.matmul %69, %71, %cst_76 {dimension_numbers = #tpu.dot_dimension_numbers<[1], [0], [0], [1], [0, 0, 1, 1], [], []>} : vector<288x8xbf16>, vector<8x32xbf16>, vector<288x32xf32> -> vector<288x32xf32>
    %c0_77 = arith.constant 0 : index
    %c0_78 = arith.constant 0 : index
    %73 = vector.load %arg11[%c0_77, %c0_78] : memref<288x32xf32, #tpu.memory_space<vmem>>, vector<288x32xf32>
    %74 = arith.addf %73, %72 : vector<288x32xf32>
    %c0_79 = arith.constant 0 : index
    %c0_80 = arith.constant 0 : index
    %75 = vector.load %arg11[%c0_79, %c0_80] : memref<288x32xf32, #tpu.memory_space<vmem>>, vector<288x32xf32>
    tpu.vector_store %arg11[%c0_79, %c0_80], %74 {strides = array<i32>} : memref<288x32xf32, #tpu.memory_space<vmem>>, vector<288x32xf32>,
    %c0_81 = arith.constant 0 : index
    %c38 = arith.constant 38 : index
    %c0_82 = arith.constant 0 : index
    %76 = vector.load %arg1[%c0_81, %c38, %c0_82] : memref<1x326x8xf32, #tpu.memory_space<vmem>>, vector<1x288x8xf32>
    %77 = vector.shape_cast %76 : vector<1x288x8xf32> to vector<288x8xf32>
    %78 = arith.truncf %77 : vector<288x8xf32> to vector<288x8xbf16>
    %c8 = arith.constant 8 : index
    %c0_83 = arith.constant 0 : index
    %c0_84 = arith.constant 0 : index
    %79 = vector.load %arg2[%c8, %c0_83, %c0_84] : memref<9x8x32xbf16, #tpu.memory_space<vmem>>, vector<1x8x32xbf16>
    %80 = vector.shape_cast %79 : vector<1x8x32xbf16> to vector<8x32xbf16>
    %cst_85 = arith.constant dense<0.000000e+00> : vector<288x32xf32>
    %81 = tpu.matmul %78, %80, %cst_85 {dimension_numbers = #tpu.dot_dimension_numbers<[1], [0], [0], [1], [0, 0, 1, 1], [], []>} : vector<288x8xbf16>, vector<8x32xbf16>, vector<288x32xf32> -> vector<288x32xf32>
    %c0_86 = arith.constant 0 : index
    %c0_87 = arith.constant 0 : index
    %82 = vector.load %arg11[%c0_86, %c0_87] : memref<288x32xf32, #tpu.memory_space<vmem>>, vector<288x32xf32>
    %83 = arith.addf %82, %81 : vector<288x32xf32>
    %c0_88 = arith.constant 0 : index
    %c0_89 = arith.constant 0 : index
    %84 = vector.load %arg11[%c0_88, %c0_89] : memref<288x32xf32, #tpu.memory_space<vmem>>, vector<288x32xf32>
    tpu.vector_store %arg11[%c0_88, %c0_89], %83 {strides = array<i32>} : memref<288x32xf32, #tpu.memory_space<vmem>>, vector<288x32xf32>,
    %c0_90 = arith.constant 0 : index
    %c0_91 = arith.constant 0 : index
    %85 = vector.load %arg11[%c0_90, %c0_91] : memref<288x32xf32, #tpu.memory_space<vmem>>, vector<288x32xf32>
    %c0_92 = arith.constant 0 : index
    %c0_93 = arith.constant 0 : index
    %86 = vector.load %arg3[%c0_92, %c0_93] : memref<1x32xf32, #tpu.memory_space<vmem>>, vector<1x32xf32>
    %87 = vector.broadcast %86 : vector<1x32xf32> to vector<288x32xf32>
    %88 = arith.addf %85, %87 : vector<288x32xf32>
    %cst_94 = arith.constant 0.000000e+00 : f32
    %89 = vector.broadcast %cst_94 : f32 to vector<288x32xf32>
    %90 = arith.maximumf %88, %89 : vector<288x32xf32>
    %c0_95 = arith.constant 0 : index
    %c0_96 = arith.constant 0 : index
    %91 = vector.load %arg11[%c0_95, %c0_96] : memref<288x32xf32, #tpu.memory_space<vmem>>, vector<288x32xf32>
    tpu.vector_store %arg11[%c0_95, %c0_96], %90 {strides = array<i32>} : memref<288x32xf32, #tpu.memory_space<vmem>>, vector<288x32xf32>,
    %c0_97 = arith.constant 0 : index
    %c0_98 = arith.constant 0 : index
    %92 = tpu.strided_load %arg11[%c0_97, %c0_98] {strides = array<i32: 2, 1>} : memref<288x32xf32, #tpu.memory_space<vmem>>, vector<144x32xf32>
    %c1_99 = arith.constant 1 : index
    %c0_100 = arith.constant 0 : index
    %93 = tpu.strided_load %arg11[%c1_99, %c0_100] {strides = array<i32: 2, 1>} : memref<288x32xf32, #tpu.memory_space<vmem>>, vector<144x32xf32>
    %94 = arith.maximumf %92, %93 : vector<144x32xf32>
    %c0_101 = arith.constant 0 : index
    %c0_102 = arith.constant 0 : index
    %95 = vector.load %arg12[%c0_101, %c0_102] : memref<144x32xf32, #tpu.memory_space<vmem>>, vector<144x32xf32>
    tpu.vector_store %arg12[%c0_101, %c0_102], %94 {strides = array<i32>} : memref<144x32xf32, #tpu.memory_space<vmem>>, vector<144x32xf32>,
    %c0_103 = arith.constant 0 : index
    %c0_104 = arith.constant 0 : index
    %96 = vector.load %arg12[%c0_103, %c0_104] : memref<144x32xf32, #tpu.memory_space<vmem>>, vector<8x32xf32>
    %c9 = arith.constant 9 : index
    %c0_105 = arith.constant 0 : index
    %97 = vector.load %arg12[%c9, %c0_105] : memref<144x32xf32, #tpu.memory_space<vmem>>, vector<8x32xf32>
    %98 = arith.maximumf %96, %97 : vector<8x32xf32>
    %c11 = arith.constant 11 : index
    %c0_106 = arith.constant 0 : index
    %99 = vector.load %arg13[%c11, %c0_106] : memref<102x32xf32, #tpu.memory_space<vmem>>, vector<8x32xf32>
    tpu.vector_store %arg13[%c11, %c0_106], %98 {strides = array<i32>} : memref<102x32xf32, #tpu.memory_space<vmem>>, vector<8x32xf32>,
    %c18_107 = arith.constant 18 : index
    %c0_108 = arith.constant 0 : index
    %100 = vector.load %arg12[%c18_107, %c0_108] : memref<144x32xf32, #tpu.memory_space<vmem>>, vector<8x32xf32>
    %c27 = arith.constant 27 : index
    %c0_109 = arith.constant 0 : index
    %101 = vector.load %arg12[%c27, %c0_109] : memref<144x32xf32, #tpu.memory_space<vmem>>, vector<8x32xf32>
    %102 = arith.maximumf %100, %101 : vector<8x32xf32>
    %c21 = arith.constant 21 : index
    %c0_110 = arith.constant 0 : index
    %103 = vector.load %arg13[%c21, %c0_110] : memref<102x32xf32, #tpu.memory_space<vmem>>, vector<8x32xf32>
    tpu.vector_store %arg13[%c21, %c0_110], %102 {strides = array<i32>} : memref<102x32xf32, #tpu.memory_space<vmem>>, vector<8x32xf32>,
    %c36_111 = arith.constant 36 : index
    %c0_112 = arith.constant 0 : index
    %104 = vector.load %arg12[%c36_111, %c0_112] : memref<144x32xf32, #tpu.memory_space<vmem>>, vector<8x32xf32>
    %c45 = arith.constant 45 : index
    %c0_113 = arith.constant 0 : index
    %105 = vector.load %arg12[%c45, %c0_113] : memref<144x32xf32, #tpu.memory_space<vmem>>, vector<8x32xf32>
    %106 = arith.maximumf %104, %105 : vector<8x32xf32>
    %c31 = arith.constant 31 : index
    %c0_114 = arith.constant 0 : index
    %107 = vector.load %arg13[%c31, %c0_114] : memref<102x32xf32, #tpu.memory_space<vmem>>, vector<8x32xf32>
    tpu.vector_store %arg13[%c31, %c0_114], %106 {strides = array<i32>} : memref<102x32xf32, #tpu.memory_space<vmem>>, vector<8x32xf32>,
    %c54 = arith.constant 54 : index
    %c0_115 = arith.constant 0 : index
    %108 = vector.load %arg12[%c54, %c0_115] : memref<144x32xf32, #tpu.memory_space<vmem>>, vector<8x32xf32>
    %c63 = arith.constant 63 : index
    %c0_116 = arith.constant 0 : index
    %109 = vector.load %arg12[%c63, %c0_116] : memref<144x32xf32, #tpu.memory_space<vmem>>, vector<8x32xf32>
    %110 = arith.maximumf %108, %109 : vector<8x32xf32>
    %c41 = arith.constant 41 : index
    %c0_117 = arith.constant 0 : index
    %111 = vector.load %arg13[%c41, %c0_117] : memref<102x32xf32, #tpu.memory_space<vmem>>, vector<8x32xf32>
    tpu.vector_store %arg13[%c41, %c0_117], %110 {strides = array<i32>} : memref<102x32xf32, #tpu.memory_space<vmem>>, vector<8x32xf32>,
    %c72 = arith.constant 72 : index
    %c0_118 = arith.constant 0 : index
    %112 = vector.load %arg12[%c72, %c0_118] : memref<144x32xf32, #tpu.memory_space<vmem>>, vector<8x32xf32>
    %c81 = arith.constant 81 : index
    %c0_119 = arith.constant 0 : index
    %113 = vector.load %arg12[%c81, %c0_119] : memref<144x32xf32, #tpu.memory_space<vmem>>, vector<8x32xf32>
    %114 = arith.maximumf %112, %113 : vector<8x32xf32>
    %c51 = arith.constant 51 : index
    %c0_120 = arith.constant 0 : index
    %115 = vector.load %arg13[%c51, %c0_120] : memref<102x32xf32, #tpu.memory_space<vmem>>, vector<8x32xf32>
    tpu.vector_store %arg13[%c51, %c0_120], %114 {strides = array<i32>} : memref<102x32xf32, #tpu.memory_space<vmem>>, vector<8x32xf32>,
    %c90 = arith.constant 90 : index
    %c0_121 = arith.constant 0 : index
    %116 = vector.load %arg12[%c90, %c0_121] : memref<144x32xf32, #tpu.memory_space<vmem>>, vector<8x32xf32>
    %c99 = arith.constant 99 : index
    %c0_122 = arith.constant 0 : index
    %117 = vector.load %arg12[%c99, %c0_122] : memref<144x32xf32, #tpu.memory_space<vmem>>, vector<8x32xf32>
    %118 = arith.maximumf %116, %117 : vector<8x32xf32>
    %c61 = arith.constant 61 : index
    %c0_123 = arith.constant 0 : index
    %119 = vector.load %arg13[%c61, %c0_123] : memref<102x32xf32, #tpu.memory_space<vmem>>, vector<8x32xf32>
    tpu.vector_store %arg13[%c61, %c0_123], %118 {strides = array<i32>} : memref<102x32xf32, #tpu.memory_space<vmem>>, vector<8x32xf32>,
    %c108 = arith.constant 108 : index
    %c0_124 = arith.constant 0 : index
    %120 = vector.load %arg12[%c108, %c0_124] : memref<144x32xf32, #tpu.memory_space<vmem>>, vector<8x32xf32>
    %c117 = arith.constant 117 : index
    %c0_125 = arith.constant 0 : index
    %121 = vector.load %arg12[%c117, %c0_125] : memref<144x32xf32, #tpu.memory_space<vmem>>, vector<8x32xf32>
    %122 = arith.maximumf %120, %121 : vector<8x32xf32>
    %c71 = arith.constant 71 : index
    %c0_126 = arith.constant 0 : index
    %123 = vector.load %arg13[%c71, %c0_126] : memref<102x32xf32, #tpu.memory_space<vmem>>, vector<8x32xf32>
    tpu.vector_store %arg13[%c71, %c0_126], %122 {strides = array<i32>} : memref<102x32xf32, #tpu.memory_space<vmem>>, vector<8x32xf32>,
    %c126 = arith.constant 126 : index
    %c0_127 = arith.constant 0 : index
    %124 = vector.load %arg12[%c126, %c0_127] : memref<144x32xf32, #tpu.memory_space<vmem>>, vector<8x32xf32>
    %c135 = arith.constant 135 : index
    %c0_128 = arith.constant 0 : index
    %125 = vector.load %arg12[%c135, %c0_128] : memref<144x32xf32, #tpu.memory_space<vmem>>, vector<8x32xf32>
    %126 = arith.maximumf %124, %125 : vector<8x32xf32>
    %c81_129 = arith.constant 81 : index
    %c0_130 = arith.constant 0 : index
    %127 = vector.load %arg13[%c81_129, %c0_130] : memref<102x32xf32, #tpu.memory_space<vmem>>, vector<8x32xf32>
    tpu.vector_store %arg13[%c81_129, %c0_130], %126 {strides = array<i32>} : memref<102x32xf32, #tpu.memory_space<vmem>>, vector<8x32xf32>,
    %c0_131 = arith.constant 0 : index
    %c0_132 = arith.constant 0 : index
    %128 = vector.load %arg13[%c0_131, %c0_132] : memref<102x32xf32, #tpu.memory_space<vmem>>, vector<80x32xf32>
    %129 = arith.truncf %128 : vector<80x32xf32> to vector<80x32xbf16>
    %c0_133 = arith.constant 0 : index
    %c0_134 = arith.constant 0 : index
    %c0_135 = arith.constant 0 : index
    %130 = vector.load %arg4[%c0_133, %c0_134, %c0_135] : memref<9x32x32xbf16, #tpu.memory_space<vmem>>, vector<1x32x32xbf16>
    %131 = vector.shape_cast %130 : vector<1x32x32xbf16> to vector<32x32xbf16>
    %cst_136 = arith.constant dense<0.000000e+00> : vector<80x32xf32>
    %132 = tpu.matmul %129, %131, %cst_136 {dimension_numbers = #tpu.dot_dimension_numbers<[1], [0], [0], [1], [0, 0, 1, 1], [], []>} : vector<80x32xbf16>, vector<32x32xbf16>, vector<80x32xf32> -> vector<80x32xf32>
    %c0_137 = arith.constant 0 : index
    %c0_138 = arith.constant 0 : index
    %133 = vector.load %arg14[%c0_137, %c0_138] : memref<80x32xf32, #tpu.memory_space<vmem>>, vector<80x32xf32>
    tpu.vector_store %arg14[%c0_137, %c0_138], %132 {strides = array<i32>} : memref<80x32xf32, #tpu.memory_space<vmem>>, vector<80x32xf32>,
    %c1_139 = arith.constant 1 : index
    %c0_140 = arith.constant 0 : index
    %134 = vector.load %arg13[%c1_139, %c0_140] : memref<102x32xf32, #tpu.memory_space<vmem>>, vector<80x32xf32>
    %135 = arith.truncf %134 : vector<80x32xf32> to vector<80x32xbf16>
    %c1_141 = arith.constant 1 : index
    %c0_142 = arith.constant 0 : index
    %c0_143 = arith.constant 0 : index
    %136 = vector.load %arg4[%c1_141, %c0_142, %c0_143] : memref<9x32x32xbf16, #tpu.memory_space<vmem>>, vector<1x32x32xbf16>
    %137 = vector.shape_cast %136 : vector<1x32x32xbf16> to vector<32x32xbf16>
    %cst_144 = arith.constant dense<0.000000e+00> : vector<80x32xf32>
    %138 = tpu.matmul %135, %137, %cst_144 {dimension_numbers = #tpu.dot_dimension_numbers<[1], [0], [0], [1], [0, 0, 1, 1], [], []>} : vector<80x32xbf16>, vector<32x32xbf16>, vector<80x32xf32> -> vector<80x32xf32>
    %c0_145 = arith.constant 0 : index
    %c0_146 = arith.constant 0 : index
    %139 = vector.load %arg14[%c0_145, %c0_146] : memref<80x32xf32, #tpu.memory_space<vmem>>, vector<80x32xf32>
    %140 = arith.addf %139, %138 : vector<80x32xf32>
    %c0_147 = arith.constant 0 : index
    %c0_148 = arith.constant 0 : index
    %141 = vector.load %arg14[%c0_147, %c0_148] : memref<80x32xf32, #tpu.memory_space<vmem>>, vector<80x32xf32>
    tpu.vector_store %arg14[%c0_147, %c0_148], %140 {strides = array<i32>} : memref<80x32xf32, #tpu.memory_space<vmem>>, vector<80x32xf32>,
    %c2_149 = arith.constant 2 : index
    %c0_150 = arith.constant 0 : index
    %142 = vector.load %arg13[%c2_149, %c0_150] : memref<102x32xf32, #tpu.memory_space<vmem>>, vector<80x32xf32>
    %143 = arith.truncf %142 : vector<80x32xf32> to vector<80x32xbf16>
    %c2_151 = arith.constant 2 : index
    %c0_152 = arith.constant 0 : index
    %c0_153 = arith.constant 0 : index
    %144 = vector.load %arg4[%c2_151, %c0_152, %c0_153] : memref<9x32x32xbf16, #tpu.memory_space<vmem>>, vector<1x32x32xbf16>
    %145 = vector.shape_cast %144 : vector<1x32x32xbf16> to vector<32x32xbf16>
    %cst_154 = arith.constant dense<0.000000e+00> : vector<80x32xf32>
    %146 = tpu.matmul %143, %145, %cst_154 {dimension_numbers = #tpu.dot_dimension_numbers<[1], [0], [0], [1], [0, 0, 1, 1], [], []>} : vector<80x32xbf16>, vector<32x32xbf16>, vector<80x32xf32> -> vector<80x32xf32>
    %c0_155 = arith.constant 0 : index
    %c0_156 = arith.constant 0 : index
    %147 = vector.load %arg14[%c0_155, %c0_156] : memref<80x32xf32, #tpu.memory_space<vmem>>, vector<80x32xf32>
    %148 = arith.addf %147, %146 : vector<80x32xf32>
    %c0_157 = arith.constant 0 : index
    %c0_158 = arith.constant 0 : index
    %149 = vector.load %arg14[%c0_157, %c0_158] : memref<80x32xf32, #tpu.memory_space<vmem>>, vector<80x32xf32>
    tpu.vector_store %arg14[%c0_157, %c0_158], %148 {strides = array<i32>} : memref<80x32xf32, #tpu.memory_space<vmem>>, vector<80x32xf32>,
    %c10 = arith.constant 10 : index
    %c0_159 = arith.constant 0 : index
    %150 = vector.load %arg13[%c10, %c0_159] : memref<102x32xf32, #tpu.memory_space<vmem>>, vector<80x32xf32>
    %151 = arith.truncf %150 : vector<80x32xf32> to vector<80x32xbf16>
    %c3_160 = arith.constant 3 : index
    %c0_161 = arith.constant 0 : index
    %c0_162 = arith.constant 0 : index
    %152 = vector.load %arg4[%c3_160, %c0_161, %c0_162] : memref<9x32x32xbf16, #tpu.memory_space<vmem>>, vector<1x32x32xbf16>
    %153 = vector.shape_cast %152 : vector<1x32x32xbf16> to vector<32x32xbf16>
    %cst_163 = arith.constant dense<0.000000e+00> : vector<80x32xf32>
    %154 = tpu.matmul %151, %153, %cst_163 {dimension_numbers = #tpu.dot_dimension_numbers<[1], [0], [0], [1], [0, 0, 1, 1], [], []>} : vector<80x32xbf16>, vector<32x32xbf16>, vector<80x32xf32> -> vector<80x32xf32>
    %c0_164 = arith.constant 0 : index
    %c0_165 = arith.constant 0 : index
    %155 = vector.load %arg14[%c0_164, %c0_165] : memref<80x32xf32, #tpu.memory_space<vmem>>, vector<80x32xf32>
    %156 = arith.addf %155, %154 : vector<80x32xf32>
    %c0_166 = arith.constant 0 : index
    %c0_167 = arith.constant 0 : index
    %157 = vector.load %arg14[%c0_166, %c0_167] : memref<80x32xf32, #tpu.memory_space<vmem>>, vector<80x32xf32>
    tpu.vector_store %arg14[%c0_166, %c0_167], %156 {strides = array<i32>} : memref<80x32xf32, #tpu.memory_space<vmem>>, vector<80x32xf32>,
    %c11_168 = arith.constant 11 : index
    %c0_169 = arith.constant 0 : index
    %158 = vector.load %arg13[%c11_168, %c0_169] : memref<102x32xf32, #tpu.memory_space<vmem>>, vector<80x32xf32>
    %159 = arith.truncf %158 : vector<80x32xf32> to vector<80x32xbf16>
    %c4_170 = arith.constant 4 : index
    %c0_171 = arith.constant 0 : index
    %c0_172 = arith.constant 0 : index
    %160 = vector.load %arg4[%c4_170, %c0_171, %c0_172] : memref<9x32x32xbf16, #tpu.memory_space<vmem>>, vector<1x32x32xbf16>
    %161 = vector.shape_cast %160 : vector<1x32x32xbf16> to vector<32x32xbf16>
    %cst_173 = arith.constant dense<0.000000e+00> : vector<80x32xf32>
    %162 = tpu.matmul %159, %161, %cst_173 {dimension_numbers = #tpu.dot_dimension_numbers<[1], [0], [0], [1], [0, 0, 1, 1], [], []>} : vector<80x32xbf16>, vector<32x32xbf16>, vector<80x32xf32> -> vector<80x32xf32>
    %c0_174 = arith.constant 0 : index
    %c0_175 = arith.constant 0 : index
    %163 = vector.load %arg14[%c0_174, %c0_175] : memref<80x32xf32, #tpu.memory_space<vmem>>, vector<80x32xf32>
    %164 = arith.addf %163, %162 : vector<80x32xf32>
    %c0_176 = arith.constant 0 : index
    %c0_177 = arith.constant 0 : index
    %165 = vector.load %arg14[%c0_176, %c0_177] : memref<80x32xf32, #tpu.memory_space<vmem>>, vector<80x32xf32>
    tpu.vector_store %arg14[%c0_176, %c0_177], %164 {strides = array<i32>} : memref<80x32xf32, #tpu.memory_space<vmem>>, vector<80x32xf32>,
    %c12 = arith.constant 12 : index
    %c0_178 = arith.constant 0 : index
    %166 = vector.load %arg13[%c12, %c0_178] : memref<102x32xf32, #tpu.memory_space<vmem>>, vector<80x32xf32>
    %167 = arith.truncf %166 : vector<80x32xf32> to vector<80x32xbf16>
    %c5_179 = arith.constant 5 : index
    %c0_180 = arith.constant 0 : index
    %c0_181 = arith.constant 0 : index
    %168 = vector.load %arg4[%c5_179, %c0_180, %c0_181] : memref<9x32x32xbf16, #tpu.memory_space<vmem>>, vector<1x32x32xbf16>
    %169 = vector.shape_cast %168 : vector<1x32x32xbf16> to vector<32x32xbf16>
    %cst_182 = arith.constant dense<0.000000e+00> : vector<80x32xf32>
    %170 = tpu.matmul %167, %169, %cst_182 {dimension_numbers = #tpu.dot_dimension_numbers<[1], [0], [0], [1], [0, 0, 1, 1], [], []>} : vector<80x32xbf16>, vector<32x32xbf16>, vector<80x32xf32> -> vector<80x32xf32>
    %c0_183 = arith.constant 0 : index
    %c0_184 = arith.constant 0 : index
    %171 = vector.load %arg14[%c0_183, %c0_184] : memref<80x32xf32, #tpu.memory_space<vmem>>, vector<80x32xf32>
    %172 = arith.addf %171, %170 : vector<80x32xf32>
    %c0_185 = arith.constant 0 : index
    %c0_186 = arith.constant 0 : index
    %173 = vector.load %arg14[%c0_185, %c0_186] : memref<80x32xf32, #tpu.memory_space<vmem>>, vector<80x32xf32>
    tpu.vector_store %arg14[%c0_185, %c0_186], %172 {strides = array<i32>} : memref<80x32xf32, #tpu.memory_space<vmem>>, vector<80x32xf32>,
    %c20_187 = arith.constant 20 : index
    %c0_188 = arith.constant 0 : index
    %174 = vector.load %arg13[%c20_187, %c0_188] : memref<102x32xf32, #tpu.memory_space<vmem>>, vector<80x32xf32>
    %175 = arith.truncf %174 : vector<80x32xf32> to vector<80x32xbf16>
    %c6_189 = arith.constant 6 : index
    %c0_190 = arith.constant 0 : index
    %c0_191 = arith.constant 0 : index
    %176 = vector.load %arg4[%c6_189, %c0_190, %c0_191] : memref<9x32x32xbf16, #tpu.memory_space<vmem>>, vector<1x32x32xbf16>
    %177 = vector.shape_cast %176 : vector<1x32x32xbf16> to vector<32x32xbf16>
    %cst_192 = arith.constant dense<0.000000e+00> : vector<80x32xf32>
    %178 = tpu.matmul %175, %177, %cst_192 {dimension_numbers = #tpu.dot_dimension_numbers<[1], [0], [0], [1], [0, 0, 1, 1], [], []>} : vector<80x32xbf16>, vector<32x32xbf16>, vector<80x32xf32> -> vector<80x32xf32>
    %c0_193 = arith.constant 0 : index
    %c0_194 = arith.constant 0 : index
    %179 = vector.load %arg14[%c0_193, %c0_194] : memref<80x32xf32, #tpu.memory_space<vmem>>, vector<80x32xf32>
    %180 = arith.addf %179, %178 : vector<80x32xf32>
    %c0_195 = arith.constant 0 : index
    %c0_196 = arith.constant 0 : index
    %181 = vector.load %arg14[%c0_195, %c0_196] : memref<80x32xf32, #tpu.memory_space<vmem>>, vector<80x32xf32>
    tpu.vector_store %arg14[%c0_195, %c0_196], %180 {strides = array<i32>} : memref<80x32xf32, #tpu.memory_space<vmem>>, vector<80x32xf32>,
    %c21_197 = arith.constant 21 : index
    %c0_198 = arith.constant 0 : index
    %182 = vector.load %arg13[%c21_197, %c0_198] : memref<102x32xf32, #tpu.memory_space<vmem>>, vector<80x32xf32>
    %183 = arith.truncf %182 : vector<80x32xf32> to vector<80x32xbf16>
    %c7_199 = arith.constant 7 : index
    %c0_200 = arith.constant 0 : index
    %c0_201 = arith.constant 0 : index
    %184 = vector.load %arg4[%c7_199, %c0_200, %c0_201] : memref<9x32x32xbf16, #tpu.memory_space<vmem>>, vector<1x32x32xbf16>
    %185 = vector.shape_cast %184 : vector<1x32x32xbf16> to vector<32x32xbf16>
    %cst_202 = arith.constant dense<0.000000e+00> : vector<80x32xf32>
    %186 = tpu.matmul %183, %185, %cst_202 {dimension_numbers = #tpu.dot_dimension_numbers<[1], [0], [0], [1], [0, 0, 1, 1], [], []>} : vector<80x32xbf16>, vector<32x32xbf16>, vector<80x32xf32> -> vector<80x32xf32>
    %c0_203 = arith.constant 0 : index
    %c0_204 = arith.constant 0 : index
    %187 = vector.load %arg14[%c0_203, %c0_204] : memref<80x32xf32, #tpu.memory_space<vmem>>, vector<80x32xf32>
    %188 = arith.addf %187, %186 : vector<80x32xf32>
    %c0_205 = arith.constant 0 : index
    %c0_206 = arith.constant 0 : index
    %189 = vector.load %arg14[%c0_205, %c0_206] : memref<80x32xf32, #tpu.memory_space<vmem>>, vector<80x32xf32>
    tpu.vector_store %arg14[%c0_205, %c0_206], %188 {strides = array<i32>} : memref<80x32xf32, #tpu.memory_space<vmem>>, vector<80x32xf32>,
    %c22 = arith.constant 22 : index
    %c0_207 = arith.constant 0 : index
    %190 = vector.load %arg13[%c22, %c0_207] : memref<102x32xf32, #tpu.memory_space<vmem>>, vector<80x32xf32>
    %191 = arith.truncf %190 : vector<80x32xf32> to vector<80x32xbf16>
    %c8_208 = arith.constant 8 : index
    %c0_209 = arith.constant 0 : index
    %c0_210 = arith.constant 0 : index
    %192 = vector.load %arg4[%c8_208, %c0_209, %c0_210] : memref<9x32x32xbf16, #tpu.memory_space<vmem>>, vector<1x32x32xbf16>
    %193 = vector.shape_cast %192 : vector<1x32x32xbf16> to vector<32x32xbf16>
    %cst_211 = arith.constant dense<0.000000e+00> : vector<80x32xf32>
    %194 = tpu.matmul %191, %193, %cst_211 {dimension_numbers = #tpu.dot_dimension_numbers<[1], [0], [0], [1], [0, 0, 1, 1], [], []>} : vector<80x32xbf16>, vector<32x32xbf16>, vector<80x32xf32> -> vector<80x32xf32>
    %c0_212 = arith.constant 0 : index
    %c0_213 = arith.constant 0 : index
    %195 = vector.load %arg14[%c0_212, %c0_213] : memref<80x32xf32, #tpu.memory_space<vmem>>, vector<80x32xf32>
    %196 = arith.addf %195, %194 : vector<80x32xf32>
    %c0_214 = arith.constant 0 : index
    %c0_215 = arith.constant 0 : index
    %197 = vector.load %arg14[%c0_214, %c0_215] : memref<80x32xf32, #tpu.memory_space<vmem>>, vector<80x32xf32>
    tpu.vector_store %arg14[%c0_214, %c0_215], %196 {strides = array<i32>} : memref<80x32xf32, #tpu.memory_space<vmem>>, vector<80x32xf32>,
    %c0_216 = arith.constant 0 : index
    %c0_217 = arith.constant 0 : index
    %198 = vector.load %arg14[%c0_216, %c0_217] : memref<80x32xf32, #tpu.memory_space<vmem>>, vector<80x32xf32>
    %c0_218 = arith.constant 0 : index
    %c0_219 = arith.constant 0 : index
    %199 = vector.load %arg5[%c0_218, %c0_219] : memref<1x32xf32, #tpu.memory_space<vmem>>, vector<1x32xf32>
    %200 = vector.broadcast %199 : vector<1x32xf32> to vector<80x32xf32>
    %201 = arith.addf %198, %200 : vector<80x32xf32>
    %cst_220 = arith.constant 0.000000e+00 : f32
    %202 = vector.broadcast %cst_220 : f32 to vector<80x32xf32>
    %203 = arith.maximumf %201, %202 : vector<80x32xf32>
    %c0_221 = arith.constant 0 : index
    %c0_222 = arith.constant 0 : index
    %204 = vector.load %arg14[%c0_221, %c0_222] : memref<80x32xf32, #tpu.memory_space<vmem>>, vector<80x32xf32>
    tpu.vector_store %arg14[%c0_221, %c0_222], %203 {strides = array<i32>} : memref<80x32xf32, #tpu.memory_space<vmem>>, vector<80x32xf32>,
    %c0_223 = arith.constant 0 : index
    %c0_224 = arith.constant 0 : index
    %205 = tpu.strided_load %arg14[%c0_223, %c0_224] {strides = array<i32: 2, 1>} : memref<80x32xf32, #tpu.memory_space<vmem>>, vector<40x32xf32>
    %c1_225 = arith.constant 1 : index
    %c0_226 = arith.constant 0 : index
    %206 = tpu.strided_load %arg14[%c1_225, %c0_226] {strides = array<i32: 2, 1>} : memref<80x32xf32, #tpu.memory_space<vmem>>, vector<40x32xf32>
    %207 = arith.maximumf %205, %206 : vector<40x32xf32>
    %c0_227 = arith.constant 0 : index
    %c0_228 = arith.constant 0 : index
    %208 = vector.load %arg15[%c0_227, %c0_228] : memref<40x32xf32, #tpu.memory_space<vmem>>, vector<40x32xf32>
    tpu.vector_store %arg15[%c0_227, %c0_228], %207 {strides = array<i32>} : memref<40x32xf32, #tpu.memory_space<vmem>>, vector<40x32xf32>,
    %c0_229 = arith.constant 0 : index
    %c0_230 = arith.constant 0 : index
    %209 = vector.load %arg15[%c0_229, %c0_230] : memref<40x32xf32, #tpu.memory_space<vmem>>, vector<4x32xf32>
    %c5_231 = arith.constant 5 : index
    %c0_232 = arith.constant 0 : index
    %210 = vector.load %arg15[%c5_231, %c0_232] : memref<40x32xf32, #tpu.memory_space<vmem>>, vector<4x32xf32>
    %211 = arith.maximumf %209, %210 : vector<4x32xf32>
    %c7_233 = arith.constant 7 : index
    %c0_234 = arith.constant 0 : index
    %212 = vector.load %arg16[%c7_233, %c0_234] : memref<38x32xf32, #tpu.memory_space<vmem>>, vector<4x32xf32>
    tpu.vector_store %arg16[%c7_233, %c0_234], %211 {strides = array<i32>} : memref<38x32xf32, #tpu.memory_space<vmem>>, vector<4x32xf32>,
    %c10_235 = arith.constant 10 : index
    %c0_236 = arith.constant 0 : index
    %213 = vector.load %arg15[%c10_235, %c0_236] : memref<40x32xf32, #tpu.memory_space<vmem>>, vector<4x32xf32>
    %c15 = arith.constant 15 : index
    %c0_237 = arith.constant 0 : index
    %214 = vector.load %arg15[%c15, %c0_237] : memref<40x32xf32, #tpu.memory_space<vmem>>, vector<4x32xf32>
    %215 = arith.maximumf %213, %214 : vector<4x32xf32>
    %c13 = arith.constant 13 : index
    %c0_238 = arith.constant 0 : index
    %216 = vector.load %arg16[%c13, %c0_238] : memref<38x32xf32, #tpu.memory_space<vmem>>, vector<4x32xf32>
    tpu.vector_store %arg16[%c13, %c0_238], %215 {strides = array<i32>} : memref<38x32xf32, #tpu.memory_space<vmem>>, vector<4x32xf32>,
    %c20_239 = arith.constant 20 : index
    %c0_240 = arith.constant 0 : index
    %217 = vector.load %arg15[%c20_239, %c0_240] : memref<40x32xf32, #tpu.memory_space<vmem>>, vector<4x32xf32>
    %c25 = arith.constant 25 : index
    %c0_241 = arith.constant 0 : index
    %218 = vector.load %arg15[%c25, %c0_241] : memref<40x32xf32, #tpu.memory_space<vmem>>, vector<4x32xf32>
    %219 = arith.maximumf %217, %218 : vector<4x32xf32>
    %c19_242 = arith.constant 19 : index
    %c0_243 = arith.constant 0 : index
    %220 = vector.load %arg16[%c19_242, %c0_243] : memref<38x32xf32, #tpu.memory_space<vmem>>, vector<4x32xf32>
    tpu.vector_store %arg16[%c19_242, %c0_243], %219 {strides = array<i32>} : memref<38x32xf32, #tpu.memory_space<vmem>>, vector<4x32xf32>,
    %c30 = arith.constant 30 : index
    %c0_244 = arith.constant 0 : index
    %221 = vector.load %arg15[%c30, %c0_244] : memref<40x32xf32, #tpu.memory_space<vmem>>, vector<4x32xf32>
    %c35 = arith.constant 35 : index
    %c0_245 = arith.constant 0 : index
    %222 = vector.load %arg15[%c35, %c0_245] : memref<40x32xf32, #tpu.memory_space<vmem>>, vector<4x32xf32>
    %223 = arith.maximumf %221, %222 : vector<4x32xf32>
    %c25_246 = arith.constant 25 : index
    %c0_247 = arith.constant 0 : index
    %224 = vector.load %arg16[%c25_246, %c0_247] : memref<38x32xf32, #tpu.memory_space<vmem>>, vector<4x32xf32>
    tpu.vector_store %arg16[%c25_246, %c0_247], %223 {strides = array<i32>} : memref<38x32xf32, #tpu.memory_space<vmem>>, vector<4x32xf32>,
    %c0_248 = arith.constant 0 : index
    %c0_249 = arith.constant 0 : index
    %225 = vector.load %arg16[%c0_248, %c0_249] : memref<38x32xf32, #tpu.memory_space<vmem>>, vector<24x32xf32>
    %226 = arith.truncf %225 : vector<24x32xf32> to vector<24x32xbf16>
    %c0_250 = arith.constant 0 : index
    %c0_251 = arith.constant 0 : index
    %c0_252 = arith.constant 0 : index
    %227 = vector.load %arg6[%c0_250, %c0_251, %c0_252] : memref<9x32x32xbf16, #tpu.memory_space<vmem>>, vector<1x32x32xbf16>
    %228 = vector.shape_cast %227 : vector<1x32x32xbf16> to vector<32x32xbf16>
    %cst_253 = arith.constant dense<0.000000e+00> : vector<24x32xf32>
    %229 = tpu.matmul %226, %228, %cst_253 {dimension_numbers = #tpu.dot_dimension_numbers<[1], [0], [0], [1], [0, 0, 1, 1], [], []>} : vector<24x32xbf16>, vector<32x32xbf16>, vector<24x32xf32> -> vector<24x32xf32>
    %c0_254 = arith.constant 0 : index
    %c0_255 = arith.constant 0 : index
    %230 = vector.load %arg17[%c0_254, %c0_255] : memref<24x32xf32, #tpu.memory_space<vmem>>, vector<24x32xf32>
    tpu.vector_store %arg17[%c0_254, %c0_255], %229 {strides = array<i32>} : memref<24x32xf32, #tpu.memory_space<vmem>>, vector<24x32xf32>,
    %c1_256 = arith.constant 1 : index
    %c0_257 = arith.constant 0 : index
    %231 = vector.load %arg16[%c1_256, %c0_257] : memref<38x32xf32, #tpu.memory_space<vmem>>, vector<24x32xf32>
    %232 = arith.truncf %231 : vector<24x32xf32> to vector<24x32xbf16>
    %c1_258 = arith.constant 1 : index
    %c0_259 = arith.constant 0 : index
    %c0_260 = arith.constant 0 : index
    %233 = vector.load %arg6[%c1_258, %c0_259, %c0_260] : memref<9x32x32xbf16, #tpu.memory_space<vmem>>, vector<1x32x32xbf16>
    %234 = vector.shape_cast %233 : vector<1x32x32xbf16> to vector<32x32xbf16>
    %cst_261 = arith.constant dense<0.000000e+00> : vector<24x32xf32>
    %235 = tpu.matmul %232, %234, %cst_261 {dimension_numbers = #tpu.dot_dimension_numbers<[1], [0], [0], [1], [0, 0, 1, 1], [], []>} : vector<24x32xbf16>, vector<32x32xbf16>, vector<24x32xf32> -> vector<24x32xf32>
    %c0_262 = arith.constant 0 : index
    %c0_263 = arith.constant 0 : index
    %236 = vector.load %arg17[%c0_262, %c0_263] : memref<24x32xf32, #tpu.memory_space<vmem>>, vector<24x32xf32>
    %237 = arith.addf %236, %235 : vector<24x32xf32>
    %c0_264 = arith.constant 0 : index
    %c0_265 = arith.constant 0 : index
    %238 = vector.load %arg17[%c0_264, %c0_265] : memref<24x32xf32, #tpu.memory_space<vmem>>, vector<24x32xf32>
    tpu.vector_store %arg17[%c0_264, %c0_265], %237 {strides = array<i32>} : memref<24x32xf32, #tpu.memory_space<vmem>>, vector<24x32xf32>,
    %c2_266 = arith.constant 2 : index
    %c0_267 = arith.constant 0 : index
    %239 = vector.load %arg16[%c2_266, %c0_267] : memref<38x32xf32, #tpu.memory_space<vmem>>, vector<24x32xf32>
    %240 = arith.truncf %239 : vector<24x32xf32> to vector<24x32xbf16>
    %c2_268 = arith.constant 2 : index
    %c0_269 = arith.constant 0 : index
    %c0_270 = arith.constant 0 : index
    %241 = vector.load %arg6[%c2_268, %c0_269, %c0_270] : memref<9x32x32xbf16, #tpu.memory_space<vmem>>, vector<1x32x32xbf16>
    %242 = vector.shape_cast %241 : vector<1x32x32xbf16> to vector<32x32xbf16>
    %cst_271 = arith.constant dense<0.000000e+00> : vector<24x32xf32>
    %243 = tpu.matmul %240, %242, %cst_271 {dimension_numbers = #tpu.dot_dimension_numbers<[1], [0], [0], [1], [0, 0, 1, 1], [], []>} : vector<24x32xbf16>, vector<32x32xbf16>, vector<24x32xf32> -> vector<24x32xf32>
    %c0_272 = arith.constant 0 : index
    %c0_273 = arith.constant 0 : index
    %244 = vector.load %arg17[%c0_272, %c0_273] : memref<24x32xf32, #tpu.memory_space<vmem>>, vector<24x32xf32>
    %245 = arith.addf %244, %243 : vector<24x32xf32>
    %c0_274 = arith.constant 0 : index
    %c0_275 = arith.constant 0 : index
    %246 = vector.load %arg17[%c0_274, %c0_275] : memref<24x32xf32, #tpu.memory_space<vmem>>, vector<24x32xf32>
    tpu.vector_store %arg17[%c0_274, %c0_275], %245 {strides = array<i32>} : memref<24x32xf32, #tpu.memory_space<vmem>>, vector<24x32xf32>,
    %c6_276 = arith.constant 6 : index
    %c0_277 = arith.constant 0 : index
    %247 = vector.load %arg16[%c6_276, %c0_277] : memref<38x32xf32, #tpu.memory_space<vmem>>, vector<24x32xf32>
    %248 = arith.truncf %247 : vector<24x32xf32> to vector<24x32xbf16>
    %c3_278 = arith.constant 3 : index
    %c0_279 = arith.constant 0 : index
    %c0_280 = arith.constant 0 : index
    %249 = vector.load %arg6[%c3_278, %c0_279, %c0_280] : memref<9x32x32xbf16, #tpu.memory_space<vmem>>, vector<1x32x32xbf16>
    %250 = vector.shape_cast %249 : vector<1x32x32xbf16> to vector<32x32xbf16>
    %cst_281 = arith.constant dense<0.000000e+00> : vector<24x32xf32>
    %251 = tpu.matmul %248, %250, %cst_281 {dimension_numbers = #tpu.dot_dimension_numbers<[1], [0], [0], [1], [0, 0, 1, 1], [], []>} : vector<24x32xbf16>, vector<32x32xbf16>, vector<24x32xf32> -> vector<24x32xf32>
    %c0_282 = arith.constant 0 : index
    %c0_283 = arith.constant 0 : index
    %252 = vector.load %arg17[%c0_282, %c0_283] : memref<24x32xf32, #tpu.memory_space<vmem>>, vector<24x32xf32>
    %253 = arith.addf %252, %251 : vector<24x32xf32>
    %c0_284 = arith.constant 0 : index
    %c0_285 = arith.constant 0 : index
    %254 = vector.load %arg17[%c0_284, %c0_285] : memref<24x32xf32, #tpu.memory_space<vmem>>, vector<24x32xf32>
    tpu.vector_store %arg17[%c0_284, %c0_285], %253 {strides = array<i32>} : memref<24x32xf32, #tpu.memory_space<vmem>>, vector<24x32xf32>,
    %c7_286 = arith.constant 7 : index
    %c0_287 = arith.constant 0 : index
    %255 = vector.load %arg16[%c7_286, %c0_287] : memref<38x32xf32, #tpu.memory_space<vmem>>, vector<24x32xf32>
    %256 = arith.truncf %255 : vector<24x32xf32> to vector<24x32xbf16>
    %c4_288 = arith.constant 4 : index
    %c0_289 = arith.constant 0 : index
    %c0_290 = arith.constant 0 : index
    %257 = vector.load %arg6[%c4_288, %c0_289, %c0_290] : memref<9x32x32xbf16, #tpu.memory_space<vmem>>, vector<1x32x32xbf16>
    %258 = vector.shape_cast %257 : vector<1x32x32xbf16> to vector<32x32xbf16>
    %cst_291 = arith.constant dense<0.000000e+00> : vector<24x32xf32>
    %259 = tpu.matmul %256, %258, %cst_291 {dimension_numbers = #tpu.dot_dimension_numbers<[1], [0], [0], [1], [0, 0, 1, 1], [], []>} : vector<24x32xbf16>, vector<32x32xbf16>, vector<24x32xf32> -> vector<24x32xf32>
    %c0_292 = arith.constant 0 : index
    %c0_293 = arith.constant 0 : index
    %260 = vector.load %arg17[%c0_292, %c0_293] : memref<24x32xf32, #tpu.memory_space<vmem>>, vector<24x32xf32>
    %261 = arith.addf %260, %259 : vector<24x32xf32>
    %c0_294 = arith.constant 0 : index
    %c0_295 = arith.constant 0 : index
    %262 = vector.load %arg17[%c0_294, %c0_295] : memref<24x32xf32, #tpu.memory_space<vmem>>, vector<24x32xf32>
    tpu.vector_store %arg17[%c0_294, %c0_295], %261 {strides = array<i32>} : memref<24x32xf32, #tpu.memory_space<vmem>>, vector<24x32xf32>,
    %c8_296 = arith.constant 8 : index
    %c0_297 = arith.constant 0 : index
    %263 = vector.load %arg16[%c8_296, %c0_297] : memref<38x32xf32, #tpu.memory_space<vmem>>, vector<24x32xf32>
    %264 = arith.truncf %263 : vector<24x32xf32> to vector<24x32xbf16>
    %c5_298 = arith.constant 5 : index
    %c0_299 = arith.constant 0 : index
    %c0_300 = arith.constant 0 : index
    %265 = vector.load %arg6[%c5_298, %c0_299, %c0_300] : memref<9x32x32xbf16, #tpu.memory_space<vmem>>, vector<1x32x32xbf16>
    %266 = vector.shape_cast %265 : vector<1x32x32xbf16> to vector<32x32xbf16>
    %cst_301 = arith.constant dense<0.000000e+00> : vector<24x32xf32>
    %267 = tpu.matmul %264, %266, %cst_301 {dimension_numbers = #tpu.dot_dimension_numbers<[1], [0], [0], [1], [0, 0, 1, 1], [], []>} : vector<24x32xbf16>, vector<32x32xbf16>, vector<24x32xf32> -> vector<24x32xf32>
    %c0_302 = arith.constant 0 : index
    %c0_303 = arith.constant 0 : index
    %268 = vector.load %arg17[%c0_302, %c0_303] : memref<24x32xf32, #tpu.memory_space<vmem>>, vector<24x32xf32>
    %269 = arith.addf %268, %267 : vector<24x32xf32>
    %c0_304 = arith.constant 0 : index
    %c0_305 = arith.constant 0 : index
    %270 = vector.load %arg17[%c0_304, %c0_305] : memref<24x32xf32, #tpu.memory_space<vmem>>, vector<24x32xf32>
    tpu.vector_store %arg17[%c0_304, %c0_305], %269 {strides = array<i32>} : memref<24x32xf32, #tpu.memory_space<vmem>>, vector<24x32xf32>,
    %c12_306 = arith.constant 12 : index
    %c0_307 = arith.constant 0 : index
    %271 = vector.load %arg16[%c12_306, %c0_307] : memref<38x32xf32, #tpu.memory_space<vmem>>, vector<24x32xf32>
    %272 = arith.truncf %271 : vector<24x32xf32> to vector<24x32xbf16>
    %c6_308 = arith.constant 6 : index
    %c0_309 = arith.constant 0 : index
    %c0_310 = arith.constant 0 : index
    %273 = vector.load %arg6[%c6_308, %c0_309, %c0_310] : memref<9x32x32xbf16, #tpu.memory_space<vmem>>, vector<1x32x32xbf16>
    %274 = vector.shape_cast %273 : vector<1x32x32xbf16> to vector<32x32xbf16>
    %cst_311 = arith.constant dense<0.000000e+00> : vector<24x32xf32>
    %275 = tpu.matmul %272, %274, %cst_311 {dimension_numbers = #tpu.dot_dimension_numbers<[1], [0], [0], [1], [0, 0, 1, 1], [], []>} : vector<24x32xbf16>, vector<32x32xbf16>, vector<24x32xf32> -> vector<24x32xf32>
    %c0_312 = arith.constant 0 : index
    %c0_313 = arith.constant 0 : index
    %276 = vector.load %arg17[%c0_312, %c0_313] : memref<24x32xf32, #tpu.memory_space<vmem>>, vector<24x32xf32>
    %277 = arith.addf %276, %275 : vector<24x32xf32>
    %c0_314 = arith.constant 0 : index
    %c0_315 = arith.constant 0 : index
    %278 = vector.load %arg17[%c0_314, %c0_315] : memref<24x32xf32, #tpu.memory_space<vmem>>, vector<24x32xf32>
    tpu.vector_store %arg17[%c0_314, %c0_315], %277 {strides = array<i32>} : memref<24x32xf32, #tpu.memory_space<vmem>>, vector<24x32xf32>,
    %c13_316 = arith.constant 13 : index
    %c0_317 = arith.constant 0 : index
    %279 = vector.load %arg16[%c13_316, %c0_317] : memref<38x32xf32, #tpu.memory_space<vmem>>, vector<24x32xf32>
    %280 = arith.truncf %279 : vector<24x32xf32> to vector<24x32xbf16>
    %c7_318 = arith.constant 7 : index
    %c0_319 = arith.constant 0 : index
    %c0_320 = arith.constant 0 : index
    %281 = vector.load %arg6[%c7_318, %c0_319, %c0_320] : memref<9x32x32xbf16, #tpu.memory_space<vmem>>, vector<1x32x32xbf16>
    %282 = vector.shape_cast %281 : vector<1x32x32xbf16> to vector<32x32xbf16>
    %cst_321 = arith.constant dense<0.000000e+00> : vector<24x32xf32>
    %283 = tpu.matmul %280, %282, %cst_321 {dimension_numbers = #tpu.dot_dimension_numbers<[1], [0], [0], [1], [0, 0, 1, 1], [], []>} : vector<24x32xbf16>, vector<32x32xbf16>, vector<24x32xf32> -> vector<24x32xf32>
    %c0_322 = arith.constant 0 : index
    %c0_323 = arith.constant 0 : index
    %284 = vector.load %arg17[%c0_322, %c0_323] : memref<24x32xf32, #tpu.memory_space<vmem>>, vector<24x32xf32>
    %285 = arith.addf %284, %283 : vector<24x32xf32>
    %c0_324 = arith.constant 0 : index
    %c0_325 = arith.constant 0 : index
    %286 = vector.load %arg17[%c0_324, %c0_325] : memref<24x32xf32, #tpu.memory_space<vmem>>, vector<24x32xf32>
    tpu.vector_store %arg17[%c0_324, %c0_325], %285 {strides = array<i32>} : memref<24x32xf32, #tpu.memory_space<vmem>>, vector<24x32xf32>,
    %c14 = arith.constant 14 : index
    %c0_326 = arith.constant 0 : index
    %287 = vector.load %arg16[%c14, %c0_326] : memref<38x32xf32, #tpu.memory_space<vmem>>, vector<24x32xf32>
    %288 = arith.truncf %287 : vector<24x32xf32> to vector<24x32xbf16>
    %c8_327 = arith.constant 8 : index
    %c0_328 = arith.constant 0 : index
    %c0_329 = arith.constant 0 : index
    %289 = vector.load %arg6[%c8_327, %c0_328, %c0_329] : memref<9x32x32xbf16, #tpu.memory_space<vmem>>, vector<1x32x32xbf16>
    %290 = vector.shape_cast %289 : vector<1x32x32xbf16> to vector<32x32xbf16>
    %cst_330 = arith.constant dense<0.000000e+00> : vector<24x32xf32>
    %291 = tpu.matmul %288, %290, %cst_330 {dimension_numbers = #tpu.dot_dimension_numbers<[1], [0], [0], [1], [0, 0, 1, 1], [], []>} : vector<24x32xbf16>, vector<32x32xbf16>, vector<24x32xf32> -> vector<24x32xf32>
    %c0_331 = arith.constant 0 : index
    %c0_332 = arith.constant 0 : index
    %292 = vector.load %arg17[%c0_331, %c0_332] : memref<24x32xf32, #tpu.memory_space<vmem>>, vector<24x32xf32>
    %293 = arith.addf %292, %291 : vector<24x32xf32>
    %c0_333 = arith.constant 0 : index
    %c0_334 = arith.constant 0 : index
    %294 = vector.load %arg17[%c0_333, %c0_334] : memref<24x32xf32, #tpu.memory_space<vmem>>, vector<24x32xf32>
    tpu.vector_store %arg17[%c0_333, %c0_334], %293 {strides = array<i32>} : memref<24x32xf32, #tpu.memory_space<vmem>>, vector<24x32xf32>,
    %c0_335 = arith.constant 0 : index
    %c0_336 = arith.constant 0 : index
    %295 = vector.load %arg17[%c0_335, %c0_336] : memref<24x32xf32, #tpu.memory_space<vmem>>, vector<24x32xf32>
    %c0_337 = arith.constant 0 : index
    %c0_338 = arith.constant 0 : index
    %296 = vector.load %arg7[%c0_337, %c0_338] : memref<1x32xf32, #tpu.memory_space<vmem>>, vector<1x32xf32>
    %297 = vector.broadcast %296 : vector<1x32xf32> to vector<24x32xf32>
    %298 = arith.addf %295, %297 : vector<24x32xf32>
    %cst_339 = arith.constant 0.000000e+00 : f32
    %299 = vector.broadcast %cst_339 : f32 to vector<24x32xf32>
    %300 = arith.maximumf %298, %299 : vector<24x32xf32>
    %c0_340 = arith.constant 0 : index
    %c0_341 = arith.constant 0 : index
    %301 = vector.load %arg17[%c0_340, %c0_341] : memref<24x32xf32, #tpu.memory_space<vmem>>, vector<24x32xf32>
    tpu.vector_store %arg17[%c0_340, %c0_341], %300 {strides = array<i32>} : memref<24x32xf32, #tpu.memory_space<vmem>>, vector<24x32xf32>,
    %c0_342 = arith.constant 0 : index
    %c0_343 = arith.constant 0 : index
    %302 = tpu.strided_load %arg17[%c0_342, %c0_343] {strides = array<i32: 2, 1>} : memref<24x32xf32, #tpu.memory_space<vmem>>, vector<12x32xf32>
    %c1_344 = arith.constant 1 : index
    %c0_345 = arith.constant 0 : index
    %303 = tpu.strided_load %arg17[%c1_344, %c0_345] {strides = array<i32: 2, 1>} : memref<24x32xf32, #tpu.memory_space<vmem>>, vector<12x32xf32>
    %304 = arith.maximumf %302, %303 : vector<12x32xf32>
    %c0_346 = arith.constant 0 : index
    %c0_347 = arith.constant 0 : index
    %305 = vector.load %arg18[%c0_346, %c0_347] : memref<12x32xf32, #tpu.memory_space<vmem>>, vector<12x32xf32>
    tpu.vector_store %arg18[%c0_346, %c0_347], %304 {strides = array<i32>} : memref<12x32xf32, #tpu.memory_space<vmem>>, vector<12x32xf32>,
    %c0_348 = arith.constant 0 : index
    %c0_349 = arith.constant 0 : index
    %306 = vector.load %arg18[%c0_348, %c0_349] : memref<12x32xf32, #tpu.memory_space<vmem>>, vector<2x32xf32>
    %c3_350 = arith.constant 3 : index
    %c0_351 = arith.constant 0 : index
    %307 = vector.load %arg18[%c3_350, %c0_351] : memref<12x32xf32, #tpu.memory_space<vmem>>, vector<2x32xf32>
    %308 = arith.maximumf %306, %307 : vector<2x32xf32>
    %c5_352 = arith.constant 5 : index
    %c0_353 = arith.constant 0 : index
    %309 = vector.load %arg19[%c5_352, %c0_353] : memref<18x32xf32, #tpu.memory_space<vmem>>, vector<2x32xf32>
    tpu.vector_store %arg19[%c5_352, %c0_353], %308 {strides = array<i32>} : memref<18x32xf32, #tpu.memory_space<vmem>>, vector<2x32xf32>,
    %c6_354 = arith.constant 6 : index
    %c0_355 = arith.constant 0 : index
    %310 = vector.load %arg18[%c6_354, %c0_355] : memref<12x32xf32, #tpu.memory_space<vmem>>, vector<2x32xf32>
    %c9_356 = arith.constant 9 : index
    %c0_357 = arith.constant 0 : index
    %311 = vector.load %arg18[%c9_356, %c0_357] : memref<12x32xf32, #tpu.memory_space<vmem>>, vector<2x32xf32>
    %312 = arith.maximumf %310, %311 : vector<2x32xf32>
    %c9_358 = arith.constant 9 : index
    %c0_359 = arith.constant 0 : index
    %313 = vector.load %arg19[%c9_358, %c0_359] : memref<18x32xf32, #tpu.memory_space<vmem>>, vector<2x32xf32>
    tpu.vector_store %arg19[%c9_358, %c0_359], %312 {strides = array<i32>} : memref<18x32xf32, #tpu.memory_space<vmem>>, vector<2x32xf32>,
    %c0_360 = arith.constant 0 : index
    %c0_361 = arith.constant 0 : index
    %314 = vector.load %arg19[%c0_360, %c0_361] : memref<18x32xf32, #tpu.memory_space<vmem>>, vector<8x32xf32>
    %315 = arith.truncf %314 : vector<8x32xf32> to vector<8x32xbf16>
    %c0_362 = arith.constant 0 : index
    %c0_363 = arith.constant 0 : index
    %c0_364 = arith.constant 0 : index
    %316 = vector.load %arg8[%c0_362, %c0_363, %c0_364] : memref<9x32x32xbf16, #tpu.memory_space<vmem>>, vector<1x32x32xbf16>
    %317 = vector.shape_cast %316 : vector<1x32x32xbf16> to vector<32x32xbf16>
    %cst_365 = arith.constant dense<0.000000e+00> : vector<8x32xf32>
    %318 = tpu.matmul %315, %317, %cst_365 {dimension_numbers = #tpu.dot_dimension_numbers<[1], [0], [0], [1], [0, 0, 1, 1], [], []>} : vector<8x32xbf16>, vector<32x32xbf16>, vector<8x32xf32> -> vector<8x32xf32>
    %c0_366 = arith.constant 0 : index
    %c0_367 = arith.constant 0 : index
    %319 = vector.load %arg20[%c0_366, %c0_367] : memref<8x32xf32, #tpu.memory_space<vmem>>, vector<8x32xf32>
    tpu.vector_store %arg20[%c0_366, %c0_367], %318 {strides = array<i32>} : memref<8x32xf32, #tpu.memory_space<vmem>>, vector<8x32xf32>,
    %c1_368 = arith.constant 1 : index
    %c0_369 = arith.constant 0 : index
    %320 = vector.load %arg19[%c1_368, %c0_369] : memref<18x32xf32, #tpu.memory_space<vmem>>, vector<8x32xf32>
    %321 = arith.truncf %320 : vector<8x32xf32> to vector<8x32xbf16>
    %c1_370 = arith.constant 1 : index
    %c0_371 = arith.constant 0 : index
    %c0_372 = arith.constant 0 : index
    %322 = vector.load %arg8[%c1_370, %c0_371, %c0_372] : memref<9x32x32xbf16, #tpu.memory_space<vmem>>, vector<1x32x32xbf16>
    %323 = vector.shape_cast %322 : vector<1x32x32xbf16> to vector<32x32xbf16>
    %cst_373 = arith.constant dense<0.000000e+00> : vector<8x32xf32>
    %324 = tpu.matmul %321, %323, %cst_373 {dimension_numbers = #tpu.dot_dimension_numbers<[1], [0], [0], [1], [0, 0, 1, 1], [], []>} : vector<8x32xbf16>, vector<32x32xbf16>, vector<8x32xf32> -> vector<8x32xf32>
    %c0_374 = arith.constant 0 : index
    %c0_375 = arith.constant 0 : index
    %325 = vector.load %arg20[%c0_374, %c0_375] : memref<8x32xf32, #tpu.memory_space<vmem>>, vector<8x32xf32>
    %326 = arith.addf %325, %324 : vector<8x32xf32>
    %c0_376 = arith.constant 0 : index
    %c0_377 = arith.constant 0 : index
    %327 = vector.load %arg20[%c0_376, %c0_377] : memref<8x32xf32, #tpu.memory_space<vmem>>, vector<8x32xf32>
    tpu.vector_store %arg20[%c0_376, %c0_377], %326 {strides = array<i32>} : memref<8x32xf32, #tpu.memory_space<vmem>>, vector<8x32xf32>,
    %c2_378 = arith.constant 2 : index
    %c0_379 = arith.constant 0 : index
    %328 = vector.load %arg19[%c2_378, %c0_379] : memref<18x32xf32, #tpu.memory_space<vmem>>, vector<8x32xf32>
    %329 = arith.truncf %328 : vector<8x32xf32> to vector<8x32xbf16>
    %c2_380 = arith.constant 2 : index
    %c0_381 = arith.constant 0 : index
    %c0_382 = arith.constant 0 : index
    %330 = vector.load %arg8[%c2_380, %c0_381, %c0_382] : memref<9x32x32xbf16, #tpu.memory_space<vmem>>, vector<1x32x32xbf16>
    %331 = vector.shape_cast %330 : vector<1x32x32xbf16> to vector<32x32xbf16>
    %cst_383 = arith.constant dense<0.000000e+00> : vector<8x32xf32>
    %332 = tpu.matmul %329, %331, %cst_383 {dimension_numbers = #tpu.dot_dimension_numbers<[1], [0], [0], [1], [0, 0, 1, 1], [], []>} : vector<8x32xbf16>, vector<32x32xbf16>, vector<8x32xf32> -> vector<8x32xf32>
    %c0_384 = arith.constant 0 : index
    %c0_385 = arith.constant 0 : index
    %333 = vector.load %arg20[%c0_384, %c0_385] : memref<8x32xf32, #tpu.memory_space<vmem>>, vector<8x32xf32>
    %334 = arith.addf %333, %332 : vector<8x32xf32>
    %c0_386 = arith.constant 0 : index
    %c0_387 = arith.constant 0 : index
    %335 = vector.load %arg20[%c0_386, %c0_387] : memref<8x32xf32, #tpu.memory_space<vmem>>, vector<8x32xf32>
    tpu.vector_store %arg20[%c0_386, %c0_387], %334 {strides = array<i32>} : memref<8x32xf32, #tpu.memory_space<vmem>>, vector<8x32xf32>,
    %c4_388 = arith.constant 4 : index
    %c0_389 = arith.constant 0 : index
    %336 = vector.load %arg19[%c4_388, %c0_389] : memref<18x32xf32, #tpu.memory_space<vmem>>, vector<8x32xf32>
    %337 = arith.truncf %336 : vector<8x32xf32> to vector<8x32xbf16>
    %c3_390 = arith.constant 3 : index
    %c0_391 = arith.constant 0 : index
    %c0_392 = arith.constant 0 : index
    %338 = vector.load %arg8[%c3_390, %c0_391, %c0_392] : memref<9x32x32xbf16, #tpu.memory_space<vmem>>, vector<1x32x32xbf16>
    %339 = vector.shape_cast %338 : vector<1x32x32xbf16> to vector<32x32xbf16>
    %cst_393 = arith.constant dense<0.000000e+00> : vector<8x32xf32>
    %340 = tpu.matmul %337, %339, %cst_393 {dimension_numbers = #tpu.dot_dimension_numbers<[1], [0], [0], [1], [0, 0, 1, 1], [], []>} : vector<8x32xbf16>, vector<32x32xbf16>, vector<8x32xf32> -> vector<8x32xf32>
    %c0_394 = arith.constant 0 : index
    %c0_395 = arith.constant 0 : index
    %341 = vector.load %arg20[%c0_394, %c0_395] : memref<8x32xf32, #tpu.memory_space<vmem>>, vector<8x32xf32>
    %342 = arith.addf %341, %340 : vector<8x32xf32>
    %c0_396 = arith.constant 0 : index
    %c0_397 = arith.constant 0 : index
    %343 = vector.load %arg20[%c0_396, %c0_397] : memref<8x32xf32, #tpu.memory_space<vmem>>, vector<8x32xf32>
    tpu.vector_store %arg20[%c0_396, %c0_397], %342 {strides = array<i32>} : memref<8x32xf32, #tpu.memory_space<vmem>>, vector<8x32xf32>,
    %c5_398 = arith.constant 5 : index
    %c0_399 = arith.constant 0 : index
    %344 = vector.load %arg19[%c5_398, %c0_399] : memref<18x32xf32, #tpu.memory_space<vmem>>, vector<8x32xf32>
    %345 = arith.truncf %344 : vector<8x32xf32> to vector<8x32xbf16>
    %c4_400 = arith.constant 4 : index
    %c0_401 = arith.constant 0 : index
    %c0_402 = arith.constant 0 : index
    %346 = vector.load %arg8[%c4_400, %c0_401, %c0_402] : memref<9x32x32xbf16, #tpu.memory_space<vmem>>, vector<1x32x32xbf16>
    %347 = vector.shape_cast %346 : vector<1x32x32xbf16> to vector<32x32xbf16>
    %cst_403 = arith.constant dense<0.000000e+00> : vector<8x32xf32>
    %348 = tpu.matmul %345, %347, %cst_403 {dimension_numbers = #tpu.dot_dimension_numbers<[1], [0], [0], [1], [0, 0, 1, 1], [], []>} : vector<8x32xbf16>, vector<32x32xbf16>, vector<8x32xf32> -> vector<8x32xf32>
    %c0_404 = arith.constant 0 : index
    %c0_405 = arith.constant 0 : index
    %349 = vector.load %arg20[%c0_404, %c0_405] : memref<8x32xf32, #tpu.memory_space<vmem>>, vector<8x32xf32>
    %350 = arith.addf %349, %348 : vector<8x32xf32>
    %c0_406 = arith.constant 0 : index
    %c0_407 = arith.constant 0 : index
    %351 = vector.load %arg20[%c0_406, %c0_407] : memref<8x32xf32, #tpu.memory_space<vmem>>, vector<8x32xf32>
    tpu.vector_store %arg20[%c0_406, %c0_407], %350 {strides = array<i32>} : memref<8x32xf32, #tpu.memory_space<vmem>>, vector<8x32xf32>,
    %c6_408 = arith.constant 6 : index
    %c0_409 = arith.constant 0 : index
    %352 = vector.load %arg19[%c6_408, %c0_409] : memref<18x32xf32, #tpu.memory_space<vmem>>, vector<8x32xf32>
    %353 = arith.truncf %352 : vector<8x32xf32> to vector<8x32xbf16>
    %c5_410 = arith.constant 5 : index
    %c0_411 = arith.constant 0 : index
    %c0_412 = arith.constant 0 : index
    %354 = vector.load %arg8[%c5_410, %c0_411, %c0_412] : memref<9x32x32xbf16, #tpu.memory_space<vmem>>, vector<1x32x32xbf16>
    %355 = vector.shape_cast %354 : vector<1x32x32xbf16> to vector<32x32xbf16>
    %cst_413 = arith.constant dense<0.000000e+00> : vector<8x32xf32>
    %356 = tpu.matmul %353, %355, %cst_413 {dimension_numbers = #tpu.dot_dimension_numbers<[1], [0], [0], [1], [0, 0, 1, 1], [], []>} : vector<8x32xbf16>, vector<32x32xbf16>, vector<8x32xf32> -> vector<8x32xf32>
    %c0_414 = arith.constant 0 : index
    %c0_415 = arith.constant 0 : index
    %357 = vector.load %arg20[%c0_414, %c0_415] : memref<8x32xf32, #tpu.memory_space<vmem>>, vector<8x32xf32>
    %358 = arith.addf %357, %356 : vector<8x32xf32>
    %c0_416 = arith.constant 0 : index
    %c0_417 = arith.constant 0 : index
    %359 = vector.load %arg20[%c0_416, %c0_417] : memref<8x32xf32, #tpu.memory_space<vmem>>, vector<8x32xf32>
    tpu.vector_store %arg20[%c0_416, %c0_417], %358 {strides = array<i32>} : memref<8x32xf32, #tpu.memory_space<vmem>>, vector<8x32xf32>,
    %c8_418 = arith.constant 8 : index
    %c0_419 = arith.constant 0 : index
    %360 = vector.load %arg19[%c8_418, %c0_419] : memref<18x32xf32, #tpu.memory_space<vmem>>, vector<8x32xf32>
    %361 = arith.truncf %360 : vector<8x32xf32> to vector<8x32xbf16>
    %c6_420 = arith.constant 6 : index
    %c0_421 = arith.constant 0 : index
    %c0_422 = arith.constant 0 : index
    %362 = vector.load %arg8[%c6_420, %c0_421, %c0_422] : memref<9x32x32xbf16, #tpu.memory_space<vmem>>, vector<1x32x32xbf16>
    %363 = vector.shape_cast %362 : vector<1x32x32xbf16> to vector<32x32xbf16>
    %cst_423 = arith.constant dense<0.000000e+00> : vector<8x32xf32>
    %364 = tpu.matmul %361, %363, %cst_423 {dimension_numbers = #tpu.dot_dimension_numbers<[1], [0], [0], [1], [0, 0, 1, 1], [], []>} : vector<8x32xbf16>, vector<32x32xbf16>, vector<8x32xf32> -> vector<8x32xf32>
    %c0_424 = arith.constant 0 : index
    %c0_425 = arith.constant 0 : index
    %365 = vector.load %arg20[%c0_424, %c0_425] : memref<8x32xf32, #tpu.memory_space<vmem>>, vector<8x32xf32>
    %366 = arith.addf %365, %364 : vector<8x32xf32>
    %c0_426 = arith.constant 0 : index
    %c0_427 = arith.constant 0 : index
    %367 = vector.load %arg20[%c0_426, %c0_427] : memref<8x32xf32, #tpu.memory_space<vmem>>, vector<8x32xf32>
    tpu.vector_store %arg20[%c0_426, %c0_427], %366 {strides = array<i32>} : memref<8x32xf32, #tpu.memory_space<vmem>>, vector<8x32xf32>,
    %c9_428 = arith.constant 9 : index
    %c0_429 = arith.constant 0 : index
    %368 = vector.load %arg19[%c9_428, %c0_429] : memref<18x32xf32, #tpu.memory_space<vmem>>, vector<8x32xf32>
    %369 = arith.truncf %368 : vector<8x32xf32> to vector<8x32xbf16>
    %c7_430 = arith.constant 7 : index
    %c0_431 = arith.constant 0 : index
    %c0_432 = arith.constant 0 : index
    %370 = vector.load %arg8[%c7_430, %c0_431, %c0_432] : memref<9x32x32xbf16, #tpu.memory_space<vmem>>, vector<1x32x32xbf16>
    %371 = vector.shape_cast %370 : vector<1x32x32xbf16> to vector<32x32xbf16>
    %cst_433 = arith.constant dense<0.000000e+00> : vector<8x32xf32>
    %372 = tpu.matmul %369, %371, %cst_433 {dimension_numbers = #tpu.dot_dimension_numbers<[1], [0], [0], [1], [0, 0, 1, 1], [], []>} : vector<8x32xbf16>, vector<32x32xbf16>, vector<8x32xf32> -> vector<8x32xf32>
    %c0_434 = arith.constant 0 : index
    %c0_435 = arith.constant 0 : index
    %373 = vector.load %arg20[%c0_434, %c0_435] : memref<8x32xf32, #tpu.memory_space<vmem>>, vector<8x32xf32>
    %374 = arith.addf %373, %372 : vector<8x32xf32>
    %c0_436 = arith.constant 0 : index
    %c0_437 = arith.constant 0 : index
    %375 = vector.load %arg20[%c0_436, %c0_437] : memref<8x32xf32, #tpu.memory_space<vmem>>, vector<8x32xf32>
    tpu.vector_store %arg20[%c0_436, %c0_437], %374 {strides = array<i32>} : memref<8x32xf32, #tpu.memory_space<vmem>>, vector<8x32xf32>,
    %c10_438 = arith.constant 10 : index
    %c0_439 = arith.constant 0 : index
    %376 = vector.load %arg19[%c10_438, %c0_439] : memref<18x32xf32, #tpu.memory_space<vmem>>, vector<8x32xf32>
    %377 = arith.truncf %376 : vector<8x32xf32> to vector<8x32xbf16>
    %c8_440 = arith.constant 8 : index
    %c0_441 = arith.constant 0 : index
    %c0_442 = arith.constant 0 : index
    %378 = vector.load %arg8[%c8_440, %c0_441, %c0_442] : memref<9x32x32xbf16, #tpu.memory_space<vmem>>, vector<1x32x32xbf16>
    %379 = vector.shape_cast %378 : vector<1x32x32xbf16> to vector<32x32xbf16>
    %cst_443 = arith.constant dense<0.000000e+00> : vector<8x32xf32>
    %380 = tpu.matmul %377, %379, %cst_443 {dimension_numbers = #tpu.dot_dimension_numbers<[1], [0], [0], [1], [0, 0, 1, 1], [], []>} : vector<8x32xbf16>, vector<32x32xbf16>, vector<8x32xf32> -> vector<8x32xf32>
    %c0_444 = arith.constant 0 : index
    %c0_445 = arith.constant 0 : index
    %381 = vector.load %arg20[%c0_444, %c0_445] : memref<8x32xf32, #tpu.memory_space<vmem>>, vector<8x32xf32>
    %382 = arith.addf %381, %380 : vector<8x32xf32>
    %c0_446 = arith.constant 0 : index
    %c0_447 = arith.constant 0 : index
    %383 = vector.load %arg20[%c0_446, %c0_447] : memref<8x32xf32, #tpu.memory_space<vmem>>, vector<8x32xf32>
    tpu.vector_store %arg20[%c0_446, %c0_447], %382 {strides = array<i32>} : memref<8x32xf32, #tpu.memory_space<vmem>>, vector<8x32xf32>,
    %c0_448 = arith.constant 0 : index
    %c0_449 = arith.constant 0 : index
    %384 = vector.load %arg20[%c0_448, %c0_449] : memref<8x32xf32, #tpu.memory_space<vmem>>, vector<8x32xf32>
    %c0_450 = arith.constant 0 : index
    %c0_451 = arith.constant 0 : index
    %385 = vector.load %arg9[%c0_450, %c0_451] : memref<1x32xf32, #tpu.memory_space<vmem>>, vector<1x32xf32>
    %386 = vector.broadcast %385 : vector<1x32xf32> to vector<8x32xf32>
    %387 = arith.addf %384, %386 : vector<8x32xf32>
    %cst_452 = arith.constant 0.000000e+00 : f32
    %388 = vector.broadcast %cst_452 : f32 to vector<8x32xf32>
    %389 = arith.maximumf %387, %388 : vector<8x32xf32>
    %c0_453 = arith.constant 0 : index
    %c0_454 = arith.constant 0 : index
    %390 = vector.load %arg20[%c0_453, %c0_454] : memref<8x32xf32, #tpu.memory_space<vmem>>, vector<8x32xf32>
    tpu.vector_store %arg20[%c0_453, %c0_454], %389 {strides = array<i32>} : memref<8x32xf32, #tpu.memory_space<vmem>>, vector<8x32xf32>,
    %c0_455 = arith.constant 0 : index
    %c0_456 = arith.constant 0 : index
    %391 = tpu.strided_load %arg20[%c0_455, %c0_456] {strides = array<i32: 2, 1>} : memref<8x32xf32, #tpu.memory_space<vmem>>, vector<4x32xf32>
    %c1_457 = arith.constant 1 : index
    %c0_458 = arith.constant 0 : index
    %392 = tpu.strided_load %arg20[%c1_457, %c0_458] {strides = array<i32: 2, 1>} : memref<8x32xf32, #tpu.memory_space<vmem>>, vector<4x32xf32>
    %393 = arith.maximumf %391, %392 : vector<4x32xf32>
    %c0_459 = arith.constant 0 : index
    %c0_460 = arith.constant 0 : index
    %394 = vector.load %arg21[%c0_459, %c0_460] : memref<4x32xf32, #tpu.memory_space<vmem>>, vector<4x32xf32>
    tpu.vector_store %arg21[%c0_459, %c0_460], %393 {strides = array<i32>} : memref<4x32xf32, #tpu.memory_space<vmem>>, vector<4x32xf32>,
    %c0_461 = arith.constant 0 : index
    %c0_462 = arith.constant 0 : index
    %395 = vector.load %arg21[%c0_461, %c0_462] : memref<4x32xf32, #tpu.memory_space<vmem>>, vector<1x32xf32>
    %c2_463 = arith.constant 2 : index
    %c0_464 = arith.constant 0 : index
    %396 = vector.load %arg21[%c2_463, %c0_464] : memref<4x32xf32, #tpu.memory_space<vmem>>, vector<1x32xf32>
    %397 = arith.maximumf %395, %396 : vector<1x32xf32>
    %c0_465 = arith.constant 0 : index
    %c0_466 = arith.constant 0 : index
    %c0_467 = arith.constant 0 : index
    %c0_468 = arith.constant 0 : index
    %398 = vector.load %arg10[%c0_465, %c0_466, %c0_467, %c0_468] : memref<1x1x1x32xf32, #tpu.memory_space<vmem>>, vector<1x1x1x32xf32>
    %399 = vector.shape_cast %398 : vector<1x1x1x32xf32> to vector<1x32xf32>
    %400 = vector.shape_cast %397 : vector<1x32xf32> to vector<1x1x1x32xf32>
    tpu.vector_store %arg10[%c0_465, %c0_466, %c0_467, %c0_468], %400 {strides = array<i32>} : memref<1x1x1x32xf32, #tpu.memory_space<vmem>>, vector<1x1x1x32xf32>,
    return
  }
  func.func @transform_0(%arg0: i32) -> (i32, i32, i32) {
    %c0_i32 = arith.constant 0 : i32
    %c0_i32_0 = arith.constant 0 : i32
    %c0_i32_1 = arith.constant 0 : i32
    return %arg0, %c0_i32, %c0_i32_0 : i32, i32, i32
  }
  func.func @transform_1(%arg0: i32) -> (i32, i32, i32) {
    %c0_i32 = arith.constant 0 : i32
    %c0_i32_0 = arith.constant 0 : i32
    %c0_i32_1 = arith.constant 0 : i32
    %c0_i32_2 = arith.constant 0 : i32
    return %c0_i32, %c0_i32_0, %c0_i32_1 : i32, i32, i32
  }
  func.func @transform_2(%arg0: i32) -> (i32, i32) {
    %c0_i32 = arith.constant 0 : i32
    %c0_i32_0 = arith.constant 0 : i32
    %c0_i32_1 = arith.constant 0 : i32
    return %c0_i32, %c0_i32_0 : i32, i32
  }
  func.func @transform_3(%arg0: i32) -> (i32, i32, i32) {
    %c0_i32 = arith.constant 0 : i32
    %c0_i32_0 = arith.constant 0 : i32
    %c0_i32_1 = arith.constant 0 : i32
    %c0_i32_2 = arith.constant 0 : i32
    return %c0_i32, %c0_i32_0, %c0_i32_1 : i32, i32, i32
  }
  func.func @transform_4(%arg0: i32) -> (i32, i32) {
    %c0_i32 = arith.constant 0 : i32
    %c0_i32_0 = arith.constant 0 : i32
    %c0_i32_1 = arith.constant 0 : i32
    return %c0_i32, %c0_i32_0 : i32, i32
  }
  func.func @transform_5(%arg0: i32) -> (i32, i32, i32) {
    %c0_i32 = arith.constant 0 : i32
    %c0_i32_0 = arith.constant 0 : i32
    %c0_i32_1 = arith.constant 0 : i32
    %c0_i32_2 = arith.constant 0 : i32
    return %c0_i32, %c0_i32_0, %c0_i32_1 : i32, i32, i32
  }
  func.func @transform_6(%arg0: i32) -> (i32, i32) {
    %c0_i32 = arith.constant 0 : i32
    %c0_i32_0 = arith.constant 0 : i32
    %c0_i32_1 = arith.constant 0 : i32
    return %c0_i32, %c0_i32_0 : i32, i32
  }
  func.func @transform_7(%arg0: i32) -> (i32, i32, i32) {
    %c0_i32 = arith.constant 0 : i32
    %c0_i32_0 = arith.constant 0 : i32
    %c0_i32_1 = arith.constant 0 : i32
    %c0_i32_2 = arith.constant 0 : i32
    return %c0_i32, %c0_i32_0, %c0_i32_1 : i32, i32, i32
  }
  func.func @transform_8(%arg0: i32) -> (i32, i32) {
    %c0_i32 = arith.constant 0 : i32
    %c0_i32_0 = arith.constant 0 : i32
    %c0_i32_1 = arith.constant 0 : i32
    return %c0_i32, %c0_i32_0 : i32, i32
  }
  func.func @transform_9(%arg0: i32) -> (i32, i32, i32, i32) {
    %c0_i32 = arith.constant 0 : i32
    %c0_i32_0 = arith.constant 0 : i32
    %c0_i32_1 = arith.constant 0 : i32
    %c0_i32_2 = arith.constant 0 : i32
    return %arg0, %c0_i32, %c0_i32_0, %c0_i32_1 : i32, i32, i32, i32
  }
}

</mosaic_0001>

<bundles_post_ra>
// kernel: baseline_train_forward.1
= control target key start
LH: loop header
LB: loop body
LE: loop exit
PB: predicated region body
PF: predicated region fallthrough
CT: control target
= control target key end

     0   :  { %s8560_s30 = smov 0   ;;  %s10339_s0 = inlined_call_operand.vmem [shape: f32[2,326,8], index: 0, kind: input, shape index: {}]   ;;  %s10340_s1 = inlined_call_operand.vmem [shape: bf16[9,8,32], index: 1, kind: input, shape index: {}]   ;;  %s10341_s2 = inlined_call_operand.vmem [shape: f32[1,32], index: 2, kind: input, shape index: {}]   ;;  %s10342_s3 = inlined_call_operand.vmem [shape: bf16[9,32,32], index: 3, kind: input, shape index: {}]   ;;  %s10343_s4 = inlined_call_operand.vmem [shape: f32[1,32], index: 4, kind: input, shape index: {}]   ;;  %s10344_s5 = inlined_call_operand.vmem [shape: bf16[9,32,32], index: 5, kind: input, shape index: {}]   ;;  %s10345_s6 = inlined_call_operand.vmem [shape: f32[1,32], index: 6, kind: input, shape index: {}]   ;;  %s10346_s7 = inlined_call_operand.vmem [shape: bf16[9,32,32], index: 7, kind: input, shape index: {}]   ;;  %s10347_s8 = inlined_call_operand.vmem [shape: f32[1,32], index: 8, kind: input, shape index: {}]   ;;  %s10348_s9 = inlined_call_operand.vmem [shape: f32[2,1,1,32], index: 9, kind: output, shape index: {}]  }
   0x1 LB: > { %s7023_s10 = sadd.s32 4294967295, %s8506_s30   ;;  %p7027_p0 = scmp.ge.s32.totalorder %s8506_s30, 1  ;;  %s8506_s30 = sphi %s8560_s30, %s19_s30  }
   0x2   : > { %p287_p1 = scmp.lt.s32.totalorder %s8506_s30, 3 }
   0x4   : > { %p288_p2 = pnand %p7027_p0, %p287_p1 }
   0x5   : > { %p321_p3 = scmp.lt.s32.totalorder (!%p288_p2), %s7023_s10, 1 }
   0x6   : > { %291 = sbr.rel (%p288_p2) target bundleno = 1636 (0x664), region = 56 }
   0xb   : > { %v408_v0 = vld [vmem:[%s10340_s1] sm:$0xf]  ;;  %vm464_vm0 = vcmask 1043456   ;;  %v7066_v2 = vld [vmem:[%s10340_s1 + $0x8] sm:$0xf]  ;;  %s10350_s10 = smov (!%p321_p3, %s7023_s10), 1 }
   0xc   : > { %8426 = vmatprep.subr.msk.bf16.mxu0 %vm464_vm0, %v408_v0  ;;  %v466_v1 = vsel %vm464_vm0, %v408_v0, 0  ;;  %v7047_v3 = vld [vmem:[%s10340_s1 + $0x4] sm:$0xf]  ;;  %v7085_v5 = vld [vmem:[%s10340_s1 + $0xc] sm:$0xf]  ;;  %s8435_s19 = smul.u32 328, %s10350_s10  ;;  %s328_s18 = scalar_lea.vmem %s10348_s9, %s10350_s10 }
   0xd   : > { %7725 = vmatpush3.bf16.msra.mxu0 %v466_v1  ;;  %8427 = vmatprep.subr.msk.bf16.mxu1 %vm464_vm0, %v7047_v3  ;;  %v792_v4 = vsel %vm464_vm0, %v7047_v3, 0  ;;  %vm409_vm1 = vcmask 64512   ;;  %v1190_v14 = vsel %vm464_vm0, %v7066_v2, 0  ;;  %v8609_v21 = vld [vmem:[%s10340_s1 + $0x10] sm:$0xf]  ;;  %v1588_v27 = vsel %vm464_vm0, %v7085_v5, 0 }
   0xe   : > { %8428 = vmatprep.subr.msk.bf16.mxu0 %vm464_vm0, %v7066_v2  ;;  %7763 = vmatpush3.bf16.msra.mxu1 %v792_v4  ;;  %s8592_s22 = scalar_lea.vmem %s10339_s0, %s8435_s19  ;;  %vm330_vm2 = vcmask 261120   ;;  %vm8509_vm3 = vmmov 0   ;;  %vm343_vm4 = vcmask 259072   ;;  %vm5563_vm5 = vcmask 257024  }
   0xf   : > { %8429 = vmatprep.subr.msk.bf16.mxu1 %vm464_vm0, %v7085_v5  ;;  %v354_v6 = vld [vmem:[%s8592_s22] sm:$0xff]  ;;  %v355_v7 = vld [vmem:[%s8592_s22 + $0x8] sm:$0xff]  ;;  %v356_v8 = vld [vmem:[%s8592_s22 + $0x10] sm:$0xff]  ;;  %vm352_vm6 = vcmask 254976   ;;  %vm6974_vm7 = vcmask 253952  }
  0x10   : > { %v390_v9 = vpack.c.bf16 %v355_v7, %v354_v6  ;;  %v357_v10 = vld [vmem:[%s8592_s22 + $0x18] sm:$0xff]  ;;  %v358_v11 = vld [vmem:[%s8592_s22 + $0x20] sm:$0xff]  ;;  %v359_v12 = vld [vmem:[%s8592_s22 + $0x28] sm:$0xff] }
  0x11   : > { %v391_v13 = vpack.c.bf16 %v357_v10, %v356_v8  ;;  %v392_v15 = vpack.c.bf16 %v359_v12, %v358_v11  ;;  %v681_v16 = vld [vmem:[%s8592_s22 + $0x1] sm:$0xff]  ;;  %v682_v17 = vld [vmem:[%s8592_s22 + $0x9] sm:$0xff]  ;;  %v683_v19 = vld [vmem:[%s8592_s22 + $0x11] sm:$0xff] }
  0x12   : > { %7726 = vmatprep.mubr.msk.bf16.mxu0 %vm409_vm1, %v390_v9  ;;  %v717_v18 = vpack.c.bf16 %v682_v17, %v681_v16  ;;  %v684_v20 = vld [vmem:[%s8592_s22 + $0x19] sm:$0xff]  ;;  %v685_v23 = vld [vmem:[%s8592_s22 + $0x21] sm:$0xff]  ;;  %v360_v24 = vld [vmem:[%s8592_s22 + $0x30] sm:$0xff] }
  0x13   : > { %7727 = vmatmul.mubr.msk.bf16.vlgmr.msra.gmra.mxu0 %vm409_vm1, %v391_v13  ;;  %v718_v22 = vpack.c.bf16 %v684_v20, %v683_v19  ;;  %v361_v25 = vld [vmem:[%s8592_s22 + $0x38] sm:$0xff]  ;;  %v686_v26 = vld [vmem:[%s8592_s22 + $0x29] sm:$0xff]  ;;  %v362_v28 = vld [vmem:[%s8592_s22 + $0x40] sm:$0xff] }
  0x14   : > { %7801 = vmatpush3.bf16.msra.mxu0 %v1190_v14  ;;  %7730 = vmatprep.mubr.msk.bf16.mxu0 %vm409_vm1, %v392_v15  ;;  %v363_v29 = vld [vmem:[%s8592_s22 + $0x48] sm:$0xff]  ;;  %v719_v30 = vpack.c.bf16 %v686_v26, %v685_v23  ;;  %v393_v31 = vpack.c.bf16 %v361_v25, %v360_v24  ;;  %v687_v32 = vld [vmem:[%s8592_s22 + $0x31] sm:$0xff]  ;;  %v688_v33 = vld [vmem:[%s8592_s22 + $0x39] sm:$0xff] }
  0x15   : > { %7764 = vmatprep.mubr.msk.bf16.mxu1 %vm409_vm1, %v717_v18  ;;  %8430 = vmatprep.subr.msk.bf16.mxu0 %vm464_vm0, %v8609_v21  ;;  %v394_v34 = vpack.c.bf16 %v363_v29, %v362_v28  ;;  %v689_v35 = vld [vmem:[%s8592_s22 + $0x41] sm:$0xff]  ;;  %v690_v36 = vld [vmem:[%s8592_s22 + $0x49] sm:$0xff]  ;;  %v720_v37 = vpack.c.bf16 %v688_v33, %v687_v32  ;;  %v365_v40 = vld [vmem:[%s8592_s22 + $0x58] sm:$0xff] }
  0x16   : > { %7765 = vmatmul.mubr.msk.bf16.vlgmr.msra.gmra.mxu1 %vm409_vm1, %v718_v22  ;;  %v721_v38 = vpack.c.bf16 %v690_v36, %v689_v35  ;;  %v364_v39 = vld [vmem:[%s8592_s22 + $0x50] sm:$0xff]  ;;  %v366_v41 = vld [vmem:[%s8592_s22 + $0x60] sm:$0xff]  ;;  %v367_v42 = vld [vmem:[%s8592_s22 + $0x68] sm:$0xff] }
  0x17   : > { %7768 = vmatprep.mubr.msk.bf16.mxu1 %vm409_vm1, %v719_v30  ;;  %7839 = vmatpush3.bf16.msra.mxu1 %v1588_v27  ;;  %v395_v43 = vpack.c.bf16 %v365_v40, %v364_v39  ;;  %v691_v44 = vld [vmem:[%s8592_s22 + $0x51] sm:$0xff]  ;;  %v692_v45 = vld [vmem:[%s8592_s22 + $0x59] sm:$0xff]  ;;  %v396_v46 = vpack.c.bf16 %v367_v42, %v366_v41  ;;  %v693_v47 = vld [vmem:[%s8592_s22 + $0x61] sm:$0xff] }
  0x18   : > { %v694_v48 = vld [vmem:[%s8592_s22 + $0x69] sm:$0xff]  ;;  %v722_v49 = vpack.c.bf16 %v692_v45, %v691_v44  ;;  %v369_v52 = vld [vmem:[%s8592_s22 + $0x78] sm:$0xff]  ;;  %v370_v53 = vld [vmem:[%s8592_s22 + $0x80] sm:$0xff] }
  0x19   : > { %v723_v50 = vpack.c.bf16 %v694_v48, %v693_v47  ;;  %v368_v51 = vld [vmem:[%s8592_s22 + $0x70] sm:$0xff]  ;;  %v371_v54 = vld [vmem:[%s8592_s22 + $0x88] sm:$0xff]  ;;  %v696_v57 = vld [vmem:[%s8592_s22 + $0x79] sm:$0xff] }
  0x1a   : > { %v397_v55 = vpack.c.bf16 %v369_v52, %v368_v51  ;;  %v695_v56 = vld [vmem:[%s8592_s22 + $0x71] sm:$0xff]  ;;  %v398_v58 = vpack.c.bf16 %v371_v54, %v370_v53  ;;  %v697_v59 = vld [vmem:[%s8592_s22 + $0x81] sm:$0xff]  ;;  %v698_v60 = vld [vmem:[%s8592_s22 + $0x89] sm:$0xff] }
  0x1b   : > { %7731 = vmatmul.mubr.msk.bf16.gmra.mxu0 %vm409_vm1, %v393_v31  ;;  %v724_v61 = vpack.c.bf16 %v696_v57, %v695_v56  ;;  %v725_v62 = vpack.c.bf16 %v698_v60, %v697_v59  ;;  %v372_v63 = vld [vmem:[%s8592_s22 + $0x90] sm:$0xff]  ;;  %v373_v0 = vld [vmem:[%s8592_s22 + $0x98] sm:$0xff]  ;;  %v374_v1 = vld [vmem:[%s8592_s22 + $0xa0] sm:$0xff] }
  0x1c   : > { %7734 = vmatprep.mubr.msk.bf16.mxu0 %vm409_vm1, %v394_v34  ;;  %v375_v2 = vld [vmem:[%s8592_s22 + $0xa8] sm:$0xff]  ;;  %v399_v3 = vpack.c.bf16 %v373_v0, %v372_v63  ;;  %v699_v4 = vld [vmem:[%s8592_s22 + $0x91] sm:$0xff]  ;;  %v700_v5 = vld [vmem:[%s8592_s22 + $0x99] sm:$0xff]  ;;  %v1986_v0 = vsel %vm464_vm0, %v8609_v21, 0 }
  0x1d   : > { %v400_v6 = vpack.c.bf16 %v375_v2, %v374_v1  ;;  %v701_v7 = vld [vmem:[%s8592_s22 + $0xa1] sm:$0xff]  ;;  %v702_v8 = vld [vmem:[%s8592_s22 + $0xa9] sm:$0xff]  ;;  %v8668_v9 = vld [vmem:[%s10340_s1 + $0x14] sm:$0xf]  ;;  %v726_v10 = vpack.c.bf16 %v700_v5, %v699_v4 }
  0x1e   : > { %7769 = vmatmul.mubr.msk.bf16.gmra.mxu1 %vm409_vm1, %v720_v37  ;;  %8431 = vmatprep.subr.msk.bf16.mxu1 %vm464_vm0, %v8668_v9  ;;  %v727_v11 = vpack.c.bf16 %v702_v8, %v701_v7  ;;  %v376_v12 = vld [vmem:[%s8592_s22 + $0xb0] sm:$0xff]  ;;  %v377_v13 = vld [vmem:[%s8592_s22 + $0xb8] sm:$0xff]  ;;  %v378_v14 = vld [vmem:[%s8592_s22 + $0xc0] sm:$0xff] }
  0x1f   : > { %7772 = vmatprep.mubr.msk.bf16.mxu1 %vm409_vm1, %v721_v38  ;;  %v379_v15 = vld [vmem:[%s8592_s22 + $0xc8] sm:$0xff]  ;;  %v401_v16 = vpack.c.bf16 %v377_v13, %v376_v12  ;;  %v703_v17 = vld [vmem:[%s8592_s22 + $0xb1] sm:$0xff]  ;;  %v704_v18 = vld [vmem:[%s8592_s22 + $0xb9] sm:$0xff] }
  0x20   : > { %v402_v19 = vpack.c.bf16 %v379_v15, %v378_v14  ;;  %v705_v20 = vld [vmem:[%s8592_s22 + $0xc1] sm:$0xff]  ;;  %v706_v22 = vld [vmem:[%s8592_s22 + $0xc9] sm:$0xff]  ;;  %v728_v23 = vpack.c.bf16 %v704_v18, %v703_v17  ;;  %v381_v26 = vld [vmem:[%s8592_s22 + $0xd8] sm:$0xff] }
  0x21   : > { %v729_v24 = vpack.c.bf16 %v706_v22, %v705_v20  ;;  %v380_v25 = vld [vmem:[%s8592_s22 + $0xd0] sm:$0xff]  ;;  %v382_v27 = vld [vmem:[%s8592_s22 + $0xe0] sm:$0xff]  ;;  %v383_v28 = vld [vmem:[%s8592_s22 + $0xe8] sm:$0xff] }
  0x22   : > { %v707_v29 = vld [vmem:[%s8592_s22 + $0xd1] sm:$0xff]  ;;  %v708_v30 = vld [vmem:[%s8592_s22 + $0xd9] sm:$0xff]  ;;  %v709_v31 = vld [vmem:[%s8592_s22 + $0xe1] sm:$0xff]  ;;  %v403_v33 = vpack.c.bf16 %v381_v26, %v380_v25  ;;  %v404_v34 = vpack.c.bf16 %v383_v28, %v382_v27 }
  0x23   : > { %7735 = vmatmul.mubr.msk.bf16.gmra.mxu0 %vm409_vm1, %v395_v43  ;;  %v710_v32 = vld [vmem:[%s8592_s22 + $0xe9] sm:$0xff]  ;;  %v730_v35 = vpack.c.bf16 %v708_v30, %v707_v29  ;;  %v385_v37 = vld [vmem:[%s8592_s22 + $0xf8] sm:$0xff]  ;;  %v386_v39 = vld [vmem:[%s8592_s22 + $0x100] sm:$0xff] }
  0x24   : > { %7738 = vmatprep.mubr.msk.bf16.mxu0 %vm409_vm1, %v396_v46  ;;  %v384_v36 = vld [vmem:[%s8592_s22 + $0xf0] sm:$0xff]  ;;  %v731_v38 = vpack.c.bf16 %v710_v32, %v709_v31  ;;  %v387_v40 = vld [vmem:[%s8592_s22 + $0x108] sm:$0xff]  ;;  %v712_v42 = vld [vmem:[%s8592_s22 + $0xf9] sm:$0xff] }
  0x25   : > { %v711_v41 = vld [vmem:[%s8592_s22 + $0xf1] sm:$0xff]  ;;  %v713_v43 = vld [vmem:[%s8592_s22 + $0x101] sm:$0xff]  ;;  %v714_v44 = vld [vmem:[%s8592_s22 + $0x109] sm:$0xff]  ;;  %v405_v45 = vpack.c.bf16 %v385_v37, %v384_v36  ;;  %v406_v46 = vpack.c.bf16 %v387_v40, %v386_v39 }
  0x26   : > { %7773 = vmatmul.mubr.msk.bf16.gmra.mxu1 %vm409_vm1, %v722_v49  ;;  %v388_v47 = vld [vmem:[%s8592_s22 + $0x110] sm:$0xff]  ;;  %v732_v48 = vpack.c.bf16 %v712_v42, %v711_v41  ;;  %v389_v49 = vld [vmem:[%s8592_s22 + $0x118] sm:$0xff]  ;;  %v1079_v51 = vld [vmem:[%s8592_s22 + $0x2] sm:$0xff] }
  0x27   : > { %7776 = vmatprep.mubr.msk.bf16.mxu1 %vm409_vm1, %v723_v50  ;;  %v733_v50 = vpack.c.bf16 %v714_v44, %v713_v43  ;;  %v1080_v52 = vld [vmem:[%s8592_s22 + $0xa] sm:$0xff]  ;;  %v716_v54 = vld [vmem:[%s8592_s22 + $0x119] sm:$0xff]  ;;  %v1083_v60 = vld [vmem:[%s8592_s22 + $0x22] sm:$0xff] }
  0x28   : > { %v715_v53 = vld [vmem:[%s8592_s22 + $0x111] sm:$0xff]  ;;  %v1115_v56 = vpack.c.bf16 %v1080_v52, %v1079_v51  ;;  %v1082_v59 = vld [vmem:[%s8592_s22 + $0x1a] sm:$0xff]  ;;  %v1087_v5 = vld [vmem:[%s8592_s22 + $0x42] sm:$0xff] }
  0x29   : > { %v734_v57 = vpack.c.bf16 %v716_v54, %v715_v53  ;;  %v1085_v1 = vld [vmem:[%s8592_s22 + $0x32] sm:$0xff]  ;;  %v1086_v2 = vld [vmem:[%s8592_s22 + $0x3a] sm:$0xff]  ;;  %v1092_v12 = vld [vmem:[%s8592_s22 + $0x6a] sm:$0xff] }
  0x2a   : > { %v8735_v4 = vld [vmem:[%s10340_s1 + $0x18] sm:$0xf]  ;;  %v1118_v21 = vpack.c.bf16 %v1086_v2, %v1085_v1  ;;  %v1095_v17 = vld [vmem:[%s8592_s22 + $0x82] sm:$0xff]  ;;  %v1096_v18 = vld [vmem:[%s8592_s22 + $0x8a] sm:$0xff] }
  0x2b   : > { %7739 = vmatmul.mubr.msk.bf16.gmra.mxu0 %vm409_vm1, %v397_v55  ;;  %v407_v55 = vpack.c.bf16 %v389_v49, %v388_v47  ;;  %v1089_v8 = vld [vmem:[%s8592_s22 + $0x52] sm:$0xff]  ;;  %v1123_v20 = vpack.c.bf16 %v1096_v18, %v1095_v17  ;;  %v1099_v25 = vld [vmem:[%s8592_s22 + $0xa2] sm:$0xff]  ;;  %v1100_v26 = vld [vmem:[%s8592_s22 + $0xaa] sm:$0xff] }
  0x2c   : > { %7742 = vmatprep.mubr.msk.bf16.mxu0 %vm409_vm1, %v398_v58  ;;  %v1081_v58 = vld [vmem:[%s8592_s22 + $0x12] sm:$0xff]  ;;  %v1125_v27 = vpack.c.bf16 %v1100_v26, %v1099_v25  ;;  %v1102_v29 = vld [vmem:[%s8592_s22 + $0xba] sm:$0xff]  ;;  %v1103_v31 = vld [vmem:[%s8592_s22 + $0xc2] sm:$0xff] }
  0x2d   : > { %v1093_v15 = vld [vmem:[%s8592_s22 + $0x72] sm:$0xff]  ;;  %v1104_v32 = vld [vmem:[%s8592_s22 + $0xca] sm:$0xff]  ;;  %v1107_v37 = vld [vmem:[%s8592_s22 + $0xe2] sm:$0xff] }
  0x2e   : > { %7777 = vmatmul.mubr.msk.bf16.gmra.mxu1 %vm409_vm1, %v724_v61  ;;  %v1084_v61 = vld [vmem:[%s8592_s22 + $0x2a] sm:$0xff]  ;;  %v1097_v22 = vld [vmem:[%s8592_s22 + $0x92] sm:$0xff]  ;;  %v1110_v41 = vld [vmem:[%s8592_s22 + $0xfa] sm:$0xff] }
  0x2f   : > { %7780 = vmatprep.mubr.msk.bf16.mxu1 %vm409_vm1, %v725_v62  ;;  %v1116_v62 = vpack.c.bf16 %v1082_v59, %v1081_v58  ;;  %v1117_v63 = vpack.c.bf16 %v1084_v61, %v1083_v60  ;;  %v1101_v28 = vld [vmem:[%s8592_s22 + $0xb2] sm:$0xff]  ;;  %v1111_v43 = vld [vmem:[%s8592_s22 + $0x102] sm:$0xff]  ;;  %v1112_v44 = vld [vmem:[%s8592_s22 + $0x10a] sm:$0xff] }
  0x30   : > { %v1126_v30 = vpack.c.bf16 %v1102_v29, %v1101_v28  ;;  %v1109_v40 = vld [vmem:[%s8592_s22 + $0xf2] sm:$0xff]  ;;  %v1114_v47 = vld [vmem:[%s8592_s22 + $0x11a] sm:$0xff]  ;;  %v1511_v51 = vld [vmem:[%s8592_s22 + $0x122] sm:$0xff] }
  0x31   : > { %v1130_v42 = vpack.c.bf16 %v1110_v41, %v1109_v40  ;;  %v1875_v49 = vld [vmem:[%s8592_s22 + $0x13] sm:$0xff]  ;;  %v1512_v52 = vld [vmem:[%s8592_s22 + $0x12a] sm:$0xff]  ;;  %v1880_v61 = vld [vmem:[%s8592_s22 + $0x3b] sm:$0xff] }
  0x32   : > { %v2273_v54 = vld [vmem:[%s8592_s22 + $0x14] sm:$0xff]  ;;  %v1877_v58 = vld [vmem:[%s8592_s22 + $0x23] sm:$0xff]  ;;  %v1878_v59 = vld [vmem:[%s8592_s22 + $0x2b] sm:$0xff] }
  0x33   : > { %7743 = vmatmul.mubr.msk.bf16.gmra.mxu0 %vm409_vm1, %v399_v3  ;;  %v2384_v3 = vsel %vm464_vm0, %v8668_v9, 0  ;;  %v1090_v9 = vld [vmem:[%s8592_s22 + $0x5a] sm:$0xff]  ;;  %v2283_v26 = vld [vmem:[%s8592_s22 + $0x64] sm:$0xff] }
  0x34   : > { %7746 = vmatprep.mubr.msk.bf16.mxu0 %vm409_vm1, %v400_v6  ;;  %v1088_v6 = vld [vmem:[%s8592_s22 + $0x4a] sm:$0xff]  ;;  %v1120_v13 = vpack.c.bf16 %v1090_v9, %v1089_v8  ;;  %v1879_v60 = vld [vmem:[%s8592_s22 + $0x33] sm:$0xff]  ;;  %v2282_v17 = vld [vmem:[%s8592_s22 + $0x5c] sm:$0xff] }
  0x35   : > { %v1119_v7 = vpack.c.bf16 %v1088_v6, %v1087_v5  ;;  %v1913_v1 = vpack.c.bf16 %v1880_v61, %v1879_v60  ;;  %v2277_v2 = vld [vmem:[%s8592_s22 + $0x34] sm:$0xff]  ;;  %v2782_v5 = vsel %vm464_vm0, %v8735_v4, 0  ;;  %v1881_v8 = vld [vmem:[%s8592_s22 + $0x43] sm:$0xff] }
  0x36   : > { %7781 = vmatmul.mubr.msk.bf16.gmra.mxu1 %vm409_vm1, %v726_v10  ;;  %v8750_v10 = vld [vmem:[%s10340_s1 + $0x1c] sm:$0xf]  ;;  %v2285_v29 = vld [vmem:[%s8592_s22 + $0x74] sm:$0xff] }
  0x37   : > { %7784 = vmatprep.mubr.msk.bf16.mxu1 %vm409_vm1, %v727_v11  ;;  %v1091_v11 = vld [vmem:[%s8592_s22 + $0x62] sm:$0xff]  ;;  %v3180_v9 = vsel %vm464_vm0, %v8750_v10, 0  ;;  %v2289_v41 = vld [vmem:[%s8592_s22 + $0x94] sm:$0xff] }
  0x38   : > { %v1121_v14 = vpack.c.bf16 %v1092_v12, %v1091_v11  ;;  %v1883_v11 = vld [vmem:[%s8592_s22 + $0x53] sm:$0xff]  ;;  %v1884_v12 = vld [vmem:[%s8592_s22 + $0x5b] sm:$0xff] }
  0x39   : > { %v1900_v60 = vld [vmem:[%s8592_s22 + $0xdb] sm:$0xff] }
  0x3b   : > { %7747 = vmatmul.mubr.msk.bf16.gmra.mxu0 %vm409_vm1, %v401_v16  ;;  %v1094_v16 = vld [vmem:[%s8592_s22 + $0x7a] sm:$0xff] }
  0x3c   : > { %7750 = vmatprep.mubr.msk.bf16.mxu0 %vm409_vm1, %v402_v19  ;;  %v1122_v19 = vpack.c.bf16 %v1094_v16, %v1093_v15  ;;  %v2280_v15 = vld [vmem:[%s8592_s22 + $0x4c] sm:$0xff]  ;;  %v2281_v16 = vld [vmem:[%s8592_s22 + $0x54] sm:$0xff] }
  0x3e   : > { %7785 = vmatmul.mubr.msk.bf16.gmra.mxu1 %vm409_vm1, %v728_v23  ;;  %v1098_v23 = vld [vmem:[%s8592_s22 + $0x9a] sm:$0xff] }
  0x3f   : > { %7788 = vmatprep.mubr.msk.bf16.mxu1 %vm409_vm1, %v729_v24  ;;  %v1124_v24 = vpack.c.bf16 %v1098_v23, %v1097_v22  ;;  %v1886_v22 = vld [vmem:[%s8592_s22 + $0x6b] sm:$0xff]  ;;  %v1887_v23 = vld [vmem:[%s8592_s22 + $0x73] sm:$0xff] }
  0x43   : > { %7751 = vmatmul.mubr.msk.bf16.gmra.mxu0 %vm409_vm1, %v403_v33  ;;  %v1127_v33 = vpack.c.bf16 %v1104_v32, %v1103_v31 }
  0x44   : > { %7754 = vmatprep.mubr.msk.bf16.mxu0 %vm409_vm1, %v404_v34  ;;  %v1105_v34 = vld [vmem:[%s8592_s22 + $0xd2] sm:$0xff] }
  0x46   : > { %7789 = vmatmul.mubr.msk.bf16.gmra.mxu1 %vm409_vm1, %v730_v35  ;;  %v1106_v35 = vld [vmem:[%s8592_s22 + $0xda] sm:$0xff] }
  0x47   : > { %7792 = vmatprep.mubr.msk.bf16.mxu1 %vm409_vm1, %v731_v38  ;;  %v1128_v36 = vpack.c.bf16 %v1106_v35, %v1105_v34  ;;  %v1108_v38 = vld [vmem:[%s8592_s22 + $0xea] sm:$0xff]  ;;  %v1891_v35 = vld [vmem:[%s8592_s22 + $0x93] sm:$0xff] }
  0x48   : > { %v1129_v39 = vpack.c.bf16 %v1108_v38, %v1107_v37  ;;  %v1890_v34 = vld [vmem:[%s8592_s22 + $0x8b] sm:$0xff] }
  0x49   : > { %v2287_v38 = vld [vmem:[%s8592_s22 + $0x84] sm:$0xff] }
  0x4b   : > { %7755 = vmatmul.mubr.msk.bf16.gmra.mxu0 %vm409_vm1, %v405_v45  ;;  %v1131_v45 = vpack.c.bf16 %v1112_v44, %v1111_v43 }
  0x4c   : > { %7758 = vmatprep.mubr.msk.bf16.mxu0 %vm409_vm1, %v406_v46  ;;  %v1113_v46 = vld [vmem:[%s8592_s22 + $0x112] sm:$0xff] }
  0x4e   : > { %7793 = vmatmul.mubr.msk.bf16.gmra.mxu1 %vm409_vm1, %v732_v48  ;;  %v1132_v48 = vpack.c.bf16 %v1114_v47, %v1113_v46  ;;  %v1894_v46 = vld [vmem:[%s8592_s22 + $0xab] sm:$0xff]  ;;  %v1895_v47 = vld [vmem:[%s8592_s22 + $0xb3] sm:$0xff] }
  0x4f   : > { %7796 = vmatprep.mubr.msk.bf16.mxu1 %vm409_vm1, %v733_v50  ;;  %v1876_v50 = vld [vmem:[%s8592_s22 + $0x1b] sm:$0xff] }
  0x50   : > { %v1911_v53 = vpack.c.bf16 %v1876_v50, %v1875_v49  ;;  %v2291_v50 = vld [vmem:[%s8592_s22 + $0xa4] sm:$0xff] }
  0x53   : > { %7759 = vmatmul.mubr.msk.bf16.gmra.mxu0 %vm409_vm1, %v407_v55  ;;  %v2274_v55 = vld [vmem:[%s8592_s22 + $0x1c] sm:$0xff] }
  0x54   : > { %7802 = vmatprep.mubr.msk.bf16.mxu0 %vm409_vm1, %v1115_v56  ;;  %v1530_v56 = vpack.c.bf16 %v1512_v52, %v1511_v51  ;;  %v2292_v51 = vld [vmem:[%s8592_s22 + $0xac] sm:$0xff] }
  0x56   : > { %7797 = vmatmul.mubr.msk.bf16.gmra.mxu1 %vm409_vm1, %v734_v57  ;;  %v2309_v57 = vpack.c.bf16 %v2274_v55, %v2273_v54  ;;  %v2294_v54 = vld [vmem:[%s8592_s22 + $0xbc] sm:$0xff]  ;;  %v8907_v55 = vpack.c.bf16 %v2292_v51, %v2291_v50  ;;  %v1910_v50 = vld [vmem:[%s8592_s22 + $0x12b] sm:$0xff] }
  0x57   : > { %7840 = vmatprep.mubr.msk.bf16.mxu1 %vm409_vm1, %v1116_v62 }
  0x5b   : > { %7803 = vmatmul.mubr.msk.bf16.vlgmr.msra.gmra.mxu0 %vm409_vm1, %v1116_v62  ;;  %v1912_v62 = vpack.c.bf16 %v1878_v59, %v1877_v58  ;;  %v1898_v58 = vld [vmem:[%s8592_s22 + $0xcb] sm:$0xff]  ;;  %v1899_v59 = vld [vmem:[%s8592_s22 + $0xd3] sm:$0xff] }
  0x5c   : > { %7877 = vmatpush3.bf16.msra.mxu0 %v1986_v0  ;;  %7806 = vmatprep.mubr.msk.bf16.mxu0 %vm409_vm1, %v1117_v63  ;;  %v2276_v0 = vld [vmem:[%s8592_s22 + $0x2c] sm:$0xff] }
  0x5d   : > { %8432 = vmatprep.subr.msk.bf16.mxu0 %vm464_vm0, %v8735_v4  ;;  %v1882_v4 = vld [vmem:[%s8592_s22 + $0x4b] sm:$0xff] }
  0x5e   : > { %7841 = vmatmul.mubr.msk.bf16.vlgmr.msra.gmra.mxu1 %vm409_vm1, %v1117_v63  ;;  %v2275_v63 = vld [vmem:[%s8592_s22 + $0x24] sm:$0xff] }
  0x5f   : > { %7844 = vmatprep.mubr.msk.bf16.mxu1 %vm409_vm1, %v1118_v21  ;;  %7915 = vmatpush3.bf16.msra.mxu1 %v2384_v3  ;;  %v2278_v3 = vld [vmem:[%s8592_s22 + $0x3c] sm:$0xff]  ;;  %v8826_v6 = vpack.c.bf16 %v2276_v0, %v2275_v63  ;;  %v2296_v63 = vld [vmem:[%s8592_s22 + $0xcc] sm:$0xff]  ;;  %v1923_v0 = vpack.c.bf16 %v1900_v60, %v1899_v59  ;;  %v2307_v60 = vld [vmem:[%s8592_s22 + $0x124] sm:$0xff] }
  0x60   : > { %8433 = vmatprep.subr.msk.bf16.mxu1 %vm464_vm0, %v8750_v10  ;;  %v1915_v10 = vpack.c.bf16 %v1884_v12, %v1883_v11  ;;  %v1904_v11 = vld [vmem:[%s8592_s22 + $0xfb] sm:$0xff] }
  0x63   : > { %7807 = vmatmul.mubr.msk.bf16.gmra.mxu0 %vm409_vm1, %v1118_v21  ;;  %v8831_v21 = vld [vmem:[%s10340_s1 + $0x20] sm:$0xf] }
  0x64   : > { %7810 = vmatprep.mubr.msk.bf16.mxu0 %vm409_vm1, %v1119_v7 }
  0x66   : > { %7845 = vmatmul.mubr.msk.bf16.gmra.mxu1 %vm409_vm1, %v1119_v7  ;;  %v8834_v7 = vpack.c.bf16 %v2278_v3, %v2277_v2  ;;  %v2298_v2 = vld [vmem:[%s8592_s22 + $0xdc] sm:$0xff] }
  0x67   : > { %7848 = vmatprep.mubr.msk.bf16.mxu1 %vm409_vm1, %v1120_v13 }
  0x6b   : > { %7811 = vmatmul.mubr.msk.bf16.gmra.mxu0 %vm409_vm1, %v1120_v13  ;;  %v1914_v13 = vpack.c.bf16 %v1882_v4, %v1881_v8  ;;  %v1901_v8 = vld [vmem:[%s8592_s22 + $0xe3] sm:$0xff]  ;;  %v1902_v4 = vld [vmem:[%s8592_s22 + $0xeb] sm:$0xff] }
  0x6c   : > { %7814 = vmatprep.mubr.msk.bf16.mxu0 %vm409_vm1, %v1121_v14  ;;  %v1924_v12 = vpack.c.bf16 %v1902_v4, %v1901_v8 }
  0x6e   : > { %7849 = vmatmul.mubr.msk.bf16.gmra.mxu1 %vm409_vm1, %v1121_v14  ;;  %v2279_v14 = vld [vmem:[%s8592_s22 + $0x44] sm:$0xff] }
  0x6f   : > { %7852 = vmatprep.mubr.msk.bf16.mxu1 %vm409_vm1, %v1122_v19  ;;  %v8853_v18 = vpack.c.bf16 %v2280_v15, %v2279_v14  ;;  %v2300_v14 = vld [vmem:[%s8592_s22 + $0xec] sm:$0xff] }
  0x73   : > { %7815 = vmatmul.mubr.msk.bf16.gmra.mxu0 %vm409_vm1, %v1122_v19  ;;  %v8856_v19 = vpack.c.bf16 %v2282_v17, %v2281_v16  ;;  %v2302_v16 = vld [vmem:[%s8592_s22 + $0xfc] sm:$0xff] }
  0x74   : > { %7818 = vmatprep.mubr.msk.bf16.mxu0 %vm409_vm1, %v1123_v20 }
  0x76   : > { %7853 = vmatmul.mubr.msk.bf16.gmra.mxu1 %vm409_vm1, %v1123_v20  ;;  %v1885_v20 = vld [vmem:[%s8592_s22 + $0x63] sm:$0xff] }
  0x77   : > { %7856 = vmatprep.mubr.msk.bf16.mxu1 %vm409_vm1, %v1124_v24  ;;  %v1916_v25 = vpack.c.bf16 %v1886_v22, %v1885_v20 }
  0x7b   : > { %7819 = vmatmul.mubr.msk.bf16.gmra.mxu0 %vm409_vm1, %v1124_v24  ;;  %v1888_v24 = vld [vmem:[%s8592_s22 + $0x7b] sm:$0xff] }
  0x7c   : > { %7822 = vmatprep.mubr.msk.bf16.mxu0 %vm409_vm1, %v1125_v27  ;;  %v1917_v28 = vpack.c.bf16 %v1888_v24, %v1887_v23  ;;  %v1905_v23 = vld [vmem:[%s8592_s22 + $0x103] sm:$0xff]  ;;  %v1906_v24 = vld [vmem:[%s8592_s22 + $0x10b] sm:$0xff] }
  0x7e   : > { %7857 = vmatmul.mubr.msk.bf16.gmra.mxu1 %vm409_vm1, %v1125_v27  ;;  %v2284_v27 = vld [vmem:[%s8592_s22 + $0x6c] sm:$0xff] }
  0x7f   : > { %7860 = vmatprep.mubr.msk.bf16.mxu1 %vm409_vm1, %v1126_v30  ;;  %v8871_v31 = vpack.c.bf16 %v2284_v27, %v2283_v26  ;;  %v1907_v26 = vld [vmem:[%s8592_s22 + $0x113] sm:$0xff]  ;;  %v1908_v27 = vld [vmem:[%s8592_s22 + $0x11b] sm:$0xff] }
  0x83   : > { %7823 = vmatmul.mubr.msk.bf16.gmra.mxu0 %vm409_vm1, %v1126_v30  ;;  %v2286_v30 = vld [vmem:[%s8592_s22 + $0x7c] sm:$0xff] }
  0x84   : > { %7826 = vmatprep.mubr.msk.bf16.mxu0 %vm409_vm1, %v1127_v33  ;;  %v8874_v32 = vpack.c.bf16 %v2286_v30, %v2285_v29  ;;  %v1926_v30 = vpack.c.bf16 %v1906_v24, %v1905_v23 }
  0x86   : > { %7861 = vmatmul.mubr.msk.bf16.gmra.mxu1 %vm409_vm1, %v1127_v33  ;;  %v1889_v33 = vld [vmem:[%s8592_s22 + $0x83] sm:$0xff] }
  0x87   : > { %7864 = vmatprep.mubr.msk.bf16.mxu1 %vm409_vm1, %v1128_v36  ;;  %v1918_v37 = vpack.c.bf16 %v1890_v34, %v1889_v33  ;;  %v2303_v33 = vld [vmem:[%s8592_s22 + $0x104] sm:$0xff]  ;;  %v2304_v34 = vld [vmem:[%s8592_s22 + $0x10c] sm:$0xff] }
  0x8b   : > { %7827 = vmatmul.mubr.msk.bf16.gmra.mxu0 %vm409_vm1, %v1128_v36  ;;  %v1892_v36 = vld [vmem:[%s8592_s22 + $0x9b] sm:$0xff] }
  0x8c   : > { %7830 = vmatprep.mubr.msk.bf16.mxu0 %vm409_vm1, %v1129_v39  ;;  %v1919_v40 = vpack.c.bf16 %v1892_v36, %v1891_v35  ;;  %v1927_v36 = vpack.c.bf16 %v1908_v27, %v1907_v26  ;;  %v3071_v27 = vld [vmem:[%s8592_s22 + $0x35] sm:$0xff] }
  0x8e   : > { %7865 = vmatmul.mubr.msk.bf16.gmra.mxu1 %vm409_vm1, %v1129_v39  ;;  %v2288_v39 = vld [vmem:[%s8592_s22 + $0x8c] sm:$0xff] }
  0x8f   : > { %7868 = vmatprep.mubr.msk.bf16.mxu1 %vm409_vm1, %v1130_v42  ;;  %v8889_v43 = vpack.c.bf16 %v2288_v39, %v2287_v38  ;;  %v2306_v38 = vld [vmem:[%s8592_s22 + $0x11c] sm:$0xff] }
  0x93   : > { %7831 = vmatmul.mubr.msk.bf16.gmra.mxu0 %vm409_vm1, %v1130_v42  ;;  %v2290_v42 = vld [vmem:[%s8592_s22 + $0x9c] sm:$0xff] }
  0x94   : > { %7834 = vmatprep.mubr.msk.bf16.mxu0 %vm409_vm1, %v1131_v45  ;;  %v8892_v44 = vpack.c.bf16 %v2290_v42, %v2289_v41  ;;  %v8965_v41 = vpack.c.bf16 %v2304_v34, %v2303_v33  ;;  %v3074_v33 = vld [vmem:[%s8592_s22 + $0x4d] sm:$0xff] }
  0x96   : > { %7869 = vmatmul.mubr.msk.bf16.gmra.mxu1 %vm409_vm1, %v1131_v45  ;;  %v1893_v45 = vld [vmem:[%s8592_s22 + $0xa3] sm:$0xff] }
  0x97   : > { %7872 = vmatprep.mubr.msk.bf16.mxu1 %vm409_vm1, %v1132_v48  ;;  %v1920_v49 = vpack.c.bf16 %v1894_v46, %v1893_v45 }
  0x9b   : > { %7835 = vmatmul.mubr.msk.bf16.gmra.mxu0 %vm409_vm1, %v1132_v48  ;;  %v1896_v48 = vld [vmem:[%s8592_s22 + $0xbb] sm:$0xff] }
  0x9c   : > { %7878 = vmatprep.mubr.msk.bf16.mxu0 %vm409_vm1, %v1911_v53  ;;  %v1921_v52 = vpack.c.bf16 %v1896_v48, %v1895_v47  ;;  %v2293_v53 = vld [vmem:[%s8592_s22 + $0xb4] sm:$0xff] }
  0x9e   : > { %7873 = vmatmul.mubr.msk.bf16.gmra.mxu1 %vm409_vm1, %v1530_v56  ;;  %v8910_v56 = vpack.c.bf16 %v2294_v54, %v2293_v53 }
  0x9f   : > { %7916 = vmatprep.mubr.msk.bf16.mxu1 %vm409_vm1, %v2309_v57  ;;  %v1897_v57 = vld [vmem:[%s8592_s22 + $0xc3] sm:$0xff] }
  0xa0   : > { %v1922_v61 = vpack.c.bf16 %v1898_v58, %v1897_v57 }
  0xa3   : > { %7879 = vmatmul.mubr.msk.bf16.vlgmr.msra.gmra.mxu0 %vm409_vm1, %v1912_v62  ;;  %v2295_v62 = vld [vmem:[%s8592_s22 + $0xc4] sm:$0xff] }
  0xa4   : > { %7953 = vmatpush3.bf16.msra.mxu0 %v2782_v5  ;;  %7882 = vmatprep.mubr.msk.bf16.mxu0 %vm409_vm1, %v1913_v1  ;;  %v2297_v1 = vld [vmem:[%s8592_s22 + $0xd4] sm:$0xff]  ;;  %v8925_v3 = vpack.c.bf16 %v2296_v63, %v2295_v62 }
  0xa5   : > { %8434 = vmatprep.subr.msk.bf16.mxu0 %vm464_vm0, %v8831_v21  ;;  %v8928_v5 = vpack.c.bf16 %v2298_v2, %v2297_v1  ;;  %v3070_v1 = vld [vmem:[%s8592_s22 + $0x2d] sm:$0xff] }
  0xa6   : > { %7917 = vmatmul.mubr.msk.bf16.vlgmr.msra.gmra.mxu1 %vm409_vm1, %v8826_v6 }
  0xa7   : > { %7920 = vmatprep.mubr.msk.bf16.mxu1 %vm409_vm1, %v8834_v7  ;;  %7991 = vmatpush3.bf16.msra.mxu1 %v3180_v9  ;;  %v1903_v9 = vld [vmem:[%s8592_s22 + $0xf3] sm:$0xff] }
  0xa8   : > { %v1925_v15 = vpack.c.bf16 %v1904_v11, %v1903_v9 }
  0xab   : > { %7883 = vmatmul.mubr.msk.bf16.gmra.mxu0 %vm409_vm1, %v1914_v13  ;;  %v2299_v13 = vld [vmem:[%s8592_s22 + $0xe4] sm:$0xff] }
  0xac   : > { %7886 = vmatprep.mubr.msk.bf16.mxu0 %vm409_vm1, %v1915_v10  ;;  %v2301_v10 = vld [vmem:[%s8592_s22 + $0xf4] sm:$0xff]  ;;  %v8943_v17 = vpack.c.bf16 %v2300_v14, %v2299_v13 }
  0xad   : > { %v8946_v22 = vpack.c.bf16 %v2302_v16, %v2301_v10 }
  0xae   : > { %7921 = vmatmul.mubr.msk.bf16.gmra.mxu1 %vm409_vm1, %v8853_v18 }
  0xaf   : > { %7924 = vmatprep.mubr.msk.bf16.mxu1 %vm409_vm1, %v8856_v19 }
  0xb3   : > { %7887 = vmatmul.mubr.msk.bf16.gmra.mxu0 %vm409_vm1, %v1916_v25 }
  0xb4   : > { %7890 = vmatprep.mubr.msk.bf16.mxu0 %vm409_vm1, %v1917_v28 }
  0xb6   : > { %7925 = vmatmul.mubr.msk.bf16.gmra.mxu1 %vm409_vm1, %v8871_v31 }
  0xb7   : > { %7928 = vmatprep.mubr.msk.bf16.mxu1 %vm409_vm1, %v8874_v32 }
  0xbb   : > { %7891 = vmatmul.mubr.msk.bf16.gmra.mxu0 %vm409_vm1, %v1918_v37  ;;  %v2305_v37 = vld [vmem:[%s8592_s22 + $0x114] sm:$0xff] }
  0xbc   : > { %7894 = vmatprep.mubr.msk.bf16.mxu0 %vm409_vm1, %v1919_v40  ;;  %v8968_v46 = vpack.c.bf16 %v2306_v38, %v2305_v37 }
  0xbe   : > { %7929 = vmatmul.mubr.msk.bf16.gmra.mxu1 %vm409_vm1, %v8889_v43 }
  0xbf   : > { %7932 = vmatprep.mubr.msk.bf16.mxu1 %vm409_vm1, %v8892_v44 }
  0xc3   : > { %7895 = vmatmul.mubr.msk.bf16.gmra.mxu0 %vm409_vm1, %v1920_v49  ;;  %v1909_v49 = vld [vmem:[%s8592_s22 + $0x123] sm:$0xff] }
  0xc4   : > { %7898 = vmatprep.mubr.msk.bf16.mxu0 %vm409_vm1, %v1921_v52  ;;  %v1928_v59 = vpack.c.bf16 %v1910_v50, %v1909_v49 }
  0xc6   : > { %7933 = vmatmul.mubr.msk.bf16.gmra.mxu1 %vm409_vm1, %v8907_v55 }
  0xc7   : > { %7936 = vmatprep.mubr.msk.bf16.mxu1 %vm409_vm1, %v8910_v56 }
  0xcb   : > { %7899 = vmatmul.mubr.msk.bf16.gmra.mxu0 %vm409_vm1, %v1922_v61  ;;  %v2308_v61 = vld [vmem:[%s8592_s22 + $0x12c] sm:$0xff] }
  0xcc   : > { %7902 = vmatprep.mubr.msk.bf16.mxu0 %vm409_vm1, %v1923_v0  ;;  %v3069_v0 = vld [vmem:[%s8592_s22 + $0x25] sm:$0xff]  ;;  %v8988_v11 = vpack.c.bf16 %v2308_v61, %v2307_v60 }
  0xcd   : > { %v3105_v14 = vpack.c.bf16 %v3070_v1, %v3069_v0 }
  0xce   : > { %7937 = vmatmul.mubr.msk.bf16.gmra.mxu1 %vm409_vm1, %v8925_v3 }
  0xcf   : > { %7940 = vmatprep.mubr.msk.bf16.mxu1 %vm409_vm1, %v8928_v5 }
  0xd3   : > { %v7728_v20 = vpop.f32.mrf.mxu0  ;;  %7903 = vmatmul.mubr.msk.bf16.gmra.mxu0 %vm409_vm1, %v1924_v12 }
  0xd4   : > { %647 = vst.msk [vmem:[#allocation2 + $0x10] sm:$0xff] %vm330_vm2, %v7728_v20  ;;  %7906 = vmatprep.mubr.msk.bf16.mxu0 %vm409_vm1, %v1925_v15 }
  0xd5   : > { %v502_v25 = vpop.f32.mrf.mxu0 }
  0xd6   : > { %645 = vst.msk [vmem:[#allocation2] sm:$0xff] %vm330_vm2, %v502_v25  ;;  %v7766_v28 = vpop.f32.mrf.mxu1  ;;  %7941 = vmatmul.mubr.msk.bf16.gmra.mxu1 %vm409_vm1, %v8943_v17 }
  0xd7   : > { %v7729_v29 = vpop.f32.mrf.mxu0  ;;  %7944 = vmatprep.mubr.msk.bf16.mxu1 %vm409_vm1, %v8946_v22 }
  0xd8   : > { %648 = vst.msk [vmem:[#allocation2 + $0x18] sm:$0xff] %vm330_vm2, %v7729_v29  ;;  %v828_v35 = vpop.f32.mrf.mxu1 }
  0xd9   : > { %v505_v39 = vpop.f32.mrf.mxu0 }
  0xda   : > { %646 = vst.msk [vmem:[#allocation2 + $0x8] sm:$0xff] %vm330_vm2, %v505_v39  ;;  %v7767_v40 = vpop.f32.mrf.mxu1 }
  0xdb   : > { %v7732_v42 = vpop.f32.mrf.mxu0  ;;  %v973_v45 = vld [vmem:[#allocation2 + $0x10] sm:$0xff]  ;;  %7907 = vmatmul.mubr.msk.bf16.gmra.mxu0 %vm409_vm1, %v1926_v30  ;;  %v3073_v30 = vld [vmem:[%s8592_s22 + $0x45] sm:$0xff] }
  0xdc   : > { %651 = vst.msk [vmem:[#allocation2 + $0x30] sm:$0xff] %vm330_vm2, %v7732_v42  ;;  %v1009_v47 = vadd.f32 %v7766_v28, %v973_v45  ;;  %v831_v48 = vpop.f32.mrf.mxu1  ;;  %7910 = vmatprep.mubr.msk.bf16.mxu0 %vm409_vm1, %v1927_v36  ;;  %v3072_v28 = vld [vmem:[%s8592_s22 + $0x3d] sm:$0xff]  ;;  %v3578_v36 = vsel %vm464_vm0, %v8831_v21, 0  ;;  %v3107_v45 = vpack.c.bf16 %v3074_v33, %v3073_v30 }
  0xdd   : > { %v518_v51 = vpop.f32.mrf.mxu0  ;;  %v971_v52 = vld [vmem:[#allocation2] sm:$0xff]  ;;  %v3106_v39 = vpack.c.bf16 %v3072_v28, %v3071_v27 }
  0xde   : > { %1045 = vst.msk [vmem:[#allocation2 + $0x10] sm:$0xff] %vm330_vm2, %v1009_v47  ;;  %649 = vst.msk [vmem:[#allocation2 + $0x20] sm:$0xff] %vm330_vm2, %v518_v51  ;;  %v1007_v53 = vadd.f32 %v971_v52, %v828_v35  ;;  %v7770_v54 = vpop.f32.mrf.mxu1  ;;  %7945 = vmatmul.mubr.msk.bf16.gmra.mxu1 %vm409_vm1, %v8965_v41 }
  0xdf   : > { %v7733_v57 = vpop.f32.mrf.mxu0  ;;  %v974_v58 = vld [vmem:[#allocation2 + $0x18] sm:$0xff]  ;;  %7948 = vmatprep.mubr.msk.bf16.mxu1 %vm409_vm1, %v8968_v46 }
  0xe0   : > { %1043 = vst.msk [vmem:[#allocation2] sm:$0xff] %vm330_vm2, %v1007_v53  ;;  %652 = vst.msk [vmem:[#allocation2 + $0x38] sm:$0xff] %vm330_vm2, %v7733_v57  ;;  %v1010_v62 = vadd.f32 %v7767_v40, %v974_v58  ;;  %v844_v63 = vpop.f32.mrf.mxu1  ;;  %v3075_v53 = vld [vmem:[%s8592_s22 + $0x55] sm:$0xff]  ;;  %v3077_v58 = vld [vmem:[%s8592_s22 + $0x65] sm:$0xff] }
  0xe1   : > { %v521_v2 = vpop.f32.mrf.mxu0  ;;  %v972_v8 = vld [vmem:[#allocation2 + $0x8] sm:$0xff] }
  0xe2   : > { %1046 = vst.msk [vmem:[#allocation2 + $0x18] sm:$0xff] %vm330_vm2, %v1010_v62  ;;  %650 = vst.msk [vmem:[#allocation2 + $0x28] sm:$0xff] %vm330_vm2, %v521_v2  ;;  %v1008_v4 = vadd.f32 %v972_v8, %v831_v48  ;;  %v7771_v9 = vpop.f32.mrf.mxu1 }
  0xe3   : > { %v7736_v12 = vpop.f32.mrf.mxu0  ;;  %v977_v13 = vld [vmem:[#allocation2 + $0x30] sm:$0xff]  ;;  %7911 = vmatmul.mubr.msk.bf16.gmra.mxu0 %vm409_vm1, %v1928_v59 }
  0xe4   : > { %1044 = vst.msk [vmem:[#allocation2 + $0x8] sm:$0xff] %vm330_vm2, %v1008_v4  ;;  %655 = vst.msk [vmem:[#allocation2 + $0x50] sm:$0xff] %vm330_vm2, %v7736_v12  ;;  %v1013_v15 = vadd.f32 %v7770_v54, %v977_v13  ;;  %v847_v10 = vpop.f32.mrf.mxu1  ;;  %7954 = vmatprep.mubr.msk.bf16.mxu0 %vm409_vm1, %v8826_v6  ;;  %v3076_v54 = vld [vmem:[%s8592_s22 + $0x5d] sm:$0xff]  ;;  %v3078_v59 = vld [vmem:[%s8592_s22 + $0x6d] sm:$0xff] }
  0xe5   : > { %v534_v16 = vpop.f32.mrf.mxu0  ;;  %v975_v20 = vld [vmem:[#allocation2 + $0x20] sm:$0xff]  ;;  %v3108_v0 = vpack.c.bf16 %v3076_v54, %v3075_v53  ;;  %v3109_v8 = vpack.c.bf16 %v3078_v59, %v3077_v58 }
  0xe6   : > { %1049 = vst.msk [vmem:[#allocation2 + $0x30] sm:$0xff] %vm330_vm2, %v1013_v15  ;;  %653 = vst.msk [vmem:[#allocation2 + $0x40] sm:$0xff] %vm330_vm2, %v534_v16  ;;  %v1011_v23 = vadd.f32 %v975_v20, %v844_v63  ;;  %v7774_v24 = vpop.f32.mrf.mxu1  ;;  %7949 = vmatmul.mubr.msk.bf16.gmra.mxu1 %vm409_vm1, %v8988_v11  ;;  %v3079_v16 = vld [vmem:[%s8592_s22 + $0x75] sm:$0xff]  ;;  %v3080_v20 = vld [vmem:[%s8592_s22 + $0x7d] sm:$0xff] }
  0xe7   : > { %v7737_v25 = vpop.f32.mrf.mxu0  ;;  %v978_v26 = vld [vmem:[#allocation2 + $0x38] sm:$0xff]  ;;  %7992 = vmatprep.mubr.msk.bf16.mxu1 %vm409_vm1, %v3105_v14 }
  0xe8   : > { %1047 = vst.msk [vmem:[#allocation2 + $0x20] sm:$0xff] %vm330_vm2, %v1011_v23  ;;  %656 = vst.msk [vmem:[#allocation2 + $0x58] sm:$0xff] %vm330_vm2, %v7737_v25  ;;  %v1014_v6 = vadd.f32 %v7771_v9, %v978_v26  ;;  %v860_v29 = vpop.f32.mrf.mxu1  ;;  %v3082_v25 = vld [vmem:[%s8592_s22 + $0x8d] sm:$0xff] }
  0xe9   : > { %v537_v34 = vpop.f32.mrf.mxu0  ;;  %v976_v35 = vld [vmem:[#allocation2 + $0x28] sm:$0xff] }
  0xea   : > { %1050 = vst.msk [vmem:[#allocation2 + $0x38] sm:$0xff] %vm330_vm2, %v1014_v6  ;;  %654 = vst.msk [vmem:[#allocation2 + $0x48] sm:$0xff] %vm330_vm2, %v537_v34  ;;  %v1012_v37 = vadd.f32 %v976_v35, %v847_v10  ;;  %v7775_v38 = vpop.f32.mrf.mxu1 }
  0xeb   : > { %v7740_v40 = vpop.f32.mrf.mxu0  ;;  %v981_v42 = vld [vmem:[#allocation2 + $0x50] sm:$0xff]  ;;  %7955 = vmatmul.mubr.msk.bf16.vlgmr.msra.gmra.mxu0 %vm409_vm1, %v8834_v7 }
  0xec   : > { %1048 = vst.msk [vmem:[#allocation2 + $0x28] sm:$0xff] %vm330_vm2, %v1012_v37  ;;  %659 = vst.msk [vmem:[#allocation2 + $0x70] sm:$0xff] %vm330_vm2, %v7740_v40  ;;  %v1017_v21 = vadd.f32 %v7774_v24, %v981_v42  ;;  %8029 = vmatpush3.bf16.msra.mxu0 %v3578_v36  ;;  %v863_v47 = vpop.f32.mrf.mxu1  ;;  %7958 = vmatprep.mubr.msk.bf16.mxu0 %vm409_vm1, %v8853_v18  ;;  %v3081_v24 = vld [vmem:[%s8592_s22 + $0x85] sm:$0xff] }
  0xed   : > { %v550_v48 = vpop.f32.mrf.mxu0  ;;  %v979_v49 = vld [vmem:[#allocation2 + $0x40] sm:$0xff]  ;;  %v3111_v34 = vpack.c.bf16 %v3082_v25, %v3081_v24 }
  0xee   : > { %1053 = vst.msk [vmem:[#allocation2 + $0x50] sm:$0xff] %vm330_vm2, %v1017_v21  ;;  %657 = vst.msk [vmem:[#allocation2 + $0x60] sm:$0xff] %vm330_vm2, %v550_v48  ;;  %v1015_v7 = vadd.f32 %v979_v49, %v860_v29  ;;  %v7778_v50 = vpop.f32.mrf.mxu1  ;;  %7993 = vmatmul.mubr.msk.bf16.vlgmr.msra.gmra.mxu1 %vm409_vm1, %v3106_v39  ;;  %v3110_v29 = vpack.c.bf16 %v3080_v20, %v3079_v16  ;;  %v3084_v21 = vld [vmem:[%s8592_s22 + $0x9d] sm:$0xff]  ;;  %v3085_v48 = vld [vmem:[%s8592_s22 + $0xa5] sm:$0xff] }
  0xef   : > { %v7741_v51 = vpop.f32.mrf.mxu0  ;;  %v982_v52 = vld [vmem:[#allocation2 + $0x58] sm:$0xff]  ;;  %7996 = vmatprep.mubr.msk.bf16.mxu1 %vm409_vm1, %v3107_v45  ;;  %v3086_v49 = vld [vmem:[%s8592_s22 + $0xad] sm:$0xff] }
  0xf0   : > { %1051 = vst.msk [vmem:[#allocation2 + $0x40] sm:$0xff] %vm330_vm2, %v1015_v7  ;;  %660 = vst.msk [vmem:[#allocation2 + $0x78] sm:$0xff] %vm330_vm2, %v7741_v51  ;;  %v1018_v18 = vadd.f32 %v7775_v38, %v982_v52  ;;  %v876_v57 = vpop.f32.mrf.mxu1  ;;  %v3083_v45 = vld [vmem:[%s8592_s22 + $0x95] sm:$0xff] }
  0xf1   : > { %v553_v60 = vpop.f32.mrf.mxu0  ;;  %v980_v61 = vld [vmem:[#allocation2 + $0x48] sm:$0xff]  ;;  %v3112_v53 = vpack.c.bf16 %v3084_v21, %v3083_v45 }
  0xf2   : > { %1054 = vst.msk [vmem:[#allocation2 + $0x58] sm:$0xff] %vm330_vm2, %v1018_v18  ;;  %658 = vst.msk [vmem:[#allocation2 + $0x68] sm:$0xff] %vm330_vm2, %v553_v60  ;;  %v1016_v62 = vadd.f32 %v980_v61, %v863_v47  ;;  %v7779_v63 = vpop.f32.mrf.mxu1 }
  0xf3   : > { %v7744_v1 = vpop.f32.mrf.mxu0  ;;  %v985_v2 = vld [vmem:[#allocation2 + $0x70] sm:$0xff]  ;;  %7959 = vmatmul.mubr.msk.bf16.gmra.mxu0 %vm409_vm1, %v8856_v19 }
  0xf4   : > { %1052 = vst.msk [vmem:[#allocation2 + $0x48] sm:$0xff] %vm330_vm2, %v1016_v62  ;;  %663 = vst.msk [vmem:[#allocation2 + $0x90] sm:$0xff] %vm330_vm2, %v7744_v1  ;;  %v1021_v4 = vadd.f32 %v7778_v50, %v985_v2  ;;  %v879_v9 = vpop.f32.mrf.mxu1  ;;  %7962 = vmatprep.mubr.msk.bf16.mxu0 %vm409_vm1, %v8871_v31  ;;  %v3087_v1 = vld [vmem:[%s8592_s22 + $0xb5] sm:$0xff]  ;;  %v3088_v2 = vld [vmem:[%s8592_s22 + $0xbd] sm:$0xff] }
  0xf5   : > { %v566_v12 = vpop.f32.mrf.mxu0  ;;  %v983_v13 = vld [vmem:[#allocation2 + $0x60] sm:$0xff] }
  0xf6   : > { %1057 = vst.msk [vmem:[#allocation2 + $0x70] sm:$0xff] %vm330_vm2, %v1021_v4  ;;  %661 = vst.msk [vmem:[#allocation2 + $0x80] sm:$0xff] %vm330_vm2, %v566_v12  ;;  %v1019_v19 = vadd.f32 %v983_v13, %v876_v57  ;;  %v7782_v14 = vpop.f32.mrf.mxu1  ;;  %7997 = vmatmul.mubr.msk.bf16.gmra.mxu1 %vm409_vm1, %v3108_v0  ;;  %v3113_v57 = vpack.c.bf16 %v3086_v49, %v3085_v48  ;;  %v3089_v4 = vld [vmem:[%s8592_s22 + $0xc5] sm:$0xff] }
  0xf7   : > { %v7745_v15 = vpop.f32.mrf.mxu0  ;;  %v986_v10 = vld [vmem:[#allocation2 + $0x78] sm:$0xff]  ;;  %8000 = vmatprep.mubr.msk.bf16.mxu1 %vm409_vm1, %v3109_v8 }
  0xf8   : > { %1055 = vst.msk [vmem:[#allocation2 + $0x60] sm:$0xff] %vm330_vm2, %v1019_v19  ;;  %664 = vst.msk [vmem:[#allocation2 + $0x98] sm:$0xff] %vm330_vm2, %v7745_v15  ;;  %v1022_v31 = vadd.f32 %v7779_v63, %v986_v10  ;;  %v892_v23 = vpop.f32.mrf.mxu1  ;;  %v3114_v15 = vpack.c.bf16 %v3088_v2, %v3087_v1 }
  0xf9   : > { %v569_v26 = vpop.f32.mrf.mxu0  ;;  %v984_v27 = vld [vmem:[#allocation2 + $0x68] sm:$0xff] }
  0xfa   : > { %1058 = vst.msk [vmem:[#allocation2 + $0x78] sm:$0xff] %vm330_vm2, %v1022_v31  ;;  %662 = vst.msk [vmem:[#allocation2 + $0x88] sm:$0xff] %vm330_vm2, %v569_v26  ;;  %v1020_v28 = vadd.f32 %v984_v27, %v879_v9  ;;  %v7783_v6 = vpop.f32.mrf.mxu1  ;;  %v3090_v9 = vld [vmem:[%s8592_s22 + $0xcd] sm:$0xff] }
  0xfb   : > { %v7748_v30 = vpop.f32.mrf.mxu0  ;;  %v989_v33 = vld [vmem:[#allocation2 + $0x90] sm:$0xff]  ;;  %7963 = vmatmul.mubr.msk.bf16.gmra.mxu0 %vm409_vm1, %v8874_v32  ;;  %v3115_v20 = vpack.c.bf16 %v3090_v9, %v3089_v4  ;;  %v1369_v4 = vld [vmem:[#allocation2] sm:$0xff] }
  0xfc   : > { %1056 = vst.msk [vmem:[#allocation2 + $0x68] sm:$0xff] %vm330_vm2, %v1020_v28  ;;  %667 = vst.msk [vmem:[#allocation2 + $0xb0] sm:$0xff] %vm330_vm2, %v7748_v30  ;;  %v1025_v35 = vadd.f32 %v7782_v14, %v989_v33  ;;  %v895_v36 = vpop.f32.mrf.mxu1  ;;  %7966 = vmatprep.mubr.msk.bf16.mxu0 %vm409_vm1, %v8889_v43  ;;  %v3093_v33 = vld [vmem:[%s8592_s22 + $0xe5] sm:$0xff] }
  0xfd   : > { %v582_v37 = vpop.f32.mrf.mxu0  ;;  %v987_v38 = vld [vmem:[#allocation2 + $0x80] sm:$0xff] }
  0xfe   : > { %1061 = vst.msk [vmem:[#allocation2 + $0x90] sm:$0xff] %vm330_vm2, %v1025_v35  ;;  %665 = vst.msk [vmem:[#allocation2 + $0xa0] sm:$0xff] %vm330_vm2, %v582_v37  ;;  %v1023_v32 = vadd.f32 %v987_v38, %v892_v23  ;;  %v7786_v39 = vpop.f32.mrf.mxu1  ;;  %8001 = vmatmul.mubr.msk.bf16.gmra.mxu1 %vm409_vm1, %v3110_v29  ;;  %v3092_v29 = vld [vmem:[%s8592_s22 + $0xdd] sm:$0xff] }
  0xff   : > { %v7749_v40 = vpop.f32.mrf.mxu0  ;;  %v990_v42 = vld [vmem:[#allocation2 + $0x98] sm:$0xff]  ;;  %8004 = vmatprep.mubr.msk.bf16.mxu1 %vm409_vm1, %v3111_v34  ;;  %v3094_v34 = vld [vmem:[%s8592_s22 + $0xed] sm:$0xff] }
 0x100   : > { %1059 = vst.msk [vmem:[#allocation2 + $0x80] sm:$0xff] %vm330_vm2, %v1023_v32  ;;  %668 = vst.msk [vmem:[#allocation2 + $0xb8] sm:$0xff] %vm330_vm2, %v7749_v40  ;;  %v1026_v43 = vadd.f32 %v7783_v6, %v990_v42  ;;  %v908_v47 = vpop.f32.mrf.mxu1  ;;  %v3091_v6 = vld [vmem:[%s8592_s22 + $0xd5] sm:$0xff]  ;;  %v3117_v42 = vpack.c.bf16 %v3094_v34, %v3093_v33 }
 0x101   : > { %v585_v7 = vpop.f32.mrf.mxu0  ;;  %v988_v50 = vld [vmem:[#allocation2 + $0x88] sm:$0xff]  ;;  %v3116_v32 = vpack.c.bf16 %v3092_v29, %v3091_v6 }
 0x102   : > { %1062 = vst.msk [vmem:[#allocation2 + $0x98] sm:$0xff] %vm330_vm2, %v1026_v43  ;;  %666 = vst.msk [vmem:[#allocation2 + $0xa8] sm:$0xff] %vm330_vm2, %v585_v7  ;;  %v1024_v51 = vadd.f32 %v988_v50, %v895_v36  ;;  %v7787_v52 = vpop.f32.mrf.mxu1  ;;  %v3095_v50 = vld [vmem:[%s8592_s22 + $0xf5] sm:$0xff] }
 0x103   : > { %v7752_v54 = vpop.f32.mrf.mxu0  ;;  %v993_v18 = vld [vmem:[#allocation2 + $0xb0] sm:$0xff]  ;;  %7967 = vmatmul.mubr.msk.bf16.gmra.mxu0 %vm409_vm1, %v8892_v44 }
 0x104   : > { %1060 = vst.msk [vmem:[#allocation2 + $0x88] sm:$0xff] %vm330_vm2, %v1024_v51  ;;  %671 = vst.msk [vmem:[#allocation2 + $0xd0] sm:$0xff] %vm330_vm2, %v7752_v54  ;;  %v1029_v58 = vadd.f32 %v7786_v39, %v993_v18  ;;  %v911_v59 = vpop.f32.mrf.mxu1  ;;  %7970 = vmatprep.mubr.msk.bf16.mxu0 %vm409_vm1, %v8907_v55  ;;  %v3096_v51 = vld [vmem:[%s8592_s22 + $0xfd] sm:$0xff]  ;;  %v3098_v54 = vld [vmem:[%s8592_s22 + $0x10d] sm:$0xff] }
 0x105   : > { %v598_v60 = vpop.f32.mrf.mxu0  ;;  %v991_v61 = vld [vmem:[#allocation2 + $0xa0] sm:$0xff] }
 0x106   : > { %1065 = vst.msk [vmem:[#allocation2 + $0xb0] sm:$0xff] %vm330_vm2, %v1029_v58  ;;  %669 = vst.msk [vmem:[#allocation2 + $0xc0] sm:$0xff] %vm330_vm2, %v598_v60  ;;  %v1027_v44 = vadd.f32 %v991_v61, %v908_v47  ;;  %v7790_v62 = vpop.f32.mrf.mxu1  ;;  %8005 = vmatmul.mubr.msk.bf16.gmra.mxu1 %vm409_vm1, %v3112_v53  ;;  %v3097_v53 = vld [vmem:[%s8592_s22 + $0x105] sm:$0xff]  ;;  %v3118_v60 = vpack.c.bf16 %v3096_v51, %v3095_v50 }
 0x107   : > { %v7753_v63 = vpop.f32.mrf.mxu0  ;;  %v994_v0 = vld [vmem:[#allocation2 + $0xb8] sm:$0xff]  ;;  %8008 = vmatprep.mubr.msk.bf16.mxu1 %vm409_vm1, %v3113_v57 }
 0x108   : > { %1063 = vst.msk [vmem:[#allocation2 + $0xa0] sm:$0xff] %vm330_vm2, %v1027_v44  ;;  %672 = vst.msk [vmem:[#allocation2 + $0xd8] sm:$0xff] %vm330_vm2, %v7753_v63  ;;  %v1030_v55 = vadd.f32 %v7787_v52, %v994_v0  ;;  %v924_v8 = vpop.f32.mrf.mxu1  ;;  %v3119_v63 = vpack.c.bf16 %v3098_v54, %v3097_v53 }
 0x109   : > { %v601_v12 = vpop.f32.mrf.mxu0  ;;  %v992_v13 = vld [vmem:[#allocation2 + $0xa8] sm:$0xff] }
 0x10a   : > { %1066 = vst.msk [vmem:[#allocation2 + $0xb8] sm:$0xff] %vm330_vm2, %v1030_v55  ;;  %670 = vst.msk [vmem:[#allocation2 + $0xc8] sm:$0xff] %vm330_vm2, %v601_v12  ;;  %v1028_v19 = vadd.f32 %v992_v13, %v911_v59  ;;  %v7791_v14 = vpop.f32.mrf.mxu1  ;;  %v3099_v13 = vld [vmem:[%s8592_s22 + $0x115] sm:$0xff] }
 0x10b   : > { %v7756_v10 = vpop.f32.mrf.mxu0  ;;  %v997_v16 = vld [vmem:[#allocation2 + $0xd0] sm:$0xff]  ;;  %7971 = vmatmul.mubr.msk.bf16.gmra.mxu0 %vm409_vm1, %v8910_v56 }
 0x10c   : > { %1064 = vst.msk [vmem:[#allocation2 + $0xa8] sm:$0xff] %vm330_vm2, %v1028_v19  ;;  %675 = vst.msk [vmem:[#allocation2 + $0xf0] sm:$0xff] %vm330_vm2, %v7756_v10  ;;  %v1033_v31 = vadd.f32 %v7790_v62, %v997_v16  ;;  %v927_v23 = vpop.f32.mrf.mxu1  ;;  %7974 = vmatprep.mubr.msk.bf16.mxu0 %vm409_vm1, %v8925_v3  ;;  %v1371_v62 = vld [vmem:[#allocation2 + $0x10] sm:$0xff] }
 0x10d   : > { %v614_v24 = vpop.f32.mrf.mxu0  ;;  %v995_v25 = vld [vmem:[#allocation2 + $0xc0] sm:$0xff] }
 0x10e   : > { %1069 = vst.msk [vmem:[#allocation2 + $0xd0] sm:$0xff] %vm330_vm2, %v1033_v31  ;;  %673 = vst.msk [vmem:[#allocation2 + $0xe0] sm:$0xff] %vm330_vm2, %v614_v24  ;;  %v1031_v56 = vadd.f32 %v995_v25, %v924_v8  ;;  %v7794_v26 = vpop.f32.mrf.mxu1  ;;  %8009 = vmatmul.mubr.msk.bf16.gmra.mxu1 %vm409_vm1, %v3114_v15  ;;  %v1372_v15 = vld [vmem:[#allocation2 + $0x18] sm:$0xff]  ;;  %v3101_v31 = vld [vmem:[%s8592_s22 + $0x125] sm:$0xff] }
 0x10f   : > { %v7757_v27 = vpop.f32.mrf.mxu0  ;;  %v998_v28 = vld [vmem:[#allocation2 + $0xd8] sm:$0xff]  ;;  %8012 = vmatprep.mubr.msk.bf16.mxu1 %vm409_vm1, %v3115_v20 }
 0x110   : > { %1067 = vst.msk [vmem:[#allocation2 + $0xc0] sm:$0xff] %vm330_vm2, %v1031_v56  ;;  %676 = vst.msk [vmem:[#allocation2 + $0xf8] sm:$0xff] %vm330_vm2, %v7757_v27  ;;  %v1034_v3 = vadd.f32 %v7791_v14, %v998_v28  ;;  %v940_v30 = vpop.f32.mrf.mxu1  ;;  %v1370_v56 = vld [vmem:[#allocation2 + $0x8] sm:$0xff] }
 0x111   : > { %v617_v35 = vpop.f32.mrf.mxu0  ;;  %v996_v36 = vld [vmem:[#allocation2 + $0xc8] sm:$0xff] }
 0x112   : > { %1070 = vst.msk [vmem:[#allocation2 + $0xd8] sm:$0xff] %vm330_vm2, %v1034_v3  ;;  %674 = vst.msk [vmem:[#allocation2 + $0xe8] sm:$0xff] %vm330_vm2, %v617_v35  ;;  %v1032_v37 = vadd.f32 %v996_v36, %v927_v23  ;;  %v7795_v38 = vpop.f32.mrf.mxu1  ;;  %v3102_v23 = vld [vmem:[%s8592_s22 + $0x12d] sm:$0xff]  ;;  %v2706_v36 = vld [vmem:[%s8592_s22 + $0x13c] sm:$0xff] }
 0x113   : > { %v7760_v39 = vpop.f32.mrf.mxu0  ;;  %v1001_v40 = vld [vmem:[#allocation2 + $0xf0] sm:$0xff]  ;;  %7975 = vmatmul.mubr.msk.bf16.gmra.mxu0 %vm409_vm1, %v8928_v5 }
 0x114   : > { %1068 = vst.msk [vmem:[#allocation2 + $0xc8] sm:$0xff] %vm330_vm2, %v1032_v37  ;;  %679 = vst.msk [vmem:[#allocation2 + $0x110] sm:$0xff] %vm330_vm2, %v7760_v39  ;;  %v1037_v45 = vadd.f32 %v7794_v26, %v1001_v40  ;;  %v943_v21 = vpop.f32.mrf.mxu1  ;;  %7978 = vmatprep.mubr.msk.bf16.mxu0 %vm409_vm1, %v8943_v17  ;;  %v1375_v3 = vld [vmem:[#allocation2 + $0x30] sm:$0xff]  ;;  %v3467_v37 = vld [vmem:[%s8592_s22 + $0x26] sm:$0xff] }
 0x115   : > { %v630_v43 = vpop.f32.mrf.mxu0  ;;  %v999_v47 = vld [vmem:[#allocation2 + $0xe0] sm:$0xff]  ;;  %v2705_v35 = vld [vmem:[%s8592_s22 + $0x134] sm:$0xff] }
 0x116   : > { %1073 = vst.msk [vmem:[#allocation2 + $0xf0] sm:$0xff] %vm330_vm2, %v1037_v45  ;;  %677 = vst.msk [vmem:[#allocation2 + $0x100] sm:$0xff] %vm330_vm2, %v630_v43  ;;  %v1035_v5 = vadd.f32 %v999_v47, %v940_v30  ;;  %v7798_v48 = vpop.f32.mrf.mxu1  ;;  %8013 = vmatmul.mubr.msk.bf16.gmra.mxu1 %vm409_vm1, %v3116_v32  ;;  %v3121_v30 = vpack.c.bf16 %v3102_v23, %v3101_v31  ;;  %v1373_v32 = vld [vmem:[#allocation2 + $0x20] sm:$0xff]  ;;  %v3468_v40 = vld [vmem:[%s8592_s22 + $0x2e] sm:$0xff] }
 0x117   : > { %v7761_v49 = vpop.f32.mrf.mxu0  ;;  %v1002_v7 = vld [vmem:[#allocation2 + $0xf8] sm:$0xff]  ;;  %8016 = vmatprep.mubr.msk.bf16.mxu1 %vm409_vm1, %v3117_v42  ;;  %v3503_v51 = vpack.c.bf16 %v3468_v40, %v3467_v37 }
 0x118   : > { %1071 = vst.msk [vmem:[#allocation2 + $0xe0] sm:$0xff] %vm330_vm2, %v1035_v5  ;;  %680 = vst.msk [vmem:[#allocation2 + $0x118] sm:$0xff] %vm330_vm2, %v7761_v49  ;;  %v1038_v17 = vadd.f32 %v7795_v38, %v1002_v7  ;;  %v956_v52 = vpop.f32.mrf.mxu1  ;;  %v1376_v47 = vld [vmem:[#allocation2 + $0x38] sm:$0xff]  ;;  %v2724_v5 = vpack.c.bf16 %v2706_v36, %v2705_v35  ;;  %v3475_v36 = vld [vmem:[%s8592_s22 + $0x66] sm:$0xff] }
 0x119   : > { %v633_v18 = vpop.f32.mrf.mxu0  ;;  %v1000_v57 = vld [vmem:[#allocation2 + $0xe8] sm:$0xff]  ;;  %v3474_v35 = vld [vmem:[%s8592_s22 + $0x5e] sm:$0xff] }
 0x11a   : > { %1074 = vst.msk [vmem:[#allocation2 + $0xf8] sm:$0xff] %vm330_vm2, %v1038_v17  ;;  %678 = vst.msk [vmem:[#allocation2 + $0x108] sm:$0xff] %vm330_vm2, %v633_v18  ;;  %v1036_v58 = vadd.f32 %v1000_v57, %v943_v21  ;;  %v7799_v59 = vpop.f32.mrf.mxu1  ;;  %v3103_v21 = vld [vmem:[%s8592_s22 + $0x135] sm:$0xff] }
 0x11b   : > { %v1005_v61 = vld [vmem:[#allocation2 + $0x110] sm:$0xff]  ;;  %v7804_v44 = vpop.f32.mrf.mxu0  ;;  %7979 = vmatmul.mubr.msk.bf16.gmra.mxu0 %vm409_vm1, %v8946_v22 }
 0x11c   : > { %1072 = vst.msk [vmem:[#allocation2 + $0xe8] sm:$0xff] %vm330_vm2, %v1036_v58  ;;  %v1041_v0 = vadd.f32 %v7798_v48, %v1005_v61  ;;  %v1407_v1 = vadd.f32 %v7804_v44, %v1371_v62  ;;  %v959_v2 = vpop.f32.mrf.mxu1  ;;  %7982 = vmatprep.mubr.msk.bf16.mxu0 %vm409_vm1, %v8965_v41  ;;  %v3100_v41 = vld [vmem:[%s8592_s22 + $0x11d] sm:$0xff] }
 0x11d   : > { %v1003_v55 = vld [vmem:[#allocation2 + $0x100] sm:$0xff]  ;;  %v1226_v8 = vpop.f32.mrf.mxu0  ;;  %v3120_v6 = vpack.c.bf16 %v3100_v41, %v3099_v13 }
 0x11e   : > { %1077 = vst.msk [vmem:[#allocation2 + $0x110] sm:$0xff] %vm330_vm2, %v1041_v0  ;;  %1443 = vst.msk [vmem:[#allocation2 + $0x10] sm:$0xff] %vm330_vm2, %v1407_v1  ;;  %v1039_v22 = vadd.f32 %v1003_v55, %v956_v52  ;;  %v1405_v9 = vadd.f32 %v1369_v4, %v1226_v8  ;;  %v7842_v12 = vpop.f32.mrf.mxu1  ;;  %8017 = vmatmul.mubr.msk.bf16.gmra.mxu1 %vm409_vm1, %v3118_v60  ;;  %v3104_v48 = vld [vmem:[%s8592_s22 + $0x13d] sm:$0xff]  ;;  %v1374_v52 = vld [vmem:[#allocation2 + $0x28] sm:$0xff] }
 0x11f   : > { %v1006_v19 = vld [vmem:[#allocation2 + $0x118] sm:$0xff]  ;;  %v7805_v14 = vpop.f32.mrf.mxu0  ;;  %8020 = vmatprep.mubr.msk.bf16.mxu1 %vm409_vm1, %v3119_v63  ;;  %v3122_v58 = vpack.c.bf16 %v3104_v48, %v3103_v21  ;;  %v1379_v60 = vld [vmem:[#allocation2 + $0x50] sm:$0xff]  ;;  %v1377_v8 = vld [vmem:[#allocation2 + $0x40] sm:$0xff] }
 0x120   : > { %1075 = vst.msk [vmem:[#allocation2 + $0x100] sm:$0xff] %vm330_vm2, %v1039_v22  ;;  %1441 = vst.msk [vmem:[#allocation2] sm:$0xff] %vm330_vm2, %v1405_v9  ;;  %v1042_v10 = vadd.f32 %v7799_v59, %v1006_v19  ;;  %v1408_v16 = vadd.f32 %v7805_v14, %v1372_v15  ;;  %v1624_v20 = vpop.f32.mrf.mxu1  ;;  %v3469_v0 = vld [vmem:[%s8592_s22 + $0x36] sm:$0xff]  ;;  %v3470_v1 = vld [vmem:[%s8592_s22 + $0x3e] sm:$0xff] }
 0x121   : > { %v1004_v24 = vld [vmem:[#allocation2 + $0x108] sm:$0xff]  ;;  %v1229_v25 = vpop.f32.mrf.mxu0  ;;  %v1380_v14 = vld [vmem:[#allocation2 + $0x58] sm:$0xff]  ;;  %v3504_v41 = vpack.c.bf16 %v3470_v1, %v3469_v0  ;;  %v1385_v0 = vld [vmem:[#allocation2 + $0x80] sm:$0xff] }
 0x122   : > { %1078 = vst.msk [vmem:[#allocation2 + $0x118] sm:$0xff] %vm330_vm2, %v1042_v10  ;;  %1444 = vst.msk [vmem:[#allocation2 + $0x18] sm:$0xff] %vm330_vm2, %v1408_v16  ;;  %v1040_v26 = vadd.f32 %v1004_v24, %v959_v2  ;;  %v1406_v27 = vadd.f32 %v1370_v56, %v1229_v25  ;;  %v7843_v28 = vpop.f32.mrf.mxu1  ;;  %v3471_v2 = vld [vmem:[%s8592_s22 + $0x46] sm:$0xff]  ;;  %v3472_v22 = vld [vmem:[%s8592_s22 + $0x4e] sm:$0xff] }
 0x123   : > { %v7808_v29 = vpop.f32.mrf.mxu0  ;;  %7983 = vmatmul.mubr.msk.bf16.gmra.mxu0 %vm409_vm1, %v8968_v46  ;;  %v3505_v31 = vpack.c.bf16 %v3472_v22, %v3471_v2  ;;  %v1378_v24 = vld [vmem:[#allocation2 + $0x48] sm:$0xff]  ;;  %v1384_v21 = vld [vmem:[#allocation2 + $0x78] sm:$0xff] }
 0x124   : > { %1076 = vst.msk [vmem:[#allocation2 + $0x108] sm:$0xff] %vm330_vm2, %v1040_v26  ;;  %1442 = vst.msk [vmem:[#allocation2 + $0x8] sm:$0xff] %vm330_vm2, %v1406_v27  ;;  %v1411_v33 = vadd.f32 %v7808_v29, %v1375_v3  ;;  %7986 = vmatprep.mubr.msk.bf16.mxu0 %vm409_vm1, %v8988_v11  ;;  %v1627_v34 = vpop.f32.mrf.mxu1  ;;  %v3480_v2 = vld [vmem:[%s8592_s22 + $0x8e] sm:$0xff] }
 0x125   : > { %v1242_v38 = vpop.f32.mrf.mxu0  ;;  %v1769_v39 = vld [vmem:[#allocation2 + $0x10] sm:$0xff] }
 0x126   : > { %1447 = vst.msk [vmem:[#allocation2 + $0x30] sm:$0xff] %vm330_vm2, %v1411_v33  ;;  %v1409_v46 = vadd.f32 %v1373_v32, %v1242_v38  ;;  %v1805_v42 = vadd.f32 %v7842_v12, %v1769_v39  ;;  %v7846_v45 = vpop.f32.mrf.mxu1  ;;  %8021 = vmatmul.mubr.msk.bf16.gmra.mxu1 %vm409_vm1, %v3120_v6  ;;  %v1383_v6 = vld [vmem:[#allocation2 + $0x70] sm:$0xff]  ;;  %v1381_v38 = vld [vmem:[#allocation2 + $0x60] sm:$0xff] }
 0x127   : > { %v7809_v43 = vpop.f32.mrf.mxu0  ;;  %v1767_v11 = vld [vmem:[#allocation2] sm:$0xff]  ;;  %8024 = vmatprep.mubr.msk.bf16.mxu1 %vm409_vm1, %v3121_v30  ;;  %v3476_v39 = vld [vmem:[%s8592_s22 + $0x6e] sm:$0xff] }
 0x128   : > { %1445 = vst.msk [vmem:[#allocation2 + $0x20] sm:$0xff] %vm330_vm2, %v1409_v46  ;;  %1841 = vst.msk [vmem:[#allocation2 + $0x10] sm:$0xff] %vm330_vm2, %v1805_v42  ;;  %v1412_v49 = vadd.f32 %v7809_v43, %v1376_v47  ;;  %v1803_v7 = vadd.f32 %v1767_v11, %v1624_v20  ;;  %v1640_v50 = vpop.f32.mrf.mxu1 }
 0x129   : > { %v1245_v17 = vpop.f32.mrf.mxu0  ;;  %v1770_v53 = vld [vmem:[#allocation2 + $0x18] sm:$0xff] }
 0x12a   : > { %1448 = vst.msk [vmem:[#allocation2 + $0x38] sm:$0xff] %vm330_vm2, %v1412_v49  ;;  %1839 = vst.msk [vmem:[#allocation2] sm:$0xff] %vm330_vm2, %v1803_v7  ;;  %v1410_v54 = vadd.f32 %v1374_v52, %v1245_v17  ;;  %v1806_v18 = vadd.f32 %v7843_v28, %v1770_v53  ;;  %v7847_v57 = vpop.f32.mrf.mxu1  ;;  %v3507_v49 = vpack.c.bf16 %v3476_v39, %v3475_v36  ;;  %v3484_v36 = vld [vmem:[%s8592_s22 + $0xae] sm:$0xff] }
 0x12b   : > { %v7812_v59 = vpop.f32.mrf.mxu0  ;;  %v1768_v61 = vld [vmem:[#allocation2 + $0x8] sm:$0xff]  ;;  %7987 = vmatmul.mubr.msk.bf16.gmra.mxu0 %vm409_vm1, %v2724_v5 }
 0x12c   : > { %1446 = vst.msk [vmem:[#allocation2 + $0x28] sm:$0xff] %vm330_vm2, %v1410_v54  ;;  %1842 = vst.msk [vmem:[#allocation2 + $0x18] sm:$0xff] %vm330_vm2, %v1806_v18  ;;  %v1415_v44 = vadd.f32 %v7812_v59, %v1379_v60  ;;  %v1804_v62 = vadd.f32 %v1768_v61, %v1627_v34  ;;  %8030 = vmatprep.mubr.msk.bf16.mxu0 %vm409_vm1, %v3503_v51  ;;  %v1643_v63 = vpop.f32.mrf.mxu1  ;;  %v3473_v34 = vld [vmem:[%s8592_s22 + $0x56] sm:$0xff] }
 0x12d   : > { %v1258_v55 = vpop.f32.mrf.mxu0  ;;  %v1773_v4 = vld [vmem:[#allocation2 + $0x30] sm:$0xff]  ;;  %v3506_v47 = vpack.c.bf16 %v3474_v35, %v3473_v34  ;;  %v1389_v34 = vld [vmem:[#allocation2 + $0xa0] sm:$0xff] }
 0x12e   : > { %1451 = vst.msk [vmem:[#allocation2 + $0x50] sm:$0xff] %vm330_vm2, %v1415_v44  ;;  %1840 = vst.msk [vmem:[#allocation2 + $0x8] sm:$0xff] %vm330_vm2, %v1804_v62  ;;  %v1413_v9 = vadd.f32 %v1377_v8, %v1258_v55  ;;  %v1809_v12 = vadd.f32 %v7846_v45, %v1773_v4  ;;  %v7850_v13 = vpop.f32.mrf.mxu1  ;;  %8025 = vmatmul.mubr.msk.bf16.gmra.mxu1 %vm409_vm1, %v3122_v58  ;;  %v1387_v18 = vld [vmem:[#allocation2 + $0x90] sm:$0xff]  ;;  %v3478_v44 = vld [vmem:[%s8592_s22 + $0x7e] sm:$0xff] }
 0x12f   : > { %v7813_v19 = vpop.f32.mrf.mxu0  ;;  %v1771_v15 = vld [vmem:[#allocation2 + $0x20] sm:$0xff]  ;;  %v3477_v61 = vld [vmem:[%s8592_s22 + $0x76] sm:$0xff] }
 0x130   : > { %1449 = vst.msk [vmem:[#allocation2 + $0x40] sm:$0xff] %vm330_vm2, %v1413_v9  ;;  %1845 = vst.msk [vmem:[#allocation2 + $0x30] sm:$0xff] %vm330_vm2, %v1809_v12  ;;  %v1416_v10 = vadd.f32 %v7813_v19, %v1380_v14  ;;  %v1807_v16 = vadd.f32 %v1771_v15, %v1640_v50  ;;  %v1656_v20 = vpop.f32.mrf.mxu1  ;;  %v1382_v50 = vld [vmem:[#allocation2 + $0x68] sm:$0xff]  ;;  %v1388_v9 = vld [vmem:[#allocation2 + $0x98] sm:$0xff] }
 0x131   : > { %v1261_v23 = vpop.f32.mrf.mxu0  ;;  %v1774_v25 = vld [vmem:[#allocation2 + $0x38] sm:$0xff]  ;;  %v3479_v62 = vld [vmem:[%s8592_s22 + $0x86] sm:$0xff] }
 0x132   : > { %1452 = vst.msk [vmem:[#allocation2 + $0x58] sm:$0xff] %vm330_vm2, %v1416_v10  ;;  %1843 = vst.msk [vmem:[#allocation2 + $0x20] sm:$0xff] %vm330_vm2, %v1807_v16  ;;  %v1414_v56 = vadd.f32 %v1378_v24, %v1261_v23  ;;  %v1810_v26 = vadd.f32 %v7847_v57, %v1774_v25  ;;  %v7851_v27 = vpop.f32.mrf.mxu1  ;;  %v1386_v16 = vld [vmem:[#allocation2 + $0x88] sm:$0xff] }
 0x133   : > { %v7816_v28 = vpop.f32.mrf.mxu0  ;;  %v1772_v29 = vld [vmem:[#allocation2 + $0x28] sm:$0xff]  ;;  %8031 = vmatmul.mubr.msk.bf16.vlgmr.msra.gmra.mxu0 %vm409_vm1, %v3504_v41  ;;  %v3509_v41 = vpack.c.bf16 %v3480_v2, %v3479_v62 }
 0x134   : > { %1450 = vst.msk [vmem:[#allocation2 + $0x48] sm:$0xff] %vm330_vm2, %v1414_v56  ;;  %1846 = vst.msk [vmem:[#allocation2 + $0x38] sm:$0xff] %vm330_vm2, %v1810_v26  ;;  %v1419_v3 = vadd.f32 %v7816_v28, %v1383_v6  ;;  %v1808_v30 = vadd.f32 %v1772_v29, %v1643_v63  ;;  %8034 = vmatprep.mubr.msk.bf16.mxu0 %vm409_vm1, %v3505_v31  ;;  %v1659_v33 = vpop.f32.mrf.mxu1  ;;  %v1391_v56 = vld [vmem:[#allocation2 + $0xb0] sm:$0xff] }
 0x135   : > { %v1274_v37 = vpop.f32.mrf.mxu0  ;;  %v1777_v32 = vld [vmem:[#allocation2 + $0x50] sm:$0xff] }
 0x136   : > { %1455 = vst.msk [vmem:[#allocation2 + $0x70] sm:$0xff] %vm330_vm2, %v1419_v3  ;;  %1844 = vst.msk [vmem:[#allocation2 + $0x28] sm:$0xff] %vm330_vm2, %v1808_v30  ;;  %v1417_v40 = vadd.f32 %v1381_v38, %v1274_v37  ;;  %v1813_v46 = vadd.f32 %v7850_v13, %v1777_v32  ;;  %v7854_v42 = vpop.f32.mrf.mxu1  ;;  %v3508_v13 = vpack.c.bf16 %v3478_v44, %v3477_v61  ;;  %v3481_v29 = vld [vmem:[%s8592_s22 + $0x96] sm:$0xff]  ;;  %v3482_v3 = vld [vmem:[%s8592_s22 + $0x9e] sm:$0xff] }
 0x137   : > { %v7817_v45 = vpop.f32.mrf.mxu0  ;;  %v1775_v43 = vld [vmem:[#allocation2 + $0x40] sm:$0xff]  ;;  %v3488_v62 = vld [vmem:[%s8592_s22 + $0xce] sm:$0xff] }
 0x138   : > { %1453 = vst.msk [vmem:[#allocation2 + $0x60] sm:$0xff] %vm330_vm2, %v1417_v40  ;;  %1849 = vst.msk [vmem:[#allocation2 + $0x50] sm:$0xff] %vm330_vm2, %v1813_v46  ;;  %v1420_v11 = vadd.f32 %v7817_v45, %v1384_v21  ;;  %v1811_v5 = vadd.f32 %v1775_v43, %v1656_v20  ;;  %v1672_v48 = vpop.f32.mrf.mxu1  ;;  %v3483_v30 = vld [vmem:[%s8592_s22 + $0xa6] sm:$0xff]  ;;  %v1392_v40 = vld [vmem:[#allocation2 + $0xb8] sm:$0xff] }
 0x139   : > { %v1277_v7 = vpop.f32.mrf.mxu0  ;;  %v1778_v51 = vld [vmem:[#allocation2 + $0x58] sm:$0xff]  ;;  %v1393_v61 = vld [vmem:[#allocation2 + $0xc0] sm:$0xff] }
 0x13a   : > { %1456 = vst.msk [vmem:[#allocation2 + $0x78] sm:$0xff] %vm330_vm2, %v1420_v11  ;;  %1847 = vst.msk [vmem:[#allocation2 + $0x40] sm:$0xff] %vm330_vm2, %v1811_v5  ;;  %v1418_v17 = vadd.f32 %v1382_v50, %v1277_v7  ;;  %v1814_v52 = vadd.f32 %v7851_v27, %v1778_v51  ;;  %v7855_v53 = vpop.f32.mrf.mxu1  ;;  %v1390_v5 = vld [vmem:[#allocation2 + $0xa8] sm:$0xff] }
 0x13b   : > { %v7820_v54 = vpop.f32.mrf.mxu0  ;;  %v1776_v57 = vld [vmem:[#allocation2 + $0x48] sm:$0xff]  ;;  %8035 = vmatmul.mubr.msk.bf16.gmra.mxu0 %vm409_vm1, %v3506_v47  ;;  %v3511_v47 = vpack.c.bf16 %v3484_v36, %v3483_v30 }
 0x13c   : > { %1454 = vst.msk [vmem:[#allocation2 + $0x68] sm:$0xff] %vm330_vm2, %v1418_v17  ;;  %1850 = vst.msk [vmem:[#allocation2 + $0x58] sm:$0xff] %vm330_vm2, %v1814_v52  ;;  %v1423_v58 = vadd.f32 %v7820_v54, %v1387_v18  ;;  %v1812_v59 = vadd.f32 %v1776_v57, %v1659_v33  ;;  %8038 = vmatprep.mubr.msk.bf16.mxu0 %vm409_vm1, %v3507_v49  ;;  %v1675_v60 = vpop.f32.mrf.mxu1  ;;  %v1395_v17 = vld [vmem:[#allocation2 + $0xd0] sm:$0xff] }
 0x13d   : > { %v1290_v63 = vpop.f32.mrf.mxu0  ;;  %v1781_v1 = vld [vmem:[#allocation2 + $0x70] sm:$0xff] }
 0x13e   : > { %1459 = vst.msk [vmem:[#allocation2 + $0x90] sm:$0xff] %vm330_vm2, %v1423_v58  ;;  %1848 = vst.msk [vmem:[#allocation2 + $0x48] sm:$0xff] %vm330_vm2, %v1812_v59  ;;  %v1421_v55 = vadd.f32 %v1385_v0, %v1290_v63  ;;  %v1817_v8 = vadd.f32 %v7854_v42, %v1781_v1  ;;  %v7858_v4 = vpop.f32.mrf.mxu1  ;;  %v3510_v42 = vpack.c.bf16 %v3482_v3, %v3481_v29  ;;  %v3485_v57 = vld [vmem:[%s8592_s22 + $0xb6] sm:$0xff]  ;;  %v3486_v58 = vld [vmem:[%s8592_s22 + $0xbe] sm:$0xff] }
 0x13f   : > { %v7821_v22 = vpop.f32.mrf.mxu0  ;;  %v1779_v12 = vld [vmem:[#allocation2 + $0x60] sm:$0xff]  ;;  %v3492_v30 = vld [vmem:[%s8592_s22 + $0xee] sm:$0xff] }
 0x140   : > { %1457 = vst.msk [vmem:[#allocation2 + $0x80] sm:$0xff] %vm330_vm2, %v1421_v55  ;;  %1853 = vst.msk [vmem:[#allocation2 + $0x70] sm:$0xff] %vm330_vm2, %v1817_v8  ;;  %v1424_v19 = vadd.f32 %v7821_v22, %v1388_v9  ;;  %v1815_v14 = vadd.f32 %v1779_v12, %v1672_v48  ;;  %v1688_v15 = vpop.f32.mrf.mxu1  ;;  %v3487_v59 = vld [vmem:[%s8592_s22 + $0xc6] sm:$0xff]  ;;  %v1396_v55 = vld [vmem:[#allocation2 + $0xd8] sm:$0xff] }
 0x141   : > { %v1293_v10 = vpop.f32.mrf.mxu0  ;;  %v1782_v20 = vld [vmem:[#allocation2 + $0x78] sm:$0xff]  ;;  %v1397_v29 = vld [vmem:[#allocation2 + $0xe0] sm:$0xff] }
 0x142   : > { %1460 = vst.msk [vmem:[#allocation2 + $0x98] sm:$0xff] %vm330_vm2, %v1424_v19  ;;  %1851 = vst.msk [vmem:[#allocation2 + $0x60] sm:$0xff] %vm330_vm2, %v1815_v14  ;;  %v1422_v31 = vadd.f32 %v1386_v16, %v1293_v10  ;;  %v1818_v23 = vadd.f32 %v7855_v53, %v1782_v20  ;;  %v7859_v24 = vpop.f32.mrf.mxu1  ;;  %v1394_v14 = vld [vmem:[#allocation2 + $0xc8] sm:$0xff] }
 0x143   : > { %v7824_v25 = vpop.f32.mrf.mxu0  ;;  %v1780_v26 = vld [vmem:[#allocation2 + $0x68] sm:$0xff]  ;;  %8039 = vmatmul.mubr.msk.bf16.gmra.mxu0 %vm409_vm1, %v3508_v13  ;;  %v3513_v13 = vpack.c.bf16 %v3488_v62, %v3487_v59 }
 0x144   : > { %1458 = vst.msk [vmem:[#allocation2 + $0x88] sm:$0xff] %vm330_vm2, %v1422_v31  ;;  %1854 = vst.msk [vmem:[#allocation2 + $0x78] sm:$0xff] %vm330_vm2, %v1818_v23  ;;  %v1427_v27 = vadd.f32 %v7824_v25, %v1391_v56  ;;  %v1816_v28 = vadd.f32 %v1780_v26, %v1675_v60  ;;  %8042 = vmatprep.mubr.msk.bf16.mxu0 %vm409_vm1, %v3509_v41  ;;  %v1691_v6 = vpop.f32.mrf.mxu1  ;;  %v1399_v31 = vld [vmem:[#allocation2 + $0xf0] sm:$0xff] }
 0x145   : > { %v1306_v33 = vpop.f32.mrf.mxu0  ;;  %v1785_v35 = vld [vmem:[#allocation2 + $0x90] sm:$0xff] }
 0x146   : > { %1463 = vst.msk [vmem:[#allocation2 + $0xb0] sm:$0xff] %vm330_vm2, %v1427_v27  ;;  %1852 = vst.msk [vmem:[#allocation2 + $0x68] sm:$0xff] %vm330_vm2, %v1816_v28  ;;  %v1425_v37 = vadd.f32 %v1389_v34, %v1306_v33  ;;  %v1821_v38 = vadd.f32 %v7858_v4, %v1785_v35  ;;  %v7862_v32 = vpop.f32.mrf.mxu1  ;;  %v3512_v4 = vpack.c.bf16 %v3486_v58, %v3485_v57  ;;  %v3489_v26 = vld [vmem:[%s8592_s22 + $0xd6] sm:$0xff]  ;;  %v3490_v27 = vld [vmem:[%s8592_s22 + $0xde] sm:$0xff] }
 0x147   : > { %v7825_v39 = vpop.f32.mrf.mxu0  ;;  %v1783_v46 = vld [vmem:[#allocation2 + $0x80] sm:$0xff]  ;;  %v3496_v59 = vld [vmem:[%s8592_s22 + $0x10e] sm:$0xff] }
 0x148   : > { %1461 = vst.msk [vmem:[#allocation2 + $0xa0] sm:$0xff] %vm330_vm2, %v1425_v37  ;;  %1857 = vst.msk [vmem:[#allocation2 + $0x90] sm:$0xff] %vm330_vm2, %v1821_v38  ;;  %v1428_v45 = vadd.f32 %v7825_v39, %v1392_v40  ;;  %v1819_v21 = vadd.f32 %v1783_v46, %v1688_v15  ;;  %v1704_v43 = vpop.f32.mrf.mxu1  ;;  %v3491_v28 = vld [vmem:[%s8592_s22 + $0xe6] sm:$0xff]  ;;  %v1400_v37 = vld [vmem:[#allocation2 + $0xf8] sm:$0xff] }
 0x149   : > { %v1309_v11 = vpop.f32.mrf.mxu0  ;;  %v1786_v48 = vld [vmem:[#allocation2 + $0x98] sm:$0xff]  ;;  %v1401_v57 = vld [vmem:[#allocation2 + $0x100] sm:$0xff] }
 0x14a   : > { %1464 = vst.msk [vmem:[#allocation2 + $0xb8] sm:$0xff] %vm330_vm2, %v1428_v45  ;;  %1855 = vst.msk [vmem:[#allocation2 + $0x80] sm:$0xff] %vm330_vm2, %v1819_v21  ;;  %v1426_v49 = vadd.f32 %v1390_v5, %v1309_v11  ;;  %v1822_v7 = vadd.f32 %v7859_v24, %v1786_v48  ;;  %v7863_v50 = vpop.f32.mrf.mxu1  ;;  %v1398_v21 = vld [vmem:[#allocation2 + $0xe8] sm:$0xff] }
 0x14b   : > { %v7828_v51 = vpop.f32.mrf.mxu0  ;;  %v1784_v52 = vld [vmem:[#allocation2 + $0x88] sm:$0xff]  ;;  %8043 = vmatmul.mubr.msk.bf16.gmra.mxu0 %vm409_vm1, %v3510_v42  ;;  %v3515_v42 = vpack.c.bf16 %v3492_v30, %v3491_v28 }
 0x14c   : > { %1462 = vst.msk [vmem:[#allocation2 + $0xa8] sm:$0xff] %vm330_vm2, %v1426_v49  ;;  %1858 = vst.msk [vmem:[#allocation2 + $0x98] sm:$0xff] %vm330_vm2, %v1822_v7  ;;  %v1431_v53 = vadd.f32 %v7828_v51, %v1395_v17  ;;  %v1820_v54 = vadd.f32 %v1784_v52, %v1691_v6  ;;  %8046 = vmatprep.mubr.msk.bf16.mxu0 %vm409_vm1, %v3511_v47  ;;  %v1707_v18 = vpop.f32.mrf.mxu1  ;;  %v1403_v49 = vld [vmem:[#allocation2 + $0x110] sm:$0xff] }
 0x14d   : > { %v1322_v60 = vpop.f32.mrf.mxu0  ;;  %v1789_v44 = vld [vmem:[#allocation2 + $0xb0] sm:$0xff] }
 0x14e   : > { %1467 = vst.msk [vmem:[#allocation2 + $0xd0] sm:$0xff] %vm330_vm2, %v1431_v53  ;;  %1856 = vst.msk [vmem:[#allocation2 + $0x88] sm:$0xff] %vm330_vm2, %v1820_v54  ;;  %v1429_v63 = vadd.f32 %v1393_v61, %v1322_v60  ;;  %v1825_v0 = vadd.f32 %v7862_v32, %v1789_v44  ;;  %v7866_v1 = vpop.f32.mrf.mxu1  ;;  %v3514_v32 = vpack.c.bf16 %v3490_v27, %v3489_v26  ;;  %v3493_v52 = vld [vmem:[%s8592_s22 + $0xf6] sm:$0xff]  ;;  %v3494_v53 = vld [vmem:[%s8592_s22 + $0xfe] sm:$0xff] }
 0x14f   : > { %v7829_v2 = vpop.f32.mrf.mxu0  ;;  %v1787_v8 = vld [vmem:[#allocation2 + $0xa0] sm:$0xff]  ;;  %v3500_v28 = vld [vmem:[%s8592_s22 + $0x12e] sm:$0xff] }
 0x150   : > { %1465 = vst.msk [vmem:[#allocation2 + $0xc0] sm:$0xff] %vm330_vm2, %v1429_v63  ;;  %1861 = vst.msk [vmem:[#allocation2 + $0xb0] sm:$0xff] %vm330_vm2, %v1825_v0  ;;  %v1432_v22 = vadd.f32 %v7829_v2, %v1396_v55  ;;  %v1823_v9 = vadd.f32 %v1787_v8, %v1704_v43  ;;  %v1720_v12 = vpop.f32.mrf.mxu1  ;;  %v3495_v54 = vld [vmem:[%s8592_s22 + $0x106] sm:$0xff]  ;;  %v1404_v63 = vld [vmem:[#allocation2 + $0x118] sm:$0xff] }
 0x151   : > { %v1325_v19 = vpop.f32.mrf.mxu0  ;;  %v1790_v15 = vld [vmem:[#allocation2 + $0xb8] sm:$0xff]  ;;  %v2165_v27 = vld [vmem:[#allocation2] sm:$0xff] }
 0x152   : > { %1468 = vst.msk [vmem:[#allocation2 + $0xd8] sm:$0xff] %vm330_vm2, %v1432_v22  ;;  %1859 = vst.msk [vmem:[#allocation2 + $0xa0] sm:$0xff] %vm330_vm2, %v1823_v9  ;;  %v1430_v41 = vadd.f32 %v1394_v14, %v1325_v19  ;;  %v1826_v10 = vadd.f32 %v7863_v50, %v1790_v15  ;;  %v7867_v16 = vpop.f32.mrf.mxu1  ;;  %v1402_v9 = vld [vmem:[#allocation2 + $0x108] sm:$0xff] }
 0x153   : > { %v7832_v20 = vpop.f32.mrf.mxu0  ;;  %v1788_v23 = vld [vmem:[#allocation2 + $0xa8] sm:$0xff]  ;;  %8047 = vmatmul.mubr.msk.bf16.gmra.mxu0 %vm409_vm1, %v3512_v4  ;;  %v3517_v4 = vpack.c.bf16 %v3496_v59, %v3495_v54 }
 0x154   : > { %1466 = vst.msk [vmem:[#allocation2 + $0xc8] sm:$0xff] %vm330_vm2, %v1430_v41  ;;  %1862 = vst.msk [vmem:[#allocation2 + $0xb8] sm:$0xff] %vm330_vm2, %v1826_v10  ;;  %v1435_v24 = vadd.f32 %v7832_v20, %v1399_v31  ;;  %v1824_v25 = vadd.f32 %v1788_v23, %v1707_v18  ;;  %8050 = vmatprep.mubr.msk.bf16.mxu0 %vm409_vm1, %v3513_v13  ;;  %v1723_v56 = vpop.f32.mrf.mxu1  ;;  %v2167_v10 = vld [vmem:[#allocation2 + $0x10] sm:$0xff] }
 0x155   : > { %v1338_v6 = vpop.f32.mrf.mxu0  ;;  %v1793_v3 = vld [vmem:[#allocation2 + $0xd0] sm:$0xff] }
 0x156   : > { %1471 = vst.msk [vmem:[#allocation2 + $0xf0] sm:$0xff] %vm330_vm2, %v1435_v24  ;;  %1860 = vst.msk [vmem:[#allocation2 + $0xa8] sm:$0xff] %vm330_vm2, %v1824_v25  ;;  %v1433_v33 = vadd.f32 %v1397_v29, %v1338_v6  ;;  %v1829_v34 = vadd.f32 %v7866_v1, %v1793_v3  ;;  %v7870_v35 = vpop.f32.mrf.mxu1  ;;  %v3516_v1 = vpack.c.bf16 %v3494_v53, %v3493_v52  ;;  %v3497_v23 = vld [vmem:[%s8592_s22 + $0x116] sm:$0xff]  ;;  %v3498_v24 = vld [vmem:[%s8592_s22 + $0x11e] sm:$0xff] }
 0x157   : > { %v7833_v36 = vpop.f32.mrf.mxu0  ;;  %v1791_v38 = vld [vmem:[#allocation2 + $0xc0] sm:$0xff] }
 0x158   : > { %1469 = vst.msk [vmem:[#allocation2 + $0xe0] sm:$0xff] %vm330_vm2, %v1433_v33  ;;  %1865 = vst.msk [vmem:[#allocation2 + $0xd0] sm:$0xff] %vm330_vm2, %v1829_v34  ;;  %v1436_v39 = vadd.f32 %v7833_v36, %v1400_v37  ;;  %v1827_v40 = vadd.f32 %v1791_v38, %v1720_v12  ;;  %v1736_v46 = vpop.f32.mrf.mxu1  ;;  %v3499_v25 = vld [vmem:[%s8592_s22 + $0x126] sm:$0xff]  ;;  %v2168_v34 = vld [vmem:[#allocation2 + $0x18] sm:$0xff] }
 0x159   : > { %v1341_v45 = vpop.f32.mrf.mxu0  ;;  %v1794_v43 = vld [vmem:[#allocation2 + $0xd8] sm:$0xff] }
 0x15a   : > { %1472 = vst.msk [vmem:[#allocation2 + $0xf8] sm:$0xff] %vm330_vm2, %v1436_v39  ;;  %1863 = vst.msk [vmem:[#allocation2 + $0xc0] sm:$0xff] %vm330_vm2, %v1827_v40  ;;  %v1434_v47 = vadd.f32 %v1398_v21, %v1341_v45  ;;  %v1830_v11 = vadd.f32 %v7867_v16, %v1794_v43  ;;  %v7871_v5 = vpop.f32.mrf.mxu1 }
 0x15b   : > { %v7836_v48 = vpop.f32.mrf.mxu0  ;;  %v1792_v7 = vld [vmem:[#allocation2 + $0xc8] sm:$0xff]  ;;  %8051 = vmatmul.mubr.msk.bf16.gmra.mxu0 %vm409_vm1, %v3514_v32  ;;  %v3519_v32 = vpack.c.bf16 %v3500_v28, %v3499_v25 }
 0x15c   : > { %1470 = vst.msk [vmem:[#allocation2 + $0xe8] sm:$0xff] %vm330_vm2, %v1434_v47  ;;  %1866 = vst.msk [vmem:[#allocation2 + $0xd8] sm:$0xff] %vm330_vm2, %v1830_v11  ;;  %v1439_v50 = vadd.f32 %v7836_v48, %v1403_v49  ;;  %v1828_v51 = vadd.f32 %v1792_v7, %v1723_v56  ;;  %8054 = vmatprep.mubr.msk.bf16.mxu0 %vm409_vm1, %v3515_v42  ;;  %v1739_v17 = vpop.f32.mrf.mxu1  ;;  %v2171_v11 = vld [vmem:[#allocation2 + $0x30] sm:$0xff]  ;;  %v2174_v28 = vld [vmem:[#allocation2 + $0x48] sm:$0xff] }
 0x15d   : > { %v1354_v18 = vpop.f32.mrf.mxu0  ;;  %v1797_v58 = vld [vmem:[#allocation2 + $0xf0] sm:$0xff] }
 0x15e   : > { %1475 = vst.msk [vmem:[#allocation2 + $0x110] sm:$0xff] %vm330_vm2, %v1439_v50  ;;  %1864 = vst.msk [vmem:[#allocation2 + $0xc8] sm:$0xff] %vm330_vm2, %v1828_v51  ;;  %v1437_v60 = vadd.f32 %v1401_v57, %v1354_v18  ;;  %v1833_v61 = vadd.f32 %v7870_v35, %v1797_v58  ;;  %v7874_v44 = vpop.f32.mrf.mxu1  ;;  %v3518_v35 = vpack.c.bf16 %v3498_v24, %v3497_v23  ;;  %v3501_v7 = vld [vmem:[%s8592_s22 + $0x136] sm:$0xff]  ;;  %v3502_v50 = vld [vmem:[%s8592_s22 + $0x13e] sm:$0xff] }
 0x15f   : > { %v7837_v62 = vpop.f32.mrf.mxu0  ;;  %v1795_v0 = vld [vmem:[#allocation2 + $0xe0] sm:$0xff]  ;;  %v2172_v58 = vld [vmem:[#allocation2 + $0x38] sm:$0xff] }
 0x160   : > { %1473 = vst.msk [vmem:[#allocation2 + $0x100] sm:$0xff] %vm330_vm2, %v1437_v60  ;;  %1869 = vst.msk [vmem:[#allocation2 + $0xf0] sm:$0xff] %vm330_vm2, %v1833_v61  ;;  %v1440_v2 = vadd.f32 %v7837_v62, %v1404_v63  ;;  %v1831_v55 = vadd.f32 %v1795_v0, %v1736_v46  ;;  %v1752_v8 = vpop.f32.mrf.mxu1  ;;  %v2166_v46 = vld [vmem:[#allocation2 + $0x8] sm:$0xff]  ;;  %v3520_v60 = vpack.c.bf16 %v3502_v50, %v3501_v7  ;;  %v2176_v23 = vld [vmem:[#allocation2 + $0x58] sm:$0xff] }
 0x161   : > { %v1357_v22 = vpop.f32.mrf.mxu0  ;;  %v1798_v12 = vld [vmem:[#allocation2 + $0xf8] sm:$0xff]  ;;  %v2170_v0 = vld [vmem:[#allocation2 + $0x28] sm:$0xff] }
 0x162   : > { %1476 = vst.msk [vmem:[#allocation2 + $0x118] sm:$0xff] %vm330_vm2, %v1440_v2  ;;  %1867 = vst.msk [vmem:[#allocation2 + $0xe0] sm:$0xff] %vm330_vm2, %v1831_v55  ;;  %v1438_v13 = vadd.f32 %v1402_v9, %v1357_v22  ;;  %v1834_v19 = vadd.f32 %v7871_v5, %v1798_v12  ;;  %v7875_v14 = vpop.f32.mrf.mxu1  ;;  %v2175_v22 = vld [vmem:[#allocation2 + $0x50] sm:$0xff]  ;;  %v2178_v7 = vld [vmem:[#allocation2 + $0x68] sm:$0xff] }
 0x163   : > { %v1796_v15 = vld [vmem:[#allocation2 + $0xe8] sm:$0xff]  ;;  %v7880_v41 = vpop.f32.mrf.mxu0  ;;  %8055 = vmatmul.mubr.msk.bf16.gmra.mxu0 %vm409_vm1, %v3516_v1 }
 0x164   : > { %1474 = vst.msk [vmem:[#allocation2 + $0x108] sm:$0xff] %vm330_vm2, %v1438_v13  ;;  %1870 = vst.msk [vmem:[#allocation2 + $0xf8] sm:$0xff] %vm330_vm2, %v1834_v19  ;;  %v1832_v16 = vadd.f32 %v1796_v15, %v1739_v17  ;;  %v2203_v20 = vadd.f32 %v7880_v41, %v2167_v10  ;;  %8058 = vmatprep.mubr.msk.bf16.mxu0 %vm409_vm1, %v3517_v4  ;;  %v1755_v31 = vpop.f32.mrf.mxu1  ;;  %v2169_v17 = vld [vmem:[#allocation2 + $0x20] sm:$0xff] }
 0x165   : > { %v1801_v56 = vld [vmem:[#allocation2 + $0x110] sm:$0xff]  ;;  %v2022_v26 = vpop.f32.mrf.mxu0  ;;  %v2173_v15 = vld [vmem:[#allocation2 + $0x40] sm:$0xff] }
 0x166   : > { %1868 = vst.msk [vmem:[#allocation2 + $0xe8] sm:$0xff] %vm330_vm2, %v1832_v16  ;;  %2239 = vst.msk [vmem:[#allocation2 + $0x10] sm:$0xff] %vm330_vm2, %v2203_v20  ;;  %v1837_v6 = vadd.f32 %v7874_v44, %v1801_v56  ;;  %v2201_v29 = vadd.f32 %v2165_v27, %v2022_v26  ;;  %v7918_v3 = vpop.f32.mrf.mxu1 }
 0x167   : > { %v1799_v30 = vld [vmem:[#allocation2 + $0x100] sm:$0xff]  ;;  %v7881_v33 = vpop.f32.mrf.mxu0 }
 0x168   : > { %1873 = vst.msk [vmem:[#allocation2 + $0x110] sm:$0xff] %vm330_vm2, %v1837_v6  ;;  %2237 = vst.msk [vmem:[#allocation2] sm:$0xff] %vm330_vm2, %v2201_v29  ;;  %v1835_v36 = vadd.f32 %v1799_v30, %v1752_v8  ;;  %v2204_v37 = vadd.f32 %v7881_v33, %v2168_v34  ;;  %v2420_v38 = vpop.f32.mrf.mxu1  ;;  %v2179_v34 = vld [vmem:[#allocation2 + $0x70] sm:$0xff] }
 0x169   : > { %v1802_v39 = vld [vmem:[#allocation2 + $0x118] sm:$0xff]  ;;  %v2025_v40 = vpop.f32.mrf.mxu0 }
 0x16a   : > { %1871 = vst.msk [vmem:[#allocation2 + $0x100] sm:$0xff] %vm330_vm2, %v1835_v36  ;;  %2240 = vst.msk [vmem:[#allocation2 + $0x18] sm:$0xff] %vm330_vm2, %v2204_v37  ;;  %v1838_v42 = vadd.f32 %v7875_v14, %v1802_v39  ;;  %v2202_v45 = vadd.f32 %v2166_v46, %v2025_v40  ;;  %v7919_v21 = vpop.f32.mrf.mxu1  ;;  %v2177_v39 = vld [vmem:[#allocation2 + $0x60] sm:$0xff] }
 0x16b   : > { %v1800_v43 = vld [vmem:[#allocation2 + $0x108] sm:$0xff]  ;;  %v7884_v47 = vpop.f32.mrf.mxu0  ;;  %8059 = vmatmul.mubr.msk.bf16.gmra.mxu0 %vm409_vm1, %v3518_v35 }
 0x16c   : > { %1874 = vst.msk [vmem:[#allocation2 + $0x118] sm:$0xff] %vm330_vm2, %v1838_v42  ;;  %2238 = vst.msk [vmem:[#allocation2 + $0x8] sm:$0xff] %vm330_vm2, %v2202_v45  ;;  %v1836_v5 = vadd.f32 %v1800_v43, %v1755_v31  ;;  %v2207_v48 = vadd.f32 %v7884_v47, %v2171_v11  ;;  %8062 = vmatprep.mubr.msk.bf16.mxu0 %vm409_vm1, %v3519_v32  ;;  %v2423_v49 = vpop.f32.mrf.mxu1  ;;  %v2180_v43 = vld [vmem:[#allocation2 + $0x78] sm:$0xff] }
 0x16d   : > { %v2038_v51 = vpop.f32.mrf.mxu0  ;;  %v2565_v52 = vld [vmem:[#allocation2 + $0x10] sm:$0xff] }
 0x16e   : > { %1872 = vst.msk [vmem:[#allocation2 + $0x108] sm:$0xff] %vm330_vm2, %v1836_v5  ;;  %2243 = vst.msk [vmem:[#allocation2 + $0x30] sm:$0xff] %vm330_vm2, %v2207_v48  ;;  %v2205_v53 = vadd.f32 %v2169_v17, %v2038_v51  ;;  %v2601_v54 = vadd.f32 %v7918_v3, %v2565_v52  ;;  %v7922_v18 = vpop.f32.mrf.mxu1 }
 0x16f   : > { %v7885_v57 = vpop.f32.mrf.mxu0  ;;  %v2563_v59 = vld [vmem:[#allocation2] sm:$0xff] }
 0x170   : > { %2241 = vst.msk [vmem:[#allocation2 + $0x20] sm:$0xff] %vm330_vm2, %v2205_v53  ;;  %2637 = vst.msk [vmem:[#allocation2 + $0x10] sm:$0xff] %vm330_vm2, %v2601_v54  ;;  %v2208_v61 = vadd.f32 %v7885_v57, %v2172_v58  ;;  %v2599_v44 = vadd.f32 %v2563_v59, %v2420_v38  ;;  %v2436_v62 = vpop.f32.mrf.mxu1  ;;  %v2183_v54 = vld [vmem:[#allocation2 + $0x90] sm:$0xff] }
 0x171   : > { %v2041_v63 = vpop.f32.mrf.mxu0  ;;  %v2566_v1 = vld [vmem:[#allocation2 + $0x18] sm:$0xff] }
 0x172   : > { %2244 = vst.msk [vmem:[#allocation2 + $0x38] sm:$0xff] %vm330_vm2, %v2208_v61  ;;  %2635 = vst.msk [vmem:[#allocation2] sm:$0xff] %vm330_vm2, %v2599_v44  ;;  %v2206_v2 = vadd.f32 %v2170_v0, %v2041_v63  ;;  %v2602_v55 = vadd.f32 %v7919_v21, %v2566_v1  ;;  %v7923_v8 = vpop.f32.mrf.mxu1  ;;  %v2181_v44 = vld [vmem:[#allocation2 + $0x80] sm:$0xff]  ;;  %v8508_v63 = vmov 0.0  }
 0x173   : > { %v7888_v4 = vpop.f32.mrf.mxu0  ;;  %v2564_v9 = vld [vmem:[#allocation2 + $0x8] sm:$0xff]  ;;  %8063 = vmatmul.mubr.msk.bf16.gmra.mxu0 %vm409_vm1, %v3520_v60  ;;  %8066 = vmatprep.subr.bf16.mxu1 %v8508_v63  ;;  %331 = vst.msk [vmem:[#allocation4] sm:$0xff] %vm330_vm2, %v8508_v63  ;;  %332 = vst.msk [vmem:[#allocation4 + $0x8] sm:$0xff] %vm330_vm2, %v8508_v63 }
 0x174   : > { %2242 = vst.msk [vmem:[#allocation2 + $0x28] sm:$0xff] %vm330_vm2, %v2206_v2  ;;  %2638 = vst.msk [vmem:[#allocation2 + $0x18] sm:$0xff] %vm330_vm2, %v2602_v55  ;;  %v2211_v12 = vadd.f32 %v7888_v4, %v2175_v22  ;;  %v2600_v13 = vadd.f32 %v2564_v9, %v2423_v49  ;;  %v2439_v19 = vpop.f32.mrf.mxu1  ;;  %v8446_v60 = vld [vmem:[%s10342_s3 + $0x8] sm:$0xff]   ;;  %8114 = vmatprep.subr.bf16.mxu0 %v8508_v63  ;;  %8070 = vmatprep.mubr.msk.bf16.mxu1 %vm8509_vm3, %v8508_v63 }
 0x175   : > { %v2054_v14 = vpop.f32.mrf.mxu0  ;;  %v2569_v41 = vld [vmem:[#allocation2 + $0x30] sm:$0xff]  ;;  %333 = vst.msk [vmem:[#allocation4 + $0x10] sm:$0xff] %vm330_vm2, %v8508_v63  ;;  %334 = vst.msk [vmem:[#allocation4 + $0x18] sm:$0xff] %vm330_vm2, %v8508_v63  ;;  %8067 = vmatpush3.bf16.msra.mxu1 %v8446_v60  ;;  %8118 = vmatprep.mubr.msk.bf16.mxu0 %vm8509_vm3, %v8508_v63 }
 0x176   : > { %2247 = vst.msk [vmem:[#allocation2 + $0x50] sm:$0xff] %vm330_vm2, %v2211_v12  ;;  %2636 = vst.msk [vmem:[#allocation2 + $0x8] sm:$0xff] %vm330_vm2, %v2600_v13  ;;  %v2209_v10 = vadd.f32 %v2173_v15, %v2054_v14  ;;  %v2605_v16 = vadd.f32 %v7922_v18, %v2569_v41  ;;  %v7926_v20 = vpop.f32.mrf.mxu1  ;;  %8068 = vmatprep.subr.bf16.mxu1 %v8508_v63 }
 0x177   : > { %v7889_v31 = vpop.f32.mrf.mxu0  ;;  %v2567_v24 = vld [vmem:[#allocation2 + $0x20] sm:$0xff]  ;;  %335 = vst.msk [vmem:[#allocation4 + $0x20] sm:$0xff] %vm330_vm2, %v8508_v63  ;;  %336 = vst.msk [vmem:[#allocation4 + $0x28] sm:$0xff] %vm330_vm2, %v8508_v63 }
 0x178   : > { %2245 = vst.msk [vmem:[#allocation2 + $0x40] sm:$0xff] %vm330_vm2, %v2209_v10  ;;  %2641 = vst.msk [vmem:[#allocation2 + $0x30] sm:$0xff] %vm330_vm2, %v2605_v16  ;;  %v2212_v25 = vadd.f32 %v7889_v31, %v2176_v23  ;;  %v2603_v56 = vadd.f32 %v2567_v24, %v2436_v62  ;;  %v2452_v26 = vpop.f32.mrf.mxu1 }
 0x179   : > { %v2057_v27 = vpop.f32.mrf.mxu0  ;;  %v2570_v6 = vld [vmem:[#allocation2 + $0x38] sm:$0xff]  ;;  %337 = vst.msk [vmem:[#allocation4 + $0x30] sm:$0xff] %vm330_vm2, %v8508_v63  ;;  %338 = vst.msk [vmem:[#allocation4 + $0x38] sm:$0xff] %vm330_vm2, %v8508_v63 }
 0x17a   : > { %2248 = vst.msk [vmem:[#allocation2 + $0x58] sm:$0xff] %vm330_vm2, %v2212_v25  ;;  %2639 = vst.msk [vmem:[#allocation2 + $0x20] sm:$0xff] %vm330_vm2, %v2603_v56  ;;  %v2210_v29 = vadd.f32 %v2174_v28, %v2057_v27  ;;  %v2606_v3 = vadd.f32 %v7923_v8, %v2570_v6  ;;  %v7927_v30 = vpop.f32.mrf.mxu1  ;;  %v2184_v8 = vld [vmem:[#allocation2 + $0x98] sm:$0xff] }
 0x17b   : > { %v7892_v33 = vpop.f32.mrf.mxu0  ;;  %v2568_v35 = vld [vmem:[#allocation2 + $0x28] sm:$0xff]  ;;  %339 = vst.msk [vmem:[#allocation4 + $0x40] sm:$0xff] %vm330_vm2, %v8508_v63  ;;  %340 = vst.msk [vmem:[#allocation4 + $0x48] sm:$0xff] %vm330_vm2, %v8508_v63 }
 0x17c   : > { %2246 = vst.msk [vmem:[#allocation2 + $0x48] sm:$0xff] %vm330_vm2, %v2210_v29  ;;  %2642 = vst.msk [vmem:[#allocation2 + $0x38] sm:$0xff] %vm330_vm2, %v2606_v3  ;;  %v2215_v36 = vadd.f32 %v7892_v33, %v2179_v34  ;;  %v2604_v37 = vadd.f32 %v2568_v35, %v2439_v19  ;;  %v2455_v38 = vpop.f32.mrf.mxu1  ;;  %v2182_v19 = vld [vmem:[#allocation2 + $0x88] sm:$0xff] }
 0x17d   : > { %v2070_v32 = vpop.f32.mrf.mxu0  ;;  %v2573_v40 = vld [vmem:[#allocation2 + $0x50] sm:$0xff]  ;;  %341 = vst.msk [vmem:[#allocation4 + $0x50] sm:$0xff] %vm330_vm2, %v8508_v63  ;;  %342 = vst.msk [vmem:[#allocation4 + $0x58] sm:$0xff] %vm330_vm2, %v8508_v63 }
 0x17e   : > { %2251 = vst.msk [vmem:[#allocation2 + $0x70] sm:$0xff] %vm330_vm2, %v2215_v36  ;;  %2640 = vst.msk [vmem:[#allocation2 + $0x28] sm:$0xff] %vm330_vm2, %v2604_v37  ;;  %v2213_v46 = vadd.f32 %v2177_v39, %v2070_v32  ;;  %v2609_v42 = vadd.f32 %v7926_v20, %v2573_v40  ;;  %v7930_v45 = vpop.f32.mrf.mxu1  ;;  %v2187_v20 = vld [vmem:[#allocation2 + $0xb0] sm:$0xff] }
 0x17f   : > { %v7893_v21 = vpop.f32.mrf.mxu0  ;;  %v2571_v47 = vld [vmem:[#allocation2 + $0x40] sm:$0xff]  ;;  %345 = vst.msk [vmem:[#allocation7] sm:$0xff] %vm330_vm2, %v8508_v63  ;;  %346 = vst.msk [vmem:[#allocation7 + $0x8] sm:$0xff] %vm330_vm2, %v8508_v63 }
 0x180   : > { %2249 = vst.msk [vmem:[#allocation2 + $0x60] sm:$0xff] %vm330_vm2, %v2213_v46  ;;  %2645 = vst.msk [vmem:[#allocation2 + $0x50] sm:$0xff] %vm330_vm2, %v2609_v42  ;;  %v2216_v11 = vadd.f32 %v7893_v21, %v2180_v43  ;;  %v2607_v5 = vadd.f32 %v2571_v47, %v2452_v26  ;;  %v2468_v48 = vpop.f32.mrf.mxu1  ;;  %v2185_v26 = vld [vmem:[#allocation2 + $0xa0] sm:$0xff] }
 0x181   : > { %v2073_v49 = vpop.f32.mrf.mxu0  ;;  %v2574_v50 = vld [vmem:[#allocation2 + $0x58] sm:$0xff]  ;;  %347 = vst.msk [vmem:[#allocation7 + $0x10] sm:$0xff] %vm330_vm2, %v8508_v63  ;;  %348 = vst.msk [vmem:[#allocation7 + $0x18] sm:$0xff] %vm330_vm2, %v8508_v63 }
 0x182   : > { %2252 = vst.msk [vmem:[#allocation2 + $0x78] sm:$0xff] %vm330_vm2, %v2216_v11  ;;  %2643 = vst.msk [vmem:[#allocation2 + $0x40] sm:$0xff] %vm330_vm2, %v2607_v5  ;;  %v2214_v51 = vadd.f32 %v2178_v7, %v2073_v49  ;;  %v2610_v17 = vadd.f32 %v7927_v30, %v2574_v50  ;;  %v7931_v52 = vpop.f32.mrf.mxu1  ;;  %v2188_v30 = vld [vmem:[#allocation2 + $0xb8] sm:$0xff] }
 0x183   : > { %v7896_v53 = vpop.f32.mrf.mxu0  ;;  %v2572_v18 = vld [vmem:[#allocation2 + $0x48] sm:$0xff]  ;;  %350 = vst.msk [vmem:[#allocation10] sm:$0xff] %vm330_vm2, %v8508_v63  ;;  %351 = vst.msk [vmem:[#allocation10 + $0x8] sm:$0xff] %vm330_vm2, %v8508_v63 }
 0x184   : > { %2250 = vst.msk [vmem:[#allocation2 + $0x68] sm:$0xff] %vm330_vm2, %v2214_v51  ;;  %2646 = vst.msk [vmem:[#allocation2 + $0x58] sm:$0xff] %vm330_vm2, %v2610_v17  ;;  %v2219_v57 = vadd.f32 %v7896_v53, %v2183_v54  ;;  %v2608_v58 = vadd.f32 %v2572_v18, %v2455_v38  ;;  %v2471_v59 = vpop.f32.mrf.mxu1  ;;  %v2186_v38 = vld [vmem:[#allocation2 + $0xa8] sm:$0xff] }
 0x185   : > { %v2086_v61 = vpop.f32.mrf.mxu0  ;;  %v2577_v62 = vld [vmem:[#allocation2 + $0x70] sm:$0xff]  ;;  %344 = vst.msk [vmem:[#allocation4 + $0x60] sm:$0x3f] %vm343_vm4, %v8508_v63  ;;  %349 = vst.msk [vmem:[#allocation7 + $0x20] sm:$0x3f] %vm343_vm4, %v8508_v63 }
 0x186   : > { %2255 = vst.msk [vmem:[#allocation2 + $0x90] sm:$0xff] %vm330_vm2, %v2219_v57  ;;  %2644 = vst.msk [vmem:[#allocation2 + $0x48] sm:$0xff] %vm330_vm2, %v2608_v58  ;;  %v2217_v0 = vadd.f32 %v2181_v44, %v2086_v61  ;;  %v2613_v1 = vadd.f32 %v7930_v45, %v2577_v62  ;;  %v7934_v2 = vpop.f32.mrf.mxu1  ;;  %v2191_v45 = vld [vmem:[#allocation2 + $0xd0] sm:$0xff] }
 0x187   : > { %v7897_v55 = vpop.f32.mrf.mxu0  ;;  %v2575_v4 = vld [vmem:[#allocation2 + $0x60] sm:$0xff]  ;;  %353 = vst.msk [vmem:[#allocation10 + $0x10] sm:$0x3] %vm352_vm6, %v8508_v63 }
 0x188   : > { %2253 = vst.msk [vmem:[#allocation2 + $0x80] sm:$0xff] %vm330_vm2, %v2217_v0  ;;  %2649 = vst.msk [vmem:[#allocation2 + $0x70] sm:$0xff] %vm330_vm2, %v2613_v1  ;;  %v2220_v22 = vadd.f32 %v7897_v55, %v2184_v8  ;;  %v2611_v9 = vadd.f32 %v2575_v4, %v2468_v48  ;;  %v2484_v12 = vpop.f32.mrf.mxu1  ;;  %v2189_v48 = vld [vmem:[#allocation2 + $0xc0] sm:$0xff]  ;;  %v2195_v1 = vld [vmem:[#allocation2 + $0xf0] sm:$0xff] }
 0x189   : > { %v2089_v13 = vpop.f32.mrf.mxu0  ;;  %v2578_v14 = vld [vmem:[#allocation2 + $0x78] sm:$0xff] }
 0x18a   : > { %2256 = vst.msk [vmem:[#allocation2 + $0x98] sm:$0xff] %vm330_vm2, %v2220_v22  ;;  %2647 = vst.msk [vmem:[#allocation2 + $0x60] sm:$0xff] %vm330_vm2, %v2611_v9  ;;  %v2218_v15 = vadd.f32 %v2182_v19, %v2089_v13  ;;  %v2614_v41 = vadd.f32 %v7931_v52, %v2578_v14  ;;  %v7935_v10 = vpop.f32.mrf.mxu1  ;;  %v2192_v52 = vld [vmem:[#allocation2 + $0xd8] sm:$0xff]  ;;  %v2193_v9 = vld [vmem:[#allocation2 + $0xe0] sm:$0xff] }
 0x18b   : > { %v7900_v16 = vpop.f32.mrf.mxu0  ;;  %v2576_v31 = vld [vmem:[#allocation2 + $0x68] sm:$0xff] }
 0x18c   : > { %2254 = vst.msk [vmem:[#allocation2 + $0x88] sm:$0xff] %vm330_vm2, %v2218_v15  ;;  %2650 = vst.msk [vmem:[#allocation2 + $0x78] sm:$0xff] %vm330_vm2, %v2614_v41  ;;  %v2223_v23 = vadd.f32 %v7900_v16, %v2187_v20  ;;  %v2612_v24 = vadd.f32 %v2576_v31, %v2471_v59  ;;  %v2487_v25 = vpop.f32.mrf.mxu1  ;;  %v2190_v59 = vld [vmem:[#allocation2 + $0xc8] sm:$0xff]  ;;  %v2196_v41 = vld [vmem:[#allocation2 + $0xf8] sm:$0xff] }
 0x18d   : > { %v2102_v56 = vpop.f32.mrf.mxu0  ;;  %v2581_v27 = vld [vmem:[#allocation2 + $0x90] sm:$0xff] }
 0x18e   : > { %2259 = vst.msk [vmem:[#allocation2 + $0xb0] sm:$0xff] %vm330_vm2, %v2223_v23  ;;  %2648 = vst.msk [vmem:[#allocation2 + $0x68] sm:$0xff] %vm330_vm2, %v2612_v24  ;;  %v2221_v28 = vadd.f32 %v2185_v26, %v2102_v56  ;;  %v2617_v6 = vadd.f32 %v7934_v2, %v2581_v27  ;;  %v7938_v29 = vpop.f32.mrf.mxu1  ;;  %v2194_v24 = vld [vmem:[#allocation2 + $0xe8] sm:$0xff] }
 0x18f   : > { %v7901_v3 = vpop.f32.mrf.mxu0  ;;  %v2579_v33 = vld [vmem:[#allocation2 + $0x80] sm:$0xff] }
 0x190   : > { %2257 = vst.msk [vmem:[#allocation2 + $0xa0] sm:$0xff] %vm330_vm2, %v2221_v28  ;;  %2653 = vst.msk [vmem:[#allocation2 + $0x90] sm:$0xff] %vm330_vm2, %v2617_v6  ;;  %v2224_v34 = vadd.f32 %v7901_v3, %v2188_v30  ;;  %v2615_v35 = vadd.f32 %v2579_v33, %v2484_v12  ;;  %v2500_v36 = vpop.f32.mrf.mxu1  ;;  %v2199_v6 = vld [vmem:[#allocation2 + $0x110] sm:$0xff] }
 0x191   : > { %v2105_v37 = vpop.f32.mrf.mxu0  ;;  %v2582_v32 = vld [vmem:[#allocation2 + $0x98] sm:$0xff] }
 0x192   : > { %2260 = vst.msk [vmem:[#allocation2 + $0xb8] sm:$0xff] %vm330_vm2, %v2224_v34  ;;  %2651 = vst.msk [vmem:[#allocation2 + $0x80] sm:$0xff] %vm330_vm2, %v2615_v35  ;;  %v2222_v39 = vadd.f32 %v2186_v38, %v2105_v37  ;;  %v2618_v40 = vadd.f32 %v7935_v10, %v2582_v32  ;;  %v7939_v46 = vpop.f32.mrf.mxu1  ;;  %v2197_v35 = vld [vmem:[#allocation2 + $0x100] sm:$0xff]  ;;  %v8448_v37 = vld [vmem:[%s10342_s3 + $0x28] sm:$0xff]  }
 0x193   : > { %v7904_v42 = vpop.f32.mrf.mxu0  ;;  %v2580_v21 = vld [vmem:[#allocation2 + $0x88] sm:$0xff]  ;;  %8115 = vmatpush3.bf16.msra.mxu0 %v8448_v37 }
 0x194   : > { %2258 = vst.msk [vmem:[#allocation2 + $0xa8] sm:$0xff] %vm330_vm2, %v2222_v39  ;;  %2654 = vst.msk [vmem:[#allocation2 + $0x98] sm:$0xff] %vm330_vm2, %v2618_v40  ;;  %v2227_v43 = vadd.f32 %v7904_v42, %v2191_v45  ;;  %v2616_v47 = vadd.f32 %v2580_v21, %v2487_v25  ;;  %v2503_v11 = vpop.f32.mrf.mxu1  ;;  %8116 = vmatprep.subr.bf16.mxu0 %v8508_v63 }
 0x195   : > { %v2118_v5 = vpop.f32.mrf.mxu0  ;;  %v2585_v49 = vld [vmem:[#allocation2 + $0xb0] sm:$0xff] }
 0x196   : > { %2263 = vst.msk [vmem:[#allocation2 + $0xd0] sm:$0xff] %vm330_vm2, %v2227_v43  ;;  %2652 = vst.msk [vmem:[#allocation2 + $0x88] sm:$0xff] %vm330_vm2, %v2616_v47  ;;  %v2225_v7 = vadd.f32 %v2189_v48, %v2118_v5  ;;  %v2621_v50 = vadd.f32 %v7938_v29, %v2585_v49  ;;  %v7942_v51 = vpop.f32.mrf.mxu1  ;;  %v8447_v48 = vld [vmem:[%s10342_s3] sm:$0xff]  }
 0x197   : > { %v7905_v17 = vpop.f32.mrf.mxu0  ;;  %v2583_v53 = vld [vmem:[#allocation2 + $0xa0] sm:$0xff]  ;;  %8069 = vmatpush3.bf16.msra.mxu1 %v8447_v48 }
 0x198   : > { %2261 = vst.msk [vmem:[#allocation2 + $0xc0] sm:$0xff] %vm330_vm2, %v2225_v7  ;;  %2657 = vst.msk [vmem:[#allocation2 + $0xb0] sm:$0xff] %vm330_vm2, %v2621_v50  ;;  %v2228_v54 = vadd.f32 %v7905_v17, %v2192_v52  ;;  %v2619_v18 = vadd.f32 %v2583_v53, %v2500_v36  ;;  %v2516_v57 = vpop.f32.mrf.mxu1  ;;  %v2963_v53 = vld [vmem:[#allocation2 + $0x10] sm:$0xff]  ;;  %8090 = vmatprep.subr.bf16.mxu1 %v8508_v63 }
 0x199   : > { %v2121_v58 = vpop.f32.mrf.mxu0  ;;  %v2586_v60 = vld [vmem:[#allocation2 + $0xb8] sm:$0xff] }
 0x19a   : > { %2264 = vst.msk [vmem:[#allocation2 + $0xd8] sm:$0xff] %vm330_vm2, %v2228_v54  ;;  %2655 = vst.msk [vmem:[#allocation2 + $0xa0] sm:$0xff] %vm330_vm2, %v2619_v18  ;;  %v2226_v61 = vadd.f32 %v2190_v59, %v2121_v58  ;;  %v2622_v44 = vadd.f32 %v7939_v46, %v2586_v60  ;;  %v7943_v62 = vpop.f32.mrf.mxu1  ;;  %v2200_v46 = vld [vmem:[#allocation2 + $0x118] sm:$0xff]  ;;  %v2961_v60 = vld [vmem:[#allocation2] sm:$0xff] }
 0x19b   : > { %v7908_v0 = vpop.f32.mrf.mxu0  ;;  %v2584_v2 = vld [vmem:[#allocation2 + $0xa8] sm:$0xff] }
 0x19c   : > { %2262 = vst.msk [vmem:[#allocation2 + $0xc8] sm:$0xff] %vm330_vm2, %v2226_v61  ;;  %2658 = vst.msk [vmem:[#allocation2 + $0xb8] sm:$0xff] %vm330_vm2, %v2622_v44  ;;  %v2231_v55 = vadd.f32 %v7908_v0, %v2195_v1  ;;  %v2620_v8 = vadd.f32 %v2584_v2, %v2503_v11  ;;  %v2519_v4 = vpop.f32.mrf.mxu1  ;;  %v2198_v11 = vld [vmem:[#allocation2 + $0x108] sm:$0xff]  ;;  %v2964_v2 = vld [vmem:[#allocation2 + $0x18] sm:$0xff] }
 0x19d   : > { %v2134_v22 = vpop.f32.mrf.mxu0  ;;  %v2589_v12 = vld [vmem:[#allocation2 + $0xd0] sm:$0xff] }
 0x19e   : > { %2267 = vst.msk [vmem:[#allocation2 + $0xf0] sm:$0xff] %vm330_vm2, %v2231_v55  ;;  %2656 = vst.msk [vmem:[#allocation2 + $0xa8] sm:$0xff] %vm330_vm2, %v2620_v8  ;;  %v2229_v13 = vadd.f32 %v2193_v9, %v2134_v22  ;;  %v2625_v19 = vadd.f32 %v7942_v51, %v2589_v12  ;;  %v7946_v14 = vpop.f32.mrf.mxu1  ;;  %v8449_v51 = vld [vmem:[%s10342_s3 + $0x20] sm:$0xff]   ;;  %v2962_v12 = vld [vmem:[#allocation2 + $0x8] sm:$0xff] }
 0x19f   : > { %v7909_v15 = vpop.f32.mrf.mxu0  ;;  %v2587_v10 = vld [vmem:[#allocation2 + $0xc0] sm:$0xff]  ;;  %8117 = vmatpush3.bf16.msra.mxu0 %v8449_v51 }
 0x1a0   : > { %2265 = vst.msk [vmem:[#allocation2 + $0xe0] sm:$0xff] %vm330_vm2, %v2229_v13  ;;  %2661 = vst.msk [vmem:[#allocation2 + $0xd0] sm:$0xff] %vm330_vm2, %v2625_v19  ;;  %v2232_v16 = vadd.f32 %v7909_v15, %v2196_v41  ;;  %v2623_v20 = vadd.f32 %v2587_v10, %v2516_v57  ;;  %v2532_v31 = vpop.f32.mrf.mxu1  ;;  %8162 = vmatprep.subr.bf16.mxu0 %v8508_v63  ;;  %v2967_v10 = vld [vmem:[#allocation2 + $0x30] sm:$0xff] }
 0x1a1   : > { %v2137_v23 = vpop.f32.mrf.mxu0  ;;  %v2590_v25 = vld [vmem:[#allocation2 + $0xd8] sm:$0xff] }
 0x1a2   : > { %2268 = vst.msk [vmem:[#allocation2 + $0xf8] sm:$0xff] %vm330_vm2, %v2232_v16  ;;  %2659 = vst.msk [vmem:[#allocation2 + $0xc0] sm:$0xff] %vm330_vm2, %v2623_v20  ;;  %v2230_v56 = vadd.f32 %v2194_v24, %v2137_v23  ;;  %v2626_v26 = vadd.f32 %v7943_v62, %v2590_v25  ;;  %v7947_v27 = vpop.f32.mrf.mxu1  ;;  %v2965_v24 = vld [vmem:[#allocation2 + $0x20] sm:$0xff] }
 0x1a3   : > { %v7912_v28 = vpop.f32.mrf.mxu0  ;;  %v2588_v29 = vld [vmem:[#allocation2 + $0xc8] sm:$0xff] }
 0x1a4   : > { %2266 = vst.msk [vmem:[#allocation2 + $0xe8] sm:$0xff] %vm330_vm2, %v2230_v56  ;;  %2662 = vst.msk [vmem:[#allocation2 + $0xd8] sm:$0xff] %vm330_vm2, %v2626_v26  ;;  %v2235_v3 = vadd.f32 %v7912_v28, %v2199_v6  ;;  %v2624_v30 = vadd.f32 %v2588_v29, %v2519_v4  ;;  %v2535_v33 = vpop.f32.mrf.mxu1  ;;  %v2968_v6 = vld [vmem:[#allocation2 + $0x38] sm:$0xff] }
 0x1a5   : > { %v2150_v34 = vpop.f32.mrf.mxu0  ;;  %v2593_v36 = vld [vmem:[#allocation2 + $0xf0] sm:$0xff] }
 0x1a6   : > { %2271 = vst.msk [vmem:[#allocation2 + $0x110] sm:$0xff] %vm330_vm2, %v2235_v3  ;;  %2660 = vst.msk [vmem:[#allocation2 + $0xc8] sm:$0xff] %vm330_vm2, %v2624_v30  ;;  %v2233_v38 = vadd.f32 %v2197_v35, %v2150_v34  ;;  %v2629_v32 = vadd.f32 %v7946_v14, %v2593_v36  ;;  %v7950_v39 = vpop.f32.mrf.mxu1  ;;  %v2966_v35 = vld [vmem:[#allocation2 + $0x28] sm:$0xff] }
 0x1a7   : > { %v7913_v40 = vpop.f32.mrf.mxu0  ;;  %v2591_v42 = vld [vmem:[#allocation2 + $0xe0] sm:$0xff] }
 0x1a8   : > { %2269 = vst.msk [vmem:[#allocation2 + $0x100] sm:$0xff] %vm330_vm2, %v2233_v38  ;;  %2665 = vst.msk [vmem:[#allocation2 + $0xf0] sm:$0xff] %vm330_vm2, %v2629_v32  ;;  %v2236_v45 = vadd.f32 %v7913_v40, %v2200_v46  ;;  %v2627_v21 = vadd.f32 %v2591_v42, %v2532_v31  ;;  %v2548_v43 = vpop.f32.mrf.mxu1  ;;  %v2971_v40 = vld [vmem:[#allocation2 + $0x50] sm:$0xff] }
 0x1a9   : > { %v2153_v47 = vpop.f32.mrf.mxu0  ;;  %v2594_v5 = vld [vmem:[#allocation2 + $0xf8] sm:$0xff] }
 0x1aa   : > { %2272 = vst.msk [vmem:[#allocation2 + $0x118] sm:$0xff] %vm330_vm2, %v2236_v45  ;;  %2663 = vst.msk [vmem:[#allocation2 + $0xe0] sm:$0xff] %vm330_vm2, %v2627_v21  ;;  %v2234_v49 = vadd.f32 %v2198_v11, %v2153_v47  ;;  %v2630_v7 = vadd.f32 %v7947_v27, %v2594_v5  ;;  %v7951_v50 = vpop.f32.mrf.mxu1  ;;  %v2969_v47 = vld [vmem:[#allocation2 + $0x40] sm:$0xff] }
 0x1ab   : > { %v2592_v17 = vld [vmem:[#allocation2 + $0xe8] sm:$0xff]  ;;  %v7956_v52 = vpop.f32.mrf.mxu0 }
 0x1ac   : > { %2270 = vst.msk [vmem:[#allocation2 + $0x108] sm:$0xff] %vm330_vm2, %v2234_v49  ;;  %2666 = vst.msk [vmem:[#allocation2 + $0xf8] sm:$0xff] %vm330_vm2, %v2630_v7  ;;  %v2628_v54 = vadd.f32 %v2592_v17, %v2535_v33  ;;  %v2999_v18 = vadd.f32 %v7956_v52, %v2963_v53  ;;  %v2551_v57 = vpop.f32.mrf.mxu1 }
 0x1ad   : > { %v2597_v58 = vld [vmem:[#allocation2 + $0x110] sm:$0xff]  ;;  %v2818_v59 = vpop.f32.mrf.mxu0 }
 0x1ae   : > { %2664 = vst.msk [vmem:[#allocation2 + $0xe8] sm:$0xff] %vm330_vm2, %v2628_v54  ;;  %3035 = vst.msk [vmem:[#allocation2 + $0x10] sm:$0xff] %vm330_vm2, %v2999_v18  ;;  %v2633_v61 = vadd.f32 %v7950_v39, %v2597_v58  ;;  %v2997_v44 = vadd.f32 %v2961_v60, %v2818_v59  ;;  %v7994_v62 = vpop.f32.mrf.mxu1  ;;  %v2970_v18 = vld [vmem:[#allocation2 + $0x48] sm:$0xff] }
 0x1af   : > { %v2595_v0 = vld [vmem:[#allocation2 + $0x100] sm:$0xff]  ;;  %v7957_v1 = vpop.f32.mrf.mxu0 }
 0x1b0   : > { %2669 = vst.msk [vmem:[#allocation2 + $0x110] sm:$0xff] %vm330_vm2, %v2633_v61  ;;  %3033 = vst.msk [vmem:[#allocation2] sm:$0xff] %vm330_vm2, %v2997_v44  ;;  %v2631_v55 = vadd.f32 %v2595_v0, %v2548_v43  ;;  %v3000_v8 = vadd.f32 %v7957_v1, %v2964_v2  ;;  %v3216_v4 = vpop.f32.mrf.mxu1  ;;  %v2975_v44 = vld [vmem:[#allocation2 + $0x70] sm:$0xff] }
 0x1b1   : > { %v2598_v22 = vld [vmem:[#allocation2 + $0x118] sm:$0xff]  ;;  %v2821_v9 = vpop.f32.mrf.mxu0 }
 0x1b2   : > { %2667 = vst.msk [vmem:[#allocation2 + $0x100] sm:$0xff] %vm330_vm2, %v2631_v55  ;;  %3036 = vst.msk [vmem:[#allocation2 + $0x18] sm:$0xff] %vm330_vm2, %v3000_v8  ;;  %v2634_v13 = vadd.f32 %v7951_v50, %v2598_v22  ;;  %v2998_v19 = vadd.f32 %v2962_v12, %v2821_v9  ;;  %v7995_v14 = vpop.f32.mrf.mxu1  ;;  %v2972_v50 = vld [vmem:[#allocation2 + $0x58] sm:$0xff]  ;;  %v2973_v8 = vld [vmem:[#allocation2 + $0x60] sm:$0xff] }
 0x1b3   : > { %v2596_v15 = vld [vmem:[#allocation2 + $0x108] sm:$0xff]  ;;  %v7960_v41 = vpop.f32.mrf.mxu0 }
 0x1b4   : > { %2670 = vst.msk [vmem:[#allocation2 + $0x118] sm:$0xff] %vm330_vm2, %v2634_v13  ;;  %3034 = vst.msk [vmem:[#allocation2 + $0x8] sm:$0xff] %vm330_vm2, %v2998_v19  ;;  %v2632_v16 = vadd.f32 %v2596_v15, %v2551_v57  ;;  %v3003_v20 = vadd.f32 %v7960_v41, %v2967_v10  ;;  %v3219_v31 = vpop.f32.mrf.mxu1  ;;  %v2976_v19 = vld [vmem:[#allocation2 + $0x78] sm:$0xff] }
 0x1b5   : > { %v2834_v23 = vpop.f32.mrf.mxu0  ;;  %v3361_v25 = vld [vmem:[#allocation2 + $0x10] sm:$0xff] }
 0x1b6   : > { %2668 = vst.msk [vmem:[#allocation2 + $0x108] sm:$0xff] %vm330_vm2, %v2632_v16  ;;  %3039 = vst.msk [vmem:[#allocation2 + $0x30] sm:$0xff] %vm330_vm2, %v3003_v20  ;;  %v3001_v56 = vadd.f32 %v2965_v24, %v2834_v23  ;;  %v3397_v26 = vadd.f32 %v7994_v62, %v3361_v25  ;;  %v7998_v27 = vpop.f32.mrf.mxu1  ;;  %v2974_v20 = vld [vmem:[#allocation2 + $0x68] sm:$0xff] }
 0x1b7   : > { %v7961_v28 = vpop.f32.mrf.mxu0  ;;  %v3359_v29 = vld [vmem:[#allocation2] sm:$0xff] }
 0x1b8   : > { %3037 = vst.msk [vmem:[#allocation2 + $0x20] sm:$0xff] %vm330_vm2, %v3001_v56  ;;  %3433 = vst.msk [vmem:[#allocation2 + $0x10] sm:$0xff] %vm330_vm2, %v3397_v26  ;;  %v3004_v3 = vadd.f32 %v7961_v28, %v2968_v6  ;;  %v3395_v30 = vadd.f32 %v3359_v29, %v3216_v4  ;;  %v3232_v33 = vpop.f32.mrf.mxu1  ;;  %v2979_v26 = vld [vmem:[#allocation2 + $0x90] sm:$0xff] }
 0x1b9   : > { %v2837_v34 = vpop.f32.mrf.mxu0  ;;  %v3362_v36 = vld [vmem:[#allocation2 + $0x18] sm:$0xff] }
 0x1ba   : > { %3040 = vst.msk [vmem:[#allocation2 + $0x38] sm:$0xff] %vm330_vm2, %v3004_v3  ;;  %3431 = vst.msk [vmem:[#allocation2] sm:$0xff] %vm330_vm2, %v3395_v30  ;;  %v3002_v37 = vadd.f32 %v2966_v35, %v2837_v34  ;;  %v3398_v38 = vadd.f32 %v7995_v14, %v3362_v36  ;;  %v7999_v32 = vpop.f32.mrf.mxu1  ;;  %v2977_v30 = vld [vmem:[#allocation2 + $0x80] sm:$0xff] }
 0x1bb   : > { %v7964_v39 = vpop.f32.mrf.mxu0  ;;  %v3360_v46 = vld [vmem:[#allocation2 + $0x8] sm:$0xff] }
 0x1bc   : > { %3038 = vst.msk [vmem:[#allocation2 + $0x28] sm:$0xff] %vm330_vm2, %v3002_v37  ;;  %3434 = vst.msk [vmem:[#allocation2 + $0x18] sm:$0xff] %vm330_vm2, %v3398_v38  ;;  %v3007_v42 = vadd.f32 %v7964_v39, %v2971_v40  ;;  %v3396_v45 = vadd.f32 %v3360_v46, %v3219_v31  ;;  %v3235_v21 = vpop.f32.mrf.mxu1  ;;  %v2980_v38 = vld [vmem:[#allocation2 + $0x98] sm:$0xff] }
 0x1bd   : > { %v2850_v43 = vpop.f32.mrf.mxu0  ;;  %v3365_v11 = vld [vmem:[#allocation2 + $0x30] sm:$0xff] }
 0x1be   : > { %3043 = vst.msk [vmem:[#allocation2 + $0x50] sm:$0xff] %vm330_vm2, %v3007_v42  ;;  %3432 = vst.msk [vmem:[#allocation2 + $0x8] sm:$0xff] %vm330_vm2, %v3396_v45  ;;  %v3005_v5 = vadd.f32 %v2969_v47, %v2850_v43  ;;  %v3401_v48 = vadd.f32 %v7998_v27, %v3365_v11  ;;  %v8002_v49 = vpop.f32.mrf.mxu1  ;;  %v2978_v45 = vld [vmem:[#allocation2 + $0x88] sm:$0xff] }
 0x1bf   : > { %v7965_v7 = vpop.f32.mrf.mxu0  ;;  %v3363_v51 = vld [vmem:[#allocation2 + $0x20] sm:$0xff] }
 0x1c0   : > { %3041 = vst.msk [vmem:[#allocation2 + $0x40] sm:$0xff] %vm330_vm2, %v3005_v5  ;;  %3437 = vst.msk [vmem:[#allocation2 + $0x30] sm:$0xff] %vm330_vm2, %v3401_v48  ;;  %v3008_v17 = vadd.f32 %v7965_v7, %v2972_v50  ;;  %v3399_v52 = vadd.f32 %v3363_v51, %v3232_v33  ;;  %v3248_v53 = vpop.f32.mrf.mxu1  ;;  %v2983_v48 = vld [vmem:[#allocation2 + $0xb0] sm:$0xff] }
 0x1c1   : > { %v2853_v54 = vpop.f32.mrf.mxu0  ;;  %v3366_v57 = vld [vmem:[#allocation2 + $0x38] sm:$0xff] }
 0x1c2   : > { %3044 = vst.msk [vmem:[#allocation2 + $0x58] sm:$0xff] %vm330_vm2, %v3008_v17  ;;  %3435 = vst.msk [vmem:[#allocation2 + $0x20] sm:$0xff] %vm330_vm2, %v3399_v52  ;;  %v3006_v58 = vadd.f32 %v2970_v18, %v2853_v54  ;;  %v3402_v59 = vadd.f32 %v7999_v32, %v3366_v57  ;;  %v8003_v60 = vpop.f32.mrf.mxu1  ;;  %v2981_v52 = vld [vmem:[#allocation2 + $0xa0] sm:$0xff] }
 0x1c3   : > { %v7968_v61 = vpop.f32.mrf.mxu0  ;;  %v3364_v62 = vld [vmem:[#allocation2 + $0x28] sm:$0xff] }
 0x1c4   : > { %3042 = vst.msk [vmem:[#allocation2 + $0x48] sm:$0xff] %vm330_vm2, %v3006_v58  ;;  %3438 = vst.msk [vmem:[#allocation2 + $0x38] sm:$0xff] %vm330_vm2, %v3402_v59  ;;  %v3011_v0 = vadd.f32 %v7968_v61, %v2975_v44  ;;  %v3400_v1 = vadd.f32 %v3364_v62, %v3235_v21  ;;  %v3251_v2 = vpop.f32.mrf.mxu1  ;;  %v2984_v59 = vld [vmem:[#allocation2 + $0xb8] sm:$0xff] }
 0x1c5   : > { %v2866_v55 = vpop.f32.mrf.mxu0  ;;  %v3369_v4 = vld [vmem:[#allocation2 + $0x50] sm:$0xff] }
 0x1c6   : > { %3047 = vst.msk [vmem:[#allocation2 + $0x70] sm:$0xff] %vm330_vm2, %v3011_v0  ;;  %3436 = vst.msk [vmem:[#allocation2 + $0x28] sm:$0xff] %vm330_vm2, %v3400_v1  ;;  %v3009_v22 = vadd.f32 %v2973_v8, %v2866_v55  ;;  %v3405_v9 = vadd.f32 %v8002_v49, %v3369_v4  ;;  %v8006_v12 = vpop.f32.mrf.mxu1  ;;  %v2982_v1 = vld [vmem:[#allocation2 + $0xa8] sm:$0xff] }
 0x1c7   : > { %v7969_v13 = vpop.f32.mrf.mxu0  ;;  %v3367_v14 = vld [vmem:[#allocation2 + $0x40] sm:$0xff] }
 0x1c8   : > { %3045 = vst.msk [vmem:[#allocation2 + $0x60] sm:$0xff] %vm330_vm2, %v3009_v22  ;;  %3441 = vst.msk [vmem:[#allocation2 + $0x50] sm:$0xff] %vm330_vm2, %v3405_v9  ;;  %v3012_v15 = vadd.f32 %v7969_v13, %v2976_v19  ;;  %v3403_v41 = vadd.f32 %v3367_v14, %v3248_v53  ;;  %v3264_v10 = vpop.f32.mrf.mxu1  ;;  %v2987_v9 = vld [vmem:[#allocation2 + $0xd0] sm:$0xff] }
 0x1c9   : > { %v2869_v16 = vpop.f32.mrf.mxu0  ;;  %v3370_v31 = vld [vmem:[#allocation2 + $0x58] sm:$0xff] }
 0x1ca   : > { %3048 = vst.msk [vmem:[#allocation2 + $0x78] sm:$0xff] %vm330_vm2, %v3012_v15  ;;  %3439 = vst.msk [vmem:[#allocation2 + $0x40] sm:$0xff] %vm330_vm2, %v3403_v41  ;;  %v3010_v23 = vadd.f32 %v2974_v20, %v2869_v16  ;;  %v3406_v24 = vadd.f32 %v8003_v60, %v3370_v31  ;;  %v8007_v25 = vpop.f32.mrf.mxu1  ;;  %v2985_v41 = vld [vmem:[#allocation2 + $0xc0] sm:$0xff] }
 0x1cb   : > { %v7972_v56 = vpop.f32.mrf.mxu0  ;;  %v3368_v27 = vld [vmem:[#allocation2 + $0x48] sm:$0xff] }
 0x1cc   : > { %3046 = vst.msk [vmem:[#allocation2 + $0x68] sm:$0xff] %vm330_vm2, %v3010_v23  ;;  %3442 = vst.msk [vmem:[#allocation2 + $0x58] sm:$0xff] %vm330_vm2, %v3406_v24  ;;  %v3015_v28 = vadd.f32 %v7972_v56, %v2979_v26  ;;  %v3404_v6 = vadd.f32 %v3368_v27, %v3251_v2  ;;  %v3267_v29 = vpop.f32.mrf.mxu1  ;;  %v2988_v24 = vld [vmem:[#allocation2 + $0xd8] sm:$0xff] }
 0x1cd   : > { %v2882_v3 = vpop.f32.mrf.mxu0  ;;  %v3373_v33 = vld [vmem:[#allocation2 + $0x70] sm:$0xff] }
 0x1ce   : > { %3051 = vst.msk [vmem:[#allocation2 + $0x90] sm:$0xff] %vm330_vm2, %v3015_v28  ;;  %3440 = vst.msk [vmem:[#allocation2 + $0x48] sm:$0xff] %vm330_vm2, %v3404_v6  ;;  %v3013_v34 = vadd.f32 %v2977_v30, %v2882_v3  ;;  %v3409_v35 = vadd.f32 %v8006_v12, %v3373_v33  ;;  %v8010_v36 = vpop.f32.mrf.mxu1  ;;  %v2986_v6 = vld [vmem:[#allocation2 + $0xc8] sm:$0xff] }
 0x1cf   : > { %v7973_v37 = vpop.f32.mrf.mxu0  ;;  %v3371_v32 = vld [vmem:[#allocation2 + $0x60] sm:$0xff] }
 0x1d0   : > { %3049 = vst.msk [vmem:[#allocation2 + $0x80] sm:$0xff] %vm330_vm2, %v3013_v34  ;;  %3445 = vst.msk [vmem:[#allocation2 + $0x70] sm:$0xff] %vm330_vm2, %v3409_v35  ;;  %v3016_v39 = vadd.f32 %v7973_v37, %v2980_v38  ;;  %v3407_v40 = vadd.f32 %v3371_v32, %v3264_v10  ;;  %v3280_v46 = vpop.f32.mrf.mxu1  ;;  %v2991_v35 = vld [vmem:[#allocation2 + $0xf0] sm:$0xff] }
 0x1d1   : > { %v2885_v42 = vpop.f32.mrf.mxu0  ;;  %v3374_v21 = vld [vmem:[#allocation2 + $0x78] sm:$0xff] }
 0x1d2   : > { %3052 = vst.msk [vmem:[#allocation2 + $0x98] sm:$0xff] %vm330_vm2, %v3016_v39  ;;  %3443 = vst.msk [vmem:[#allocation2 + $0x60] sm:$0xff] %vm330_vm2, %v3407_v40  ;;  %v3014_v43 = vadd.f32 %v2978_v45, %v2885_v42  ;;  %v3410_v47 = vadd.f32 %v8007_v25, %v3374_v21  ;;  %v8011_v11 = vpop.f32.mrf.mxu1  ;;  %v2989_v40 = vld [vmem:[#allocation2 + $0xe0] sm:$0xff] }
 0x1d3   : > { %v7976_v5 = vpop.f32.mrf.mxu0  ;;  %v3372_v49 = vld [vmem:[#allocation2 + $0x68] sm:$0xff] }
 0x1d4   : > { %3050 = vst.msk [vmem:[#allocation2 + $0x88] sm:$0xff] %vm330_vm2, %v3014_v43  ;;  %3446 = vst.msk [vmem:[#allocation2 + $0x78] sm:$0xff] %vm330_vm2, %v3410_v47  ;;  %v3019_v7 = vadd.f32 %v7976_v5, %v2983_v48  ;;  %v3408_v50 = vadd.f32 %v3372_v49, %v3267_v29  ;;  %v3283_v51 = vpop.f32.mrf.mxu1  ;;  %v2992_v47 = vld [vmem:[#allocation2 + $0xf8] sm:$0xff] }
 0x1d5   : > { %v2898_v17 = vpop.f32.mrf.mxu0  ;;  %v3377_v53 = vld [vmem:[#allocation2 + $0x90] sm:$0xff] }
 0x1d6   : > { %3055 = vst.msk [vmem:[#allocation2 + $0xb0] sm:$0xff] %vm330_vm2, %v3019_v7  ;;  %3444 = vst.msk [vmem:[#allocation2 + $0x68] sm:$0xff] %vm330_vm2, %v3408_v50  ;;  %v3017_v54 = vadd.f32 %v2981_v52, %v2898_v17  ;;  %v3413_v18 = vadd.f32 %v8010_v36, %v3377_v53  ;;  %v8014_v57 = vpop.f32.mrf.mxu1  ;;  %v2990_v50 = vld [vmem:[#allocation2 + $0xe8] sm:$0xff] }
 0x1d7   : > { %v7977_v58 = vpop.f32.mrf.mxu0  ;;  %v3375_v60 = vld [vmem:[#allocation2 + $0x80] sm:$0xff] }
 0x1d8   : > { %3053 = vst.msk [vmem:[#allocation2 + $0xa0] sm:$0xff] %vm330_vm2, %v3017_v54  ;;  %3449 = vst.msk [vmem:[#allocation2 + $0x90] sm:$0xff] %vm330_vm2, %v3413_v18  ;;  %v3020_v61 = vadd.f32 %v7977_v58, %v2984_v59  ;;  %v3411_v44 = vadd.f32 %v3375_v60, %v3280_v46  ;;  %v3296_v62 = vpop.f32.mrf.mxu1  ;;  %v2995_v18 = vld [vmem:[#allocation2 + $0x110] sm:$0xff] }
 0x1d9   : > { %v2901_v0 = vpop.f32.mrf.mxu0  ;;  %v3378_v2 = vld [vmem:[#allocation2 + $0x98] sm:$0xff] }
 0x1da   : > { %3056 = vst.msk [vmem:[#allocation2 + $0xb8] sm:$0xff] %vm330_vm2, %v3020_v61  ;;  %3447 = vst.msk [vmem:[#allocation2 + $0x80] sm:$0xff] %vm330_vm2, %v3411_v44  ;;  %v3018_v55 = vadd.f32 %v2982_v1, %v2901_v0  ;;  %v3414_v8 = vadd.f32 %v8011_v11, %v3378_v2  ;;  %v8015_v4 = vpop.f32.mrf.mxu1  ;;  %v2993_v44 = vld [vmem:[#allocation2 + $0x100] sm:$0xff] }
 0x1db   : > { %v7980_v22 = vpop.f32.mrf.mxu0  ;;  %v3376_v12 = vld [vmem:[#allocation2 + $0x88] sm:$0xff] }
 0x1dc   : > { %3054 = vst.msk [vmem:[#allocation2 + $0xa8] sm:$0xff] %vm330_vm2, %v3018_v55  ;;  %3450 = vst.msk [vmem:[#allocation2 + $0x98] sm:$0xff] %vm330_vm2, %v3414_v8  ;;  %v3023_v13 = vadd.f32 %v7980_v22, %v2987_v9  ;;  %v3412_v19 = vadd.f32 %v3376_v12, %v3283_v51  ;;  %v3299_v14 = vpop.f32.mrf.mxu1  ;;  %v2996_v8 = vld [vmem:[#allocation2 + $0x118] sm:$0xff] }
 0x1dd   : > { %v2914_v15 = vpop.f32.mrf.mxu0  ;;  %v3381_v10 = vld [vmem:[#allocation2 + $0xb0] sm:$0xff] }
 0x1de   : > { %3059 = vst.msk [vmem:[#allocation2 + $0xd0] sm:$0xff] %vm330_vm2, %v3023_v13  ;;  %3448 = vst.msk [vmem:[#allocation2 + $0x88] sm:$0xff] %vm330_vm2, %v3412_v19  ;;  %v3021_v16 = vadd.f32 %v2985_v41, %v2914_v15  ;;  %v3417_v20 = vadd.f32 %v8014_v57, %v3381_v10  ;;  %v8018_v31 = vpop.f32.mrf.mxu1  ;;  %v2994_v13 = vld [vmem:[#allocation2 + $0x108] sm:$0xff] }
 0x1df   : > { %v7981_v23 = vpop.f32.mrf.mxu0  ;;  %v3379_v25 = vld [vmem:[#allocation2 + $0xa0] sm:$0xff] }
 0x1e0   : > { %3057 = vst.msk [vmem:[#allocation2 + $0xc0] sm:$0xff] %vm330_vm2, %v3021_v16  ;;  %3453 = vst.msk [vmem:[#allocation2 + $0xb0] sm:$0xff] %vm330_vm2, %v3417_v20  ;;  %v3024_v56 = vadd.f32 %v7981_v23, %v2988_v24  ;;  %v3415_v26 = vadd.f32 %v3379_v25, %v3296_v62  ;;  %v3312_v27 = vpop.f32.mrf.mxu1  ;;  %v3759_v20 = vld [vmem:[#allocation2 + $0x10] sm:$0xff] }
 0x1e1   : > { %v2917_v28 = vpop.f32.mrf.mxu0  ;;  %v3382_v29 = vld [vmem:[#allocation2 + $0xb8] sm:$0xff] }
 0x1e2   : > { %3060 = vst.msk [vmem:[#allocation2 + $0xd8] sm:$0xff] %vm330_vm2, %v3024_v56  ;;  %3451 = vst.msk [vmem:[#allocation2 + $0xa0] sm:$0xff] %vm330_vm2, %v3415_v26  ;;  %v3022_v3 = vadd.f32 %v2986_v6, %v2917_v28  ;;  %v3418_v30 = vadd.f32 %v8015_v4, %v3382_v29  ;;  %v8019_v33 = vpop.f32.mrf.mxu1  ;;  %v3757_v56 = vld [vmem:[#allocation2] sm:$0xff] }
 0x1e3   : > { %v7984_v34 = vpop.f32.mrf.mxu0  ;;  %v3380_v36 = vld [vmem:[#allocation2 + $0xa8] sm:$0xff] }
 0x1e4   : > { %3058 = vst.msk [vmem:[#allocation2 + $0xc8] sm:$0xff] %vm330_vm2, %v3022_v3  ;;  %3454 = vst.msk [vmem:[#allocation2 + $0xb8] sm:$0xff] %vm330_vm2, %v3418_v30  ;;  %v3027_v37 = vadd.f32 %v7984_v34, %v2991_v35  ;;  %v3416_v38 = vadd.f32 %v3380_v36, %v3299_v14  ;;  %v3315_v32 = vpop.f32.mrf.mxu1  ;;  %v3760_v3 = vld [vmem:[#allocation2 + $0x18] sm:$0xff]  ;;  %v3758_v36 = vld [vmem:[#allocation2 + $0x8] sm:$0xff] }
 0x1e5   : > { %v2930_v39 = vpop.f32.mrf.mxu0  ;;  %v3385_v46 = vld [vmem:[#allocation2 + $0xd0] sm:$0xff] }
 0x1e6   : > { %3063 = vst.msk [vmem:[#allocation2 + $0xf0] sm:$0xff] %vm330_vm2, %v3027_v37  ;;  %3452 = vst.msk [vmem:[#allocation2 + $0xa8] sm:$0xff] %vm330_vm2, %v3416_v38  ;;  %v3025_v42 = vadd.f32 %v2989_v40, %v2930_v39  ;;  %v3421_v45 = vadd.f32 %v8018_v31, %v3385_v46  ;;  %v8022_v21 = vpop.f32.mrf.mxu1  ;;  %v9479_v39 = vld [vmem:[%s10341_s2] ss:$0 sm:$0xff] }
 0x1e7   : > { %v7985_v43 = vpop.f32.mrf.mxu0  ;;  %v3383_v11 = vld [vmem:[#allocation2 + $0xc0] sm:$0xff] }
 0x1e8   : > { %3061 = vst.msk [vmem:[#allocation2 + $0xe0] sm:$0xff] %vm330_vm2, %v3025_v42  ;;  %3457 = vst.msk [vmem:[#allocation2 + $0xd0] sm:$0xff] %vm330_vm2, %v3421_v45  ;;  %v3028_v5 = vadd.f32 %v7985_v43, %v2992_v47  ;;  %v3419_v48 = vadd.f32 %v3383_v11, %v3312_v27  ;;  %v3328_v49 = vpop.f32.mrf.mxu1  ;;  %v3763_v42 = vld [vmem:[#allocation2 + $0x30] sm:$0xff]  ;;  %v3761_v11 = vld [vmem:[#allocation2 + $0x20] sm:$0xff] }
 0x1e9   : > { %v2933_v7 = vpop.f32.mrf.mxu0  ;;  %v3386_v51 = vld [vmem:[#allocation2 + $0xd8] sm:$0xff] }
 0x1ea   : > { %3064 = vst.msk [vmem:[#allocation2 + $0xf8] sm:$0xff] %vm330_vm2, %v3028_v5  ;;  %3455 = vst.msk [vmem:[#allocation2 + $0xc0] sm:$0xff] %vm330_vm2, %v3419_v48  ;;  %v3026_v17 = vadd.f32 %v2990_v50, %v2933_v7  ;;  %v3422_v52 = vadd.f32 %v8019_v33, %v3386_v51  ;;  %v8023_v53 = vpop.f32.mrf.mxu1  ;;  %v3764_v50 = vld [vmem:[#allocation2 + $0x38] sm:$0xff] }
 0x1eb   : > { %v7988_v54 = vpop.f32.mrf.mxu0  ;;  %v3384_v57 = vld [vmem:[#allocation2 + $0xc8] sm:$0xff] }
 0x1ec   : > { %3062 = vst.msk [vmem:[#allocation2 + $0xe8] sm:$0xff] %vm330_vm2, %v3026_v17  ;;  %3458 = vst.msk [vmem:[#allocation2 + $0xd8] sm:$0xff] %vm330_vm2, %v3422_v52  ;;  %v3031_v58 = vadd.f32 %v7988_v54, %v2995_v18  ;;  %v3420_v59 = vadd.f32 %v3384_v57, %v3315_v32  ;;  %v3331_v60 = vpop.f32.mrf.mxu1  ;;  %v3762_v18 = vld [vmem:[#allocation2 + $0x28] sm:$0xff] }
 0x1ed   : > { %v2946_v61 = vpop.f32.mrf.mxu0  ;;  %v3389_v62 = vld [vmem:[#allocation2 + $0xf0] sm:$0xff] }
 0x1ee   : > { %3067 = vst.msk [vmem:[#allocation2 + $0x110] sm:$0xff] %vm330_vm2, %v3031_v58  ;;  %3456 = vst.msk [vmem:[#allocation2 + $0xc8] sm:$0xff] %vm330_vm2, %v3420_v59  ;;  %v3029_v0 = vadd.f32 %v2993_v44, %v2946_v61  ;;  %v3425_v1 = vadd.f32 %v8022_v21, %v3389_v62  ;;  %v8026_v2 = vpop.f32.mrf.mxu1  ;;  %v3767_v44 = vld [vmem:[#allocation2 + $0x50] sm:$0xff] }
 0x1ef   : > { %v7989_v55 = vpop.f32.mrf.mxu0  ;;  %v3387_v4 = vld [vmem:[#allocation2 + $0xe0] sm:$0xff] }
 0x1f0   : > { %3065 = vst.msk [vmem:[#allocation2 + $0x100] sm:$0xff] %vm330_vm2, %v3029_v0  ;;  %3461 = vst.msk [vmem:[#allocation2 + $0xf0] sm:$0xff] %vm330_vm2, %v3425_v1  ;;  %v3032_v22 = vadd.f32 %v7989_v55, %v2996_v8  ;;  %v3423_v9 = vadd.f32 %v3387_v4, %v3328_v49  ;;  %v3344_v14 = vpop.f32.mrf.mxu1  ;;  %v3765_v8 = vld [vmem:[#allocation2 + $0x40] sm:$0xff] }
 0x1f1   : > { %v2949_v12 = vpop.f32.mrf.mxu0  ;;  %v3390_v19 = vld [vmem:[#allocation2 + $0xf8] sm:$0xff] }
 0x1f2   : > { %3068 = vst.msk [vmem:[#allocation2 + $0x118] sm:$0xff] %vm330_vm2, %v3032_v22  ;;  %3459 = vst.msk [vmem:[#allocation2 + $0xe0] sm:$0xff] %vm330_vm2, %v3423_v9  ;;  %v3030_v15 = vadd.f32 %v2994_v13, %v2949_v12  ;;  %v3426_v41 = vadd.f32 %v8023_v53, %v3390_v19  ;;  %v8027_v26 = vpop.f32.mrf.mxu1  ;;  %v3768_v19 = vld [vmem:[#allocation2 + $0x58] sm:$0xff] }
 0x1f3   : > { %v3388_v10 = vld [vmem:[#allocation2 + $0xe8] sm:$0xff]  ;;  %v8032_v16 = vpop.f32.mrf.mxu0 }
 0x1f4   : > { %3066 = vst.msk [vmem:[#allocation2 + $0x108] sm:$0xff] %vm330_vm2, %v3030_v15  ;;  %3462 = vst.msk [vmem:[#allocation2 + $0xf8] sm:$0xff] %vm330_vm2, %v3426_v41  ;;  %v3424_v31 = vadd.f32 %v3388_v10, %v3331_v60  ;;  %v3795_v23 = vadd.f32 %v8032_v16, %v3759_v20  ;;  %v3347_v37 = vpop.f32.mrf.mxu1  ;;  %v3766_v20 = vld [vmem:[#allocation2 + $0x48] sm:$0xff] }
 0x1f5   : > { %v3393_v24 = vld [vmem:[#allocation2 + $0x110] sm:$0xff]  ;;  %v3614_v25 = vpop.f32.mrf.mxu0 }
 0x1f6   : > { %3460 = vst.msk [vmem:[#allocation2 + $0xe8] sm:$0xff] %vm330_vm2, %v3424_v31  ;;  %3831 = vst.msk [vmem:[#allocation2 + $0x10] sm:$0xff] %vm330_vm2, %v3795_v23  ;;  %v3429_v27 = vadd.f32 %v8026_v2, %v3393_v24  ;;  %v3793_v28 = vadd.f32 %v3757_v56, %v3614_v25 }
 0x1f7   : > { %v3391_v6 = vld [vmem:[#allocation2 + $0x100] sm:$0xff]  ;;  %v8033_v29 = vpop.f32.mrf.mxu0 }
 0x1f8   : > { %3465 = vst.msk [vmem:[#allocation2 + $0x110] sm:$0xff] %vm330_vm2, %v3429_v27  ;;  %3829 = vst.msk [vmem:[#allocation2] sm:$0xff] %vm330_vm2, %v3793_v28  ;;  %v3427_v30 = vadd.f32 %v3391_v6, %v3344_v14  ;;  %v3796_v33 = vadd.f32 %v8033_v29, %v3760_v3  ;;  %v3769_v29 = vld [vmem:[#allocation2 + $0x60] sm:$0xff] }
 0x1f9   : > { %v3394_v34 = vld [vmem:[#allocation2 + $0x118] sm:$0xff]  ;;  %v3617_v35 = vpop.f32.mrf.mxu0 }
 0x1fa   : > { %3463 = vst.msk [vmem:[#allocation2 + $0x100] sm:$0xff] %vm330_vm2, %v3427_v30  ;;  %3832 = vst.msk [vmem:[#allocation2 + $0x18] sm:$0xff] %vm330_vm2, %v3796_v33  ;;  %v3430_v38 = vadd.f32 %v8027_v26, %v3394_v34  ;;  %v3794_v32 = vadd.f32 %v3758_v36, %v3617_v35  ;;  %v3771_v26 = vld [vmem:[#allocation2 + $0x70] sm:$0xff] }
 0x1fb   : > { %v3392_v40 = vld [vmem:[#allocation2 + $0x108] sm:$0xff]  ;;  %v8036_v46 = vpop.f32.mrf.mxu0 }
 0x1fc   : > { %3466 = vst.msk [vmem:[#allocation2 + $0x118] sm:$0xff] %vm330_vm2, %v3430_v38  ;;  %3830 = vst.msk [vmem:[#allocation2 + $0x8] sm:$0xff] %vm330_vm2, %v3794_v32  ;;  %v3428_v45 = vadd.f32 %v3392_v40, %v3347_v37  ;;  %v3799_v21 = vadd.f32 %v8036_v46, %v3763_v42  ;;  %v3772_v32 = vld [vmem:[#allocation2 + $0x78] sm:$0xff] }
 0x1fd   : > { %v3867_v43 = vld [vmem:[#allocation2 + $0x10] sm:$0xff]  ;;  %v3630_v47 = vpop.f32.mrf.mxu0 }
 0x1fe   : > { %v3910_v5 = vadd.f32 %v9479_v39, %v3867_v43  ;;  %3464 = vst.msk [vmem:[#allocation2 + $0x108] sm:$0xff] %vm330_vm2, %v3428_v45  ;;  %3835 = vst.msk [vmem:[#allocation2 + $0x30] sm:$0xff] %vm330_vm2, %v3799_v21  ;;  %v3797_v48 = vadd.f32 %v3761_v11, %v3630_v47 }
 0x1ff   : > { %v3865_v49 = vld [vmem:[#allocation2] sm:$0xff]  ;;  %v8037_v7 = vpop.f32.mrf.mxu0 }
 0x200   : > { %v3946_v51 = vmax.f32 %v3910_v5, 0.0  ;;  %v3908_v17 = vadd.f32 %v9479_v39, %v3865_v49  ;;  %3833 = vst.msk [vmem:[#allocation2 + $0x20] sm:$0xff] %vm330_vm2, %v3797_v48  ;;  %v3800_v52 = vadd.f32 %v8037_v7, %v3764_v50  ;;  %v3770_v49 = vld [vmem:[#allocation2 + $0x68] sm:$0xff] }
 0x201   : > { %v3868_v53 = vld [vmem:[#allocation2 + $0x18] sm:$0xff]  ;;  %v3633_v54 = vpop.f32.mrf.mxu0 }
 0x202   : > { %3982 = vst.msk [vmem:[#allocation2 + $0x10] sm:$0xff] %vm330_vm2, %v3946_v51  ;;  %v3944_v57 = vmax.f32 %v3908_v17, 0.0  ;;  %v3911_v58 = vadd.f32 %v9479_v39, %v3868_v53  ;;  %3836 = vst.msk [vmem:[#allocation2 + $0x38] sm:$0xff] %vm330_vm2, %v3800_v52  ;;  %v3798_v59 = vadd.f32 %v3762_v18, %v3633_v54  ;;  %v3775_v53 = vld [vmem:[#allocation2 + $0x90] sm:$0xff] }
 0x203   : > { %v3866_v60 = vld [vmem:[#allocation2 + $0x8] sm:$0xff]  ;;  %v8040_v61 = vpop.f32.mrf.mxu0 }
 0x204   : > { %3980 = vst.msk [vmem:[#allocation2] sm:$0xff] %vm330_vm2, %v3944_v57  ;;  %v3947_v62 = vmax.f32 %v3911_v58, 0.0  ;;  %v3909_v0 = vadd.f32 %v9479_v39, %v3866_v60  ;;  %3834 = vst.msk [vmem:[#allocation2 + $0x28] sm:$0xff] %vm330_vm2, %v3798_v59  ;;  %v3803_v1 = vadd.f32 %v8040_v61, %v3767_v44  ;;  %v3773_v58 = vld [vmem:[#allocation2 + $0x80] sm:$0xff] }
 0x205   : > { %v3871_v2 = vld [vmem:[#allocation2 + $0x30] sm:$0xff]  ;;  %v3646_v55 = vpop.f32.mrf.mxu0 }
 0x206   : > { %3983 = vst.msk [vmem:[#allocation2 + $0x18] sm:$0xff] %vm330_vm2, %v3947_v62  ;;  %v3945_v4 = vmax.f32 %v3909_v0, 0.0  ;;  %v3914_v22 = vadd.f32 %v9479_v39, %v3871_v2  ;;  %3839 = vst.msk [vmem:[#allocation2 + $0x50] sm:$0xff] %vm330_vm2, %v3803_v1  ;;  %v3801_v9 = vadd.f32 %v3765_v8, %v3646_v55  ;;  %v3776_v55 = vld [vmem:[#allocation2 + $0x98] sm:$0xff] }
 0x207   : > { %v3869_v12 = vld [vmem:[#allocation2 + $0x20] sm:$0xff]  ;;  %v8041_v13 = vpop.f32.mrf.mxu0 }
 0x208   : > { %3981 = vst.msk [vmem:[#allocation2 + $0x8] sm:$0xff] %vm330_vm2, %v3945_v4  ;;  %v3950_v14 = vmax.f32 %v3914_v22, 0.0  ;;  %v3912_v15 = vadd.f32 %v9479_v39, %v3869_v12  ;;  %3837 = vst.msk [vmem:[#allocation2 + $0x40] sm:$0xff] %vm330_vm2, %v3801_v9  ;;  %v3804_v41 = vadd.f32 %v8041_v13, %v3768_v19 }
 0x209   : > { %v3872_v10 = vld [vmem:[#allocation2 + $0x38] sm:$0xff]  ;;  %v3649_v16 = vpop.f32.mrf.mxu0 }
 0x20a   : > { %3986 = vst.msk [vmem:[#allocation2 + $0x30] sm:$0xff] %vm330_vm2, %v3950_v14  ;;  %v3948_v31 = vmax.f32 %v3912_v15, 0.0  ;;  %v3915_v23 = vadd.f32 %v9479_v39, %v3872_v10  ;;  %3840 = vst.msk [vmem:[#allocation2 + $0x58] sm:$0xff] %vm330_vm2, %v3804_v41  ;;  %v3802_v24 = vadd.f32 %v3766_v20, %v3649_v16  ;;  %v3774_v10 = vld [vmem:[#allocation2 + $0x88] sm:$0xff] }
 0x20b   : > { %v3870_v25 = vld [vmem:[#allocation2 + $0x28] sm:$0xff]  ;;  %v8044_v56 = vpop.f32.mrf.mxu0 }
 0x20c   : > { %3984 = vst.msk [vmem:[#allocation2 + $0x20] sm:$0xff] %vm330_vm2, %v3948_v31  ;;  %v3951_v27 = vmax.f32 %v3915_v23, 0.0  ;;  %v3913_v28 = vadd.f32 %v9479_v39, %v3870_v25  ;;  %3838 = vst.msk [vmem:[#allocation2 + $0x48] sm:$0xff] %vm330_vm2, %v3802_v24  ;;  %v3807_v6 = vadd.f32 %v8044_v56, %v3771_v26  ;;  %v3779_v25 = vld [vmem:[#allocation2 + $0xb0] sm:$0xff] }
 0x20d   : > { %v4018_v3 = vld [vmem:[#allocation2 + $0x10] ss:$2 sm:$0xff]  ;;  %v4054_v30 = vld [vmem:[#allocation2 + $0x11] ss:$2 sm:$0xff]  ;;  %v3662_v34 = vpop.f32.mrf.mxu0 }
 0x20e   : > { %v3875_v33 = vld [vmem:[#allocation2 + $0x50] sm:$0xff]  ;;  %v4088_v35 = vmax.f32 %v4018_v3, %v4054_v30  ;;  %3987 = vst.msk [vmem:[#allocation2 + $0x38] sm:$0xff] %vm330_vm2, %v3951_v27  ;;  %v3949_v36 = vmax.f32 %v3913_v28, 0.0  ;;  %3843 = vst.msk [vmem:[#allocation2 + $0x70] sm:$0xff] %vm330_vm2, %v3807_v6  ;;  %v3805_v38 = vadd.f32 %v3769_v29, %v3662_v34  ;;  %v3777_v28 = vld [vmem:[#allocation2 + $0xa0] sm:$0xff] }
 0x20f   : > { %v3918_v37 = vadd.f32 %v9479_v39, %v3875_v33  ;;  %v4016_v40 = vld [vmem:[#allocation2] ss:$2 sm:$0xff]  ;;  %v4052_v46 = vld [vmem:[#allocation2 + $0x1] ss:$2 sm:$0xff]  ;;  %v8045_v45 = vpop.f32.mrf.mxu0 }
 0x210   : > { %v3873_v42 = vld [vmem:[#allocation2 + $0x40] sm:$0xff]  ;;  %4106 = vst.msk [vmem:[#allocation3 + $0x8] sm:$0xff] %vm330_vm2, %v4088_v35  ;;  %v4087_v21 = vmax.f32 %v4016_v40, %v4052_v46  ;;  %3985 = vst.msk [vmem:[#allocation2 + $0x28] sm:$0xff] %vm330_vm2, %v3949_v36  ;;  %v3808_v11 = vadd.f32 %v8045_v45, %v3772_v32 }
 0x211   : > { %v3954_v43 = vmax.f32 %v3918_v37, 0.0  ;;  %v3916_v47 = vadd.f32 %v9479_v39, %v3873_v42  ;;  %3841 = vst.msk [vmem:[#allocation2 + $0x60] sm:$0xff] %vm330_vm2, %v3805_v38  ;;  %v3876_v5 = vld [vmem:[#allocation2 + $0x58] sm:$0xff]  ;;  %v3665_v48 = vpop.f32.mrf.mxu0 }
 0x212   : > { %4105 = vst.msk [vmem:[#allocation3] sm:$0xff] %vm330_vm2, %v4087_v21  ;;  %v3919_v50 = vadd.f32 %v9479_v39, %v3876_v5  ;;  %3844 = vst.msk [vmem:[#allocation2 + $0x78] sm:$0xff] %vm330_vm2, %v3808_v11  ;;  %v3806_v51 = vadd.f32 %v3770_v49, %v3665_v48  ;;  %v3780_v37 = vld [vmem:[#allocation2 + $0xb8] sm:$0xff] }
 0x213   : > { %3990 = vst.msk [vmem:[#allocation2 + $0x50] sm:$0xff] %vm330_vm2, %v3954_v43  ;;  %v3952_v7 = vmax.f32 %v3916_v47, 0.0  ;;  %v3874_v17 = vld [vmem:[#allocation2 + $0x48] sm:$0xff]  ;;  %v8048_v52 = vpop.f32.mrf.mxu0 }
 0x214   : > { %v3955_v54 = vmax.f32 %v3919_v50, 0.0  ;;  %v3917_v18 = vadd.f32 %v9479_v39, %v3874_v17  ;;  %3842 = vst.msk [vmem:[#allocation2 + $0x68] sm:$0xff] %vm330_vm2, %v3806_v51  ;;  %v3811_v57 = vadd.f32 %v8048_v52, %v3775_v53  ;;  %v3778_v47 = vld [vmem:[#allocation2 + $0xa8] sm:$0xff] }
 0x215   : > { %3988 = vst.msk [vmem:[#allocation2 + $0x40] sm:$0xff] %vm330_vm2, %v3952_v7  ;;  %v4022_v59 = vld [vmem:[#allocation2 + $0x30] ss:$2 sm:$0xff]  ;;  %v4058_v60 = vld [vmem:[#allocation2 + $0x31] ss:$2 sm:$0xff]  ;;  %v3678_v44 = vpop.f32.mrf.mxu0 }
 0x216   : > { %v3879_v61 = vld [vmem:[#allocation2 + $0x70] sm:$0xff]  ;;  %v4090_v62 = vmax.f32 %v4022_v59, %v4058_v60  ;;  %3991 = vst.msk [vmem:[#allocation2 + $0x58] sm:$0xff] %vm330_vm2, %v3955_v54  ;;  %v3953_v0 = vmax.f32 %v3917_v18, 0.0  ;;  %3847 = vst.msk [vmem:[#allocation2 + $0x90] sm:$0xff] %vm330_vm2, %v3811_v57  ;;  %v3809_v2 = vadd.f32 %v3773_v58, %v3678_v44  ;;  %v3781_v59 = vld [vmem:[#allocation2 + $0xc0] sm:$0xff] }
 0x217   : > { %v3922_v1 = vadd.f32 %v9479_v39, %v3879_v61  ;;  %v4020_v8 = vld [vmem:[#allocation2 + $0x20] ss:$2 sm:$0xff]  ;;  %v4056_v4 = vld [vmem:[#allocation2 + $0x21] ss:$2 sm:$0xff]  ;;  %v8049_v9 = vpop.f32.mrf.mxu0  ;;  %v3783_v54 = vld [vmem:[#allocation2 + $0xd0] sm:$0xff] }
 0x218   : > { %v3877_v22 = vld [vmem:[#allocation2 + $0x60] sm:$0xff]  ;;  %4108 = vst.msk [vmem:[#allocation3 + $0x18] sm:$0xff] %vm330_vm2, %v4090_v62  ;;  %v4089_v12 = vmax.f32 %v4020_v8, %v4056_v4  ;;  %3989 = vst.msk [vmem:[#allocation2 + $0x48] sm:$0xff] %vm330_vm2, %v3953_v0  ;;  %v3812_v14 = vadd.f32 %v8049_v9, %v3776_v55  ;;  %v3784_v8 = vld [vmem:[#allocation2 + $0xd8] sm:$0xff] }
 0x219   : > { %v3958_v13 = vmax.f32 %v3922_v1, 0.0  ;;  %v3920_v19 = vadd.f32 %v9479_v39, %v3877_v22  ;;  %3845 = vst.msk [vmem:[#allocation2 + $0x80] sm:$0xff] %vm330_vm2, %v3809_v2  ;;  %v3880_v15 = vld [vmem:[#allocation2 + $0x78] sm:$0xff]  ;;  %v3681_v41 = vpop.f32.mrf.mxu0  ;;  %v4123_v48 = vld [vmem:[#allocation3] sm:$0xff] }
 0x21a   : > { %4107 = vst.msk [vmem:[#allocation3 + $0x10] sm:$0xff] %vm330_vm2, %v4089_v12  ;;  %v3923_v20 = vadd.f32 %v9479_v39, %v3880_v15  ;;  %3848 = vst.msk [vmem:[#allocation2 + $0x98] sm:$0xff] %vm330_vm2, %v3812_v14  ;;  %v3810_v31 = vadd.f32 %v3774_v10, %v3681_v41  ;;  %v3782_v41 = vld [vmem:[#allocation2 + $0xc8] sm:$0xff]  ;;  %v4155_v10 = vld [vmem:[#allocation4] sm:$0xff] }
 0x21b   : > { %3994 = vst.msk [vmem:[#allocation2 + $0x70] sm:$0xff] %vm330_vm2, %v3958_v13  ;;  %v3956_v16 = vmax.f32 %v3920_v19, 0.0  ;;  %v3878_v23 = vld [vmem:[#allocation2 + $0x68] sm:$0xff]  ;;  %v8052_v24 = vpop.f32.mrf.mxu0 }
 0x21c   : > { %v3959_v56 = vmax.f32 %v3923_v20, 0.0  ;;  %v3921_v26 = vadd.f32 %v9479_v39, %v3878_v23  ;;  %3846 = vst.msk [vmem:[#allocation2 + $0x88] sm:$0xff] %vm330_vm2, %v3810_v31  ;;  %v3815_v27 = vadd.f32 %v8052_v24, %v3779_v25 }
 0x21d   : > { %3992 = vst.msk [vmem:[#allocation2 + $0x60] sm:$0xff] %vm330_vm2, %v3956_v16  ;;  %v4026_v6 = vld [vmem:[#allocation2 + $0x50] ss:$2 sm:$0xff]  ;;  %v4062_v29 = vld [vmem:[#allocation2 + $0x51] ss:$2 sm:$0xff]  ;;  %v3694_v30 = vpop.f32.mrf.mxu0 }
 0x21e   : > { %v3883_v3 = vld [vmem:[#allocation2 + $0x90] sm:$0xff]  ;;  %v4092_v33 = vmax.f32 %v4026_v6, %v4062_v29  ;;  %3995 = vst.msk [vmem:[#allocation2 + $0x78] sm:$0xff] %vm330_vm2, %v3959_v56  ;;  %v3957_v34 = vmax.f32 %v3921_v26, 0.0  ;;  %3851 = vst.msk [vmem:[#allocation2 + $0xb0] sm:$0xff] %vm330_vm2, %v3815_v27  ;;  %v3813_v36 = vadd.f32 %v3777_v28, %v3694_v30 }
 0x21f   : > { %v3926_v35 = vadd.f32 %v9479_v39, %v3883_v3  ;;  %v4024_v38 = vld [vmem:[#allocation2 + $0x40] ss:$2 sm:$0xff]  ;;  %v4060_v32 = vld [vmem:[#allocation2 + $0x41] ss:$2 sm:$0xff]  ;;  %v8053_v46 = vpop.f32.mrf.mxu0  ;;  %v3787_v26 = vld [vmem:[#allocation2 + $0xf0] sm:$0xff] }
 0x220   : > { %v3881_v40 = vld [vmem:[#allocation2 + $0x80] sm:$0xff]  ;;  %4110 = vst.msk [vmem:[#allocation3 + $0x28] sm:$0xff] %vm330_vm2, %v4092_v33  ;;  %v4091_v42 = vmax.f32 %v4024_v38, %v4060_v32  ;;  %3993 = vst.msk [vmem:[#allocation2 + $0x68] sm:$0xff] %vm330_vm2, %v3957_v34  ;;  %v3816_v43 = vadd.f32 %v8053_v46, %v3780_v37  ;;  %v4434_v27 = vld [vmem:[#allocation4 + $0x2] sm:$0xff] }
 0x221   : > { %v3962_v45 = vmax.f32 %v3926_v35, 0.0  ;;  %v3924_v21 = vadd.f32 %v9479_v39, %v3881_v40  ;;  %3849 = vst.msk [vmem:[#allocation2 + $0xa0] sm:$0xff] %vm330_vm2, %v3813_v36  ;;  %v3884_v11 = vld [vmem:[#allocation2 + $0x98] sm:$0xff]  ;;  %v3697_v5 = vpop.f32.mrf.mxu0  ;;  %v4124_v49 = vld [vmem:[#allocation3 + $0x9] sm:$0xff]  ;;  %v3785_v36 = vld [vmem:[#allocation2 + $0xe0] sm:$0xff] }
 0x222   : > { %4109 = vst.msk [vmem:[#allocation3 + $0x20] sm:$0xff] %vm330_vm2, %v4091_v42  ;;  %v3927_v50 = vadd.f32 %v9479_v39, %v3884_v11  ;;  %3852 = vst.msk [vmem:[#allocation2 + $0xb8] sm:$0xff] %vm330_vm2, %v3816_v43  ;;  %v3814_v51 = vadd.f32 %v3778_v47, %v3697_v5  ;;  %v4125_v17 = vmax.f32 %v4123_v48, %v4124_v49  ;;  %v4127_v31 = vld [vmem:[#allocation3 + $0x12] sm:$0xff]  ;;  %v8453_v32 = vld [vmem:[%s10342_s3 + $0x48] sm:$0xff]  }
 0x223   : > { %3998 = vst.msk [vmem:[#allocation2 + $0x90] sm:$0xff] %vm330_vm2, %v3962_v45  ;;  %v3960_v7 = vmax.f32 %v3924_v21, 0.0  ;;  %v3882_v52 = vld [vmem:[#allocation2 + $0x88] sm:$0xff]  ;;  %v8056_v53 = vpop.f32.mrf.mxu0  ;;  %v8450_v38 = vld [vmem:[%s10342_s3 + $0x18] sm:$0xff]  }
 0x224   : > { %v3963_v18 = vmax.f32 %v3927_v50, 0.0  ;;  %v3925_v57 = vadd.f32 %v9479_v39, %v3882_v52  ;;  %3850 = vst.msk [vmem:[#allocation2 + $0xa8] sm:$0xff] %vm330_vm2, %v3814_v51  ;;  %v3819_v58 = vadd.f32 %v8056_v53, %v3783_v54  ;;  %4126 = vst.msk [vmem:[#allocation4 + $0xb] sm:$0xff] %vm330_vm2, %v4125_v17  ;;  %v3788_v48 = vld [vmem:[#allocation2 + $0xf8] sm:$0xff] }
 0x225   : > { %3996 = vst.msk [vmem:[#allocation2 + $0x80] sm:$0xff] %vm330_vm2, %v3960_v7  ;;  %v4030_v60 = vld [vmem:[#allocation2 + $0x70] ss:$2 sm:$0xff]  ;;  %v4066_v61 = vld [vmem:[#allocation2 + $0x71] ss:$2 sm:$0xff]  ;;  %v3710_v62 = vpop.f32.mrf.mxu0 }
 0x226   : > { %v3887_v44 = vld [vmem:[#allocation2 + $0xb0] sm:$0xff]  ;;  %v4094_v0 = vmax.f32 %v4030_v60, %v4066_v61  ;;  %3999 = vst.msk [vmem:[#allocation2 + $0x98] sm:$0xff] %vm330_vm2, %v3963_v18  ;;  %v3961_v1 = vmax.f32 %v3925_v57, 0.0  ;;  %3855 = vst.msk [vmem:[#allocation2 + $0xd0] sm:$0xff] %vm330_vm2, %v3819_v58  ;;  %v3817_v55 = vadd.f32 %v3781_v59, %v3710_v62  ;;  %v3786_v18 = vld [vmem:[#allocation2 + $0xe8] sm:$0xff] }
 0x227   : > { %v3930_v2 = vadd.f32 %v9479_v39, %v3887_v44  ;;  %v4028_v4 = vld [vmem:[#allocation2 + $0x60] ss:$2 sm:$0xff]  ;;  %v4064_v22 = vld [vmem:[#allocation2 + $0x61] ss:$2 sm:$0xff]  ;;  %v8057_v12 = vpop.f32.mrf.mxu0  ;;  %v8451_v57 = vld [vmem:[%s10342_s3 + $0x10] sm:$0xff]  }
 0x228   : > { %v3885_v9 = vld [vmem:[#allocation2 + $0xa0] sm:$0xff]  ;;  %4112 = vst.msk [vmem:[#allocation3 + $0x38] sm:$0xff] %vm330_vm2, %v4094_v0  ;;  %v4093_v13 = vmax.f32 %v4028_v4, %v4064_v22  ;;  %3997 = vst.msk [vmem:[#allocation2 + $0x88] sm:$0xff] %vm330_vm2, %v3961_v1  ;;  %v3820_v15 = vadd.f32 %v8057_v12, %v3784_v8  ;;  %v3791_v4 = vld [vmem:[#allocation2 + $0x110] sm:$0xff] }
 0x229   : > { %v3966_v19 = vmax.f32 %v3930_v2, 0.0  ;;  %v3928_v14 = vadd.f32 %v9479_v39, %v3885_v9  ;;  %3853 = vst.msk [vmem:[#allocation2 + $0xc0] sm:$0xff] %vm330_vm2, %v3817_v55  ;;  %v3888_v16 = vld [vmem:[#allocation2 + $0xb8] sm:$0xff]  ;;  %v3713_v20 = vpop.f32.mrf.mxu0  ;;  %v8454_v58 = vld [vmem:[%s10342_s3 + $0x40] sm:$0xff]  }
 0x22a   : > { %v4128_v23 = vld [vmem:[#allocation3 + $0x1b] sm:$0xff]  ;;  %4111 = vst.msk [vmem:[#allocation3 + $0x30] sm:$0xff] %vm330_vm2, %v4093_v13  ;;  %v3931_v25 = vadd.f32 %v9479_v39, %v3888_v16  ;;  %3856 = vst.msk [vmem:[#allocation2 + $0xd8] sm:$0xff] %vm330_vm2, %v3820_v15  ;;  %v3818_v56 = vadd.f32 %v3782_v41, %v3713_v20  ;;  %v4131_v61 = vld [vmem:[#allocation3 + $0x24] sm:$0xff] }
 0x22b   : > { %4002 = vst.msk [vmem:[#allocation2 + $0xb0] sm:$0xff] %vm330_vm2, %v3966_v19  ;;  %v3964_v24 = vmax.f32 %v3928_v14, 0.0  ;;  %v4129_v28 = vmax.f32 %v4127_v31, %v4128_v23  ;;  %v3886_v6 = vld [vmem:[#allocation2 + $0xa8] sm:$0xff]  ;;  %v8060_v29 = vpop.f32.mrf.mxu0  ;;  %v4156_v3 = vld [vmem:[#allocation4 + $0x8] sm:$0xff]  ;;  %v3789_v19 = vld [vmem:[#allocation2 + $0x100] sm:$0xff] }
 0x22c   : > { %v9560_v30 = vld [vmem:[#allocation4 + $0xa] sm:$0xff]  ;;  %v3967_v33 = vmax.f32 %v3931_v25, 0.0  ;;  %v3929_v34 = vadd.f32 %v9479_v39, %v3886_v6  ;;  %3854 = vst.msk [vmem:[#allocation2 + $0xc8] sm:$0xff] %vm330_vm2, %v3818_v56  ;;  %v3823_v35 = vadd.f32 %v8060_v29, %v3787_v26  ;;  %v4165_v37 = vpack.c.bf16 %v4156_v3, %v4155_v10 }
 0x22d   : > { %4000 = vst.msk [vmem:[#allocation2 + $0xa0] sm:$0xff] %vm330_vm2, %v3964_v24  ;;  %4130 = vst.msk [vmem:[#allocation4 + $0x15] sm:$0xff] %vm330_vm2, %v4129_v28  ;;  %v4034_v40 = vld [vmem:[#allocation2 + $0x90] ss:$2 sm:$0xff]  ;;  %v4070_v46 = vld [vmem:[#allocation2 + $0x91] ss:$2 sm:$0xff]  ;;  %v3726_v45 = vpop.f32.mrf.mxu0  ;;  %v4444_v21 = vpack.c.bf16 %v9560_v30, %v4434_v27 }
 0x22e   : > { %v3891_v42 = vld [vmem:[#allocation2 + $0xd0] sm:$0xff]  ;;  %v4096_v43 = vmax.f32 %v4034_v40, %v4070_v46  ;;  %4003 = vst.msk [vmem:[#allocation2 + $0xb8] sm:$0xff] %vm330_vm2, %v3967_v33  ;;  %v3965_v47 = vmax.f32 %v3929_v34, 0.0  ;;  %3859 = vst.msk [vmem:[#allocation2 + $0xf0] sm:$0xff] %vm330_vm2, %v3823_v35  ;;  %v3821_v5 = vadd.f32 %v3785_v36, %v3726_v45  ;;  %8071 = vmatmul.mubr.msk.bf16.vlgmr.msra.gmra.mxu1 %vm330_vm2, %v4165_v37  ;;  %v3792_v25 = vld [vmem:[#allocation2 + $0x118] sm:$0xff] }
 0x22f   : > { %v3934_v11 = vadd.f32 %v9479_v39, %v3891_v42  ;;  %v4032_v49 = vld [vmem:[#allocation2 + $0x80] ss:$2 sm:$0xff]  ;;  %v4068_v7 = vld [vmem:[#allocation2 + $0x81] ss:$2 sm:$0xff]  ;;  %8119 = vmatmul.mubr.msk.bf16.vlgmr.msra.gmra.mxu0 %vm330_vm2, %v4444_v21  ;;  %v8061_v51 = vpop.f32.mrf.mxu0  ;;  %8074 = vmatprep.mubr.msk.bf16.mxu1 %vm8509_vm3, %v8508_v63 }
 0x230   : > { %v3889_v50 = vld [vmem:[#allocation2 + $0xc0] sm:$0xff]  ;;  %4114 = vst.msk [vmem:[#allocation3 + $0x48] sm:$0xff] %vm330_vm2, %v4096_v43  ;;  %v4095_v17 = vmax.f32 %v4032_v49, %v4068_v7  ;;  %4001 = vst.msk [vmem:[#allocation2 + $0xa8] sm:$0xff] %vm330_vm2, %v3965_v47  ;;  %v3824_v54 = vadd.f32 %v8061_v51, %v3788_v48  ;;  %8122 = vmatprep.mubr.msk.bf16.mxu0 %vm8509_vm3, %v8508_v63  ;;  %8091 = vmatpush3.bf16.msra.mxu1 %v8450_v38  ;;  %v3790_v34 = vld [vmem:[#allocation2 + $0x108] sm:$0xff] }
 0x231   : > { %v3970_v52 = vmax.f32 %v3934_v11, 0.0  ;;  %v3932_v53 = vadd.f32 %v9479_v39, %v3889_v50  ;;  %3857 = vst.msk [vmem:[#allocation2 + $0xe0] sm:$0xff] %vm330_vm2, %v3821_v5  ;;  %v3892_v59 = vld [vmem:[#allocation2 + $0xd8] sm:$0xff]  ;;  %v3729_v60 = vpop.f32.mrf.mxu0  ;;  %v4132_v44 = vld [vmem:[#allocation3 + $0x2d] sm:$0xff]  ;;  %8092 = vmatprep.subr.bf16.mxu1 %v8508_v63  ;;  %8163 = vmatpush3.bf16.msra.mxu0 %v8453_v32 }
 0x232   : > { %4113 = vst.msk [vmem:[#allocation3 + $0x40] sm:$0xff] %vm330_vm2, %v4095_v17  ;;  %v3935_v0 = vadd.f32 %v9479_v39, %v3892_v59  ;;  %3860 = vst.msk [vmem:[#allocation2 + $0xf8] sm:$0xff] %vm330_vm2, %v3824_v54  ;;  %v3822_v1 = vadd.f32 %v3786_v18, %v3729_v60  ;;  %v4133_v2 = vmax.f32 %v4131_v61, %v4132_v44  ;;  %8164 = vmatprep.subr.bf16.mxu0 %v8508_v63  ;;  %v4135_v37 = vld [vmem:[#allocation3 + $0x36] sm:$0xff] }
 0x233   : > { %4006 = vst.msk [vmem:[#allocation2 + $0xd0] sm:$0xff] %vm330_vm2, %v3970_v52  ;;  %v3968_v62 = vmax.f32 %v3932_v53, 0.0  ;;  %v3890_v55 = vld [vmem:[#allocation2 + $0xc8] sm:$0xff]  ;;  %v8064_v8 = vpop.f32.mrf.mxu0 }
 0x234   : > { %v9598_v22 = vld [vmem:[#allocation4 + $0x12] sm:$0xff]  ;;  %v3971_v9 = vmax.f32 %v3935_v0, 0.0  ;;  %v3933_v12 = vadd.f32 %v9479_v39, %v3890_v55  ;;  %3858 = vst.msk [vmem:[#allocation2 + $0xe8] sm:$0xff] %vm330_vm2, %v3822_v1  ;;  %v3827_v13 = vadd.f32 %v8064_v8, %v3791_v4  ;;  %4134 = vst.msk [vmem:[#allocation4 + $0x1f] sm:$0xff] %vm330_vm2, %v4133_v2  ;;  %8093 = vmatpush3.bf16.msra.mxu1 %v8451_v57 }
 0x235   : > { %4004 = vst.msk [vmem:[#allocation2 + $0xc0] sm:$0xff] %vm330_vm2, %v3968_v62  ;;  %v4594_v14 = vpack.c.bf16 %v9598_v22, %v9560_v30  ;;  %v4038_v15 = vld [vmem:[#allocation2 + $0xb0] ss:$2 sm:$0xff]  ;;  %v4074_v41 = vld [vmem:[#allocation2 + $0xb1] ss:$2 sm:$0xff]  ;;  %v3742_v16 = vpop.f32.mrf.mxu0  ;;  %8138 = vmatprep.subr.bf16.mxu1 %v8508_v63  ;;  %8165 = vmatpush3.bf16.msra.mxu0 %v8454_v58  ;;  %v4157_v42 = vld [vmem:[#allocation4 + $0x10] sm:$0xff] }
 0x236   : > { %v3895_v10 = vld [vmem:[#allocation2 + $0xf0] sm:$0xff]  ;;  %v4098_v20 = vmax.f32 %v4038_v15, %v4074_v41  ;;  %4007 = vst.msk [vmem:[#allocation2 + $0xd8] sm:$0xff] %vm330_vm2, %v3971_v9  ;;  %v3969_v31 = vmax.f32 %v3933_v12, 0.0  ;;  %3863 = vst.msk [vmem:[#allocation2 + $0x110] sm:$0xff] %vm330_vm2, %v3827_v13  ;;  %v3825_v24 = vadd.f32 %v3789_v19, %v3742_v16  ;;  %8210 = vmatprep.subr.bf16.mxu0 %v8508_v63 }
 0x237   : > { %v3938_v23 = vadd.f32 %v9479_v39, %v3895_v10  ;;  %v4036_v56 = vld [vmem:[#allocation2 + $0xa0] ss:$2 sm:$0xff]  ;;  %v4072_v26 = vld [vmem:[#allocation2 + $0xa1] ss:$2 sm:$0xff]  ;;  %v8065_v28 = vpop.f32.mrf.mxu0 }
 0x238   : > { %v3893_v27 = vld [vmem:[#allocation2 + $0xe0] sm:$0xff]  ;;  %4116 = vst.msk [vmem:[#allocation3 + $0x58] sm:$0xff] %vm330_vm2, %v4098_v20  ;;  %v4097_v6 = vmax.f32 %v4036_v56, %v4072_v26  ;;  %4005 = vst.msk [vmem:[#allocation2 + $0xc8] sm:$0xff] %vm330_vm2, %v3969_v31  ;;  %v3828_v33 = vadd.f32 %v8065_v28, %v3792_v25  ;;  %v4139_v44 = vld [vmem:[#allocation3 + $0x48] sm:$0xff] }
 0x239   : > { %v3974_v29 = vmax.f32 %v3938_v23, 0.0  ;;  %v3936_v3 = vadd.f32 %v9479_v39, %v3893_v27  ;;  %3861 = vst.msk [vmem:[#allocation2 + $0x100] sm:$0xff] %vm330_vm2, %v3825_v24  ;;  %v3896_v35 = vld [vmem:[#allocation2 + $0xf8] sm:$0xff]  ;;  %v3745_v36 = vpop.f32.mrf.mxu0 }
 0x23a   : > { %v4136_v38 = vld [vmem:[#allocation3 + $0x3f] sm:$0xff]  ;;  %4115 = vst.msk [vmem:[#allocation3 + $0x50] sm:$0xff] %vm330_vm2, %v4097_v6  ;;  %v3939_v40 = vadd.f32 %v9479_v39, %v3896_v35  ;;  %3864 = vst.msk [vmem:[#allocation2 + $0x118] sm:$0xff] %vm330_vm2, %v3828_v33  ;;  %v3826_v46 = vadd.f32 %v3790_v34, %v3745_v36 }
 0x23b   : > { %4010 = vst.msk [vmem:[#allocation2 + $0xf0] sm:$0xff] %vm330_vm2, %v3974_v29  ;;  %v3972_v32 = vmax.f32 %v3936_v3, 0.0  ;;  %v4137_v45 = vmax.f32 %v4135_v37, %v4136_v38  ;;  %v3894_v21 = vld [vmem:[#allocation2 + $0xe8] sm:$0xff]  ;;  %v4159_v2 = vld [vmem:[#allocation4 + $0x20] sm:$0xff] }
 0x23c   : > { %v4158_v43 = vld [vmem:[#allocation4 + $0x18] sm:$0xff]  ;;  %v3975_v11 = vmax.f32 %v3939_v40, 0.0  ;;  %v3937_v5 = vadd.f32 %v9479_v39, %v3894_v21  ;;  %3862 = vst.msk [vmem:[#allocation2 + $0x108] sm:$0xff] %vm330_vm2, %v3826_v46 }
 0x23d   : > { %v9619_v47 = vld [vmem:[#allocation4 + $0x1a] sm:$0xff]  ;;  %4008 = vst.msk [vmem:[#allocation2 + $0xe0] sm:$0xff] %vm330_vm2, %v3972_v32  ;;  %v4166_v48 = vpack.c.bf16 %v4158_v43, %v4157_v42  ;;  %4138 = vst.msk [vmem:[#allocation4 + $0x29] sm:$0xff] %vm330_vm2, %v4137_v45 }
 0x23e   : > { %v4445_v49 = vpack.c.bf16 %v9619_v47, %v9598_v22  ;;  %v4042_v7 = vld [vmem:[#allocation2 + $0xd0] ss:$2 sm:$0xff]  ;;  %v4078_v50 = vld [vmem:[#allocation2 + $0xd1] ss:$2 sm:$0xff]  ;;  %4011 = vst.msk [vmem:[#allocation2 + $0xf8] sm:$0xff] %vm330_vm2, %v3975_v11  ;;  %v3973_v52 = vmax.f32 %v3937_v5, 0.0 }
 0x23f   : > { %v3899_v51 = vld [vmem:[#allocation2 + $0x110] sm:$0xff]  ;;  %v4100_v17 = vmax.f32 %v4042_v7, %v4078_v50  ;;  %8075 = vmatmul.mubr.msk.bf16.gmra.mxu1 %vm330_vm2, %v4166_v48  ;;  %v4040_v54 = vld [vmem:[#allocation2 + $0xc0] ss:$2 sm:$0xff]  ;;  %v4076_v18 = vld [vmem:[#allocation2 + $0xc1] ss:$2 sm:$0xff] }
 0x240   : > { %v3942_v53 = vadd.f32 %v9479_v39, %v3899_v51  ;;  %8123 = vmatmul.mubr.msk.bf16.gmra.mxu0 %vm330_vm2, %v4445_v49  ;;  %v3897_v57 = vld [vmem:[#allocation2 + $0x100] sm:$0xff]  ;;  %8078 = vmatprep.mubr.msk.bf16.mxu1 %vm8509_vm3, %v8508_v63  ;;  %v4099_v58 = vmax.f32 %v4040_v54, %v4076_v18  ;;  %4009 = vst.msk [vmem:[#allocation2 + $0xe8] sm:$0xff] %vm330_vm2, %v3973_v52  ;;  %v8452_v54 = vld [vmem:[%s10342_s3 + $0x38] sm:$0xff]   ;;  %v8461_v22 = vld [vmem:[%s10342_s3 + $0x88] sm:$0xff]  }
 0x241   : > { %8126 = vmatprep.mubr.msk.bf16.mxu0 %vm8509_vm3, %v8508_v63  ;;  %4118 = vst.msk [vmem:[#allocation3 + $0x68] sm:$0xff] %vm330_vm2, %v4100_v17  ;;  %v3940_v60 = vadd.f32 %v9479_v39, %v3897_v57  ;;  %v3900_v61 = vld [vmem:[#allocation2 + $0x118] sm:$0xff] }
 0x242   : > { %v3978_v59 = vmax.f32 %v3942_v53, 0.0  ;;  %v4140_v62 = vld [vmem:[#allocation3 + $0x51] sm:$0xff]  ;;  %4117 = vst.msk [vmem:[#allocation3 + $0x60] sm:$0xff] %vm330_vm2, %v4099_v58  ;;  %v3943_v1 = vadd.f32 %v9479_v39, %v3900_v61  ;;  %v4285_v52 = vld [vmem:[#allocation4 + $0x9] sm:$0xff]  ;;  %v4286_v61 = vld [vmem:[#allocation4 + $0x11] sm:$0xff] }
 0x243   : > { %v3976_v0 = vmax.f32 %v3940_v60, 0.0  ;;  %v4141_v55 = vmax.f32 %v4139_v44, %v4140_v62  ;;  %v3898_v8 = vld [vmem:[#allocation2 + $0x108] sm:$0xff]  ;;  %v4284_v17 = vld [vmem:[#allocation4 + $0x1] sm:$0xff]  ;;  %v4734_v44 = vld [vmem:[#allocation4 + $0xb] sm:$0xff] }
 0x244   : > { %4014 = vst.msk [vmem:[#allocation2 + $0x110] sm:$0xff] %vm330_vm2, %v3978_v59  ;;  %v4160_v4 = vld [vmem:[#allocation4 + $0x28] sm:$0xff]  ;;  %v3979_v12 = vmax.f32 %v3943_v1, 0.0  ;;  %v3941_v13 = vadd.f32 %v9479_v39, %v3898_v8  ;;  %v4294_v18 = vpack.c.bf16 %v4285_v52, %v4284_v17  ;;  %v8455_v58 = vld [vmem:[%s10342_s3 + $0x30] sm:$0xff]   ;;  %v4735_v60 = vld [vmem:[#allocation4 + $0x13] sm:$0xff] }
 0x245   : > { %v9641_v9 = vld [vmem:[#allocation4 + $0x22] sm:$0xff]  ;;  %4012 = vst.msk [vmem:[#allocation2 + $0x100] sm:$0xff] %vm330_vm2, %v3976_v0  ;;  %v4167_v19 = vpack.c.bf16 %v4160_v4, %v4159_v2  ;;  %v9645_v15 = vld [vmem:[#allocation4 + $0x2a] sm:$0xff]  ;;  %4142 = vst.msk [vmem:[#allocation4 + $0x33] sm:$0xff] %vm330_vm2, %v4141_v55  ;;  %v4744_v0 = vpack.c.bf16 %v4735_v60, %v4734_v44 }
 0x246   : > { %v4595_v41 = vpack.c.bf16 %v9641_v9, %v9619_v47  ;;  %v4046_v10 = vld [vmem:[#allocation2 + $0xf0] ss:$2 sm:$0xff]  ;;  %v4082_v16 = vld [vmem:[#allocation2 + $0xf1] ss:$2 sm:$0xff]  ;;  %v4446_v20 = vpack.c.bf16 %v9645_v15, %v9641_v9  ;;  %4015 = vst.msk [vmem:[#allocation2 + $0x118] sm:$0xff] %vm330_vm2, %v3979_v12  ;;  %v3977_v23 = vmax.f32 %v3941_v13, 0.0 }
 0x247   : > { %v4102_v31 = vmax.f32 %v4046_v10, %v4082_v16  ;;  %8079 = vmatmul.mubr.msk.bf16.gmra.mxu1 %vm330_vm2, %v4167_v19  ;;  %v4044_v39 = vld [vmem:[#allocation2 + $0xe0] ss:$2 sm:$0xff]  ;;  %v4080_v24 = vld [vmem:[#allocation2 + $0xe1] ss:$2 sm:$0xff]  ;;  %v4737_v8 = vld [vmem:[#allocation4 + $0x23] sm:$0xff] }
 0x248   : > { %8127 = vmatmul.mubr.msk.bf16.gmra.mxu0 %vm330_vm2, %v4446_v20  ;;  %8082 = vmatprep.mubr.msk.bf16.mxu1 %vm8509_vm3, %v8508_v63  ;;  %v4101_v25 = vmax.f32 %v4044_v39, %v4080_v24  ;;  %4013 = vst.msk [vmem:[#allocation2 + $0x108] sm:$0xff] %vm330_vm2, %v3977_v23  ;;  %v4287_v59 = vld [vmem:[#allocation4 + $0x19] sm:$0xff]  ;;  %v8458_v2 = vld [vmem:[%s10342_s3 + $0x60] sm:$0xff]   ;;  %v4288_v4 = vld [vmem:[#allocation4 + $0x21] sm:$0xff] }
 0x249   : > { %4120 = vst.msk [vmem:[#allocation3 + $0x78] sm:$0xff] %vm330_vm2, %v4102_v31  ;;  %8130 = vmatprep.mubr.msk.bf16.mxu0 %vm8509_vm3, %v8508_v63  ;;  %v4143_v56 = vld [vmem:[#allocation3 + $0x5a] sm:$0xff]  ;;  %v4144_v26 = vld [vmem:[#allocation3 + $0x63] sm:$0xff]  ;;  %v4295_v62 = vpack.c.bf16 %v4287_v59, %v4286_v61  ;;  %v4736_v12 = vld [vmem:[#allocation4 + $0x1b] sm:$0xff] }
 0x24a   : > { %4119 = vst.msk [vmem:[#allocation3 + $0x70] sm:$0xff] %vm330_vm2, %v4101_v25  ;;  %v4145_v27 = vmax.f32 %v4143_v56, %v4144_v26  ;;  %v8457_v1 = vld [vmem:[%s10342_s3 + $0x68] sm:$0xff]   ;;  %v4289_v55 = vld [vmem:[#allocation4 + $0x29] sm:$0xff]  ;;  %v4745_v19 = vpack.c.bf16 %v4737_v8, %v4736_v12 }
 0x24b   : > { %v4296_v13 = vpack.c.bf16 %v4289_v55, %v4288_v4  ;;  %v4738_v31 = vld [vmem:[#allocation4 + $0x2b] sm:$0xff]  ;;  %v5343_v8 = vld [vmem:[#allocation4 + $0x5e] sm:$0xff]  ;;  %v5184_v4 = vld [vmem:[#allocation4 + $0x15] sm:$0xff] }
 0x24c   : > { %v9662_v28 = vld [vmem:[#allocation4 + $0x32] sm:$0xff]  ;;  %4146 = vst.msk [vmem:[#allocation4 + $0x3d] sm:$0xff] %vm330_vm2, %v4145_v27 }
 0x24d   : > { %v4596_v6 = vpack.c.bf16 %v9662_v28, %v9645_v15  ;;  %v4050_v29 = vld [vmem:[#allocation2 + $0x110] ss:$2 sm:$0xff]  ;;  %v4086_v3 = vld [vmem:[#allocation2 + $0x111] ss:$2 sm:$0xff]  ;;  %v4161_v40 = vld [vmem:[#allocation4 + $0x30] sm:$0xff] }
 0x24e   : > { %v4104_v33 = vmax.f32 %v4050_v29, %v4086_v3  ;;  %v4739_v16 = vld [vmem:[#allocation4 + $0x33] sm:$0xff] }
 0x24f   : > { %v4048_v34 = vld [vmem:[#allocation2 + $0x100] ss:$2 sm:$0xff]  ;;  %v4084_v35 = vld [vmem:[#allocation2 + $0x101] ss:$2 sm:$0xff]  ;;  %v4746_v39 = vpack.c.bf16 %v4739_v16, %v4738_v31 }
 0x250   : > { %4122 = vst.msk [vmem:[#allocation3 + $0x88] sm:$0xff] %vm330_vm2, %v4104_v33  ;;  %v4103_v36 = vmax.f32 %v4048_v34, %v4084_v35  ;;  %v4290_v20 = vld [vmem:[#allocation4 + $0x31] sm:$0xff]  ;;  %v8456_v34 = vld [vmem:[%s10342_s3 + $0x58] sm:$0xff]  }
 0x251   : > { %v4147_v37 = vld [vmem:[#allocation3 + $0x6c] sm:$0xff]  ;;  %v4148_v38 = vld [vmem:[#allocation3 + $0x75] sm:$0xff] }
 0x252   : > { %4121 = vst.msk [vmem:[#allocation3 + $0x80] sm:$0xff] %vm330_vm2, %v4103_v36  ;;  %v4149_v32 = vmax.f32 %v4147_v37, %v4148_v38  ;;  %v8459_v36 = vld [vmem:[%s10342_s3 + $0x50] sm:$0xff]   ;;  %v5034_v38 = vld [vmem:[#allocation4 + $0x14] sm:$0xff] }
 0x253   : > { %v4162_v46 = vld [vmem:[#allocation4 + $0x38] sm:$0xff] }
 0x254   : > { %v9669_v42 = vld [vmem:[#allocation4 + $0x3a] sm:$0xff]  ;;  %v4168_v45 = vpack.c.bf16 %v4162_v46, %v4161_v40  ;;  %4150 = vst.msk [vmem:[#allocation4 + $0x47] sm:$0xff] %vm330_vm2, %v4149_v32  ;;  %v5037_v32 = vld [vmem:[#allocation4 + $0x2c] sm:$0xff]  ;;  %v5036_v40 = vld [vmem:[#allocation4 + $0x24] sm:$0xff] }
 0x255   : > { %v4447_v21 = vpack.c.bf16 %v9669_v42, %v9662_v28  ;;  %v4291_v10 = vld [vmem:[#allocation4 + $0x39] sm:$0xff]  ;;  %v5045_v47 = vpack.c.bf16 %v5037_v32, %v5036_v40 }
 0x256   : > { %8083 = vmatmul.mubr.msk.bf16.gmra.mxu1 %vm330_vm2, %v4168_v45  ;;  %v4297_v23 = vpack.c.bf16 %v4291_v10, %v4290_v20  ;;  %v4740_v26 = vld [vmem:[#allocation4 + $0x3b] sm:$0xff]  ;;  %v5186_v10 = vld [vmem:[#allocation4 + $0x25] sm:$0xff] }
 0x257   : > { %8131 = vmatmul.mubr.msk.bf16.gmra.mxu0 %vm330_vm2, %v4447_v21  ;;  %8086 = vmatprep.mubr.msk.bf16.mxu1 %vm8509_vm3, %v8508_v63  ;;  %v5035_v37 = vld [vmem:[#allocation4 + $0x1c] sm:$0xff] }
 0x258   : > { %8134 = vmatprep.mubr.msk.bf16.mxu0 %vm8509_vm3, %v8508_v63  ;;  %v5044_v30 = vpack.c.bf16 %v5035_v37, %v5034_v38  ;;  %v5039_v9 = vld [vmem:[#allocation4 + $0x3c] sm:$0xff]  ;;  %v4895_v17 = vpack.c.bf16 %v5036_v40, %v5035_v37 }
 0x259   : > { %v4151_v43 = vld [vmem:[#allocation3 + $0x7e] sm:$0xff]  ;;  %v4152_v11 = vld [vmem:[#allocation3 + $0x87] sm:$0xff] }
 0x25a   : > { %v4153_v5 = vmax.f32 %v4151_v43, %v4152_v11  ;;  %v5043_v43 = vld [vmem:[#allocation4 + $0x5c] sm:$0xff]  ;;  %v4884_v11 = vld [vmem:[#allocation4 + $0xc] sm:$0xff] }
 0x25b   : > { %v4163_v48 = vld [vmem:[#allocation4 + $0x40] sm:$0xff]  ;;  %v4164_v49 = vld [vmem:[#allocation4 + $0x48] sm:$0xff]  ;;  %v5188_v31 = vld [vmem:[#allocation4 + $0x35] sm:$0xff] }
 0x25c   : > { %v9680_v7 = vld [vmem:[#allocation4 + $0x42] sm:$0xff]  ;;  %v4169_v50 = vpack.c.bf16 %v4164_v49, %v4163_v48  ;;  %4154 = vst.msk [vmem:[#allocation4 + $0x51] sm:$0xff] %vm330_vm2, %v4153_v5  ;;  %v4894_v48 = vpack.c.bf16 %v5034_v38, %v4884_v11 }
 0x25d   : > { %v4597_v51 = vpack.c.bf16 %v9680_v7, %v9669_v42  ;;  %v4292_v24 = vld [vmem:[#allocation4 + $0x41] sm:$0xff]  ;;  %v4293_v25 = vld [vmem:[#allocation4 + $0x49] sm:$0xff] }
 0x25e   : > { %8087 = vmatmul.mubr.msk.bf16.gmra.mxu1 %vm330_vm2, %v4169_v50  ;;  %v4741_v56 = vld [vmem:[#allocation4 + $0x43] sm:$0xff]  ;;  %v4298_v27 = vpack.c.bf16 %v4293_v25, %v4292_v24 }
 0x25f   : > { %8094 = vmatprep.mubr.msk.bf16.mxu1 %vm8509_vm3, %v8508_v63  ;;  %v4747_v29 = vpack.c.bf16 %v4741_v56, %v4740_v26  ;;  %v8460_v5 = vld [vmem:[%s10342_s3 + $0x78] sm:$0xff]   ;;  %v5335_v50 = vld [vmem:[#allocation4 + $0x1e] sm:$0xff] }
 0x260   : > { %v5339_v59 = vld [vmem:[#allocation4 + $0x3e] sm:$0xff] }
 0x261   : > { %v5189_v20 = vld [vmem:[#allocation4 + $0x3d] sm:$0xff] }
 0x262   : > { %v5193_v37 = vld [vmem:[#allocation4 + $0x5d] sm:$0xff] }
 0x263   : > { %v9688_v53 = vld [vmem:[#allocation4 + $0x4a] sm:$0xff]  ;;  %v4743_v33 = vld [vmem:[#allocation4 + $0x53] sm:$0xff] }
 0x264   : > { %v4448_v57 = vpack.c.bf16 %v9688_v53, %v9680_v7  ;;  %v4742_v3 = vld [vmem:[#allocation4 + $0x4b] sm:$0xff]  ;;  %v5042_v42 = vld [vmem:[#allocation4 + $0x54] sm:$0xff]  ;;  %v8463_v7 = vld [vmem:[%s10342_s3 + $0x70] sm:$0xff]  }
 0x265   : > { %v4748_v35 = vpack.c.bf16 %v4743_v33, %v4742_v3  ;;  %v4593_v15 = vld [vmem:[#allocation4 + $0x52] sm:$0xff]  ;;  %v5048_v49 = vpack.c.bf16 %v5043_v43, %v5042_v42  ;;  %v5190_v3 = vld [vmem:[#allocation4 + $0x45] sm:$0xff] }
 0x266   : > { %8095 = vmatmul.mubr.msk.bf16.vlgmr.msra.gmra.mxu1 %vm330_vm2, %v4294_v18  ;;  %8135 = vmatmul.mubr.msk.bf16.gmra.mxu0 %vm330_vm2, %v4448_v57  ;;  %v5041_v28 = vld [vmem:[#allocation4 + $0x4c] sm:$0xff]  ;;  %v4598_v45 = vpack.c.bf16 %v4593_v15, %v9688_v53  ;;  %v5342_v55 = vld [vmem:[#allocation4 + $0x56] sm:$0xff] }
 0x267   : > { %8139 = vmatpush3.bf16.msra.mxu1 %v8452_v54  ;;  %8098 = vmatprep.mubr.msk.bf16.mxu1 %vm8509_vm3, %v8508_v63  ;;  %v5337_v53 = vld [vmem:[#allocation4 + $0x2e] sm:$0xff]  ;;  %v5336_v54 = vld [vmem:[#allocation4 + $0x26] sm:$0xff] }
 0x268   : > { %8166 = vmatprep.mubr.msk.bf16.mxu0 %vm8509_vm3, %v8508_v63  ;;  %8140 = vmatprep.subr.bf16.mxu1 %v8508_v63  ;;  %v5345_v57 = vpack.c.bf16 %v5337_v53, %v5336_v54  ;;  %v5341_v44 = vld [vmem:[#allocation4 + $0x4e] sm:$0xff] }
 0x269   : > { %v5191_v26 = vld [vmem:[#allocation4 + $0x4d] sm:$0xff] }
 0x26b   : > { %8141 = vmatpush3.bf16.msra.mxu1 %v8455_v58  ;;  %v5338_v58 = vld [vmem:[#allocation4 + $0x36] sm:$0xff] }
 0x26c   : > { %8186 = vmatprep.subr.bf16.mxu1 %v8508_v63  ;;  %v5346_v61 = vpack.c.bf16 %v5339_v59, %v5338_v58 }
 0x26e   : > { %8099 = vmatmul.mubr.msk.bf16.gmra.mxu1 %vm330_vm2, %v4295_v62  ;;  %8167 = vmatmul.mubr.msk.bf16.vlgmr.msra.gmra.mxu0 %vm330_vm2, %v4744_v0  ;;  %v5340_v62 = vld [vmem:[#allocation4 + $0x46] sm:$0xff]  ;;  %v4898_v0 = vpack.c.bf16 %v5042_v42, %v5041_v28 }
 0x26f   : > { %8102 = vmatprep.mubr.msk.bf16.mxu1 %vm8509_vm3, %v8508_v63  ;;  %8170 = vmatprep.mubr.msk.bf16.mxu0 %vm8509_vm3, %v8508_v63 }
 0x270   : > { %8211 = vmatpush3.bf16.msra.mxu0 %v8457_v1  ;;  %v5347_v1 = vpack.c.bf16 %v5341_v44, %v5340_v62 }
 0x271   : > { %8212 = vmatprep.subr.bf16.mxu0 %v8508_v63 }
 0x274   : > { %8213 = vmatpush3.bf16.msra.mxu0 %v8458_v2  ;;  %v5185_v2 = vld [vmem:[#allocation4 + $0x1d] sm:$0xff] }
 0x275   : > { %8258 = vmatprep.subr.bf16.mxu0 %v8508_v63  ;;  %v5194_v12 = vpack.c.bf16 %v5185_v2, %v5184_v4 }
 0x276   : > { %8103 = vmatmul.mubr.msk.bf16.gmra.mxu1 %vm330_vm2, %v4296_v13  ;;  %8171 = vmatmul.mubr.msk.bf16.gmra.mxu0 %vm330_vm2, %v4745_v19  ;;  %v5348_v13 = vpack.c.bf16 %v5343_v8, %v5342_v55  ;;  %v5187_v19 = vld [vmem:[#allocation4 + $0x2d] sm:$0xff] }
 0x277   : > { %8106 = vmatprep.mubr.msk.bf16.mxu1 %vm8509_vm3, %v8508_v63  ;;  %8174 = vmatprep.mubr.msk.bf16.mxu0 %vm8509_vm3, %v8508_v63  ;;  %v5195_v16 = vpack.c.bf16 %v5187_v19, %v5186_v10 }
 0x27e   : > { %8107 = vmatmul.mubr.msk.bf16.gmra.mxu1 %vm330_vm2, %v4297_v23  ;;  %8175 = vmatmul.mubr.msk.bf16.gmra.mxu0 %vm330_vm2, %v4746_v39  ;;  %v5196_v23 = vpack.c.bf16 %v5189_v20, %v5188_v31 }
 0x27f   : > { %8110 = vmatprep.mubr.msk.bf16.mxu1 %vm8509_vm3, %v8508_v63  ;;  %8178 = vmatprep.mubr.msk.bf16.mxu0 %vm8509_vm3, %v8508_v63 }
 0x286   : > { %8111 = vmatmul.mubr.msk.bf16.gmra.mxu1 %vm330_vm2, %v4298_v27  ;;  %8179 = vmatmul.mubr.msk.bf16.gmra.mxu0 %vm330_vm2, %v4747_v29 }
 0x287   : > { %8142 = vmatprep.mubr.msk.bf16.mxu1 %vm8509_vm3, %v8508_v63  ;;  %8182 = vmatprep.mubr.msk.bf16.mxu0 %vm8509_vm3, %v8508_v63 }
 0x28e   : > { %8143 = vmatmul.mubr.msk.bf16.vlgmr.msra.gmra.mxu1 %vm330_vm2, %v4594_v14  ;;  %8183 = vmatmul.mubr.msk.bf16.gmra.mxu0 %vm330_vm2, %v4748_v35  ;;  %v8462_v14 = vld [vmem:[%s10342_s3 + $0x80] sm:$0xff]  }
 0x28f   : > { %8187 = vmatpush3.bf16.msra.mxu1 %v8456_v34  ;;  %8146 = vmatprep.mubr.msk.bf16.mxu1 %vm8509_vm3, %v8508_v63  ;;  %v5197_v34 = vpack.c.bf16 %v5191_v26, %v5190_v3 }
 0x290   : > { %8214 = vmatprep.mubr.msk.bf16.mxu0 %vm8509_vm3, %v8508_v63  ;;  %8188 = vmatprep.subr.bf16.mxu1 %v8508_v63 }
 0x293   : > { %8189 = vmatpush3.bf16.msra.mxu1 %v8459_v36  ;;  %v5192_v36 = vld [vmem:[#allocation4 + $0x55] sm:$0xff] }
 0x294   : > { %8234 = vmatprep.subr.bf16.mxu1 %v8508_v63  ;;  %v5198_v38 = vpack.c.bf16 %v5193_v37, %v5192_v36 }
 0x296   : > { %8147 = vmatmul.mubr.msk.bf16.gmra.mxu1 %vm330_vm2, %v4595_v41  ;;  %8215 = vmatmul.mubr.msk.bf16.vlgmr.msra.gmra.mxu0 %vm330_vm2, %v5044_v30  ;;  %v5038_v41 = vld [vmem:[#allocation4 + $0x34] sm:$0xff] }
 0x297   : > { %8150 = vmatprep.mubr.msk.bf16.mxu1 %vm8509_vm3, %v8508_v63  ;;  %8218 = vmatprep.mubr.msk.bf16.mxu0 %vm8509_vm3, %v8508_v63  ;;  %v5046_v46 = vpack.c.bf16 %v5039_v9, %v5038_v41  ;;  %v4896_v18 = vpack.c.bf16 %v5038_v41, %v5037_v32 }
 0x298   : > { %8259 = vmatpush3.bf16.msra.mxu0 %v8461_v22 }
 0x299   : > { %8260 = vmatprep.subr.bf16.mxu0 %v8508_v63 }
 0x29c   : > { %8261 = vmatpush3.bf16.msra.mxu0 %v8462_v14 }
 0x29e   : > { %8151 = vmatmul.mubr.msk.bf16.gmra.mxu1 %vm330_vm2, %v4596_v6  ;;  %8219 = vmatmul.mubr.msk.bf16.gmra.mxu0 %vm330_vm2, %v5045_v47  ;;  %v5040_v6 = vld [vmem:[#allocation4 + $0x44] sm:$0xff] }
 0x29f   : > { %8154 = vmatprep.mubr.msk.bf16.mxu1 %vm8509_vm3, %v8508_v63  ;;  %8222 = vmatprep.mubr.msk.bf16.mxu0 %vm8509_vm3, %v8508_v63  ;;  %v5047_v21 = vpack.c.bf16 %v5041_v28, %v5040_v6  ;;  %v4897_v60 = vpack.c.bf16 %v5040_v6, %v5039_v9 }
 0x2a6   : > { %8155 = vmatmul.mubr.msk.bf16.gmra.mxu1 %vm330_vm2, %v4597_v51  ;;  %8223 = vmatmul.mubr.msk.bf16.gmra.mxu0 %vm330_vm2, %v5046_v46  ;;  %v5334_v51 = vld [vmem:[#allocation4 + $0x16] sm:$0xff] }
 0x2a7   : > { %8158 = vmatprep.mubr.msk.bf16.mxu1 %vm8509_vm3, %v8508_v63  ;;  %8226 = vmatprep.mubr.msk.bf16.mxu0 %vm8509_vm3, %v8508_v63  ;;  %v5344_v52 = vpack.c.bf16 %v5335_v50, %v5334_v51 }
 0x2ae   : > { %8159 = vmatmul.mubr.msk.bf16.gmra.mxu1 %vm330_vm2, %v4598_v45  ;;  %8227 = vmatmul.mubr.msk.bf16.gmra.mxu0 %vm330_vm2, %v5047_v21 }
 0x2af   : > { %8190 = vmatprep.mubr.msk.bf16.mxu1 %vm8509_vm3, %v8508_v63  ;;  %8230 = vmatprep.mubr.msk.bf16.mxu0 %vm8509_vm3, %v8508_v63 }
 0x2b6   : > { %8191 = vmatmul.mubr.msk.bf16.vlgmr.msra.gmra.mxu1 %vm330_vm2, %v4894_v48  ;;  %8231 = vmatmul.mubr.msk.bf16.gmra.mxu0 %vm330_vm2, %v5048_v49 }
 0x2b7   : > { %8235 = vmatpush3.bf16.msra.mxu1 %v8460_v5  ;;  %8194 = vmatprep.mubr.msk.bf16.mxu1 %vm8509_vm3, %v8508_v63 }
 0x2b8   : > { %8262 = vmatprep.mubr.msk.bf16.mxu0 %vm8509_vm3, %v8508_v63  ;;  %8236 = vmatprep.subr.bf16.mxu1 %v8508_v63 }
 0x2bb   : > { %8237 = vmatpush3.bf16.msra.mxu1 %v8463_v7 }
 0x2be   : > { %8195 = vmatmul.mubr.msk.bf16.gmra.mxu1 %vm330_vm2, %v4895_v17  ;;  %8263 = vmatmul.mubr.msk.bf16.vlgmr.msra.gmra.mxu0 %vm330_vm2, %v5344_v52 }
 0x2bf   : > { %8198 = vmatprep.mubr.msk.bf16.mxu1 %vm8509_vm3, %v8508_v63  ;;  %8266 = vmatprep.mubr.msk.bf16.mxu0 %vm8509_vm3, %v8508_v63 }
 0x2c6   : > { %8199 = vmatmul.mubr.msk.bf16.gmra.mxu1 %vm330_vm2, %v4896_v18  ;;  %8267 = vmatmul.mubr.msk.bf16.gmra.mxu0 %vm330_vm2, %v5345_v57 }
 0x2c7   : > { %8202 = vmatprep.mubr.msk.bf16.mxu1 %vm8509_vm3, %v8508_v63  ;;  %8270 = vmatprep.mubr.msk.bf16.mxu0 %vm8509_vm3, %v8508_v63 }
 0x2ce   : > { %8203 = vmatmul.mubr.msk.bf16.gmra.mxu1 %vm330_vm2, %v4897_v60  ;;  %8271 = vmatmul.mubr.msk.bf16.gmra.mxu0 %vm330_vm2, %v5346_v61 }
 0x2cf   : > { %8206 = vmatprep.mubr.msk.bf16.mxu1 %vm8509_vm3, %v8508_v63  ;;  %8274 = vmatprep.mubr.msk.bf16.mxu0 %vm8509_vm3, %v8508_v63 }
 0x2d6   : > { %8207 = vmatmul.mubr.msk.bf16.gmra.mxu1 %vm330_vm2, %v4898_v0  ;;  %8275 = vmatmul.mubr.msk.bf16.gmra.mxu0 %vm330_vm2, %v5347_v1 }
 0x2d7   : > { %8238 = vmatprep.mubr.msk.bf16.mxu1 %vm8509_vm3, %v8508_v63  ;;  %8278 = vmatprep.mubr.msk.bf16.mxu0 %vm8509_vm3, %v8508_v63 }
 0x2de   : > { %8239 = vmatmul.mubr.msk.bf16.vlgmr.msra.gmra.mxu1 %vm330_vm2, %v5194_v12  ;;  %8279 = vmatmul.mubr.msk.bf16.gmra.mxu0 %vm330_vm2, %v5348_v13 }
 0x2df   : > { %8242 = vmatprep.mubr.msk.bf16.mxu1 %vm8509_vm3, %v8508_v63 }
 0x2e6   : > { %8243 = vmatmul.mubr.msk.bf16.gmra.mxu1 %vm330_vm2, %v5195_v16 }
 0x2e7   : > { %8246 = vmatprep.mubr.msk.bf16.mxu1 %vm8509_vm3, %v8508_v63 }
 0x2ee   : > { %v4235_v39 = vpop.f32.mrf.mxu1  ;;  %8247 = vmatmul.mubr.msk.bf16.gmra.mxu1 %vm330_vm2, %v5196_v23 }
 0x2ef   : > { %4274 = vst.msk [vmem:[#allocation5] sm:$0xff] %vm330_vm2, %v4235_v39  ;;  %v9842_v24 = vpop.f32.mrf.mxu0  ;;  %8250 = vmatprep.mubr.msk.bf16.mxu1 %vm8509_vm3, %v8508_v63 }
 0x2f0   : > { %v8072_v25 = vpop.f32.mrf.mxu1 }
 0x2f1   : > { %v8120_v56 = vpop.f32.mrf.mxu0 }
 0x2f2   : > { %v4238_v27 = vpop.f32.mrf.mxu1 }
 0x2f3   : > { %4275 = vst.msk [vmem:[#allocation5 + $0x8] sm:$0xff] %vm330_vm2, %v4238_v27  ;;  %v9847_v29 = vpop.f32.mrf.mxu0 }
 0x2f4   : > { %v8073_v33 = vpop.f32.mrf.mxu1 }
 0x2f5   : > { %v8121_v35 = vpop.f32.mrf.mxu0 }
 0x2f6   : > { %8251 = vmatmul.mubr.msk.bf16.gmra.mxu1 %vm330_vm2, %v5197_v34  ;;  %v4404_v58 = vld [vmem:[#allocation5] sm:$0xff] }
 0x2f7   : > { %8254 = vmatprep.mubr.msk.bf16.mxu1 %vm8509_vm3, %v8508_v63 }
 0x2fa   : > { %v4405_v0 = vld [vmem:[#allocation5 + $0x8] sm:$0xff] }
 0x2fe   : > { %8255 = vmatmul.mubr.msk.bf16.gmra.mxu1 %vm330_vm2, %v5198_v38 }
 0x2ff   : > { %v4243_v30 = vpop.f32.mrf.mxu1 }
 0x300   : > { %v9852_v22 = vpop.f32.mrf.mxu0  ;;  %4276 = vst.msk [vmem:[#allocation5 + $0x10] sm:$0xff] %vm330_vm2, %v4243_v30 }
 0x301   : > { %v8076_v14 = vpop.f32.mrf.mxu1 }
 0x302   : > { %v8124_v32 = vpop.f32.mrf.mxu0 }
 0x303   : > { %v4246_v40 = vpop.f32.mrf.mxu1 }
 0x304   : > { %v9856_v47 = vpop.f32.mrf.mxu0  ;;  %4277 = vst.msk [vmem:[#allocation5 + $0x18] sm:$0xff] %vm330_vm2, %v4246_v40 }
 0x305   : > { %v8077_v9 = vpop.f32.mrf.mxu1 }
 0x306   : > { %v8125_v41 = vpop.f32.mrf.mxu0 }
 0x307   : > { %v4251_v46 = vpop.f32.mrf.mxu1  ;;  %v4406_v12 = vld [vmem:[#allocation5 + $0x10] sm:$0xff] }
 0x308   : > { %4278 = vst.msk [vmem:[#allocation5 + $0x20] sm:$0xff] %vm330_vm2, %v4251_v46  ;;  %v9860_v15 = vpop.f32.mrf.mxu0 }
 0x309   : > { %v8080_v28 = vpop.f32.mrf.mxu1 }
 0x30a   : > { %v8128_v6 = vpop.f32.mrf.mxu0 }
 0x30b   : > { %v4254_v45 = vpop.f32.mrf.mxu1  ;;  %v4407_v39 = vld [vmem:[#allocation5 + $0x18] sm:$0xff] }
 0x30c   : > { %4279 = vst.msk [vmem:[#allocation5 + $0x28] sm:$0xff] %vm330_vm2, %v4254_v45  ;;  %v9863_v21 = vpop.f32.mrf.mxu0 }
 0x30d   : > { %v8081_v42 = vpop.f32.mrf.mxu1 }
 0x30e   : > { %v8129_v43 = vpop.f32.mrf.mxu0 }
 0x30f   : > { %v4408_v35 = vld [vmem:[#allocation5 + $0x20] sm:$0xff] }
 0x313   : > { %v4409_v40 = vld [vmem:[#allocation5 + $0x28] sm:$0xff] }
 0x316   : > { %v4259_v11 = vpop.f32.mrf.mxu1 }
 0x317   : > { %v9865_v5 = vpop.f32.mrf.mxu0  ;;  %4280 = vst.msk [vmem:[#allocation5 + $0x30] sm:$0xff] %vm330_vm2, %v4259_v11 }
 0x318   : > { %v8084_v48 = vpop.f32.mrf.mxu1 }
 0x319   : > { %v8132_v49 = vpop.f32.mrf.mxu0 }
 0x31a   : > { %v4262_v7 = vpop.f32.mrf.mxu1 }
 0x31b   : > { %v9868_v50 = vpop.f32.mrf.mxu0  ;;  %4281 = vst.msk [vmem:[#allocation5 + $0x38] sm:$0xff] %vm330_vm2, %v4262_v7 }
 0x31c   : > { %v8085_v51 = vpop.f32.mrf.mxu1 }
 0x31d   : > { %v8133_v17 = vpop.f32.mrf.mxu0 }
 0x31e   : > { %v4267_v52 = vpop.f32.mrf.mxu1  ;;  %v4410_v42 = vld [vmem:[#allocation5 + $0x30] sm:$0xff] }
 0x31f   : > { %4282 = vst.msk [vmem:[#allocation5 + $0x40] sm:$0xff] %vm330_vm2, %v4267_v52 }
 0x320   : > { %v8088_v53 = vpop.f32.mrf.mxu1 }
 0x322   : > { %v4270_v54 = vpop.f32.mrf.mxu1  ;;  %v4411_v17 = vld [vmem:[#allocation5 + $0x38] sm:$0xff] }
 0x323   : > { %4283 = vst.msk [vmem:[#allocation5 + $0x48] sm:$0xff] %vm330_vm2, %v4270_v54 }
 0x324   : > { %v8089_v18 = vpop.f32.mrf.mxu1 }
 0x326   : > { %v4365_v57 = vpop.f32.mrf.mxu1  ;;  %v9873_v59 = vpop.f32.mrf.mxu0 }
 0x327   : > { %v4414_v60 = vadd.f32 %v4404_v58, %v4365_v57 }
 0x328   : > { %v8096_v61 = vpop.f32.mrf.mxu1  ;;  %v8136_v44 = vpop.f32.mrf.mxu0 }
 0x329   : > { %4424 = vst.msk [vmem:[#allocation5] sm:$0xff] %vm330_vm2, %v4414_v60  ;;  %v4412_v60 = vld [vmem:[#allocation5 + $0x40] sm:$0xff] }
 0x32a   : > { %v4368_v62 = vpop.f32.mrf.mxu1  ;;  %v9876_v1 = vpop.f32.mrf.mxu0 }
 0x32b   : > { %v4415_v2 = vadd.f32 %v4405_v0, %v4368_v62 }
 0x32c   : > { %v8097_v55 = vpop.f32.mrf.mxu1  ;;  %v8137_v8 = vpop.f32.mrf.mxu0 }
 0x32d   : > { %4425 = vst.msk [vmem:[#allocation5 + $0x8] sm:$0xff] %vm330_vm2, %v4415_v2  ;;  %v4413_v8 = vld [vmem:[#allocation5 + $0x48] sm:$0xff] }
 0x32e   : > { %v4373_v4 = vpop.f32.mrf.mxu1  ;;  %v9879_v13 = vpop.f32.mrf.mxu0 }
 0x32f   : > { %v4416_v19 = vadd.f32 %v4406_v12, %v4373_v4 }
 0x330   : > { %v8100_v10 = vpop.f32.mrf.mxu1  ;;  %v8168_v16 = vpop.f32.mrf.mxu0  ;;  %v4554_v20 = vld [vmem:[#allocation5] sm:$0xff] }
 0x331   : > { %4426 = vst.msk [vmem:[#allocation5 + $0x10] sm:$0xff] %vm330_vm2, %v4416_v19  ;;  %v4564_v31 = vadd.f32 %v4554_v20, %v9842_v24 }
 0x332   : > { %v4376_v23 = vpop.f32.mrf.mxu1  ;;  %v9883_v25 = vpop.f32.mrf.mxu0 }
 0x333   : > { %v4417_v56 = vadd.f32 %v4407_v39, %v4376_v23  ;;  %4574 = vst.msk [vmem:[#allocation5] sm:$0xff] %vm330_vm2, %v4564_v31 }
 0x334   : > { %v8101_v26 = vpop.f32.mrf.mxu1  ;;  %v8169_v27 = vpop.f32.mrf.mxu0  ;;  %v4555_v3 = vld [vmem:[#allocation5 + $0x8] sm:$0xff] }
 0x335   : > { %4427 = vst.msk [vmem:[#allocation5 + $0x18] sm:$0xff] %vm330_vm2, %v4417_v56  ;;  %v4565_v33 = vadd.f32 %v4555_v3, %v9847_v29 }
 0x336   : > { %v4381_v34 = vpop.f32.mrf.mxu1  ;;  %v9888_v36 = vpop.f32.mrf.mxu0 }
 0x337   : > { %v4418_v37 = vadd.f32 %v4408_v35, %v4381_v34  ;;  %4575 = vst.msk [vmem:[#allocation5 + $0x8] sm:$0xff] %vm330_vm2, %v4565_v33 }
 0x338   : > { %v8104_v24 = vpop.f32.mrf.mxu1  ;;  %v8172_v38 = vpop.f32.mrf.mxu0  ;;  %v4556_v30 = vld [vmem:[#allocation5 + $0x10] sm:$0xff] }
 0x339   : > { %4428 = vst.msk [vmem:[#allocation5 + $0x20] sm:$0xff] %vm330_vm2, %v4418_v37  ;;  %v4566_v14 = vadd.f32 %v4556_v30, %v9852_v22 }
 0x33a   : > { %v4384_v32 = vpop.f32.mrf.mxu1  ;;  %v9893_v9 = vpop.f32.mrf.mxu0  ;;  %v4704_v31 = vld [vmem:[#allocation5] sm:$0xff] }
 0x33b   : > { %v4419_v41 = vadd.f32 %v4409_v40, %v4384_v32  ;;  %4576 = vst.msk [vmem:[#allocation5 + $0x10] sm:$0xff] %vm330_vm2, %v4566_v14 }
 0x33c   : > { %v8105_v29 = vpop.f32.mrf.mxu1  ;;  %v8173_v46 = vpop.f32.mrf.mxu0  ;;  %v4557_v28 = vld [vmem:[#allocation5 + $0x18] sm:$0xff] }
 0x33d   : > { %4429 = vst.msk [vmem:[#allocation5 + $0x28] sm:$0xff] %vm330_vm2, %v4419_v41  ;;  %v4567_v6 = vadd.f32 %v4557_v28, %v9856_v47 }
 0x33e   : > { %v4389_v45 = vpop.f32.mrf.mxu1  ;;  %v9898_v43 = vpop.f32.mrf.mxu0  ;;  %v4705_v33 = vld [vmem:[#allocation5 + $0x8] sm:$0xff] }
 0x33f   : > { %v4420_v11 = vadd.f32 %v4410_v42, %v4389_v45  ;;  %4577 = vst.msk [vmem:[#allocation5 + $0x18] sm:$0xff] %vm330_vm2, %v4567_v6 }
 0x340   : > { %v8108_v22 = vpop.f32.mrf.mxu1  ;;  %v8176_v48 = vpop.f32.mrf.mxu0  ;;  %v4558_v49 = vld [vmem:[#allocation5 + $0x20] sm:$0xff] }
 0x341   : > { %4430 = vst.msk [vmem:[#allocation5 + $0x30] sm:$0xff] %vm330_vm2, %v4420_v11  ;;  %v4568_v7 = vadd.f32 %v4558_v49, %v9860_v15 }
 0x342   : > { %v4392_v51 = vpop.f32.mrf.mxu1  ;;  %v9903_v52 = vpop.f32.mrf.mxu0  ;;  %v4706_v14 = vld [vmem:[#allocation5 + $0x10] sm:$0xff] }
 0x343   : > { %v4421_v53 = vadd.f32 %v4411_v17, %v4392_v51  ;;  %4578 = vst.msk [vmem:[#allocation5 + $0x20] sm:$0xff] %vm330_vm2, %v4568_v7 }
 0x344   : > { %v8109_v47 = vpop.f32.mrf.mxu1  ;;  %v8177_v54 = vpop.f32.mrf.mxu0  ;;  %v4559_v18 = vld [vmem:[#allocation5 + $0x28] sm:$0xff] }
 0x345   : > { %4431 = vst.msk [vmem:[#allocation5 + $0x38] sm:$0xff] %vm330_vm2, %v4421_v53  ;;  %v4569_v57 = vadd.f32 %v4559_v18, %v9863_v21 }
 0x346   : > { %v4397_v58 = vpop.f32.mrf.mxu1  ;;  %v9908_v61 = vpop.f32.mrf.mxu0  ;;  %v4707_v6 = vld [vmem:[#allocation5 + $0x18] sm:$0xff] }
 0x347   : > { %v4422_v44 = vadd.f32 %v4412_v60, %v4397_v58  ;;  %4579 = vst.msk [vmem:[#allocation5 + $0x28] sm:$0xff] %vm330_vm2, %v4569_v57 }
 0x348   : > { %v8112_v15 = vpop.f32.mrf.mxu1  ;;  %v8180_v62 = vpop.f32.mrf.mxu0  ;;  %v4560_v0 = vld [vmem:[#allocation5 + $0x30] sm:$0xff] }
 0x349   : > { %4432 = vst.msk [vmem:[#allocation5 + $0x40] sm:$0xff] %vm330_vm2, %v4422_v44  ;;  %v4570_v2 = vadd.f32 %v4560_v0, %v9865_v5  ;;  %v8464_v0 = vld [vmem:[%s10344_s5 + $0x8] sm:$0xff]  }
 0x34a   : > { %v4400_v55 = vpop.f32.mrf.mxu1  ;;  %v9913_v4 = vpop.f32.mrf.mxu0  ;;  %v4708_v7 = vld [vmem:[#allocation5 + $0x20] sm:$0xff]  ;;  %8282 = vmatprep.subr.bf16.mxu1 %v8464_v0 }
 0x34b   : > { %v4423_v12 = vadd.f32 %v4413_v8, %v4400_v55  ;;  %4580 = vst.msk [vmem:[#allocation5 + $0x30] sm:$0xff] %vm330_vm2, %v4570_v2  ;;  %8283 = vmatpush3.bf16.msra.mxu1 %v8464_v0 }
 0x34c   : > { %v8113_v21 = vpop.f32.mrf.mxu1  ;;  %v8181_v19 = vpop.f32.mrf.mxu0  ;;  %v4561_v10 = vld [vmem:[#allocation5 + $0x38] sm:$0xff] }
 0x34d   : > { %4433 = vst.msk [vmem:[#allocation5 + $0x48] sm:$0xff] %vm330_vm2, %v4423_v12  ;;  %v4571_v16 = vadd.f32 %v4561_v10, %v9868_v50 }
 0x34e   : > { %v4665_v20 = vpop.f32.mrf.mxu1  ;;  %v9918_v23 = vpop.f32.mrf.mxu0  ;;  %v4709_v57 = vld [vmem:[#allocation5 + $0x28] sm:$0xff] }
 0x34f   : > { %v4714_v39 = vadd.f32 %v4704_v31, %v4665_v20  ;;  %4581 = vst.msk [vmem:[#allocation5 + $0x38] sm:$0xff] %vm330_vm2, %v4571_v16  ;;  %v8466_v16 = vld [vmem:[%s10344_s5 + $0x48] sm:$0xff]   ;;  %v9965_v20 = vld [vmem:[%s10344_s5 + $0x18] sm:$0xff]  }
 0x350   : > { %v8144_v5 = vpop.f32.mrf.mxu1  ;;  %v8184_v56 = vpop.f32.mrf.mxu0  ;;  %v4562_v26 = vld [vmem:[#allocation5 + $0x40] sm:$0xff]  ;;  %8314 = vmatprep.subr.bf16.mxu0 %v8466_v16 }
 0x351   : > { %4724 = vst.msk [vmem:[#allocation5] sm:$0xff] %vm330_vm2, %v4714_v39  ;;  %v4572_v27 = vadd.f32 %v4562_v26, %v9873_v59  ;;  %8315 = vmatpush3.bf16.msra.mxu0 %v8466_v16 }
 0x352   : > { %v4668_v3 = vpop.f32.mrf.mxu1  ;;  %v9923_v34 = vpop.f32.mrf.mxu0  ;;  %v4710_v55 = vld [vmem:[#allocation5 + $0x30] sm:$0xff] }
 0x353   : > { %v4715_v35 = vadd.f32 %v4705_v33, %v4668_v3  ;;  %4582 = vst.msk [vmem:[#allocation5 + $0x40] sm:$0xff] %vm330_vm2, %v4572_v27 }
 0x354   : > { %v8145_v50 = vpop.f32.mrf.mxu1  ;;  %v8185_v37 = vpop.f32.mrf.mxu0  ;;  %v4563_v24 = vld [vmem:[#allocation5 + $0x48] sm:$0xff] }
 0x355   : > { %4725 = vst.msk [vmem:[#allocation5 + $0x8] sm:$0xff] %vm330_vm2, %v4715_v35  ;;  %v4573_v38 = vadd.f32 %v4563_v24, %v9876_v1 }
 0x356   : > { %v4673_v30 = vpop.f32.mrf.mxu1  ;;  %v9928_v32 = vpop.f32.mrf.mxu0  ;;  %v4711_v39 = vld [vmem:[#allocation5 + $0x38] sm:$0xff] }
 0x357   : > { %v4716_v40 = vadd.f32 %v4706_v14, %v4673_v30  ;;  %4583 = vst.msk [vmem:[#allocation5 + $0x48] sm:$0xff] %vm330_vm2, %v4573_v38 }
 0x358   : > { %v8148_v59 = vpop.f32.mrf.mxu1  ;;  %v8216_v41 = vpop.f32.mrf.mxu0  ;;  %v4854_v29 = vld [vmem:[#allocation5] sm:$0xff] }
 0x359   : > { %4726 = vst.msk [vmem:[#allocation5 + $0x10] sm:$0xff] %vm330_vm2, %v4716_v40  ;;  %v4864_v46 = vadd.f32 %v4854_v29, %v9879_v13 }
 0x35a   : > { %v4676_v28 = vpop.f32.mrf.mxu1  ;;  %v9933_v45 = vpop.f32.mrf.mxu0  ;;  %v4712_v35 = vld [vmem:[#allocation5 + $0x40] sm:$0xff] }
 0x35b   : > { %v4717_v42 = vadd.f32 %v4707_v6, %v4676_v28  ;;  %4874 = vst.msk [vmem:[#allocation5] sm:$0xff] %vm330_vm2, %v4864_v46 }
 0x35c   : > { %v8149_v1 = vpop.f32.mrf.mxu1  ;;  %v8217_v11 = vpop.f32.mrf.mxu0  ;;  %v4855_v22 = vld [vmem:[#allocation5 + $0x8] sm:$0xff] }
 0x35d   : > { %4727 = vst.msk [vmem:[#allocation5 + $0x18] sm:$0xff] %vm330_vm2, %v4717_v42  ;;  %v4865_v48 = vadd.f32 %v4855_v22, %v9883_v25 }
 0x35e   : > { %v4681_v49 = vpop.f32.mrf.mxu1  ;;  %v9938_v51 = vpop.f32.mrf.mxu0  ;;  %v4713_v59 = vld [vmem:[#allocation5 + $0x48] sm:$0xff] }
 0x35f   : > { %v4718_v17 = vadd.f32 %v4708_v7, %v4681_v49  ;;  %4875 = vst.msk [vmem:[#allocation5 + $0x8] sm:$0xff] %vm330_vm2, %v4865_v48 }
 0x360   : > { %v8152_v13 = vpop.f32.mrf.mxu1  ;;  %v8220_v53 = vpop.f32.mrf.mxu0  ;;  %v4856_v47 = vld [vmem:[#allocation5 + $0x10] sm:$0xff] }
 0x361   : > { %4728 = vst.msk [vmem:[#allocation5 + $0x20] sm:$0xff] %vm330_vm2, %v4718_v17  ;;  %v4866_v54 = vadd.f32 %v4856_v47, %v9888_v36  ;;  %v8465_v36 = vld [vmem:[%s10344_s5] sm:$0xff]  }
 0x362   : > { %v4684_v18 = vpop.f32.mrf.mxu1  ;;  %v9943_v58 = vpop.f32.mrf.mxu0  ;;  %8284 = vmatprep.subr.bf16.mxu1 %v8465_v36  ;;  %v5004_v1 = vld [vmem:[#allocation5] sm:$0xff] }
 0x363   : > { %v4719_v60 = vadd.f32 %v4709_v57, %v4684_v18  ;;  %4876 = vst.msk [vmem:[#allocation5 + $0x10] sm:$0xff] %vm330_vm2, %v4866_v54  ;;  %8285 = vmatpush3.bf16.msra.mxu1 %v8465_v36 }
 0x364   : > { %v8153_v25 = vpop.f32.mrf.mxu1  ;;  %v8221_v44 = vpop.f32.mrf.mxu0  ;;  %v4857_v15 = vld [vmem:[#allocation5 + $0x18] sm:$0xff]  ;;  %8290 = vmatprep.subr.bf16.mxu1 %v9965_v20 }
 0x365   : > { %4729 = vst.msk [vmem:[#allocation5 + $0x28] sm:$0xff] %vm330_vm2, %v4719_v60  ;;  %v4867_v62 = vadd.f32 %v4857_v15, %v9893_v9 }
 0x366   : > { %v4689_v2 = vpop.f32.mrf.mxu1  ;;  %v9954_v8 = vpop.f32.mrf.mxu0  ;;  %v5005_v53 = vld [vmem:[#allocation5 + $0x8] sm:$0xff] }
 0x367   : > { %v4720_v12 = vadd.f32 %v4710_v55, %v4689_v2  ;;  %4877 = vst.msk [vmem:[#allocation5 + $0x18] sm:$0xff] %vm330_vm2, %v4867_v62 }
 0x368   : > { %v8156_v21 = vpop.f32.mrf.mxu1  ;;  %v8224_v19 = vpop.f32.mrf.mxu0  ;;  %v4858_v10 = vld [vmem:[#allocation5 + $0x20] sm:$0xff] }
 0x369   : > { %4730 = vst.msk [vmem:[#allocation5 + $0x30] sm:$0xff] %vm330_vm2, %v4720_v12  ;;  %v4868_v9 = vadd.f32 %v4858_v10, %v9898_v43 }
 0x36a   : > { %v4692_v31 = vpop.f32.mrf.mxu1  ;;  %v9967_v5 = vpop.f32.mrf.mxu0  ;;  %v5006_v44 = vld [vmem:[#allocation5 + $0x10] sm:$0xff] }
 0x36b   : > { %v4721_v56 = vadd.f32 %v4711_v39, %v4692_v31  ;;  %4878 = vst.msk [vmem:[#allocation5 + $0x20] sm:$0xff] %vm330_vm2, %v4868_v9 }
 0x36c   : > { %v8157_v26 = vpop.f32.mrf.mxu1  ;;  %v8225_v43 = vpop.f32.mrf.mxu0  ;;  %v4859_v27 = vld [vmem:[#allocation5 + $0x28] sm:$0xff] }
 0x36d   : > { %4731 = vst.msk [vmem:[#allocation5 + $0x38] sm:$0xff] %vm330_vm2, %v4721_v56  ;;  %v4869_v3 = vadd.f32 %v4859_v27, %v9903_v52 }
 0x36e   : > { %v4697_v33 = vpop.f32.mrf.mxu1  ;;  %v9973_v50 = vpop.f32.mrf.mxu0  ;;  %v5007_v21 = vld [vmem:[#allocation5 + $0x18] sm:$0xff] }
 0x36f   : > { %v4722_v37 = vadd.f32 %v4712_v35, %v4697_v33  ;;  %4879 = vst.msk [vmem:[#allocation5 + $0x28] sm:$0xff] %vm330_vm2, %v4869_v3 }
 0x370   : > { %v8160_v24 = vpop.f32.mrf.mxu1  ;;  %v8228_v38 = vpop.f32.mrf.mxu0  ;;  %v4860_v30 = vld [vmem:[#allocation5 + $0x30] sm:$0xff] }
 0x371   : > { %4732 = vst.msk [vmem:[#allocation5 + $0x40] sm:$0xff] %vm330_vm2, %v4722_v37  ;;  %v4870_v14 = vadd.f32 %v4860_v30, %v9908_v61  ;;  %v8469_v61 = vld [vmem:[%s10344_s5 + $0x40] sm:$0xff]  }
 0x372   : > { %v4700_v40 = vpop.f32.mrf.mxu1  ;;  %v9978_v41 = vpop.f32.mrf.mxu0  ;;  %8316 = vmatprep.subr.bf16.mxu0 %v8469_v61  ;;  %v5008_v56 = vld [vmem:[#allocation5 + $0x20] sm:$0xff] }
 0x373   : > { %v4723_v52 = vadd.f32 %v4713_v59, %v4700_v40  ;;  %4880 = vst.msk [vmem:[#allocation5 + $0x30] sm:$0xff] %vm330_vm2, %v4870_v14  ;;  %8317 = vmatpush3.bf16.msra.mxu0 %v8469_v61 }
 0x374   : > { %v8161_v29 = vpop.f32.mrf.mxu1  ;;  %v8229_v46 = vpop.f32.mrf.mxu0  ;;  %v4861_v28 = vld [vmem:[#allocation5 + $0x38] sm:$0xff] }
 0x375   : > { %4733 = vst.msk [vmem:[#allocation5 + $0x48] sm:$0xff] %vm330_vm2, %v4723_v52  ;;  %v4871_v6 = vadd.f32 %v4861_v28, %v9913_v4  ;;  %v9994_v4 = vld [vmem:[%s10344_s5 + $0x68] sm:$0xff]  }
 0x376   : > { %v4965_v42 = vpop.f32.mrf.mxu1  ;;  %v9983_v11 = vpop.f32.mrf.mxu0  ;;  %8330 = vmatprep.subr.bf16.mxu0 %v9994_v4  ;;  %v5009_v37 = vld [vmem:[#allocation5 + $0x28] sm:$0xff] }
 0x377   : > { %v5014_v22 = vadd.f32 %v5004_v1, %v4965_v42  ;;  %4881 = vst.msk [vmem:[#allocation5 + $0x38] sm:$0xff] %vm330_vm2, %v4871_v6 }
 0x378   : > { %v8192_v48 = vpop.f32.mrf.mxu1  ;;  %v8232_v49 = vpop.f32.mrf.mxu0  ;;  %v4862_v7 = vld [vmem:[#allocation5 + $0x40] sm:$0xff] }
 0x379   : > { %5024 = vst.msk [vmem:[#allocation5] sm:$0xff] %vm330_vm2, %v5014_v22  ;;  %v4872_v17 = vadd.f32 %v4862_v7, %v9918_v23 }
 0x37a   : > { %v4968_v13 = vpop.f32.mrf.mxu1  ;;  %v9996_v47 = vpop.f32.mrf.mxu0  ;;  %v5010_v52 = vld [vmem:[#allocation5 + $0x30] sm:$0xff] }
 0x37b   : > { %v5015_v54 = vadd.f32 %v5005_v53, %v4968_v13  ;;  %4882 = vst.msk [vmem:[#allocation5 + $0x40] sm:$0xff] %vm330_vm2, %v4872_v17 }
 0x37c   : > { %v8193_v18 = vpop.f32.mrf.mxu1  ;;  %v8233_v57 = vpop.f32.mrf.mxu0  ;;  %v4863_v60 = vld [vmem:[#allocation5 + $0x48] sm:$0xff] }
 0x37d   : > { %5025 = vst.msk [vmem:[#allocation5 + $0x8] sm:$0xff] %vm330_vm2, %v5015_v54  ;;  %v4873_v23 = vadd.f32 %v4863_v60, %v9923_v34 }
 0x37e   : > { %v4973_v25 = vpop.f32.mrf.mxu1  ;;  %v10002_v15 = vpop.f32.mrf.mxu0  ;;  %v5011_v61 = vld [vmem:[#allocation5 + $0x38] sm:$0xff] }
 0x37f   : > { %v5016_v62 = vadd.f32 %v5006_v44, %v4973_v25  ;;  %4883 = vst.msk [vmem:[#allocation5 + $0x48] sm:$0xff] %vm330_vm2, %v4873_v23 }
 0x380   : > { %v8196_v0 = vpop.f32.mrf.mxu1  ;;  %v8264_v36 = vpop.f32.mrf.mxu0  ;;  %v5154_v2 = vld [vmem:[#allocation5] sm:$0xff] }
 0x381   : > { %5026 = vst.msk [vmem:[#allocation5 + $0x10] sm:$0xff] %vm330_vm2, %v5016_v62  ;;  %v5164_v55 = vadd.f32 %v5154_v2, %v9928_v32 }
 0x382   : > { %v4976_v12 = vpop.f32.mrf.mxu1  ;;  %v10007_v19 = vpop.f32.mrf.mxu0  ;;  %v5012_v53 = vld [vmem:[#allocation5 + $0x40] sm:$0xff] }
 0x383   : > { %v5017_v10 = vadd.f32 %v5007_v21, %v4976_v12  ;;  %5174 = vst.msk [vmem:[#allocation5] sm:$0xff] %vm330_vm2, %v5164_v55 }
 0x384   : > { %v8197_v34 = vpop.f32.mrf.mxu1  ;;  %v8265_v9 = vpop.f32.mrf.mxu0  ;;  %v5155_v16 = vld [vmem:[#allocation5 + $0x8] sm:$0xff] }
 0x385   : > { %5027 = vst.msk [vmem:[#allocation5 + $0x18] sm:$0xff] %vm330_vm2, %v5017_v10  ;;  %v5165_v31 = vadd.f32 %v5155_v16, %v9933_v45 }
 0x386   : > { %v4981_v39 = vpop.f32.mrf.mxu1  ;;  %v10012_v26 = vpop.f32.mrf.mxu0  ;;  %v5013_v44 = vld [vmem:[#allocation5 + $0x48] sm:$0xff] }
 0x387   : > { %v5018_v43 = vadd.f32 %v5008_v56, %v4981_v39  ;;  %5175 = vst.msk [vmem:[#allocation5 + $0x8] sm:$0xff] %vm330_vm2, %v5165_v31 }
 0x388   : > { %v8200_v32 = vpop.f32.mrf.mxu1  ;;  %v8268_v27 = vpop.f32.mrf.mxu0  ;;  %v5156_v3 = vld [vmem:[#allocation5 + $0x10] sm:$0xff] }
 0x389   : > { %5028 = vst.msk [vmem:[#allocation5 + $0x20] sm:$0xff] %vm330_vm2, %v5018_v43  ;;  %v5166_v33 = vadd.f32 %v5156_v3, %v9938_v51 }
 0x38a   : > { %v4984_v35 = vpop.f32.mrf.mxu1  ;;  %v10017_v24 = vpop.f32.mrf.mxu0  ;;  %v5304_v21 = vld [vmem:[#allocation5] sm:$0xff] }
 0x38b   : > { %v5019_v38 = vadd.f32 %v5009_v37, %v4984_v35  ;;  %5176 = vst.msk [vmem:[#allocation5 + $0x10] sm:$0xff] %vm330_vm2, %v5166_v33 }
 0x38c   : > { %v8201_v45 = vpop.f32.mrf.mxu1  ;;  %v8269_v30 = vpop.f32.mrf.mxu0  ;;  %v5157_v14 = vld [vmem:[#allocation5 + $0x18] sm:$0xff] }
 0x38d   : > { %5029 = vst.msk [vmem:[#allocation5 + $0x28] sm:$0xff] %vm330_vm2, %v5019_v38  ;;  %v5167_v40 = vadd.f32 %v5157_v14, %v9943_v58 }
 0x38e   : > { %v4989_v59 = vpop.f32.mrf.mxu1  ;;  %v10022_v29 = vpop.f32.mrf.mxu0  ;;  %v5305_v56 = vld [vmem:[#allocation5 + $0x8] sm:$0xff] }
 0x38f   : > { %v5020_v46 = vadd.f32 %v5010_v52, %v4989_v59  ;;  %5177 = vst.msk [vmem:[#allocation5 + $0x18] sm:$0xff] %vm330_vm2, %v5167_v40 }
 0x390   : > { %v8204_v51 = vpop.f32.mrf.mxu1  ;;  %v8272_v28 = vpop.f32.mrf.mxu0  ;;  %v5158_v6 = vld [vmem:[#allocation5 + $0x20] sm:$0xff] }
 0x391   : > { %5030 = vst.msk [vmem:[#allocation5 + $0x30] sm:$0xff] %vm330_vm2, %v5020_v46  ;;  %v5168_v42 = vadd.f32 %v5158_v6, %v9954_v8 }
 0x392   : > { %v4992_v1 = vpop.f32.mrf.mxu1  ;;  %v10027_v22 = vpop.f32.mrf.mxu0  ;;  %v5306_v37 = vld [vmem:[#allocation5 + $0x10] sm:$0xff] }
 0x393   : > { %v5021_v48 = vadd.f32 %v5011_v61, %v4992_v1  ;;  %5178 = vst.msk [vmem:[#allocation5 + $0x20] sm:$0xff] %vm330_vm2, %v5168_v42 }
 0x394   : > { %v8205_v58 = vpop.f32.mrf.mxu1  ;;  %v8273_v49 = vpop.f32.mrf.mxu0  ;;  %v5159_v7 = vld [vmem:[#allocation5 + $0x28] sm:$0xff] }
 0x395   : > { %5031 = vst.msk [vmem:[#allocation5 + $0x38] sm:$0xff] %vm330_vm2, %v5021_v48  ;;  %v5169_v17 = vadd.f32 %v5159_v7, %v9967_v5 }
 0x396   : > { %v4997_v13 = vpop.f32.mrf.mxu1  ;;  %v10032_v54 = vpop.f32.mrf.mxu0  ;;  %v5307_v40 = vld [vmem:[#allocation5 + $0x18] sm:$0xff] }
 0x397   : > { %v5022_v18 = vadd.f32 %v5012_v53, %v4997_v13  ;;  %5179 = vst.msk [vmem:[#allocation5 + $0x28] sm:$0xff] %vm330_vm2, %v5169_v17 }
 0x398   : > { %v8208_v8 = vpop.f32.mrf.mxu1  ;;  %v8276_v57 = vpop.f32.mrf.mxu0  ;;  %v5160_v60 = vld [vmem:[#allocation5 + $0x30] sm:$0xff] }
 0x399   : > { %5032 = vst.msk [vmem:[#allocation5 + $0x40] sm:$0xff] %vm330_vm2, %v5022_v18  ;;  %v5170_v23 = vadd.f32 %v5160_v60, %v9973_v50 }
 0x39a   : > { %v5000_v25 = vpop.f32.mrf.mxu1  ;;  %v10037_v62 = vpop.f32.mrf.mxu0  ;;  %v5308_v28 = vld [vmem:[#allocation5 + $0x20] sm:$0xff] }
 0x39b   : > { %v5023_v0 = vadd.f32 %v5013_v44, %v5000_v25  ;;  %5180 = vst.msk [vmem:[#allocation5 + $0x30] sm:$0xff] %vm330_vm2, %v5170_v23 }
 0x39c   : > { %v8209_v5 = vpop.f32.mrf.mxu1  ;;  %v8277_v36 = vpop.f32.mrf.mxu0  ;;  %v5161_v2 = vld [vmem:[#allocation5 + $0x38] sm:$0xff] }
 0x39d   : > { %5033 = vst.msk [vmem:[#allocation5 + $0x48] sm:$0xff] %vm330_vm2, %v5023_v0  ;;  %v5171_v55 = vadd.f32 %v5161_v2, %v9978_v41 }
 0x39e   : > { %v5265_v12 = vpop.f32.mrf.mxu1  ;;  %v10042_v10 = vpop.f32.mrf.mxu0  ;;  %v5309_v58 = vld [vmem:[#allocation5 + $0x28] sm:$0xff] }
 0x39f   : > { %v5314_v34 = vadd.f32 %v5304_v21, %v5265_v12  ;;  %5181 = vst.msk [vmem:[#allocation5 + $0x38] sm:$0xff] %vm330_vm2, %v5171_v55 }
 0x3a0   : > { %v8240_v50 = vpop.f32.mrf.mxu1  ;;  %v8280_v9 = vpop.f32.mrf.mxu0  ;;  %v5162_v16 = vld [vmem:[#allocation5 + $0x40] sm:$0xff] }
 0x3a1   : > { %5324 = vst.msk [vmem:[#allocation5] sm:$0xff] %vm330_vm2, %v5314_v34  ;;  %v5172_v31 = vadd.f32 %v5162_v16, %v9983_v11 }
 0x3a2   : > { %v5268_v39 = vpop.f32.mrf.mxu1  ;;  %v10047_v43 = vpop.f32.mrf.mxu0 }
 0x3a3   : > { %v5315_v32 = vadd.f32 %v5305_v56, %v5268_v39  ;;  %5182 = vst.msk [vmem:[#allocation5 + $0x40] sm:$0xff] %vm330_vm2, %v5172_v31 }
 0x3a4   : > { %v8241_v41 = vpop.f32.mrf.mxu1  ;;  %v8281_v27 = vpop.f32.mrf.mxu0  ;;  %v5163_v3 = vld [vmem:[#allocation5 + $0x48] sm:$0xff] }
 0x3a5   : > { %5325 = vst.msk [vmem:[#allocation5 + $0x8] sm:$0xff] %vm330_vm2, %v5315_v32  ;;  %v5173_v33 = vadd.f32 %v5163_v3, %v9996_v47 }
 0x3a6   : > { %v5273_v35 = vpop.f32.mrf.mxu1  ;;  %v5311_v2 = vld [vmem:[#allocation5 + $0x38] sm:$0xff] }
 0x3a7   : > { %v5316_v38 = vadd.f32 %v5306_v37, %v5273_v35  ;;  %5183 = vst.msk [vmem:[#allocation5 + $0x48] sm:$0xff] %vm330_vm2, %v5173_v33 }
 0x3a8   : > { %v5454_v11 = vld [vmem:[#allocation5] sm:$0xff]  ;;  %v8244_v45 = vpop.f32.mrf.mxu1 }
 0x3a9   : > { %v5464_v30 = vadd.f32 %v5454_v11, %v10002_v15  ;;  %5326 = vst.msk [vmem:[#allocation5 + $0x10] sm:$0xff] %vm330_vm2, %v5316_v38  ;;  %v10062_v15 = vld [vmem:[%s10343_s4] ss:$0 sm:$0xff] }
 0x3aa   : > { %v5276_v14 = vpop.f32.mrf.mxu1  ;;  %v5312_v31 = vld [vmem:[#allocation5 + $0x40] sm:$0xff] }
 0x3ab   : > { %5474 = vst.msk [vmem:[#allocation5] sm:$0xff] %vm330_vm2, %v5464_v30  ;;  %v5317_v59 = vadd.f32 %v5307_v40, %v5276_v14 }
 0x3ac   : > { %v5455_v52 = vld [vmem:[#allocation5 + $0x8] sm:$0xff]  ;;  %v8245_v46 = vpop.f32.mrf.mxu1 }
 0x3ad   : > { %v5465_v47 = vadd.f32 %v5455_v52, %v10007_v19  ;;  %5327 = vst.msk [vmem:[#allocation5 + $0x18] sm:$0xff] %vm330_vm2, %v5317_v59 }
 0x3ae   : > { %v5281_v51 = vpop.f32.mrf.mxu1 }
 0x3af   : > { %5475 = vst.msk [vmem:[#allocation5 + $0x8] sm:$0xff] %vm330_vm2, %v5465_v47  ;;  %v5318_v6 = vadd.f32 %v5308_v28, %v5281_v51 }
 0x3b0   : > { %v5456_v42 = vld [vmem:[#allocation5 + $0x10] sm:$0xff]  ;;  %v8248_v1 = vpop.f32.mrf.mxu1 }
 0x3b1   : > { %v5466_v61 = vadd.f32 %v5456_v42, %v10012_v26  ;;  %5328 = vst.msk [vmem:[#allocation5 + $0x20] sm:$0xff] %vm330_vm2, %v5318_v6  ;;  %v5310_v26 = vld [vmem:[#allocation5 + $0x30] sm:$0xff] }
 0x3b2   : > { %v5484_v48 = vld [vmem:[#allocation5] sm:$0xff]  ;;  %v5284_v19 = vpop.f32.mrf.mxu1 }
 0x3b3   : > { %v5501_v49 = vadd.f32 %v10062_v15, %v5484_v48  ;;  %5476 = vst.msk [vmem:[#allocation5 + $0x10] sm:$0xff] %vm330_vm2, %v5466_v61  ;;  %v5319_v7 = vadd.f32 %v5309_v58, %v5284_v19 }
 0x3b4   : > { %v5457_v17 = vld [vmem:[#allocation5 + $0x18] sm:$0xff]  ;;  %v8249_v13 = vpop.f32.mrf.mxu1 }
 0x3b5   : > { %v5511_v53 = vmax.f32 %v5501_v49, 0.0  ;;  %v5467_v18 = vadd.f32 %v5457_v17, %v10017_v24  ;;  %5329 = vst.msk [vmem:[#allocation5 + $0x28] sm:$0xff] %vm330_vm2, %v5319_v7 }
 0x3b6   : > { %v5485_v8 = vld [vmem:[#allocation5 + $0x8] sm:$0xff]  ;;  %v5289_v57 = vpop.f32.mrf.mxu1 }
 0x3b7   : > { %5521 = vst.msk [vmem:[#allocation5] sm:$0xff] %vm330_vm2, %v5511_v53  ;;  %v5502_v60 = vadd.f32 %v10062_v15, %v5485_v8  ;;  %5477 = vst.msk [vmem:[#allocation5 + $0x18] sm:$0xff] %vm330_vm2, %v5467_v18  ;;  %v5320_v23 = vadd.f32 %v5310_v26, %v5289_v57 }
 0x3b8   : > { %v5458_v25 = vld [vmem:[#allocation5 + $0x20] sm:$0xff]  ;;  %v8252_v44 = vpop.f32.mrf.mxu1 }
 0x3b9   : > { %v5512_v0 = vmax.f32 %v5502_v60, 0.0  ;;  %v5468_v5 = vadd.f32 %v5458_v25, %v10022_v29  ;;  %5330 = vst.msk [vmem:[#allocation5 + $0x30] sm:$0xff] %vm330_vm2, %v5320_v23 }
 0x3ba   : > { %v5486_v24 = vld [vmem:[#allocation5 + $0x10] sm:$0xff]  ;;  %v5292_v36 = vpop.f32.mrf.mxu1 }
 0x3bb   : > { %5522 = vst.msk [vmem:[#allocation5 + $0x8] sm:$0xff] %vm330_vm2, %v5512_v0  ;;  %v5503_v55 = vadd.f32 %v10062_v15, %v5486_v24  ;;  %5478 = vst.msk [vmem:[#allocation5 + $0x20] sm:$0xff] %vm330_vm2, %v5468_v5  ;;  %v5321_v12 = vadd.f32 %v5311_v2, %v5292_v36 }
 0x3bc   : > { %v5459_v21 = vld [vmem:[#allocation5 + $0x28] sm:$0xff]  ;;  %v8253_v34 = vpop.f32.mrf.mxu1 }
 0x3bd   : > { %v5513_v50 = vmax.f32 %v5503_v55, 0.0  ;;  %v5469_v9 = vadd.f32 %v5459_v21, %v10027_v22  ;;  %5331 = vst.msk [vmem:[#allocation5 + $0x38] sm:$0xff] %vm330_vm2, %v5321_v12  ;;  %v5313_v22 = vld [vmem:[#allocation5 + $0x48] sm:$0xff] }
 0x3be   : > { %v5487_v29 = vld [vmem:[#allocation5 + $0x18] sm:$0xff]  ;;  %v5297_v16 = vpop.f32.mrf.mxu1 }
 0x3bf   : > { %5523 = vst.msk [vmem:[#allocation5 + $0x10] sm:$0xff] %vm330_vm2, %v5513_v50  ;;  %v5504_v39 = vadd.f32 %v10062_v15, %v5487_v29  ;;  %5479 = vst.msk [vmem:[#allocation5 + $0x28] sm:$0xff] %vm330_vm2, %v5469_v9  ;;  %v5322_v56 = vadd.f32 %v5312_v31, %v5297_v16 }
 0x3c0   : > { %v5460_v32 = vld [vmem:[#allocation5 + $0x30] sm:$0xff]  ;;  %v8256_v41 = vpop.f32.mrf.mxu1 }
 0x3c1   : > { %v5514_v27 = vmax.f32 %v5504_v39, 0.0  ;;  %v5470_v3 = vadd.f32 %v5460_v32, %v10032_v54  ;;  %5332 = vst.msk [vmem:[#allocation5 + $0x40] sm:$0xff] %vm330_vm2, %v5322_v56 }
 0x3c2   : > { %v5531_v33 = vld [vmem:[#allocation5] ss:$2 sm:$0xff]  ;;  %v5541_v35 = vld [vmem:[#allocation5 + $0x1] ss:$2 sm:$0xff]  ;;  %v5300_v38 = vpop.f32.mrf.mxu1 }
 0x3c3   : > { %v5488_v37 = vld [vmem:[#allocation5 + $0x20] sm:$0xff]  ;;  %v5550_v11 = vmax.f32 %v5531_v33, %v5541_v35  ;;  %5524 = vst.msk [vmem:[#allocation5 + $0x18] sm:$0xff] %vm330_vm2, %v5514_v27  ;;  %5480 = vst.msk [vmem:[#allocation5 + $0x30] sm:$0xff] %vm330_vm2, %v5470_v3  ;;  %v5323_v30 = vadd.f32 %v5313_v22, %v5300_v38  ;;  %v8468_v38 = vld [vmem:[%s10344_s5 + $0x10] sm:$0xff]  }
 0x3c4   : > { %v5505_v45 = vadd.f32 %v10062_v15, %v5488_v37  ;;  %v5461_v14 = vld [vmem:[#allocation5 + $0x38] sm:$0xff]  ;;  %v8257_v40 = vpop.f32.mrf.mxu1 }
 0x3c5   : > { %5555 = vst.msk [vmem:[#allocation6] sm:$0xff] %vm330_vm2, %v5550_v11  ;;  %v5471_v59 = vadd.f32 %v5461_v14, %v10037_v62  ;;  %5333 = vst.msk [vmem:[#allocation5 + $0x48] sm:$0xff] %vm330_vm2, %v5323_v30 }
 0x3c6   : > { %v5515_v54 = vmax.f32 %v5505_v45, 0.0  ;;  %v5489_v52 = vld [vmem:[#allocation5 + $0x28] sm:$0xff]  ;;  %v8470_v45 = vld [vmem:[%s10344_s5 + $0x28] sm:$0xff]  }
 0x3c7   : > { %v5506_v46 = vadd.f32 %v10062_v15, %v5489_v52  ;;  %5481 = vst.msk [vmem:[#allocation5 + $0x38] sm:$0xff] %vm330_vm2, %v5471_v59 }
 0x3c8   : > { %5525 = vst.msk [vmem:[#allocation5 + $0x20] sm:$0xff] %vm330_vm2, %v5515_v54  ;;  %v5462_v47 = vld [vmem:[#allocation5 + $0x40] sm:$0xff] }
 0x3c9   : > { %v5516_v51 = vmax.f32 %v5506_v46, 0.0  ;;  %v5472_v28 = vadd.f32 %v5462_v47, %v10042_v10 }
 0x3ca   : > { %v5533_v6 = vld [vmem:[#allocation5 + $0x10] ss:$2 sm:$0xff]  ;;  %v5543_v42 = vld [vmem:[#allocation5 + $0x11] ss:$2 sm:$0xff] }
 0x3cb   : > { %v5490_v1 = vld [vmem:[#allocation5 + $0x30] sm:$0xff]  ;;  %v5551_v61 = vmax.f32 %v5533_v6, %v5543_v42  ;;  %5526 = vst.msk [vmem:[#allocation5 + $0x28] sm:$0xff] %vm330_vm2, %v5516_v51  ;;  %5482 = vst.msk [vmem:[#allocation5 + $0x40] sm:$0xff] %vm330_vm2, %v5472_v28  ;;  %v8473_v6 = vld [vmem:[%s10344_s5 + $0x60] sm:$0xff]  }
 0x3cc   : > { %v5507_v62 = vadd.f32 %v10062_v15, %v5490_v1  ;;  %v5463_v48 = vld [vmem:[#allocation5 + $0x48] sm:$0xff]  ;;  %v5560_v57 = vld [vmem:[#allocation6] sm:$0xf]  ;;  %v8474_v42 = vld [vmem:[%s10344_s5 + $0x38] sm:$0xff]  }
 0x3cd   : > { %5556 = vst.msk [vmem:[#allocation6 + $0x8] sm:$0xff] %vm330_vm2, %v5551_v61  ;;  %v5473_v58 = vadd.f32 %v5463_v48, %v10047_v43  ;;  %v8480_v61 = vld [vmem:[%s10344_s5 + $0x88] sm:$0xff]  }
 0x3ce   : > { %v5517_v19 = vmax.f32 %v5507_v62, 0.0  ;;  %v5491_v49 = vld [vmem:[#allocation5 + $0x38] sm:$0xff] }
 0x3cf   : > { %v5508_v10 = vadd.f32 %v10062_v15, %v5491_v49  ;;  %5483 = vst.msk [vmem:[#allocation5 + $0x48] sm:$0xff] %vm330_vm2, %v5473_v58 }
 0x3d0   : > { %5527 = vst.msk [vmem:[#allocation5 + $0x30] sm:$0xff] %vm330_vm2, %v5517_v19 }
 0x3d1   : > { %v5518_v7 = vmax.f32 %v5508_v10, 0.0  ;;  %v8475_v10 = vld [vmem:[%s10344_s5 + $0x30] sm:$0xff]  }
 0x3d2   : > { %v5535_v17 = vld [vmem:[#allocation5 + $0x20] ss:$2 sm:$0xff]  ;;  %v5545_v13 = vld [vmem:[#allocation5 + $0x21] ss:$2 sm:$0xff] }
 0x3d3   : > { %v5492_v53 = vld [vmem:[#allocation5 + $0x40] sm:$0xff]  ;;  %v5552_v18 = vmax.f32 %v5535_v17, %v5545_v13  ;;  %5528 = vst.msk [vmem:[#allocation5 + $0x38] sm:$0xff] %vm330_vm2, %v5518_v7  ;;  %v8481_v13 = vld [vmem:[%s10344_s5 + $0x80] sm:$0xff]  }
 0x3d4   : > { %v5509_v8 = vadd.f32 %v10062_v15, %v5492_v53  ;;  %v5561_v26 = vld [vmem:[#allocation6 + $0x5] sm:$0xf]  ;;  %v5565_v36 = vld [vmem:[#allocation6 + $0xa] sm:$0xf]  ;;  %v8476_v53 = vld [vmem:[%s10344_s5 + $0x58] sm:$0xff]  }
 0x3d5   : > { %5557 = vst.msk [vmem:[#allocation6 + $0x10] sm:$0xff] %vm330_vm2, %v5552_v18  ;;  %v5562_v60 = vmax.f32 %v5560_v57, %v5561_v26  ;;  %v6252_v18 = vld [vmem:[#allocation7 + $0x1e] sm:$0xff] }
 0x3d6   : > { %v5519_v43 = vmax.f32 %v5509_v8, 0.0  ;;  %v5493_v23 = vld [vmem:[#allocation5 + $0x48] sm:$0xff]  ;;  %v8477_v57 = vld [vmem:[%s10344_s5 + $0x50] sm:$0xff]   ;;  %v6254_v26 = vpack.c.bf16 %v6252_v18, %v6252_v18 }
 0x3d7   : > { %v5510_v25 = vadd.f32 %v10062_v15, %v5493_v23  ;;  %5564 = vst.msk [vmem:[#allocation7 + $0x7] sm:$0xf] %vm5563_vm5, %v5562_v60  ;;  %v8478_v60 = vld [vmem:[%s10344_s5 + $0x78] sm:$0xff]  }
 0x3d8   : > { %5529 = vst.msk [vmem:[#allocation5 + $0x40] sm:$0xff] %vm330_vm2, %v5519_v43 }
 0x3d9   : > { %v5520_v44 = vmax.f32 %v5510_v25, 0.0 }
 0x3da   : > { %v5537_v0 = vld [vmem:[#allocation5 + $0x30] ss:$2 sm:$0xff]  ;;  %v5547_v5 = vld [vmem:[#allocation5 + $0x31] ss:$2 sm:$0xff] }
 0x3db   : > { %v5553_v24 = vmax.f32 %v5537_v0, %v5547_v5  ;;  %5530 = vst.msk [vmem:[#allocation5 + $0x48] sm:$0xff] %vm330_vm2, %v5520_v44  ;;  %v8479_v5 = vld [vmem:[%s10344_s5 + $0x70] sm:$0xff]  }
 0x3dc   : > { %v5566_v2 = vld [vmem:[#allocation6 + $0xf] sm:$0xf]  ;;  %v5569_v50 = vld [vmem:[#allocation6 + $0x14] sm:$0xf] }
 0x3dd   : > { %5558 = vst.msk [vmem:[#allocation6 + $0x18] sm:$0xff] %vm330_vm2, %v5553_v24  ;;  %v5567_v55 = vmax.f32 %v5565_v36, %v5566_v2  ;;  %v6167_v36 = vld [vmem:[#allocation7 + $0x1d] sm:$0xff] }
 0x3de   : > { %v5577_v29 = vld [vmem:[#allocation7] sm:$0xff]  ;;  %v6169_v2 = vpack.c.bf16 %v6167_v36, %v6167_v36 }
 0x3df   : > { %5568 = vst.msk [vmem:[#allocation7 + $0xd] sm:$0xf] %vm5563_vm5, %v5567_v55  ;;  %v5655_v37 = vld [vmem:[#allocation7 + $0x1] sm:$0xff]  ;;  %v8482_v55 = vld [vmem:[%s10346_s7 + $0x8] sm:$0xff]  }
 0x3e0   : > { %v5740_v47 = vld [vmem:[#allocation7 + $0x2] sm:$0xff] }
 0x3e2   : > { %v5539_v12 = vld [vmem:[#allocation5 + $0x40] ss:$2 sm:$0xff]  ;;  %v5549_v21 = vld [vmem:[#allocation5 + $0x41] ss:$2 sm:$0xff] }
 0x3e3   : > { %v5554_v34 = vmax.f32 %v5539_v12, %v5549_v21  ;;  %v8483_v12 = vld [vmem:[%s10346_s7 + $0x18] sm:$0xff]   ;;  %v8484_v21 = vld [vmem:[%s10346_s7] sm:$0xff]  }
 0x3e4   : > { %v5570_v15 = vld [vmem:[#allocation6 + $0x19] sm:$0xf] }
 0x3e5   : > { %5559 = vst.msk [vmem:[#allocation6 + $0x20] sm:$0xff] %vm330_vm2, %v5554_v34  ;;  %v5571_v9 = vmax.f32 %v5569_v50, %v5570_v15  ;;  %v8485_v34 = vld [vmem:[%s10346_s7 + $0x10] sm:$0xff]  }
 0x3e6   : > { %v10113_v16 = vld [vmem:[#allocation7 + $0x8] sm:$0xff] }
 0x3e7   : > { %v5580_v31 = vpack.c.bf16 %v10113_v16, %v5577_v29  ;;  %5572 = vst.msk [vmem:[#allocation7 + $0x13] sm:$0xf] %vm5563_vm5, %v5571_v9  ;;  %v5656_v32 = vld [vmem:[#allocation7 + $0x9] sm:$0xff] }
 0x3e8   : > { %v5910_v3 = vld [vmem:[#allocation7 + $0x7] sm:$0xff]  ;;  %v5658_v11 = vpack.c.bf16 %v5656_v32, %v5655_v37 }
 0x3e9   : > { %8286 = vmatprep.mubr.msk.bf16.mxu1 %vm330_vm2, %v5580_v31  ;;  %v5741_v14 = vld [vmem:[#allocation7 + $0xa] sm:$0xff] }
 0x3ea   : > { %v5743_v28 = vpack.c.bf16 %v5741_v14, %v5740_v47  ;;  %v5825_v49 = vld [vmem:[#allocation7 + $0x6] sm:$0xff] }
 0x3ec   : > { %v5573_v39 = vld [vmem:[#allocation6 + $0x1e] sm:$0xf]  ;;  %v5574_v56 = vld [vmem:[#allocation6 + $0x23] sm:$0xf] }
 0x3ed   : > { %v5575_v41 = vmax.f32 %v5573_v39, %v5574_v56 }
 0x3ee   : > { %v10118_v27 = vld [vmem:[#allocation7 + $0x10] sm:$0xff] }
 0x3ef   : > { %v5911_v22 = vld [vmem:[#allocation7 + $0xf] sm:$0xff]  ;;  %v5581_v33 = vpack.c.bf16 %v10118_v27, %v10118_v27  ;;  %5576 = vst.msk [vmem:[#allocation7 + $0x19] sm:$0xf] %vm5563_vm5, %v5575_v41  ;;  %v5998_v43 = vpack.c.bf16 %v10118_v27, %v10113_v16 }
 0x3f0   : > { %v5913_v35 = vpack.c.bf16 %v5911_v22, %v5910_v3  ;;  %v5657_v30 = vld [vmem:[#allocation7 + $0x11] sm:$0xff] }
 0x3f1   : > { %8287 = vmatmul.mubr.msk.bf16.vlgmr.msra.gmra.mxu1 %vm330_vm2, %v5581_v33  ;;  %v6080_v54 = vld [vmem:[#allocation7 + $0xc] sm:$0xff]  ;;  %v5659_v52 = vpack.c.bf16 %v5657_v30, %v5657_v30 }
 0x3f2   : > { %8318 = vmatprep.mubr.msk.bf16.mxu0 %vm330_vm2, %v5913_v35  ;;  %8291 = vmatpush3.bf16.msra.mxu1 %v9965_v20  ;;  %v8472_v20 = vld [vmem:[%s10344_s5 + $0x20] sm:$0xff]  }
 0x3f3   : > { %8294 = vmatprep.mubr.msk.bf16.mxu1 %vm330_vm2, %v5658_v11  ;;  %8292 = vmatprep.subr.bf16.mxu1 %v8468_v38  ;;  %v5826_v48 = vld [vmem:[#allocation7 + $0xe] sm:$0xff] }
 0x3f4   : > { %v5828_v7 = vpack.c.bf16 %v5826_v48, %v5825_v49  ;;  %v6165_v0 = vld [vmem:[#allocation7 + $0xd] sm:$0xff] }
 0x3f6   : > { %8293 = vmatpush3.bf16.msra.mxu1 %v8468_v38  ;;  %v5912_v40 = vld [vmem:[#allocation7 + $0x17] sm:$0xff] }
 0x3f7   : > { %v6081_v59 = vld [vmem:[#allocation7 + $0x14] sm:$0xff]  ;;  %8298 = vmatprep.subr.bf16.mxu1 %v8470_v45  ;;  %v5914_v46 = vpack.c.bf16 %v5912_v40, %v5912_v40  ;;  %v6082_v62 = vld [vmem:[#allocation7 + $0x1c] sm:$0xff] }
 0x3f8   : > { %v6083_v51 = vpack.c.bf16 %v6081_v59, %v6080_v54  ;;  %v5742_v1 = vld [vmem:[#allocation7 + $0x12] sm:$0xff] }
 0x3f9   : > { %8295 = vmatmul.mubr.msk.bf16.vlgmr.msra.gmra.mxu1 %vm330_vm2, %v5659_v52  ;;  %8319 = vmatmul.mubr.msk.bf16.vlgmr.msra.gmra.mxu0 %vm330_vm2, %v5914_v46  ;;  %v6251_v19 = vld [vmem:[#allocation7 + $0x16] sm:$0xff]  ;;  %v5744_v58 = vpack.c.bf16 %v5742_v1, %v5742_v1 }
 0x3fa   : > { %8299 = vmatpush3.bf16.msra.mxu1 %v8470_v45  ;;  %8302 = vmatprep.mubr.msk.bf16.mxu1 %vm330_vm2, %v5743_v28  ;;  %v6253_v17 = vpack.c.bf16 %v6251_v19, %v5826_v48  ;;  %v5829_v8 = vpack.c.bf16 %v6251_v19, %v6251_v19  ;;  %v5997_v23 = vld [vmem:[#allocation7 + $0x18] sm:$0xff] }
 0x3fb   : > { %8331 = vmatpush3.bf16.msra.mxu0 %v9994_v4  ;;  %8334 = vmatprep.mubr.msk.bf16.mxu0 %vm330_vm2, %v6083_v51  ;;  %v6084_v4 = vpack.c.bf16 %v6082_v62, %v6082_v62  ;;  %v6166_v25 = vld [vmem:[#allocation7 + $0x15] sm:$0xff]  ;;  %v5999_v44 = vpack.c.bf16 %v5997_v23, %v5997_v23 }
 0x3fc   : > { %8300 = vmatprep.subr.bf16.mxu1 %v8472_v20  ;;  %8332 = vmatprep.subr.bf16.mxu0 %v8473_v6  ;;  %v6168_v24 = vpack.c.bf16 %v6166_v25, %v6165_v0 }
 0x3fe   : > { %8301 = vmatpush3.bf16.msra.mxu1 %v8472_v20 }
 0x3ff   : > { %8333 = vmatpush3.bf16.msra.mxu0 %v8473_v6  ;;  %8306 = vmatprep.subr.bf16.mxu1 %v8474_v42 }
 0x400   : > { %8346 = vmatprep.subr.bf16.mxu0 %v8480_v61 }
 0x401   : > { %8303 = vmatmul.mubr.msk.bf16.vlgmr.msra.gmra.mxu1 %vm330_vm2, %v5744_v58 }
 0x402   : > { %8335 = vmatmul.mubr.msk.bf16.vlgmr.msra.gmra.mxu0 %vm330_vm2, %v6084_v4  ;;  %8307 = vmatpush3.bf16.msra.mxu1 %v8474_v42 }
 0x403   : > { %8310 = vmatprep.mubr.msk.bf16.mxu1 %vm330_vm2, %v5828_v7  ;;  %8350 = vmatprep.mubr.msk.bf16.mxu0 %vm330_vm2, %v6253_v17 }
 0x404   : > { %8308 = vmatprep.subr.bf16.mxu1 %v8475_v10  ;;  %8347 = vmatpush3.bf16.msra.mxu0 %v8480_v61 }
 0x405   : > { %8348 = vmatprep.subr.bf16.mxu0 %v8481_v13 }
 0x406   : > { %8309 = vmatpush3.bf16.msra.mxu1 %v8475_v10 }
 0x407   : > { %8322 = vmatprep.subr.bf16.mxu1 %v8476_v53 }
 0x408   : > { %8349 = vmatpush3.bf16.msra.mxu0 %v8481_v13 }
 0x409   : > { %8311 = vmatmul.mubr.msk.bf16.vlgmr.msra.gmra.mxu1 %vm330_vm2, %v5829_v8  ;;  %8362 = vmatprep.subr.bf16.mxu0 %v8508_v63 }
 0x40a   : > { %8323 = vmatpush3.bf16.msra.mxu1 %v8476_v53  ;;  %8326 = vmatprep.mubr.msk.bf16.mxu1 %vm330_vm2, %v5998_v43 }
 0x40b   : > { %8324 = vmatprep.subr.bf16.mxu1 %v8477_v57  ;;  %8351 = vmatmul.mubr.msk.bf16.vlgmr.msra.gmra.mxu0 %vm330_vm2, %v6254_v26 }
 0x40c   : > { %8366 = vmatprep.mubr.msk.bf16.mxu0 %vm8509_vm3, %v8508_v63  ;;  %8363 = vmatpush3.bf16.msra.mxu0 %v8483_v12 }
 0x40d   : > { %8364 = vmatprep.subr.bf16.mxu0 %v8508_v63 }
 0x40e   : > { %8325 = vmatpush3.bf16.msra.mxu1 %v8477_v57 }
 0x40f   : > { %8338 = vmatprep.subr.bf16.mxu1 %v8478_v60 }
 0x410   : > { %8365 = vmatpush3.bf16.msra.mxu0 %v8485_v34 }
 0x411   : > { %8327 = vmatmul.mubr.msk.bf16.vlgmr.msra.gmra.mxu1 %vm330_vm2, %v5999_v44  ;;  %8378 = vmatprep.subr.bf16.mxu0 %v8508_v63 }
 0x412   : > { %8342 = vmatprep.mubr.msk.bf16.mxu1 %vm330_vm2, %v6168_v24  ;;  %8339 = vmatpush3.bf16.msra.mxu1 %v8478_v60 }
 0x413   : > { %8340 = vmatprep.subr.bf16.mxu1 %v8479_v5 }
 0x416   : > { %8341 = vmatpush3.bf16.msra.mxu1 %v8479_v5 }
 0x417   : > { %8354 = vmatprep.subr.bf16.mxu1 %v8508_v63 }
 0x419   : > { %8343 = vmatmul.mubr.msk.bf16.vlgmr.msra.gmra.mxu1 %vm330_vm2, %v6169_v2 }
 0x41a   : > { %8358 = vmatprep.mubr.msk.bf16.mxu1 %vm8509_vm3, %v8508_v63  ;;  %8355 = vmatpush3.bf16.msra.mxu1 %v8482_v55 }
 0x41b   : > { %8356 = vmatprep.subr.bf16.mxu1 %v8508_v63 }
 0x41e   : > { %8357 = vmatpush3.bf16.msra.mxu1 %v8484_v21 }
 0x41f   : > { %8370 = vmatprep.subr.bf16.mxu1 %v8508_v63 }
 0x4b1   : > { %v8288_v50 = vpop.f32.mrf.mxu1 }
 0x4b2   : > { %5654 = vst.msk [vmem:[#allocation8 + $0x10] sm:$0xff] %vm330_vm2, %v8288_v50 }
 0x4b3   : > { %v5638_v15 = vpop.f32.mrf.mxu1 }
 0x4b4   : > { %5652 = vst.msk [vmem:[#allocation8] sm:$0xff] %vm330_vm2, %v5638_v15 }
 0x4b5   : > { %v8289_v9 = vpop.f32.mrf.mxu1 }
 0x4b7   : > { %v5641_v29 = vpop.f32.mrf.mxu1 }
 0x4b8   : > { %5653 = vst.msk [vmem:[#allocation8 + $0x8] sm:$0xff] %vm330_vm2, %v5641_v29 }
 0x4b9   : > { %v8296_v16 = vpop.f32.mrf.mxu1  ;;  %v5733_v31 = vld [vmem:[#allocation8 + $0x10] sm:$0xff]  ;;  %v8320_v39 = vpop.f32.mrf.mxu0 }
 0x4ba   : > { %v5736_v56 = vadd.f32 %v8296_v16, %v5733_v31 }
 0x4bb   : > { %v5717_v32 = vpop.f32.mrf.mxu1  ;;  %v5731_v41 = vld [vmem:[#allocation8] sm:$0xff]  ;;  %v5972_v27 = vpop.f32.mrf.mxu0 }
 0x4bc   : > { %5739 = vst.msk [vmem:[#allocation8 + $0x10] sm:$0xff] %vm330_vm2, %v5736_v56  ;;  %v5734_v3 = vadd.f32 %v5731_v41, %v5717_v32 }
 0x4bd   : > { %v8297_v22 = vpop.f32.mrf.mxu1  ;;  %v8321_v33 = vpop.f32.mrf.mxu0 }
 0x4be   : > { %5737 = vst.msk [vmem:[#allocation8] sm:$0xff] %vm330_vm2, %v5734_v3 }
 0x4bf   : > { %v5720_v35 = vpop.f32.mrf.mxu1  ;;  %v5732_v37 = vld [vmem:[#allocation8 + $0x8] sm:$0xff]  ;;  %v5975_v38 = vpop.f32.mrf.mxu0 }
 0x4c0   : > { %v5735_v11 = vadd.f32 %v5732_v37, %v5720_v35 }
 0x4c1   : > { %v8304_v45 = vpop.f32.mrf.mxu1 }
 0x4c2   : > { %5738 = vst.msk [vmem:[#allocation8 + $0x8] sm:$0xff] %vm330_vm2, %v5735_v11  ;;  %v8336_v30 = vpop.f32.mrf.mxu0 }
 0x4c3   : > { %v5818_v14 = vld [vmem:[#allocation8 + $0x10] sm:$0xff]  ;;  %v5802_v40 = vpop.f32.mrf.mxu1 }
 0x4c4   : > { %v5821_v54 = vadd.f32 %v8304_v45, %v5818_v14  ;;  %v6142_v59 = vpop.f32.mrf.mxu0 }
 0x4c5   : > { %v5816_v52 = vld [vmem:[#allocation8] sm:$0xff]  ;;  %v8305_v46 = vpop.f32.mrf.mxu1 }
 0x4c6   : > { %5824 = vst.msk [vmem:[#allocation8 + $0x10] sm:$0xff] %vm330_vm2, %v5821_v54  ;;  %v5819_v47 = vadd.f32 %v5816_v52, %v5802_v40  ;;  %v8337_v51 = vpop.f32.mrf.mxu0  ;;  %v7364_v40 = vld [vmem:[%s10345_s6] ss:$0 sm:$0xff] }
 0x4c7   : > { %v5805_v28 = vpop.f32.mrf.mxu1 }
 0x4c8   : > { %5822 = vst.msk [vmem:[#allocation8] sm:$0xff] %vm330_vm2, %v5819_v47  ;;  %v6145_v6 = vpop.f32.mrf.mxu0 }
 0x4c9   : > { %v5817_v20 = vld [vmem:[#allocation8 + $0x8] sm:$0xff]  ;;  %v8312_v42 = vpop.f32.mrf.mxu1 }
 0x4ca   : > { %v5820_v1 = vadd.f32 %v5817_v20, %v5805_v28 }
 0x4cb   : > { %v5887_v61 = vpop.f32.mrf.mxu1  ;;  %v8352_v62 = vpop.f32.mrf.mxu0 }
 0x4cc   : > { %5823 = vst.msk [vmem:[#allocation8 + $0x8] sm:$0xff] %vm330_vm2, %v5820_v1 }
 0x4cd   : > { %v5903_v48 = vld [vmem:[#allocation8 + $0x10] sm:$0xff]  ;;  %v8313_v19 = vpop.f32.mrf.mxu1  ;;  %v6312_v58 = vpop.f32.mrf.mxu0 }
 0x4ce   : > { %v5906_v4 = vadd.f32 %v8312_v42, %v5903_v48 }
 0x4cf   : > { %v5901_v49 = vld [vmem:[#allocation8] sm:$0xff]  ;;  %v5890_v10 = vpop.f32.mrf.mxu1  ;;  %v8353_v7 = vpop.f32.mrf.mxu0 }
 0x4d0   : > { %5909 = vst.msk [vmem:[#allocation8 + $0x10] sm:$0xff] %vm330_vm2, %v5906_v4  ;;  %v5904_v17 = vadd.f32 %v5901_v49, %v5887_v61 }
 0x4d1   : > { %v8328_v13 = vpop.f32.mrf.mxu1  ;;  %v6315_v45 = vpop.f32.mrf.mxu0 }
 0x4d2   : > { %5907 = vst.msk [vmem:[#allocation8] sm:$0xff] %vm330_vm2, %v5904_v17 }
 0x4d3   : > { %v5902_v53 = vld [vmem:[#allocation8 + $0x8] sm:$0xff]  ;;  %v6057_v18 = vpop.f32.mrf.mxu1 }
 0x4d4   : > { %v5905_v8 = vadd.f32 %v5902_v53, %v5890_v10 }
 0x4d5   : > { %v8329_v57 = vpop.f32.mrf.mxu1 }
 0x4d6   : > { %5908 = vst.msk [vmem:[#allocation8 + $0x8] sm:$0xff] %vm330_vm2, %v5905_v8  ;;  %v8487_v8 = vld [vmem:[%s10346_s7 + $0x38] sm:$0xff]  }
 0x4d7   : > { %v5988_v26 = vld [vmem:[#allocation8 + $0x10] sm:$0xff]  ;;  %v6060_v43 = vpop.f32.mrf.mxu1 }
 0x4d8   : > { %v5991_v60 = vadd.f32 %v8320_v39, %v5988_v26 }
 0x4d9   : > { %v5986_v23 = vld [vmem:[#allocation8] sm:$0xff]  ;;  %v8344_v25 = vpop.f32.mrf.mxu1 }
 0x4da   : > { %5994 = vst.msk [vmem:[#allocation8 + $0x10] sm:$0xff] %vm330_vm2, %v5991_v60  ;;  %v5989_v44 = vadd.f32 %v5986_v23, %v5972_v27  ;;  %v8489_v60 = vld [vmem:[%s10346_s7 + $0x30] sm:$0xff]  }
 0x4db   : > { %v6227_v0 = vpop.f32.mrf.mxu1 }
 0x4dc   : > { %5992 = vst.msk [vmem:[#allocation8] sm:$0xff] %vm330_vm2, %v5989_v44  ;;  %v8490_v44 = vld [vmem:[%s10346_s7 + $0x48] sm:$0xff]  }
 0x4dd   : > { %v5987_v5 = vld [vmem:[#allocation8 + $0x8] sm:$0xff]  ;;  %v8345_v24 = vpop.f32.mrf.mxu1 }
 0x4de   : > { %v5990_v36 = vadd.f32 %v5987_v5, %v5975_v38 }
 0x4df   : > { %v6230_v3 = vpop.f32.mrf.mxu1 }
 0x4e0   : > { %5993 = vst.msk [vmem:[#allocation8 + $0x8] sm:$0xff] %vm330_vm2, %v5990_v36  ;;  %v8492_v36 = vld [vmem:[%s10346_s7 + $0x40] sm:$0xff]  }
 0x4e1   : > { %v6073_v2 = vld [vmem:[#allocation8 + $0x10] sm:$0xff] }
 0x4e2   : > { %v6076_v55 = vadd.f32 %v8328_v13, %v6073_v2  ;;  %v8486_v13 = vld [vmem:[%s10346_s7 + $0x28] sm:$0xff]   ;;  %v8493_v2 = vld [vmem:[%s10346_s7 + $0x50] sm:$0xff]  }
 0x4e3   : > { %v6071_v12 = vld [vmem:[#allocation8] sm:$0xff] }
 0x4e4   : > { %6079 = vst.msk [vmem:[#allocation8 + $0x10] sm:$0xff] %vm330_vm2, %v6076_v55  ;;  %v6074_v21 = vadd.f32 %v6071_v12, %v6057_v18 }
 0x4e6   : > { %6077 = vst.msk [vmem:[#allocation8] sm:$0xff] %vm330_vm2, %v6074_v21  ;;  %v8494_v21 = vld [vmem:[%s10346_s7 + $0x68] sm:$0xff]  }
 0x4e7   : > { %v6072_v34 = vld [vmem:[#allocation8 + $0x8] sm:$0xff] }
 0x4e8   : > { %v6075_v50 = vadd.f32 %v6072_v34, %v6060_v43  ;;  %v8488_v43 = vld [vmem:[%s10346_s7 + $0x20] sm:$0xff]   ;;  %v8495_v34 = vld [vmem:[%s10346_s7 + $0x78] sm:$0xff]  }
 0x4ea   : > { %6078 = vst.msk [vmem:[#allocation8 + $0x8] sm:$0xff] %vm330_vm2, %v6075_v50 }
 0x4eb   : > { %v6158_v15 = vld [vmem:[#allocation8 + $0x10] sm:$0xff] }
 0x4ec   : > { %v6161_v9 = vadd.f32 %v8336_v30, %v6158_v15 }
 0x4ed   : > { %v6156_v29 = vld [vmem:[#allocation8] sm:$0xff] }
 0x4ee   : > { %6164 = vst.msk [vmem:[#allocation8 + $0x10] sm:$0xff] %vm330_vm2, %v6161_v9  ;;  %v6159_v16 = vadd.f32 %v6156_v29, %v6142_v59  ;;  %v8496_v9 = vld [vmem:[%s10346_s7 + $0x60] sm:$0xff]   ;;  %v8497_v29 = vld [vmem:[%s10346_s7 + $0x70] sm:$0xff]  }
 0x4f0   : > { %6162 = vst.msk [vmem:[#allocation8] sm:$0xff] %vm330_vm2, %v6159_v16 }
 0x4f1   : > { %v6157_v31 = vld [vmem:[#allocation8 + $0x8] sm:$0xff] }
 0x4f2   : > { %v6160_v39 = vadd.f32 %v6157_v31, %v6145_v6 }
 0x4f4   : > { %6163 = vst.msk [vmem:[#allocation8 + $0x8] sm:$0xff] %vm330_vm2, %v6160_v39  ;;  %v8498_v39 = vld [vmem:[%s10346_s7 + $0x88] sm:$0xff]  }
 0x4f5   : > { %v6243_v56 = vld [vmem:[#allocation8 + $0x10] sm:$0xff] }
 0x4f6   : > { %v6246_v32 = vadd.f32 %v8344_v25, %v6243_v56 }
 0x4f7   : > { %v6241_v41 = vld [vmem:[#allocation8] sm:$0xff] }
 0x4f8   : > { %6249 = vst.msk [vmem:[#allocation8 + $0x10] sm:$0xff] %vm330_vm2, %v6246_v32  ;;  %v6244_v27 = vadd.f32 %v6241_v41, %v6227_v0  ;;  %v8491_v0 = vld [vmem:[%s10346_s7 + $0x58] sm:$0xff]   ;;  %v8499_v41 = vld [vmem:[%s10346_s7 + $0x80] sm:$0xff]  }
 0x4fa   : > { %6247 = vst.msk [vmem:[#allocation8] sm:$0xff] %vm330_vm2, %v6244_v27 }
 0x4fb   : > { %v6242_v22 = vld [vmem:[#allocation8 + $0x8] sm:$0xff] }
 0x4fc   : > { %v6245_v33 = vadd.f32 %v6242_v22, %v6230_v3 }
 0x4fe   : > { %6248 = vst.msk [vmem:[#allocation8 + $0x8] sm:$0xff] %vm330_vm2, %v6245_v33 }
 0x4ff   : > { %v6328_v35 = vld [vmem:[#allocation8 + $0x10] sm:$0xff] }
 0x500   : > { %v6331_v37 = vadd.f32 %v8352_v62, %v6328_v35 }
 0x501   : > { %v6326_v38 = vld [vmem:[#allocation8] sm:$0xff] }
 0x502   : > { %6334 = vst.msk [vmem:[#allocation8 + $0x10] sm:$0xff] %vm330_vm2, %v6331_v37  ;;  %v6329_v11 = vadd.f32 %v6326_v38, %v6312_v58 }
 0x504   : > { %6332 = vst.msk [vmem:[#allocation8] sm:$0xff] %vm330_vm2, %v6329_v11 }
 0x505   : > { %v6327_v30 = vld [vmem:[#allocation8 + $0x8] sm:$0xff] }
 0x506   : > { %v6330_v14 = vadd.f32 %v6327_v30, %v6315_v45 }
 0x508   : > { %6333 = vst.msk [vmem:[#allocation8 + $0x8] sm:$0xff] %vm330_vm2, %v6330_v14 }
 0x509   : > { %v6337_v54 = vld [vmem:[#allocation8 + $0x10] sm:$0xff] }
 0x50a   : > { %v6347_v59 = vadd.f32 %v7364_v40, %v6337_v54 }
 0x50b   : > { %v6335_v52 = vld [vmem:[#allocation8] sm:$0xff] }
 0x50c   : > { %v6350_v46 = vmax.f32 %v6347_v59, 0.0  ;;  %v6345_v47 = vadd.f32 %v7364_v40, %v6335_v52 }
 0x50e   : > { %6353 = vst.msk [vmem:[#allocation8 + $0x10] sm:$0xff] %vm330_vm2, %v6350_v46  ;;  %v6348_v51 = vmax.f32 %v6345_v47, 0.0 }
 0x50f   : > { %v6336_v28 = vld [vmem:[#allocation8 + $0x8] sm:$0xff] }
 0x510   : > { %6351 = vst.msk [vmem:[#allocation8] sm:$0xff] %vm330_vm2, %v6348_v51  ;;  %v6346_v20 = vadd.f32 %v7364_v40, %v6336_v28 }
 0x512   : > { %v6349_v6 = vmax.f32 %v6346_v20, 0.0 }
 0x514   : > { %6352 = vst.msk [vmem:[#allocation8 + $0x8] sm:$0xff] %vm330_vm2, %v6349_v6 }
 0x515   : > { %v6356_v42 = vld [vmem:[#allocation8 + $0x10] ss:$2 sm:$0xf]  ;;  %v6360_v1 = vld [vmem:[#allocation8 + $0x11] ss:$2 sm:$0xf] }
 0x516   : > { %v6362_v61 = vmax.f32 %v6356_v42, %v6360_v1 }
 0x518   : > { %6364 = vst.msk [vmem:[#allocation9 + $0x8] sm:$0xf] %vm5563_vm5, %v6362_v61 }
 0x51b   : > { %v6354_v62 = vld [vmem:[#allocation8] ss:$2 sm:$0xff]  ;;  %v6358_v48 = vld [vmem:[#allocation8 + $0x1] ss:$2 sm:$0xff] }
 0x51c   : > { %v6361_v19 = vmax.f32 %v6354_v62, %v6358_v48 }
 0x51e   : > { %6363 = vst.msk [vmem:[#allocation9] sm:$0xff] %vm330_vm2, %v6361_v19 }
 0x51f   : > { %v6370_v58 = vld [vmem:[#allocation9 + $0x9] sm:$0x3] }
 0x525   : > { %v6365_v4 = vld [vmem:[#allocation9] sm:$0x3]  ;;  %v6366_v49 = vld [vmem:[#allocation9 + $0x3] sm:$0x3]  ;;  %v6369_v10 = vld [vmem:[#allocation9 + $0x6] sm:$0x3] }
 0x526   : > { %v6367_v7 = vmax.f32 %v6365_v4, %v6366_v49  ;;  %v6371_v17 = vmax.f32 %v6369_v10, %v6370_v58 }
 0x528   : > { %6368 = vst.msk [vmem:[#allocation10 + $0x5] sm:$0x3] %vm352_vm6, %v6367_v7  ;;  %6372 = vst.msk [vmem:[#allocation10 + $0x9] sm:$0x3] %vm352_vm6, %v6371_v17 }
 0x52f   : > { %v6373_v53 = vld [vmem:[#allocation10] sm:$0xff]  ;;  %v6760_v16 = vld [vmem:[#allocation10 + $0x8] sm:$0xff] }
 0x530   : > { %v6435_v18 = vld [vmem:[#allocation10 + $0x1] sm:$0xff]  ;;  %v6374_v57 = vpack.c.bf16 %v6373_v53, %v6373_v53  ;;  %v6825_v31 = vld [vmem:[#allocation10 + $0x9] sm:$0xff]  ;;  %v6761_v56 = vpack.c.bf16 %v6760_v16, %v6760_v16 }
 0x531   : > { %v6436_v26 = vpack.c.bf16 %v6435_v18, %v6435_v18  ;;  %v6500_v23 = vld [vmem:[#allocation10 + $0x2] sm:$0xff]  ;;  %v6826_v32 = vpack.c.bf16 %v6825_v31, %v6825_v31  ;;  %v6890_v27 = vld [vmem:[#allocation10 + $0xa] sm:$0xff] }
 0x532   : > { %8359 = vmatmul.mubr.msk.bf16.vlgmr.msra.gmra.mxu1 %vm330_vm2, %v6374_v57  ;;  %v6565_v25 = vld [vmem:[#allocation10 + $0x4] sm:$0xff]  ;;  %v6501_v5 = vpack.c.bf16 %v6500_v23, %v6500_v23  ;;  %v6891_v3 = vpack.c.bf16 %v6890_v27, %v6890_v27 }
 0x533   : > { %8367 = vmatmul.mubr.msk.bf16.vlgmr.msra.gmra.mxu0 %vm330_vm2, %v6436_v26  ;;  %8371 = vmatpush3.bf16.msra.mxu1 %v8486_v13  ;;  %v6566_v24 = vpack.c.bf16 %v6565_v25, %v6565_v25  ;;  %v6630_v55 = vld [vmem:[#allocation10 + $0x5] sm:$0xff] }
 0x534   : > { %8379 = vmatpush3.bf16.msra.mxu0 %v8487_v8  ;;  %8372 = vmatprep.subr.bf16.mxu1 %v8508_v63  ;;  %v6695_v12 = vld [vmem:[#allocation10 + $0x6] sm:$0xff]  ;;  %v6631_v50 = vpack.c.bf16 %v6630_v55, %v6630_v55 }
 0x535   : > { %8380 = vmatprep.subr.bf16.mxu0 %v8508_v63  ;;  %8374 = vmatprep.mubr.msk.bf16.mxu1 %vm8509_vm3, %v8508_v63  ;;  %v6696_v15 = vpack.c.bf16 %v6695_v12, %v6695_v12 }
 0x536   : > { %8382 = vmatprep.mubr.msk.bf16.mxu0 %vm8509_vm3, %v8508_v63 }
 0x537   : > { %8373 = vmatpush3.bf16.msra.mxu1 %v8488_v43 }
 0x538   : > { %8381 = vmatpush3.bf16.msra.mxu0 %v8489_v60  ;;  %8386 = vmatprep.subr.bf16.mxu1 %v8508_v63 }
 0x539   : > { %8394 = vmatprep.subr.bf16.mxu0 %v8508_v63 }
 0x53a   : > { %8375 = vmatmul.mubr.msk.bf16.vlgmr.msra.gmra.mxu1 %vm330_vm2, %v6501_v5 }
 0x53b   : > { %8383 = vmatmul.mubr.msk.bf16.vlgmr.msra.gmra.mxu0 %vm330_vm2, %v6566_v24  ;;  %8387 = vmatpush3.bf16.msra.mxu1 %v8490_v44 }
 0x53c   : > { %8395 = vmatpush3.bf16.msra.mxu0 %v8491_v0  ;;  %8388 = vmatprep.subr.bf16.mxu1 %v8508_v63 }
 0x53d   : > { %8396 = vmatprep.subr.bf16.mxu0 %v8508_v63  ;;  %8390 = vmatprep.mubr.msk.bf16.mxu1 %vm8509_vm3, %v8508_v63 }
 0x53e   : > { %8398 = vmatprep.mubr.msk.bf16.mxu0 %vm8509_vm3, %v8508_v63 }
 0x53f   : > { %8389 = vmatpush3.bf16.msra.mxu1 %v8492_v36 }
 0x540   : > { %8397 = vmatpush3.bf16.msra.mxu0 %v8493_v2  ;;  %8402 = vmatprep.subr.bf16.mxu1 %v8508_v63 }
 0x541   : > { %8410 = vmatprep.subr.bf16.mxu0 %v8508_v63 }
 0x542   : > { %8391 = vmatmul.mubr.msk.bf16.vlgmr.msra.gmra.mxu1 %vm330_vm2, %v6631_v50  ;;  %v7424_v50 = vld [vmem:[%s10347_s8] ss:$0 sm:$0xff] }
 0x543   : > { %8399 = vmatmul.mubr.msk.bf16.vlgmr.msra.gmra.mxu0 %vm330_vm2, %v6696_v15  ;;  %8403 = vmatpush3.bf16.msra.mxu1 %v8494_v21 }
 0x544   : > { %8411 = vmatpush3.bf16.msra.mxu0 %v8495_v34  ;;  %8404 = vmatprep.subr.bf16.mxu1 %v8508_v63 }
 0x545   : > { %8412 = vmatprep.subr.bf16.mxu0 %v8508_v63  ;;  %8406 = vmatprep.mubr.msk.bf16.mxu1 %vm8509_vm3, %v8508_v63 }
 0x546   : > { %8414 = vmatprep.mubr.msk.bf16.mxu0 %vm8509_vm3, %v8508_v63 }
 0x547   : > { %8405 = vmatpush3.bf16.msra.mxu1 %v8496_v9 }
 0x548   : > { %8413 = vmatpush3.bf16.msra.mxu0 %v8497_v29  ;;  %8418 = vmatprep.subr.bf16.mxu1 %v8508_v63 }
 0x54a   : > { %8407 = vmatmul.mubr.msk.bf16.vlgmr.msra.gmra.mxu1 %vm330_vm2, %v6761_v56 }
 0x54b   : > { %8415 = vmatmul.mubr.msk.bf16.vlgmr.msra.gmra.mxu0 %vm330_vm2, %v6826_v32  ;;  %8419 = vmatpush3.bf16.msra.mxu1 %v8498_v39 }
 0x54c   : > { %8422 = vmatprep.mubr.msk.bf16.mxu1 %vm8509_vm3, %v8508_v63  ;;  %8420 = vmatprep.subr.bf16.mxu1 %v8508_v63 }
 0x54f   : > { %8421 = vmatpush3.bf16.msra.mxu1 %v8499_v41 }
 0x552   : > { %8423 = vmatmul.mubr.msk.bf16.vlgmr.msra.gmra.mxu1 %vm330_vm2, %v6891_v3 }
 0x5f2   : > { %v6428_v22 = vpop.f32.mrf.mxu1 }
 0x5f3   : > { %v6491_v33 = vpop.f32.mrf.mxu0  ;;  %6434 = vst.msk [vmem:[#allocation11] sm:$0xff] %vm330_vm2, %v6428_v22 }
 0x5f4   : > { %v8360_v35 = vpop.f32.mrf.mxu1 }
 0x5f5   : > { %v8368_v37 = vpop.f32.mrf.mxu0 }
 0x5f6   : > { %v6431_v38 = vpop.f32.mrf.mxu1 }
 0x5f7   : > { %v6494_v11 = vpop.f32.mrf.mxu0 }
 0x5f8   : > { %v8361_v45 = vpop.f32.mrf.mxu1 }
 0x5f9   : > { %v8369_v30 = vpop.f32.mrf.mxu0 }
 0x5fa   : > { %v6497_v14 = vld [vmem:[#allocation11] sm:$0xff]  ;;  %v6556_v40 = vpop.f32.mrf.mxu1 }
 0x5fb   : > { %v6621_v54 = vpop.f32.mrf.mxu0  ;;  %v6498_v59 = vadd.f32 %v6497_v14, %v6491_v33 }
 0x5fc   : > { %v8376_v63 = vpop.f32.mrf.mxu1 }
 0x5fd   : > { %v8384_v52 = vpop.f32.mrf.mxu0  ;;  %6499 = vst.msk [vmem:[#allocation11] sm:$0xff] %vm330_vm2, %v6498_v59 }
 0x5fe   : > { %v6559_v46 = vpop.f32.mrf.mxu1 }
 0x5ff   : > { %v6624_v47 = vpop.f32.mrf.mxu0 }
 0x600   : > { %v8377_v51 = vpop.f32.mrf.mxu1 }
 0x601   : > { %v8385_v28 = vpop.f32.mrf.mxu0 }
 0x602   : > { %v6686_v20 = vpop.f32.mrf.mxu1 }
 0x603   : > { %v6751_v6 = vpop.f32.mrf.mxu0 }
 0x604   : > { %v6562_v42 = vld [vmem:[#allocation11] sm:$0xff]  ;;  %v8392_v1 = vpop.f32.mrf.mxu1 }
 0x605   : > { %v8400_v61 = vpop.f32.mrf.mxu0  ;;  %v6563_v62 = vadd.f32 %v6562_v42, %v6556_v40 }
 0x606   : > { %v6689_v48 = vpop.f32.mrf.mxu1 }
 0x607   : > { %v6754_v19 = vpop.f32.mrf.mxu0  ;;  %6564 = vst.msk [vmem:[#allocation11] sm:$0xff] %vm330_vm2, %v6563_v62 }
 0x608   : > { %v8393_v58 = vpop.f32.mrf.mxu1 }
 0x609   : > { %v8401_v4 = vpop.f32.mrf.mxu0 }
 0x60a   : > { %v6816_v49 = vpop.f32.mrf.mxu1 }
 0x60b   : > { %v6881_v10 = vpop.f32.mrf.mxu0 }
 0x60c   : > { %v8408_v7 = vpop.f32.mrf.mxu1 }
 0x60d   : > { %v8416_v17 = vpop.f32.mrf.mxu0 }
 0x60e   : > { %v6627_v13 = vld [vmem:[#allocation11] sm:$0xff]  ;;  %v6819_v53 = vpop.f32.mrf.mxu1 }
 0x60f   : > { %v6884_v18 = vpop.f32.mrf.mxu0  ;;  %v6628_v8 = vadd.f32 %v6627_v13, %v6621_v54 }
 0x610   : > { %v8409_v57 = vpop.f32.mrf.mxu1 }
 0x611   : > { %v8417_v26 = vpop.f32.mrf.mxu0  ;;  %6629 = vst.msk [vmem:[#allocation11] sm:$0xff] %vm330_vm2, %v6628_v8 }
 0x612   : > { %v6946_v43 = vpop.f32.mrf.mxu1 }
 0x614   : > { %v8424_v60 = vpop.f32.mrf.mxu1 }
 0x616   : > { %v6949_v23 = vpop.f32.mrf.mxu1 }
 0x618   : > { %v6692_v25 = vld [vmem:[#allocation11] sm:$0xff]  ;;  %v8425_v44 = vpop.f32.mrf.mxu1 }
 0x619   : > { %v6693_v0 = vadd.f32 %v6692_v25, %v6686_v20 }
 0x61b   : > { %6694 = vst.msk [vmem:[#allocation11] sm:$0xff] %vm330_vm2, %v6693_v0 }
 0x622   : > { %v6757_v5 = vld [vmem:[#allocation11] sm:$0xff] }
 0x623   : > { %v6758_v24 = vadd.f32 %v6757_v5, %v6751_v6 }
 0x625   : > { %6759 = vst.msk [vmem:[#allocation11] sm:$0xff] %vm330_vm2, %v6758_v24 }
 0x62c   : > { %v6822_v36 = vld [vmem:[#allocation11] sm:$0xff] }
 0x62d   : > { %v6823_v2 = vadd.f32 %v6822_v36, %v6816_v49 }
 0x62f   : > { %6824 = vst.msk [vmem:[#allocation11] sm:$0xff] %vm330_vm2, %v6823_v2 }
 0x636   : > { %v6887_v55 = vld [vmem:[#allocation11] sm:$0xff] }
 0x637   : > { %v6888_v12 = vadd.f32 %v6887_v55, %v6881_v10 }
 0x639   : > { %6889 = vst.msk [vmem:[#allocation11] sm:$0xff] %vm330_vm2, %v6888_v12 }
 0x640   : > { %v6952_v21 = vld [vmem:[#allocation11] sm:$0xff] }
 0x641   : > { %v6953_v34 = vadd.f32 %v6952_v21, %v6946_v43 }
 0x643   : > { %6954 = vst.msk [vmem:[#allocation11] sm:$0xff] %vm330_vm2, %v6953_v34 }
 0x64a   : > { %v6955_v15 = vld [vmem:[#allocation11] sm:$0xff] }
 0x64b   : > { %v6963_v9 = vadd.f32 %v7424_v50, %v6955_v15 }
 0x64d   : > { %v6964_v29 = vmax.f32 %v6963_v9, 0.0 }
 0x64f   : > { %6965 = vst.msk [vmem:[#allocation11] sm:$0xff] %vm330_vm2, %v6964_v29 }
 0x656   : > { %v6966_v16 = vld [vmem:[#allocation11] ss:$2 sm:$0xf]  ;;  %v6968_v31 = vld [vmem:[#allocation11 + $0x1] ss:$2 sm:$0xf] }
 0x657   : > { %v6969_v39 = vmax.f32 %v6966_v16, %v6968_v31 }
 0x659   : > { %6970 = vst.msk [vmem:[#allocation12] sm:$0xf] %vm5563_vm5, %v6969_v39 }
 0x660   : > { %v6971_v56 = vld [vmem:[#allocation12] sm:$0x1]  ;;  %v6972_v32 = vld [vmem:[#allocation12 + $0x2] sm:$0x1] }
 0x661   : > { %v6973_v41 = vmax.f32 %v6971_v56, %v6972_v32 }
 0x663   : > { %6975 = vst.msk [vmem:[%s328_s18] sm:$0x1] %vm6974_vm7, %v6973_v41 }
 0x664 PF: > { %s19_s30 = sadd.s32 1, %s8506_s30  }
 0x665   : > { %p16_p4 = scmp.ge.s32.totalorder %s19_s30, 4  }
 0x667   :  { %18 = sbr.rel (!%p16_p4) target bundleno = 1 (0x1), region = 166 }

</bundles_post_ra>
